<compile_context>
chip_gen: v7x
topology: tpu7x:2x2x1
jax: 0.10.0
libtpu: 0.0.40
codegen_flags: <defaults>
</compile_context>

<pallas_src>
import jax
import jax.numpy as jnp
from jax import lax
from jax.experimental import pallas as pl
from jax.experimental.pallas import tpu as pltpu

B = 2                       # example batch
CIN, COUT = 128, 32
H = W = 16
KH = KW = 3
OH = OW = 14                # 16 - 3 + 1 (VALID)
HW = OH * OW                # 196
K_IM2COL = KH * KW * CIN    # 1152
FLAT = COUT * HW            # 6272
HID = 512
OUT = 136
NK = 2                      # grid steps over conv-output-channel groups
CG = COUT // NK             # 16 channels / step -> 3136-deep fc1 slice / step


def make_fused_kernel(bsz):
    def kernel(x_ref, wc_ref, bc_ref, w1_ref, b1_ref, w2_ref, b2_ref,
               o_ref, acc_ref):
        # x_ref:  (bsz, 1152, 196) bf16  im2col slab (whole batch, fetched once)
        # wc_ref: (CG, 1152)       bf16  conv weight rows for this channel group
        # bc_ref: (CG, 1)          f32   conv bias for this channel group
        # w1_ref: (CG, 196, 512)   bf16  fc1 weight slice (flatten order kept)
        # b1_ref: (1, 512) f32, w2_ref: (512, 136) f32, b2_ref: (1, 136) f32
        # o_ref:  (bsz, 136) f32,  acc_ref: (bsz, 512) f32 fc1 accumulator
        k = pl.program_id(0)

        @pl.when(k == 0)
        def _():
            acc_ref[...] = jnp.zeros_like(acc_ref)

        wc = wc_ref[...]                       # (CG, 1152) bf16
        bias = bc_ref[...]                     # (CG, 1)    f32
        w1 = w1_ref[...]                       # (CG, HW, HID) bf16

        rows = []
        for b in range(bsz):                   # small static batch -> unrolled
            # conv for this channel group: single bf16 MXU matmul (9 taps in K)
            cg = jnp.dot(wc, x_ref[b],
                         preferred_element_type=jnp.float32)        # (CG, HW)
            yb = jnp.maximum(cg + bias, 0.0).astype(jnp.bfloat16)   # (CG, HW)
            # fc1 partial: ONE batched contraction over hw per sample
            # (batch dim = conv channel), then reduce over channels.
            part = lax.dot_general(
                yb[:, None, :], w1,
                dimension_numbers=(((2,), (1,)), ((0,), (0,))),
                preferred_element_type=jnp.float32)                 # (CG,1,HID)
            rows.append(jnp.sum(part, axis=0))                      # (1, HID)
        acc_ref[...] += jnp.concatenate(rows, axis=0)               # (bsz, HID)

        @pl.when(k == pl.num_programs(0) - 1)
        def _():
            h = jnp.maximum(acc_ref[...] + b1_ref[...], 0.0)        # (bsz, HID)
            o_ref[...] = (jnp.dot(h, w2_ref[...],
                                  preferred_element_type=jnp.float32)
                          + b2_ref[...]).astype(o_ref.dtype)

    return kernel


def prepare_params(params):
    """One-time layout / dtype prep (kept OUT of the per-call jitted path)."""
    conv_w, conv_b, fc1_w, fc1_b, fc2_w, fc2_b = params
    # conv weight -> (cout, (kh*3+kw)*128 + cin), matching the im2col slab; bf16.
    wc = (jnp.transpose(conv_w, (0, 2, 3, 1))
          .reshape(COUT, K_IM2COL).astype(jnp.bfloat16))
    bc = conv_b.reshape(COUT, 1)
    # fc1 weight (512, 6272) -> (6272, 512) -> (32, 196, 512), bf16 MXU operand.
    w1 = fc1_w.T.reshape(COUT, HW, HID).astype(jnp.bfloat16)
    b1 = fc1_b.reshape(1, HID)
    w2 = fc2_w.T                                     # (512, 136) f32
    b2 = fc2_b.reshape(1, OUT)
    return wc, bc, w1, b1, w2, b2


@jax.jit
def ldm_predictor_forward(x, prep):
    wc, bc, w1, b1, w2, b2 = prep
    bsz = x.shape[0]

    # im2col slab in bf16: K index = (kh*3 + kw)*128 + cin, matching wc's layout.
    cols = [x[:, :, kh:kh + OH, kw:kw + OW].reshape(bsz, CIN, HW)
            for kh in range(KH) for kw in range(KW)]
    x_sh = jnp.concatenate(cols, axis=1).astype(jnp.bfloat16)  # (bsz,1152,196)

    kernel = make_fused_kernel(bsz)
    return pl.pallas_call(
        kernel,
        out_shape=jax.ShapeDtypeStruct((bsz, OUT), jnp.float32),
        grid_spec=pltpu.PrefetchScalarGridSpec(
            num_scalar_prefetch=0,
            grid=(NK,),
            in_specs=[
                pl.BlockSpec((bsz, K_IM2COL, HW), lambda k: (0, 0, 0)),
                pl.BlockSpec((CG, K_IM2COL), lambda k: (k, 0)),
                pl.BlockSpec((CG, 1), lambda k: (k, 0)),
                pl.BlockSpec((CG, HW, HID), lambda k: (k, 0, 0)),
                pl.BlockSpec((1, HID), lambda k: (0, 0)),
                pl.BlockSpec((HID, OUT), lambda k: (0, 0)),
                pl.BlockSpec((1, OUT), lambda k: (0, 0)),
            ],
            out_specs=pl.BlockSpec((bsz, OUT), lambda k: (0, 0)),
            scratch_shapes=[pltpu.VMEM((bsz, HID), jnp.float32)],
        ),
        compiler_params=pltpu.CompilerParams(
            dimension_semantics=("arbitrary",)),   # single axis is a reduction
    )(x_sh, wc, bc, w1, b1, w2, b2)


def reference_forward(x, params):
    conv_w, conv_b, fc1_w, fc1_b, fc2_w, fc2_b = params
    y = jax.lax.conv_general_dilated(
        x, conv_w, window_strides=(1, 1), padding="VALID",
        dimension_numbers=("NCHW", "OIHW", "NCHW"))
    y = jnp.maximum(y + conv_b.reshape(1, COUT, 1, 1), 0.0)
    y = y.reshape(x.shape[0], -1)
    h = jnp.maximum(y @ fc1_w.T + fc1_b, 0.0)
    return h @ fc2_w.T + fc2_b


def init_params(key):
    ks = jax.random.split(key, 6)
    conv_w = 0.02 * jax.random.normal(ks[0], (COUT, CIN, 3, 3), jnp.float32)
    conv_b = 0.01 * jax.random.normal(ks[1], (COUT,), jnp.float32)
    fc1_w = 0.02 * jax.random.normal(ks[2], (HID, FLAT), jnp.float32)
    fc1_b = 0.01 * jax.random.normal(ks[3], (HID,), jnp.float32)
    fc2_w = 0.02 * jax.random.normal(ks[4], (OUT, HID), jnp.float32)
    fc2_b = 0.01 * jax.random.normal(ks[5], (OUT,), jnp.float32)
    return (conv_w, conv_b, fc1_w, fc1_b, fc2_w, fc2_b)


if __name__ == "__main__":
    key = jax.random.PRNGKey(0)
    kx, kp = jax.random.split(key)
    # channels/spatial fixed by fc1 (6272 = 32*14*14 -> 16x16 input); small batch.
    x = jax.random.normal(kx, (B, CIN, H, W), jnp.float32)
    params = init_params(kp)

    prep = prepare_params(params)           # one-time layout/bf16 prep
    out = ldm_predictor_forward(x, prep)
    out = jax.block_until_ready(out)

    ref = reference_forward(x, params)
    assert out.shape == (B, OUT), out.shape
    # bf16 MXU operands (conv + fc1) -> looser tol than pure f32.
    assert jnp.allclose(out, ref, rtol=2e-2, atol=2e-2), \
        float(jnp.max(jnp.abs(out - ref)))
    print("KERNEL_OK")
</pallas_src>

<mosaic_0001>
module attributes {stable_mosaic.version = 11 : i64} {
  func.func @kernel(%arg0: i32, %arg1: memref<2x1152x196xbf16, #tpu.memory_space<vmem>>, %arg2: memref<16x1152xbf16, #tpu.memory_space<vmem>>, %arg3: memref<16x1xf32, #tpu.memory_space<vmem>>, %arg4: memref<16x196x512xbf16, #tpu.memory_space<vmem>>, %arg5: memref<1x512xf32, #tpu.memory_space<vmem>>, %arg6: memref<512x136xf32, #tpu.memory_space<vmem>>, %arg7: memref<1x136xf32, #tpu.memory_space<vmem>>, %arg8: memref<2x136xf32, #tpu.memory_space<vmem>>, %arg9: memref<2x512xf32, #tpu.memory_space<vmem>>) attributes {dimension_semantics = [#tpu.dimension_semantics<arbitrary>], iteration_bounds = array<i64: 2>, scalar_prefetch = 0 : i64, scratch_operands = 1 : i64, tpu.core_type = #tpu.core_type<tc>, window_params = [{pipeline_mode = #tpu.pipeline_mode<synchronous>, transform_indices = @transform_0, window_bounds = array<i64: 2, 1152, 196>}, {transform_indices = @transform_1, window_bounds = array<i64: 16, 1152>}, {transform_indices = @transform_2, window_bounds = array<i64: 16, 1>}, {transform_indices = @transform_3, window_bounds = array<i64: 16, 196, 512>}, {pipeline_mode = #tpu.pipeline_mode<synchronous>, transform_indices = @transform_4, window_bounds = array<i64: 1, 512>}, {pipeline_mode = #tpu.pipeline_mode<synchronous>, transform_indices = @transform_5, window_bounds = array<i64: 512, 136>}, {pipeline_mode = #tpu.pipeline_mode<synchronous>, transform_indices = @transform_6, window_bounds = array<i64: 1, 136>}, {pipeline_mode = #tpu.pipeline_mode<synchronous>, transform_indices = @transform_7, window_bounds = array<i64: 2, 136>}]} {
    %c0_i32 = arith.constant 0 : i32
    %0 = arith.cmpi eq, %arg0, %c0_i32 : i32
    %1 = arith.extui %0 : i1 to i32
    %c0_i32_0 = arith.constant 0 : i32
    %2 = arith.cmpi ne, %1, %c0_i32_0 : i32
    scf.if %2 {
      %cst_24 = arith.constant 0.000000e+00 : f32
      %35 = vector.broadcast %cst_24 : f32 to vector<2x512xf32>
      %c0_25 = arith.constant 0 : index
      %c0_26 = arith.constant 0 : index
      %36 = vector.load %arg9[%c0_25, %c0_26] : memref<2x512xf32, #tpu.memory_space<vmem>>, vector<2x512xf32>
      tpu.vector_store %arg9[%c0_25, %c0_26], %35 {strides = array<i32>} : memref<2x512xf32, #tpu.memory_space<vmem>>, vector<2x512xf32>,
    } else {
    }
    %c0 = arith.constant 0 : index
    %c0_1 = arith.constant 0 : index
    %3 = vector.load %arg2[%c0, %c0_1] : memref<16x1152xbf16, #tpu.memory_space<vmem>>, vector<16x1152xbf16>
    %c0_2 = arith.constant 0 : index
    %c0_3 = arith.constant 0 : index
    %4 = vector.load %arg3[%c0_2, %c0_3] : memref<16x1xf32, #tpu.memory_space<vmem>>, vector<16x1xf32>
    %c0_4 = arith.constant 0 : index
    %c0_5 = arith.constant 0 : index
    %c0_6 = arith.constant 0 : index
    %5 = vector.load %arg4[%c0_4, %c0_5, %c0_6] : memref<16x196x512xbf16, #tpu.memory_space<vmem>>, vector<16x196x512xbf16>
    %c0_7 = arith.constant 0 : index
    %c0_8 = arith.constant 0 : index
    %c0_9 = arith.constant 0 : index
    %6 = vector.load %arg1[%c0_7, %c0_8, %c0_9] : memref<2x1152x196xbf16, #tpu.memory_space<vmem>>, vector<1x1152x196xbf16>
    %7 = vector.shape_cast %6 : vector<1x1152x196xbf16> to vector<1152x196xbf16>
    %cst = arith.constant dense<0.000000e+00> : vector<16x196xf32>
    %8 = tpu.matmul %3, %7, %cst {dimension_numbers = #tpu.dot_dimension_numbers<[1], [0], [0], [1], [0, 0, 1, 1], [], []>} : vector<16x1152xbf16>, vector<1152x196xbf16>, vector<16x196xf32> -> vector<16x196xf32>
    %9 = vector.broadcast %4 : vector<16x1xf32> to vector<16x196xf32>
    %10 = arith.addf %8, %9 : vector<16x196xf32>
    %cst_10 = arith.constant 0.000000e+00 : f32
    %11 = vector.broadcast %cst_10 : f32 to vector<16x196xf32>
    %12 = arith.maximumf %10, %11 : vector<16x196xf32>
    %13 = arith.truncf %12 : vector<16x196xf32> to vector<16x196xbf16>
    %14 = vector.shape_cast %13 : vector<16x196xbf16> to vector<16x1x196xbf16>
    %cst_11 = arith.constant dense<0.000000e+00> : vector<16x1x512xf32>
    %15 = tpu.matmul %14, %5, %cst_11 {dimension_numbers = #tpu.dot_dimension_numbers<[2], [1], [1], [2], [0, 0, 0, 1, 1, 2], [0], [0]>} : vector<16x1x196xbf16>, vector<16x196x512xbf16>, vector<16x1x512xf32> -> vector<16x1x512xf32>
    %cst_12 = arith.constant dense<0.000000e+00> : vector<1x512xf32>
    %16 = vector.multi_reduction <add>, %15, %cst_12 [0] : vector<16x1x512xf32> to vector<1x512xf32>
    %c1 = arith.constant 1 : index
    %c0_13 = arith.constant 0 : index
    %c0_14 = arith.constant 0 : index
    %17 = vector.load %arg1[%c1, %c0_13, %c0_14] : memref<2x1152x196xbf16, #tpu.memory_space<vmem>>, vector<1x1152x196xbf16>
    %18 = vector.shape_cast %17 : vector<1x1152x196xbf16> to vector<1152x196xbf16>
    %cst_15 = arith.constant dense<0.000000e+00> : vector<16x196xf32>
    %19 = tpu.matmul %3, %18, %cst_15 {dimension_numbers = #tpu.dot_dimension_numbers<[1], [0], [0], [1], [0, 0, 1, 1], [], []>} : vector<16x1152xbf16>, vector<1152x196xbf16>, vector<16x196xf32> -> vector<16x196xf32>
    %20 = vector.broadcast %4 : vector<16x1xf32> to vector<16x196xf32>
    %21 = arith.addf %19, %20 : vector<16x196xf32>
    %cst_16 = arith.constant 0.000000e+00 : f32
    %22 = vector.broadcast %cst_16 : f32 to vector<16x196xf32>
    %23 = arith.maximumf %21, %22 : vector<16x196xf32>
    %24 = arith.truncf %23 : vector<16x196xf32> to vector<16x196xbf16>
    %25 = vector.shape_cast %24 : vector<16x196xbf16> to vector<16x1x196xbf16>
    %cst_17 = arith.constant dense<0.000000e+00> : vector<16x1x512xf32>
    %26 = tpu.matmul %25, %5, %cst_17 {dimension_numbers = #tpu.dot_dimension_numbers<[2], [1], [1], [2], [0, 0, 0, 1, 1, 2], [0], [0]>} : vector<16x1x196xbf16>, vector<16x196x512xbf16>, vector<16x1x512xf32> -> vector<16x1x512xf32>
    %cst_18 = arith.constant dense<0.000000e+00> : vector<1x512xf32>
    %27 = vector.multi_reduction <add>, %26, %cst_18 [0] : vector<16x1x512xf32> to vector<1x512xf32>
    %c0_19 = arith.constant 0 : index
    %c0_20 = arith.constant 0 : index
    %28 = vector.load %arg9[%c0_19, %c0_20] : memref<2x512xf32, #tpu.memory_space<vmem>>, vector<2x512xf32>
    %29 = tpu.concatenate %16, %27 in 0 : vector<1x512xf32>, vector<1x512xf32> -> vector<2x512xf32>
    %30 = arith.addf %28, %29 : vector<2x512xf32>
    %c0_21 = arith.constant 0 : index
    %c0_22 = arith.constant 0 : index
    %31 = vector.load %arg9[%c0_21, %c0_22] : memref<2x512xf32, #tpu.memory_space<vmem>>, vector<2x512xf32>
    tpu.vector_store %arg9[%c0_21, %c0_22], %30 {strides = array<i32>} : memref<2x512xf32, #tpu.memory_space<vmem>>, vector<2x512xf32>,
    %c1_i32 = arith.constant 1 : i32
    %32 = arith.cmpi eq, %arg0, %c1_i32 : i32
    %33 = arith.extui %32 : i1 to i32
    %c0_i32_23 = arith.constant 0 : i32
    %34 = arith.cmpi ne, %33, %c0_i32_23 : i32
    scf.if %34 {
      %c0_24 = arith.constant 0 : index
      %c0_25 = arith.constant 0 : index
      %35 = vector.load %arg9[%c0_24, %c0_25] : memref<2x512xf32, #tpu.memory_space<vmem>>, vector<2x512xf32>
      %c0_26 = arith.constant 0 : index
      %c0_27 = arith.constant 0 : index
      %36 = vector.load %arg5[%c0_26, %c0_27] : memref<1x512xf32, #tpu.memory_space<vmem>>, vector<1x512xf32>
      %37 = vector.broadcast %36 : vector<1x512xf32> to vector<2x512xf32>
      %38 = arith.addf %35, %37 : vector<2x512xf32>
      %cst_28 = arith.constant 0.000000e+00 : f32
      %39 = vector.broadcast %cst_28 : f32 to vector<2x512xf32>
      %40 = arith.maximumf %38, %39 : vector<2x512xf32>
      %c0_29 = arith.constant 0 : index
      %c0_30 = arith.constant 0 : index
      %41 = vector.load %arg6[%c0_29, %c0_30] : memref<512x136xf32, #tpu.memory_space<vmem>>, vector<512x136xf32>
      %cst_31 = arith.constant dense<0.000000e+00> : vector<2x136xf32>
      %42 = tpu.matmul %40, %41, %cst_31 {dimension_numbers = #tpu.dot_dimension_numbers<[1], [0], [0], [1], [0, 0, 1, 1], [], []>} : vector<2x512xf32>, vector<512x136xf32>, vector<2x136xf32> -> vector<2x136xf32>
      %c0_32 = arith.constant 0 : index
      %c0_33 = arith.constant 0 : index
      %43 = vector.load %arg7[%c0_32, %c0_33] : memref<1x136xf32, #tpu.memory_space<vmem>>, vector<1x136xf32>
      %44 = vector.broadcast %43 : vector<1x136xf32> to vector<2x136xf32>
      %45 = arith.addf %42, %44 : vector<2x136xf32>
      %c0_34 = arith.constant 0 : index
      %c0_35 = arith.constant 0 : index
      %46 = vector.load %arg8[%c0_34, %c0_35] : memref<2x136xf32, #tpu.memory_space<vmem>>, vector<2x136xf32>
      tpu.vector_store %arg8[%c0_34, %c0_35], %45 {strides = array<i32>} : memref<2x136xf32, #tpu.memory_space<vmem>>, vector<2x136xf32>,
    } else {
    }
    return
  }
  func.func @transform_0(%arg0: i32) -> (i32, i32, i32) {
    %c0_i32 = arith.constant 0 : i32
    %c0_i32_0 = arith.constant 0 : i32
    %c0_i32_1 = arith.constant 0 : i32
    %c0_i32_2 = arith.constant 0 : i32
    return %c0_i32, %c0_i32_0, %c0_i32_1 : i32, i32, i32
  }
  func.func @transform_1(%arg0: i32) -> (i32, i32) {
    %c0_i32 = arith.constant 0 : i32
    %c0_i32_0 = arith.constant 0 : i32
    return %arg0, %c0_i32 : i32, i32
  }
  func.func @transform_2(%arg0: i32) -> (i32, i32) {
    %c0_i32 = arith.constant 0 : i32
    %c0_i32_0 = arith.constant 0 : i32
    return %arg0, %c0_i32 : i32, i32
  }
  func.func @transform_3(%arg0: i32) -> (i32, i32, i32) {
    %c0_i32 = arith.constant 0 : i32
    %c0_i32_0 = arith.constant 0 : i32
    %c0_i32_1 = arith.constant 0 : i32
    return %arg0, %c0_i32, %c0_i32_0 : i32, i32, i32
  }
  func.func @transform_4(%arg0: i32) -> (i32, i32) {
    %c0_i32 = arith.constant 0 : i32
    %c0_i32_0 = arith.constant 0 : i32
    %c0_i32_1 = arith.constant 0 : i32
    return %c0_i32, %c0_i32_0 : i32, i32
  }
  func.func @transform_5(%arg0: i32) -> (i32, i32) {
    %c0_i32 = arith.constant 0 : i32
    %c0_i32_0 = arith.constant 0 : i32
    %c0_i32_1 = arith.constant 0 : i32
    return %c0_i32, %c0_i32_0 : i32, i32
  }
  func.func @transform_6(%arg0: i32) -> (i32, i32) {
    %c0_i32 = arith.constant 0 : i32
    %c0_i32_0 = arith.constant 0 : i32
    %c0_i32_1 = arith.constant 0 : i32
    return %c0_i32, %c0_i32_0 : i32, i32
  }
  func.func @transform_7(%arg0: i32) -> (i32, i32) {
    %c0_i32 = arith.constant 0 : i32
    %c0_i32_0 = arith.constant 0 : i32
    %c0_i32_1 = arith.constant 0 : i32
    return %c0_i32, %c0_i32_0 : i32, i32
  }
}

</mosaic_0001>

<bundles_post_ra>
// kernel: ldm_predictor_forward.1
= control target key start
LH: loop header
LB: loop body
LE: loop exit
PB: predicated region body
PF: predicated region fallthrough
CT: control target
= control target key end

     0   :  { %12 = vsyncpa [#allocation4], 0  ;;  %s15605_s24 = smov 0   ;;  %s19962_s0 = inlined_call_operand.vmem [shape: bf16[2,1152,196], index: 0, kind: input, shape index: {}]   ;;  %s19963_s1 = inlined_call_operand.vmem [shape: bf16[32,1152], index: 1, kind: input, shape index: {}]   ;;  %s19964_s2 = inlined_call_operand.vmem [shape: f32[32,1], index: 2, kind: input, shape index: {}]   ;;  %s19965_s3 = inlined_call_operand.vmem [shape: bf16[32,196,512], index: 3, kind: input, shape index: {}]   ;;  %s19966_s4 = inlined_call_operand.vmem [shape: f32[1,512], index: 4, kind: input, shape index: {}]   ;;  %s19967_s5 = inlined_call_operand.vmem [shape: f32[512,136], index: 5, kind: input, shape index: {}]   ;;  %s19968_s6 = inlined_call_operand.vmem [shape: f32[1,136], index: 6, kind: input, shape index: {}]   ;;  %s19969_s7 = inlined_call_operand.hbm [shape: f32[2,136], index: 7, kind: output, shape index: {}]  }
   0x1 LB: > { %s15611_s25 = sadd.s32 4294967295, %s15558_s24   ;;  %p11456_p0 = scmp.ge.s32.totalorder %s15558_s24, 1  ;;  %s15558_s24 = sphi %s15605_s24, %s18_s24  }
   0x2   : > { %p258_p1 = scmp.lt.s32.totalorder %s15558_s24, 3 }
   0x4   : > { %p259_p2 = pnand %p11456_p0, %p258_p1 }
   0x6   : > { %262 = sbr.rel (%p259_p2) target bundleno = 3144 (0xc48), region = 48 }
   0xd   : > { %s11457_s26 = sshll.u32 %s15611_s25, 1  ;;  %s11461_s27 = sshll.u32 %s15611_s25, 4 }
   0xe   : > { %p298_p3 = scmp.lt.s32.totalorder %s11457_s26, 3  ;;  %p311_p4 = scmp.lt.s32.totalorder %s11461_s27, 31 }
   0xf   : > { %p11463_p5 = scmp.ne.s32.totalorder %s15611_s25, 0 }
  0x10   : > { %s20057_s26 = smov (!%p298_p3, %s11457_s26), 3  ;;  %s20059_s27 = smov (!%p311_p4, %s11461_s27), 31 }
  0x11   : > { %s13062_s28 = smul.u32 36, %s20057_s26  ;;  %s11460_s29 = sshll.u32 %s20057_s26, 3  ;;  %v15560_v0 = vmov (!%p11463_p5), 0.0  }
  0x12   : > { %s15620_s9 = scalar_lea.vmem %s19964_s2, %s11460_s29  ;;  %s13063_s10 = smul.u32 400, %s20059_s27  ;;  %322 = vst [vmem:[#allocation2] sm:$0xff] (!%p11463_p5), %v15560_v0 }
  0x13   : > { %s15625_s13 = scalar_lea.vmem %s19963_s1, %s13062_s28  ;;  %321 = sbr.rel (%p11463_p5) target bundleno = 26 (0x1a), region = 52 }
  0x14   : > { %s15630_s16 = scalar_lea.vmem %s19965_s3, %s13063_s10 }
  0x1a PF: > { %v13084_v1 = vld [vmem:[%s19962_s0 + $0x4] ss:$8 sps:$4 sm:$0xff]   ;;  %v13086_v2 = vld [vmem:[%s19962_s0] ss:$8 sps:$4 sm:$0xff]   ;;  %v13087_v3 = vld [vmem:[%s19962_s0 + $0x14] ss:$8 sps:$4 sm:$0xff]  }
  0x1b   : > { %2055 = vmatprep.subr.bf16.mxu0 %v13084_v1  ;;  %v13089_v4 = vld [vmem:[%s19962_s0 + $0x10] ss:$8 sps:$4 sm:$0xff]   ;;  %v13090_v5 = vld [vmem:[%s19962_s0 + $0x24] ss:$8 sps:$4 sm:$0xff]   ;;  %v13092_v6 = vld [vmem:[%s19962_s0 + $0x20] ss:$8 sps:$4 sm:$0xff]  }
  0x1c   : > { %2056 = vmatpush1.bf16.msra.mxu0 %v13086_v2  ;;  %v13093_v7 = vld [vmem:[%s19962_s0 + $0x34] ss:$8 sps:$4 sm:$0xff]   ;;  %v13095_v8 = vld [vmem:[%s19962_s0 + $0x30] ss:$8 sps:$4 sm:$0xff]   ;;  %v13096_v9 = vld [vmem:[%s19962_s0 + $0x44] ss:$8 sps:$4 sm:$0xff]  }
  0x1d   : > { %2057 = vmatprep.subr.bf16.mxu0 %v13087_v3  ;;  %v13098_v10 = vld [vmem:[%s19962_s0 + $0x40] ss:$8 sps:$4 sm:$0xff]   ;;  %v13099_v11 = vld [vmem:[%s19962_s0 + $0x54] ss:$8 sps:$4 sm:$0xff]   ;;  %v13101_v12 = vld [vmem:[%s19962_s0 + $0x50] ss:$8 sps:$4 sm:$0xff]  }
  0x1e   : > { %v13102_v13 = vld [vmem:[%s19962_s0 + $0x64] ss:$8 sps:$4 sm:$0xff]   ;;  %v13104_v15 = vld [vmem:[%s19962_s0 + $0x60] ss:$8 sps:$4 sm:$0xff]   ;;  %v13105_v16 = vld [vmem:[%s19962_s0 + $0x74] ss:$8 sps:$4 sm:$0xff]  }
  0x1f   : > { %v13134_v14 = vld [vmem:[%s15625_s13 + $0x4] ss:$36 sps:$4 sm:$0xff]   ;;  %v13107_v17 = vld [vmem:[%s19962_s0 + $0x70] ss:$8 sps:$4 sm:$0xff]   ;;  %v13111_v20 = vld [vmem:[%s19962_s0 + $0x94] ss:$8 sps:$4 sm:$0xff]  }
  0x20   : > { %2058 = vmatpush1.bf16.msra.mxu0 %v13089_v4  ;;  %2087 = vmatprep.mubr.bf16.mxu0 %v13134_v14  ;;  %v13108_v18 = vld [vmem:[%s19962_s0 + $0x84] ss:$8 sps:$4 sm:$0xff]   ;;  %v13110_v19 = vld [vmem:[%s19962_s0 + $0x80] ss:$8 sps:$4 sm:$0xff]   ;;  %v13113_v21 = vld [vmem:[%s19962_s0 + $0x90] ss:$8 sps:$4 sm:$0xff]  }
  0x21   : > { %2059 = vmatprep.subr.bf16.mxu0 %v13090_v5  ;;  %v13114_v22 = vld [vmem:[%s19962_s0 + $0xa4] ss:$8 sps:$4 sm:$0xff]   ;;  %v13116_v23 = vld [vmem:[%s19962_s0 + $0xa0] ss:$8 sps:$4 sm:$0xff]   ;;  %v13117_v24 = vld [vmem:[%s19962_s0 + $0xb4] ss:$8 sps:$4 sm:$0xff]  }
  0x22   : > { %v13119_v25 = vld [vmem:[%s19962_s0 + $0xb0] ss:$8 sps:$4 sm:$0xff]   ;;  %v13120_v26 = vld [vmem:[%s19962_s0 + $0xc4] ss:$8 sps:$4 sm:$0xff]   ;;  %v13122_v27 = vld [vmem:[%s19962_s0 + $0xc0] ss:$8 sps:$4 sm:$0xff]  }
  0x23   : > { %v13123_v28 = vld [vmem:[%s19962_s0 + $0xd4] ss:$8 sps:$4 sm:$0xff]   ;;  %v13125_v29 = vld [vmem:[%s19962_s0 + $0xd0] ss:$8 sps:$4 sm:$0xff]   ;;  %v13126_v30 = vld [vmem:[%s19962_s0 + $0xe4] ss:$8 sps:$4 sm:$0xff]  }
  0x24   : > { %2060 = vmatpush1.bf16.msra.mxu0 %v13092_v6  ;;  %v13128_v31 = vld [vmem:[%s19962_s0 + $0xe0] ss:$8 sps:$4 sm:$0xff]   ;;  %v13129_v32 = vld [vmem:[%s19962_s0 + $0xf4] ss:$8 sps:$4 sm:$0xff]   ;;  %v13131_v33 = vld [vmem:[%s19962_s0 + $0xf0] ss:$8 sps:$4 sm:$0xff]  }
  0x25   : > { %2061 = vmatprep.subr.bf16.mxu0 %v13093_v7  ;;  %v13137_v34 = vld [vmem:[%s19962_s0 + $0x104] ss:$8 sps:$4 sm:$0xff]   ;;  %v13135_v36 = vld [vmem:[%s19962_s0 + $0x100] ss:$8 sps:$4 sm:$0xff]   ;;  %v13140_v38 = vld [vmem:[%s19962_s0 + $0x114] ss:$8 sps:$4 sm:$0xff]  }
  0x26   : > { %v13132_v35 = vld [vmem:[%s15625_s13] ss:$36 sps:$4 sm:$0xff]   ;;  %v13185_v37 = vld [vmem:[%s15625_s13 + $0xc] ss:$36 sps:$4 sm:$0xff]   ;;  %v13146_v42 = vld [vmem:[%s19962_s0 + $0x134] ss:$8 sps:$4 sm:$0xff]  }
  0x27   : > { %v13138_v39 = vld [vmem:[%s19962_s0 + $0x110] ss:$8 sps:$4 sm:$0xff]   ;;  %v13143_v40 = vld [vmem:[%s19962_s0 + $0x124] ss:$8 sps:$4 sm:$0xff]   ;;  %v13141_v41 = vld [vmem:[%s19962_s0 + $0x120] ss:$8 sps:$4 sm:$0xff]  }
  0x28   : > { %2062 = vmatpush1.bf16.msra.mxu0 %v13095_v8  ;;  %v13144_v43 = vld [vmem:[%s19962_s0 + $0x130] ss:$8 sps:$4 sm:$0xff]   ;;  %v13149_v44 = vld [vmem:[%s19962_s0 + $0x144] ss:$8 sps:$4 sm:$0xff]   ;;  %v13147_v45 = vld [vmem:[%s19962_s0 + $0x140] ss:$8 sps:$4 sm:$0xff]  }
  0x29   : > { %2063 = vmatprep.subr.bf16.mxu0 %v13096_v9  ;;  %v13152_v46 = vld [vmem:[%s19962_s0 + $0x154] ss:$8 sps:$4 sm:$0xff]   ;;  %v13150_v47 = vld [vmem:[%s19962_s0 + $0x150] ss:$8 sps:$4 sm:$0xff]   ;;  %v13155_v48 = vld [vmem:[%s19962_s0 + $0x164] ss:$8 sps:$4 sm:$0xff]  }
  0x2a   : > { %v13153_v49 = vld [vmem:[%s19962_s0 + $0x160] ss:$8 sps:$4 sm:$0xff]   ;;  %v13158_v50 = vld [vmem:[%s19962_s0 + $0x174] ss:$8 sps:$4 sm:$0xff]   ;;  %v13156_v51 = vld [vmem:[%s19962_s0 + $0x170] ss:$8 sps:$4 sm:$0xff]  }
  0x2b   : > { %v13161_v52 = vld [vmem:[%s19962_s0 + $0x184] ss:$8 sps:$4 sm:$0xff]   ;;  %v13159_v53 = vld [vmem:[%s19962_s0 + $0x180] ss:$8 sps:$4 sm:$0xff]   ;;  %v13164_v54 = vld [vmem:[%s19962_s0 + $0x194] ss:$8 sps:$4 sm:$0xff]  }
  0x2c   : > { %2064 = vmatpush1.bf16.msra.mxu0 %v13098_v10  ;;  %v13162_v55 = vld [vmem:[%s19962_s0 + $0x190] ss:$8 sps:$4 sm:$0xff]   ;;  %v13167_v56 = vld [vmem:[%s19962_s0 + $0x1a4] ss:$8 sps:$4 sm:$0xff]   ;;  %v13165_v57 = vld [vmem:[%s19962_s0 + $0x1a0] ss:$8 sps:$4 sm:$0xff]  }
  0x2d   : > { %2065 = vmatprep.subr.bf16.mxu0 %v13099_v11  ;;  %v13170_v58 = vld [vmem:[%s19962_s0 + $0x1b4] ss:$8 sps:$4 sm:$0xff]   ;;  %v13168_v59 = vld [vmem:[%s19962_s0 + $0x1b0] ss:$8 sps:$4 sm:$0xff]   ;;  %v13173_v60 = vld [vmem:[%s19962_s0 + $0x1c4] ss:$8 sps:$4 sm:$0xff]  }
  0x2e   : > { %v13171_v61 = vld [vmem:[%s19962_s0 + $0x1c0] ss:$8 sps:$4 sm:$0xff]   ;;  %v13176_v62 = vld [vmem:[%s19962_s0 + $0x1d4] ss:$8 sps:$4 sm:$0xff]   ;;  %v13174_v63 = vld [vmem:[%s19962_s0 + $0x1d0] ss:$8 sps:$4 sm:$0xff]  }
  0x2f   : > { %v13179_v0 = vld [vmem:[%s19962_s0 + $0x1e4] ss:$8 sps:$4 sm:$0xff]   ;;  %v13177_v1 = vld [vmem:[%s19962_s0 + $0x1e0] ss:$8 sps:$4 sm:$0xff]   ;;  %v13182_v2 = vld [vmem:[%s19962_s0 + $0x1f4] ss:$8 sps:$4 sm:$0xff]  }
  0x30   : > { %2066 = vmatpush1.bf16.msra.mxu0 %v13101_v12  ;;  %v13180_v3 = vld [vmem:[%s19962_s0 + $0x1f0] ss:$8 sps:$4 sm:$0xff]   ;;  %v13188_v4 = vld [vmem:[%s19962_s0 + $0x204] ss:$8 sps:$4 sm:$0xff]   ;;  %v13186_v6 = vld [vmem:[%s19962_s0 + $0x200] ss:$8 sps:$4 sm:$0xff]  }
  0x31   : > { %2067 = vmatprep.subr.bf16.mxu0 %v13102_v13  ;;  %v13183_v5 = vld [vmem:[%s15625_s13 + $0x8] ss:$36 sps:$4 sm:$0xff]   ;;  %v13236_v7 = vld [vmem:[%s15625_s13 + $0x14] ss:$36 sps:$4 sm:$0xff]   ;;  %vm2608_vm0 = vcmask 1041408   ;;  %vm2604_vm1 = vcmask 556032  }
  0x32   : > { %v13191_v8 = vld [vmem:[%s19962_s0 + $0x214] ss:$8 sps:$4 sm:$0xff]   ;;  %v13189_v9 = vld [vmem:[%s19962_s0 + $0x210] ss:$8 sps:$4 sm:$0xff]   ;;  %v13194_v10 = vld [vmem:[%s19962_s0 + $0x224] ss:$8 sps:$4 sm:$0xff]  }
  0x33   : > { %v13192_v11 = vld [vmem:[%s19962_s0 + $0x220] ss:$8 sps:$4 sm:$0xff]   ;;  %v13197_v12 = vld [vmem:[%s19962_s0 + $0x234] ss:$8 sps:$4 sm:$0xff]   ;;  %v13195_v13 = vld [vmem:[%s19962_s0 + $0x230] ss:$8 sps:$4 sm:$0xff]  }
  0x34   : > { %2068 = vmatpush1.bf16.msra.mxu0 %v13104_v15  ;;  %v13200_v14 = vld [vmem:[%s19962_s0 + $0x244] ss:$8 sps:$4 sm:$0xff]   ;;  %v13198_v15 = vld [vmem:[%s19962_s0 + $0x240] ss:$8 sps:$4 sm:$0xff]   ;;  %vm8058_vm2 = vcmask 1040384   ;;  %p12885_p6 = scmp.ne.s32.totalorder %s15611_s25, 1 }
  0x35   : > { %2069 = vmatprep.subr.bf16.mxu0 %v13105_v16  ;;  %v13203_v16 = vld [vmem:[%s19962_s0 + $0x254] ss:$8 sps:$4 sm:$0xff]   ;;  %vm11380_vm3 = vcmask (!%p12885_p6), 60418  }
  0x36   : > { %vm11381_vm4 = vmor (!%p12885_p6), %vm11380_vm3, %vm2608_vm0 }
  0x38   : > { %2070 = vmatpush1.bf16.msra.mxu0 %v13107_v17  ;;  %v13201_v17 = vld [vmem:[%s19962_s0 + $0x250] ss:$8 sps:$4 sm:$0xff]  }
  0x39   : > { %2071 = vmatprep.subr.bf16.mxu0 %v13108_v18  ;;  %v13206_v18 = vld [vmem:[%s19962_s0 + $0x264] ss:$8 sps:$4 sm:$0xff]  }
  0x3c   : > { %2072 = vmatpush1.bf16.msra.mxu0 %v13110_v19  ;;  %v13204_v19 = vld [vmem:[%s19962_s0 + $0x260] ss:$8 sps:$4 sm:$0xff]  }
  0x3d   : > { %2073 = vmatprep.subr.bf16.mxu0 %v13111_v20  ;;  %v13209_v20 = vld [vmem:[%s19962_s0 + $0x274] ss:$8 sps:$4 sm:$0xff]  }
  0x40   : > { %2074 = vmatpush1.bf16.msra.mxu0 %v13113_v21  ;;  %v13207_v21 = vld [vmem:[%s19962_s0 + $0x270] ss:$8 sps:$4 sm:$0xff]  }
  0x41   : > { %2075 = vmatprep.subr.bf16.mxu0 %v13114_v22  ;;  %v13212_v22 = vld [vmem:[%s19962_s0 + $0x284] ss:$8 sps:$4 sm:$0xff]  }
  0x44   : > { %2076 = vmatpush1.bf16.msra.mxu0 %v13116_v23  ;;  %v13210_v23 = vld [vmem:[%s19962_s0 + $0x280] ss:$8 sps:$4 sm:$0xff]  }
  0x45   : > { %2077 = vmatprep.subr.bf16.mxu0 %v13117_v24  ;;  %v13215_v24 = vld [vmem:[%s19962_s0 + $0x294] ss:$8 sps:$4 sm:$0xff]  }
  0x48   : > { %2078 = vmatpush1.bf16.msra.mxu0 %v13119_v25  ;;  %v19970_v25 = vmov 0  }
  0x49   : > { %2079 = vmatprep.subr.bf16.mxu0 %v13120_v26  ;;  %13083 = vset.pattern.permute.xlu0 %v19970_v25  ;;  %v333_v26 = vld [vmem:[%s15620_s9] sm:$0xff] }
  0x4a   : > { %1281 = vperm.xlu0 %13083, %v333_v26   ;;  %v13281_v26 = vld [vmem:[%s19962_s0 + $0x3e4] ss:$8 sps:$4 sm:$0xff]  }
  0x4c   : > { %2080 = vmatpush1.bf16.msra.mxu0 %v13122_v27  ;;  %v13313_v27 = vld [vmem:[%s15630_s16 + $0x4] ss:$16 sps:$4 sm:$0xff]  }
  0x4d   : > { %2081 = vmatprep.subr.bf16.mxu0 %v13123_v28  ;;  %v13213_v28 = vld [vmem:[%s19962_s0 + $0x290] ss:$8 sps:$4 sm:$0xff]   ;;  %2621 = vmatprep.subr.bf16.mxu1 %v13313_v27  ;;  %v13279_v27 = vld [vmem:[%s19962_s0 + $0x3e0] ss:$8 sps:$4 sm:$0xff]  }
  0x50   : > { %2082 = vmatpush1.bf16.msra.mxu0 %v13125_v29  ;;  %v13315_v29 = vld [vmem:[%s15630_s16] ss:$16 sps:$4 sm:$0xff]  }
  0x51   : > { %2083 = vmatprep.subr.bf16.mxu0 %v13126_v30  ;;  %v13316_v30 = vld [vmem:[%s15630_s16 + $0x24] ss:$16 sps:$4 sm:$0xff]   ;;  %2622 = vmatpush1.bf16.msra.mxu1 %v13315_v29  ;;  %v13282_v29 = vld [vmem:[%s19962_s0 + $0x3f0] ss:$8 sps:$4 sm:$0xff]  }
  0x52   : > { %2623 = vmatprep.subr.bf16.mxu1 %v13316_v30  ;;  %v13290_v30 = vld [vmem:[%s19962_s0 + $0x404] ss:$8 sps:$4 sm:$0xff]  }
  0x54   : > { %2084 = vmatpush1.bf16.msra.mxu0 %v13128_v31  ;;  %v13218_v31 = vld [vmem:[%s19962_s0 + $0x2a4] ss:$8 sps:$4 sm:$0xff]  }
  0x55   : > { %2085 = vmatprep.subr.bf16.mxu0 %v13129_v32  ;;  %v334_v32 = vld [vmem:[%s15620_s9 + $0x8] sm:$0xff] }
  0x56   : > { %1286 = vperm.xlu0 %13083, %v334_v32   ;;  %v13288_v32 = vld [vmem:[%s19962_s0 + $0x400] ss:$8 sps:$4 sm:$0xff]  }
  0x58   : > { %2086 = vmatpush1.bf16.msra.mxu0 %v13131_v33  ;;  %v13321_v33 = vld [vmem:[%s15630_s16 + $0x20] ss:$16 sps:$4 sm:$0xff]  }
  0x59   : > { %2098 = vmatprep.subr.bf16.mxu0 %v13137_v34  ;;  %v13322_v34 = vld [vmem:[%s15630_s16 + $0x44] ss:$16 sps:$4 sm:$0xff]   ;;  %2624 = vmatpush1.bf16.msra.mxu1 %v13321_v33 }
  0x5a   : > { %2625 = vmatprep.subr.bf16.mxu1 %v13322_v34  ;;  %v13293_v33 = vld [vmem:[%s19962_s0 + $0x414] ss:$8 sps:$4 sm:$0xff]   ;;  %v13291_v34 = vld [vmem:[%s19962_s0 + $0x410] ss:$8 sps:$4 sm:$0xff]  }
  0x5b   : > { %2088 = vmatmul.mubr.bf16.vlgmr.msra.gmra.mrb[0].mxu0 %v13132_v35  ;;  %v13216_v35 = vld [vmem:[%s19962_s0 + $0x2a0] ss:$8 sps:$4 sm:$0xff]  }
  0x5c   : > { %2099 = vmatpush1.bf16.msra.mxu0 %v13135_v36  ;;  %2130 = vmatprep.mubr.bf16.mxu0 %v13185_v37  ;;  %v13221_v36 = vld [vmem:[%s19962_s0 + $0x2b4] ss:$8 sps:$4 sm:$0xff]   ;;  %v13327_v37 = vld [vmem:[%s15630_s16 + $0x40] ss:$16 sps:$4 sm:$0xff]  }
  0x5d   : > { %2100 = vmatprep.subr.bf16.mxu0 %v13140_v38  ;;  %v13328_v38 = vld [vmem:[%s15630_s16 + $0x64] ss:$16 sps:$4 sm:$0xff]   ;;  %2626 = vmatpush1.bf16.msra.mxu1 %v13327_v37 }
  0x5e   : > { %2627 = vmatprep.subr.bf16.mxu1 %v13328_v38  ;;  %v13299_v37 = vld [vmem:[%s19962_s0 + $0x434] ss:$8 sps:$4 sm:$0xff]   ;;  %v13297_v38 = vld [vmem:[%s19962_s0 + $0x430] ss:$8 sps:$4 sm:$0xff]  }
  0x60   : > { %2101 = vmatpush1.bf16.msra.mxu0 %v13138_v39  ;;  %v13219_v39 = vld [vmem:[%s19962_s0 + $0x2b0] ss:$8 sps:$4 sm:$0xff]  }
  0x61   : > { %2102 = vmatprep.subr.bf16.mxu0 %v13143_v40  ;;  %v13224_v40 = vld [vmem:[%s19962_s0 + $0x2c4] ss:$8 sps:$4 sm:$0xff]  }
  0x64   : > { %2103 = vmatpush1.bf16.msra.mxu0 %v13141_v41  ;;  %v13333_v41 = vld [vmem:[%s15630_s16 + $0x60] ss:$16 sps:$4 sm:$0xff]  }
  0x65   : > { %2104 = vmatprep.subr.bf16.mxu0 %v13146_v42  ;;  %v13334_v42 = vld [vmem:[%s15630_s16 + $0x84] ss:$16 sps:$4 sm:$0xff]   ;;  %2628 = vmatpush1.bf16.msra.mxu1 %v13333_v41 }
  0x66   : > { %2629 = vmatprep.subr.bf16.mxu1 %v13334_v42  ;;  %v13305_v41 = vld [vmem:[%s19962_s0 + $0x454] ss:$8 sps:$4 sm:$0xff]   ;;  %v13303_v42 = vld [vmem:[%s19962_s0 + $0x450] ss:$8 sps:$4 sm:$0xff]  }
  0x68   : > { %2105 = vmatpush1.bf16.msra.mxu0 %v13144_v43  ;;  %v13222_v43 = vld [vmem:[%s19962_s0 + $0x2c0] ss:$8 sps:$4 sm:$0xff]  }
  0x69   : > { %2106 = vmatprep.subr.bf16.mxu0 %v13149_v44  ;;  %v13227_v44 = vld [vmem:[%s19962_s0 + $0x2d4] ss:$8 sps:$4 sm:$0xff]  }
  0x6c   : > { %2107 = vmatpush1.bf16.msra.mxu0 %v13147_v45  ;;  %v13339_v45 = vld [vmem:[%s15630_s16 + $0x80] ss:$16 sps:$4 sm:$0xff]  }
  0x6d   : > { %2108 = vmatprep.subr.bf16.mxu0 %v13152_v46  ;;  %v13340_v46 = vld [vmem:[%s15630_s16 + $0xa4] ss:$16 sps:$4 sm:$0xff]   ;;  %2630 = vmatpush1.bf16.msra.mxu1 %v13339_v45 }
  0x6e   : > { %2631 = vmatprep.subr.bf16.mxu1 %v13340_v46  ;;  %v13311_v45 = vld [vmem:[%s19962_s0 + $0x474] ss:$8 sps:$4 sm:$0xff]   ;;  %v13309_v46 = vld [vmem:[%s19962_s0 + $0x470] ss:$8 sps:$4 sm:$0xff]  }
  0x70   : > { %2109 = vmatpush1.bf16.msra.mxu0 %v13150_v47  ;;  %v13225_v47 = vld [vmem:[%s19962_s0 + $0x2d0] ss:$8 sps:$4 sm:$0xff]  }
  0x71   : > { %2110 = vmatprep.subr.bf16.mxu0 %v13155_v48  ;;  %v13230_v48 = vld [vmem:[%s19962_s0 + $0x2e4] ss:$8 sps:$4 sm:$0xff]  }
  0x74   : > { %2111 = vmatpush1.bf16.msra.mxu0 %v13153_v49  ;;  %v13345_v49 = vld [vmem:[%s15630_s16 + $0xa0] ss:$16 sps:$4 sm:$0xff]  }
  0x75   : > { %2112 = vmatprep.subr.bf16.mxu0 %v13158_v50  ;;  %v13346_v50 = vld [vmem:[%s15630_s16 + $0xc4] ss:$16 sps:$4 sm:$0xff]   ;;  %2632 = vmatpush1.bf16.msra.mxu1 %v13345_v49  ;;  %v13318_v49 = vld [vmem:[%s15630_s16 + $0x4b0] ss:$16 sps:$4 sm:$0xff]  }
  0x76   : > { %2633 = vmatprep.subr.bf16.mxu1 %v13346_v50  ;;  %v13326_v50 = vld [vmem:[%s15630_s16 + $0x4d4] ss:$16 sps:$4 sm:$0xff]  }
  0x78   : > { %2113 = vmatpush1.bf16.msra.mxu0 %v13156_v51  ;;  %v13228_v51 = vld [vmem:[%s19962_s0 + $0x2e0] ss:$8 sps:$4 sm:$0xff]  }
  0x79   : > { %2114 = vmatprep.subr.bf16.mxu0 %v13161_v52  ;;  %v13233_v52 = vld [vmem:[%s19962_s0 + $0x2f4] ss:$8 sps:$4 sm:$0xff]  }
  0x7c   : > { %2115 = vmatpush1.bf16.msra.mxu0 %v13159_v53  ;;  %v13351_v53 = vld [vmem:[%s15630_s16 + $0xc0] ss:$16 sps:$4 sm:$0xff]  }
  0x7d   : > { %2116 = vmatprep.subr.bf16.mxu0 %v13164_v54  ;;  %v13352_v54 = vld [vmem:[%s15630_s16 + $0xe4] ss:$16 sps:$4 sm:$0xff]   ;;  %2634 = vmatpush1.bf16.msra.mxu1 %v13351_v53  ;;  %v13330_v53 = vld [vmem:[%s15630_s16 + $0x4f0] ss:$16 sps:$4 sm:$0xff]  }
  0x7e   : > { %2635 = vmatprep.subr.bf16.mxu1 %v13352_v54  ;;  %v13338_v54 = vld [vmem:[%s15630_s16 + $0x514] ss:$16 sps:$4 sm:$0xff]  }
  0x80   : > { %2117 = vmatpush1.bf16.msra.mxu0 %v13162_v55  ;;  %v13231_v55 = vld [vmem:[%s19962_s0 + $0x2f0] ss:$8 sps:$4 sm:$0xff]  }
  0x81   : > { %2118 = vmatprep.subr.bf16.mxu0 %v13167_v56  ;;  %v13239_v56 = vld [vmem:[%s19962_s0 + $0x304] ss:$8 sps:$4 sm:$0xff]  }
  0x84   : > { %2119 = vmatpush1.bf16.msra.mxu0 %v13165_v57  ;;  %v13357_v57 = vld [vmem:[%s15630_s16 + $0xe0] ss:$16 sps:$4 sm:$0xff]  }
  0x85   : > { %2120 = vmatprep.subr.bf16.mxu0 %v13170_v58  ;;  %v13234_v58 = vld [vmem:[%s15625_s13 + $0x10] ss:$36 sps:$4 sm:$0xff]   ;;  %2636 = vmatpush1.bf16.msra.mxu1 %v13357_v57 }
  0x86   : > { %v13342_v57 = vld [vmem:[%s15630_s16 + $0x530] ss:$16 sps:$4 sm:$0xff]  }
  0x88   : > { %2121 = vmatpush1.bf16.msra.mxu0 %v13168_v59  ;;  %v13358_v59 = vld [vmem:[%s15630_s16 + $0x104] ss:$16 sps:$4 sm:$0xff]  }
  0x89   : > { %2122 = vmatprep.subr.bf16.mxu0 %v13173_v60  ;;  %v13237_v60 = vld [vmem:[%s19962_s0 + $0x300] ss:$8 sps:$4 sm:$0xff]   ;;  %2637 = vmatprep.subr.bf16.mxu1 %v13358_v59 }
  0x8a   : > { %v13348_v59 = vld [vmem:[%s15630_s16 + $0x550] ss:$16 sps:$4 sm:$0xff]  }
  0x8c   : > { %2123 = vmatpush1.bf16.msra.mxu0 %v13171_v61  ;;  %v13287_v61 = vld [vmem:[%s15625_s13 + $0x1c] ss:$36 sps:$4 sm:$0xff]  }
  0x8d   : > { %2124 = vmatprep.subr.bf16.mxu0 %v13176_v62  ;;  %v13242_v62 = vld [vmem:[%s19962_s0 + $0x314] ss:$8 sps:$4 sm:$0xff]  }
  0x90   : > { %2125 = vmatpush1.bf16.msra.mxu0 %v13174_v63  ;;  %v13363_v63 = vld [vmem:[%s15630_s16 + $0x100] ss:$16 sps:$4 sm:$0xff]  }
  0x91   : > { %2126 = vmatprep.subr.bf16.mxu0 %v13179_v0  ;;  %v13240_v0 = vld [vmem:[%s19962_s0 + $0x310] ss:$8 sps:$4 sm:$0xff]   ;;  %2638 = vmatpush1.bf16.msra.mxu1 %v13363_v63 }
  0x92   : > { %v13360_v63 = vld [vmem:[%s15630_s16 + $0x590] ss:$16 sps:$4 sm:$0xff]  }
  0x94   : > { %2127 = vmatpush1.bf16.msra.mxu0 %v13177_v1  ;;  %v13245_v1 = vld [vmem:[%s19962_s0 + $0x324] ss:$8 sps:$4 sm:$0xff]  }
  0x95   : > { %2128 = vmatprep.subr.bf16.mxu0 %v13182_v2  ;;  %v13243_v2 = vld [vmem:[%s19962_s0 + $0x320] ss:$8 sps:$4 sm:$0xff]  }
  0x98   : > { %2129 = vmatpush1.bf16.msra.mxu0 %v13180_v3  ;;  %v13248_v3 = vld [vmem:[%s19962_s0 + $0x334] ss:$8 sps:$4 sm:$0xff]  }
  0x99   : > { %2141 = vmatprep.subr.bf16.mxu0 %v13188_v4  ;;  %v13246_v4 = vld [vmem:[%s19962_s0 + $0x330] ss:$8 sps:$4 sm:$0xff]  }
  0x9b   : > { %2131 = vmatmul.mubr.bf16.vlgmr.msra.gmra.mrb[0].mxu0 %v13183_v5  ;;  %v13251_v5 = vld [vmem:[%s19962_s0 + $0x344] ss:$8 sps:$4 sm:$0xff]  }
  0x9c   : > { %2142 = vmatpush1.bf16.msra.mxu0 %v13186_v6  ;;  %2173 = vmatprep.mubr.bf16.mxu0 %v13236_v7  ;;  %v13249_v6 = vld [vmem:[%s19962_s0 + $0x340] ss:$8 sps:$4 sm:$0xff]   ;;  %v13254_v7 = vld [vmem:[%s19962_s0 + $0x354] ss:$8 sps:$4 sm:$0xff]  }
  0x9d   : > { %2143 = vmatprep.subr.bf16.mxu0 %v13191_v8  ;;  %v13252_v8 = vld [vmem:[%s19962_s0 + $0x350] ss:$8 sps:$4 sm:$0xff]  }
  0xa0   : > { %2144 = vmatpush1.bf16.msra.mxu0 %v13189_v9  ;;  %v13257_v9 = vld [vmem:[%s19962_s0 + $0x364] ss:$8 sps:$4 sm:$0xff]  }
  0xa1   : > { %2145 = vmatprep.subr.bf16.mxu0 %v13194_v10  ;;  %v13255_v10 = vld [vmem:[%s19962_s0 + $0x360] ss:$8 sps:$4 sm:$0xff]  }
  0xa4   : > { %2146 = vmatpush1.bf16.msra.mxu0 %v13192_v11  ;;  %v13260_v11 = vld [vmem:[%s19962_s0 + $0x374] ss:$8 sps:$4 sm:$0xff]  }
  0xa5   : > { %2147 = vmatprep.subr.bf16.mxu0 %v13197_v12  ;;  %v13258_v12 = vld [vmem:[%s19962_s0 + $0x370] ss:$8 sps:$4 sm:$0xff]  }
  0xa8   : > { %2148 = vmatpush1.bf16.msra.mxu0 %v13195_v13  ;;  %v13263_v13 = vld [vmem:[%s19962_s0 + $0x384] ss:$8 sps:$4 sm:$0xff]  }
  0xa9   : > { %2149 = vmatprep.subr.bf16.mxu0 %v13200_v14  ;;  %v13261_v14 = vld [vmem:[%s19962_s0 + $0x380] ss:$8 sps:$4 sm:$0xff]  }
  0xac   : > { %2150 = vmatpush1.bf16.msra.mxu0 %v13198_v15  ;;  %v13266_v15 = vld [vmem:[%s19962_s0 + $0x394] ss:$8 sps:$4 sm:$0xff]  }
  0xad   : > { %2151 = vmatprep.subr.bf16.mxu0 %v13203_v16  ;;  %v13264_v16 = vld [vmem:[%s19962_s0 + $0x390] ss:$8 sps:$4 sm:$0xff]  }
  0xb0   : > { %2152 = vmatpush1.bf16.msra.mxu0 %v13201_v17  ;;  %v13269_v17 = vld [vmem:[%s19962_s0 + $0x3a4] ss:$8 sps:$4 sm:$0xff]  }
  0xb1   : > { %2153 = vmatprep.subr.bf16.mxu0 %v13206_v18  ;;  %v13267_v18 = vld [vmem:[%s19962_s0 + $0x3a0] ss:$8 sps:$4 sm:$0xff]  }
  0xb4   : > { %2154 = vmatpush1.bf16.msra.mxu0 %v13204_v19  ;;  %v13272_v19 = vld [vmem:[%s19962_s0 + $0x3b4] ss:$8 sps:$4 sm:$0xff]  }
  0xb5   : > { %2155 = vmatprep.subr.bf16.mxu0 %v13209_v20  ;;  %v13270_v20 = vld [vmem:[%s19962_s0 + $0x3b0] ss:$8 sps:$4 sm:$0xff]  }
  0xb8   : > { %2156 = vmatpush1.bf16.msra.mxu0 %v13207_v21  ;;  %v13275_v21 = vld [vmem:[%s19962_s0 + $0x3c4] ss:$8 sps:$4 sm:$0xff]  }
  0xb9   : > { %2157 = vmatprep.subr.bf16.mxu0 %v13212_v22  ;;  %v13273_v22 = vld [vmem:[%s19962_s0 + $0x3c0] ss:$8 sps:$4 sm:$0xff]  }
  0xbc   : > { %2158 = vmatpush1.bf16.msra.mxu0 %v13210_v23  ;;  %v13278_v23 = vld [vmem:[%s19962_s0 + $0x3d4] ss:$8 sps:$4 sm:$0xff]  }
  0xbd   : > { %2159 = vmatprep.subr.bf16.mxu0 %v13215_v24  ;;  %v13276_v24 = vld [vmem:[%s19962_s0 + $0x3d0] ss:$8 sps:$4 sm:$0xff]  }
  0xc0   : > { %2160 = vmatpush1.bf16.msra.mxu0 %v13213_v28  ;;  %v13284_v28 = vld [vmem:[%s19962_s0 + $0x3f4] ss:$8 sps:$4 sm:$0xff]  }
  0xc1   : > { %2161 = vmatprep.subr.bf16.mxu0 %v13218_v31  ;;  %v13285_v31 = vld [vmem:[%s15625_s13 + $0x18] ss:$36 sps:$4 sm:$0xff]  }
  0xc4   : > { %2162 = vmatpush1.bf16.msra.mxu0 %v13216_v35  ;;  %v13296_v35 = vld [vmem:[%s19962_s0 + $0x424] ss:$8 sps:$4 sm:$0xff]  }
  0xc5   : > { %2163 = vmatprep.subr.bf16.mxu0 %v13221_v36  ;;  %v13294_v36 = vld [vmem:[%s19962_s0 + $0x420] ss:$8 sps:$4 sm:$0xff]  }
  0xc8   : > { %2164 = vmatpush1.bf16.msra.mxu0 %v13219_v39  ;;  %v13302_v39 = vld [vmem:[%s19962_s0 + $0x444] ss:$8 sps:$4 sm:$0xff]  }
  0xc9   : > { %2165 = vmatprep.subr.bf16.mxu0 %v13224_v40  ;;  %v13300_v40 = vld [vmem:[%s19962_s0 + $0x440] ss:$8 sps:$4 sm:$0xff]  }
  0xcc   : > { %2166 = vmatpush1.bf16.msra.mxu0 %v13222_v43  ;;  %v13308_v43 = vld [vmem:[%s19962_s0 + $0x464] ss:$8 sps:$4 sm:$0xff]  }
  0xcd   : > { %2167 = vmatprep.subr.bf16.mxu0 %v13227_v44  ;;  %v13306_v44 = vld [vmem:[%s19962_s0 + $0x460] ss:$8 sps:$4 sm:$0xff]  }
  0xd0   : > { %2168 = vmatpush1.bf16.msra.mxu0 %v13225_v47  ;;  %v13320_v47 = vld [vmem:[%s15630_s16 + $0x4b4] ss:$16 sps:$4 sm:$0xff]  }
  0xd1   : > { %2169 = vmatprep.subr.bf16.mxu0 %v13230_v48  ;;  %v13312_v48 = vld [vmem:[%s15625_s13 + $0x20] ss:$36 sps:$4 sm:$0xff]  }
  0xd4   : > { %2170 = vmatpush1.bf16.msra.mxu0 %v13228_v51  ;;  %v13324_v51 = vld [vmem:[%s15630_s16 + $0x4d0] ss:$16 sps:$4 sm:$0xff]  }
  0xd5   : > { %2171 = vmatprep.subr.bf16.mxu0 %v13233_v52  ;;  %v13332_v52 = vld [vmem:[%s15630_s16 + $0x4f4] ss:$16 sps:$4 sm:$0xff]  }
  0xd8   : > { %2172 = vmatpush1.bf16.msra.mxu0 %v13231_v55  ;;  %v13336_v55 = vld [vmem:[%s15630_s16 + $0x510] ss:$16 sps:$4 sm:$0xff]  }
  0xd9   : > { %2184 = vmatprep.subr.bf16.mxu0 %v13239_v56  ;;  %v13344_v56 = vld [vmem:[%s15630_s16 + $0x534] ss:$16 sps:$4 sm:$0xff]  }
  0xdb   : > { %2174 = vmatmul.mubr.bf16.vlgmr.msra.gmra.mrb[0].mxu0 %v13234_v58  ;;  %v13350_v58 = vld [vmem:[%s15630_s16 + $0x554] ss:$16 sps:$4 sm:$0xff]  }
  0xdc   : > { %2185 = vmatpush1.bf16.msra.mxu0 %v13237_v60  ;;  %2216 = vmatprep.mubr.bf16.mxu0 %v13287_v61  ;;  %v13356_v60 = vld [vmem:[%s15630_s16 + $0x574] ss:$16 sps:$4 sm:$0xff]   ;;  %v13354_v61 = vld [vmem:[%s15630_s16 + $0x570] ss:$16 sps:$4 sm:$0xff]  }
  0xdd   : > { %2186 = vmatprep.subr.bf16.mxu0 %v13242_v62  ;;  %v13362_v62 = vld [vmem:[%s15630_s16 + $0x594] ss:$16 sps:$4 sm:$0xff]  }
  0xe0   : > { %2187 = vmatpush1.bf16.msra.mxu0 %v13240_v0  ;;  %v13364_v0 = vld [vmem:[%s15630_s16 + $0x124] ss:$16 sps:$4 sm:$0xff]  }
  0xe1   : > { %2188 = vmatprep.subr.bf16.mxu0 %v13245_v1  ;;  %v13368_v1 = vld [vmem:[%s15630_s16 + $0x5b4] ss:$16 sps:$4 sm:$0xff]   ;;  %2639 = vmatprep.subr.bf16.mxu1 %v13364_v0  ;;  %v13395_v0 = vld [vmem:[%s15630_s16 + $0x640] ss:$16 sps:$4 sm:$0xff]  }
  0xe4   : > { %2189 = vmatpush1.bf16.msra.mxu0 %v13243_v2  ;;  %v13366_v2 = vld [vmem:[%s15630_s16 + $0x5b0] ss:$16 sps:$4 sm:$0xff]  }
  0xe5   : > { %2190 = vmatprep.subr.bf16.mxu0 %v13248_v3  ;;  %v13369_v3 = vld [vmem:[%s15630_s16 + $0x120] ss:$16 sps:$4 sm:$0xff]  }
  0xe6   : > { %2640 = vmatpush1.bf16.msra.mxu1 %v13369_v3  ;;  %v13403_v3 = vld [vmem:[%s15630_s16 + $0x664] ss:$16 sps:$4 sm:$0xff]  }
  0xe8   : > { %2191 = vmatpush1.bf16.msra.mxu0 %v13246_v4  ;;  %v13370_v4 = vld [vmem:[%s15630_s16 + $0x144] ss:$16 sps:$4 sm:$0xff]  }
  0xe9   : > { %2192 = vmatprep.subr.bf16.mxu0 %v13251_v5  ;;  %v13374_v5 = vld [vmem:[%s15630_s16 + $0x5d4] ss:$16 sps:$4 sm:$0xff]   ;;  %2641 = vmatprep.subr.bf16.mxu1 %v13370_v4 }
  0xec   : > { %2193 = vmatpush1.bf16.msra.mxu0 %v13249_v6  ;;  %v13372_v6 = vld [vmem:[%s15630_s16 + $0x5d0] ss:$16 sps:$4 sm:$0xff]  }
  0xed   : > { %2194 = vmatprep.subr.bf16.mxu0 %v13254_v7  ;;  %v13375_v7 = vld [vmem:[%s15630_s16 + $0x140] ss:$16 sps:$4 sm:$0xff]  }
  0xee   : > { %2642 = vmatpush1.bf16.msra.mxu1 %v13375_v7  ;;  %v13406_v7 = vld [vmem:[%s15630_s16 + $0x6c] ss:$16 sps:$4 sm:$0xff]  }
  0xf0   : > { %2195 = vmatpush1.bf16.msra.mxu0 %v13252_v8  ;;  %v13376_v8 = vld [vmem:[%s15630_s16 + $0x164] ss:$16 sps:$4 sm:$0xff]  }
  0xf1   : > { %2196 = vmatprep.subr.bf16.mxu0 %v13257_v9  ;;  %v13380_v9 = vld [vmem:[%s15630_s16 + $0x5f4] ss:$16 sps:$4 sm:$0xff]   ;;  %2643 = vmatprep.subr.bf16.mxu1 %v13376_v8 }
  0xf2   : > { %v13409_v8 = vld [vmem:[%s15630_s16 + $0x684] ss:$16 sps:$4 sm:$0xff]  }
  0xf4   : > { %2197 = vmatpush1.bf16.msra.mxu0 %v13255_v10  ;;  %v13378_v10 = vld [vmem:[%s15630_s16 + $0x5f0] ss:$16 sps:$4 sm:$0xff]  }
  0xf5   : > { %2198 = vmatprep.subr.bf16.mxu0 %v13260_v11  ;;  %v13381_v11 = vld [vmem:[%s15630_s16 + $0x160] ss:$16 sps:$4 sm:$0xff]  }
  0xf6   : > { %2644 = vmatpush1.bf16.msra.mxu1 %v13381_v11  ;;  %v13412_v11 = vld [vmem:[%s15630_s16 + $0x8c] ss:$16 sps:$4 sm:$0xff]  }
  0xf8   : > { %2199 = vmatpush1.bf16.msra.mxu0 %v13258_v12  ;;  %v383_v12 = vld [vmem:[%s15630_s16 + $0x180] sm:$0x33] }
  0xf9   : > { %2200 = vmatprep.subr.bf16.mxu0 %v13263_v13  ;;  %v16125_v13 = vcombine.high %v383_v12, %v383_v12 }
  0xfb   : > { %11672 = vmatprep.subr.msk.bf16.mxu1 %vm2608_vm0, %v16125_v13 }
  0xfc   : > { %2201 = vmatpush1.bf16.msra.mxu0 %v13261_v14  ;;  %v13385_v14 = vld [vmem:[%s15630_s16 + $0x614] ss:$16 sps:$4 sm:$0xff]  }
  0xfd   : > { %2202 = vmatprep.subr.bf16.mxu0 %v13266_v15  ;;  %v11668_v15 = vcombine.low %v383_v12, %v383_v12  ;;  %v13415_v12 = vld [vmem:[%s15630_s16 + $0x6a4] ss:$16 sps:$4 sm:$0xff]  }
 0x100   : > { %2203 = vmatpush1.bf16.msra.mxu0 %v13264_v16  ;;  %v13383_v16 = vld [vmem:[%s15630_s16 + $0x610] ss:$16 sps:$4 sm:$0xff]  }
 0x101   : > { %2204 = vmatprep.subr.bf16.mxu0 %v13269_v17  ;;  %v16132_v17 = vsel %vm2608_vm0, %v11668_v15, 0  ;;  %v13413_v15 = vld [vmem:[%s15630_s16 + $0x6a0] ss:$16 sps:$4 sm:$0xff]  }
 0x102   : > { %2646 = vmatpush1.bf16.msra.mxu1 %v16132_v17 }
 0x104   : > { %2205 = vmatpush1.bf16.msra.mxu0 %v13267_v18  ;;  %v533_v18 = vld [vmem:[%s15630_s16 + $0x630] sm:$0x33] }
 0x105   : > { %2206 = vmatprep.subr.bf16.mxu0 %v13272_v19  ;;  %v13389_v19 = vld [vmem:[%s15630_s16 + $0xc] ss:$16 sps:$4 sm:$0xff]  }
 0x106   : > { %2662 = vmatprep.subr.bf16.mxu1 %v13389_v19  ;;  %v13416_v19 = vld [vmem:[%s15630_s16 + $0xa8] ss:$16 sps:$4 sm:$0xff]  }
 0x108   : > { %2207 = vmatpush1.bf16.msra.mxu0 %v13270_v20  ;;  %v16137_v20 = vcombine.high %v533_v18, %v533_v18 }
 0x109   : > { %2208 = vmatprep.subr.bf16.mxu0 %v13275_v21  ;;  %v11837_v21 = vcombine.low %v533_v18, %v533_v18  ;;  %v13421_v18 = vld [vmem:[%s15630_s16 + $0x6c4] ss:$16 sps:$4 sm:$0xff]  }
 0x10c   : > { %2209 = vmatpush1.bf16.msra.mxu0 %v13273_v22  ;;  %v16142_v22 = vsel %vm2608_vm0, %v11837_v21, 0  ;;  %v13419_v21 = vld [vmem:[%s15630_s16 + $0x6c0] ss:$16 sps:$4 sm:$0xff]  }
 0x10d   : > { %2210 = vmatprep.subr.bf16.mxu0 %v13278_v23  ;;  %v13397_v23 = vld [vmem:[%s15630_s16 + $0x644] ss:$16 sps:$4 sm:$0xff]  }
 0x110   : > { %2211 = vmatpush1.bf16.msra.mxu0 %v13276_v24  ;;  %v16146_v24 = vpop.permute.xlu0 %1281 }
 0x111   : > { %2212 = vmatprep.subr.bf16.mxu0 %v13281_v26  ;;  %v15562_v26 = vmov 1966171168  }
 0x114   : > { %2213 = vmatpush1.bf16.msra.mxu0 %v13279_v27  ;;  %v2281_v27 = vunpack.c.l.s4 %v15562_v26  ;;  %v13427_v26 = vld [vmem:[%s15630_s16 + $0x6e4] ss:$16 sps:$4 sm:$0xff]  }
 0x115   : > { %2214 = vmatprep.subr.bf16.mxu0 %v13284_v28  ;;  %v2283_v28 = vlaneseq }
 0x118   : > { %2215 = vmatpush1.bf16.msra.mxu0 %v13282_v29 }
 0x119   : > { %2227 = vmatprep.subr.bf16.mxu0 %v13290_v30  ;;  %v16148_v30 = vpop.permute.xlu0 %1286 }
 0x11b   : > { %2217 = vmatmul.mubr.bf16.vlgmr.msra.gmra.mrb[0].mxu0 %v13285_v31  ;;  %v2282_v31 = vunpack.c.0.s8 %v2281_v27  ;;  %v13422_v27 = vld [vmem:[%s15630_s16 + $0xc8] ss:$16 sps:$4 sm:$0xff]  }
 0x11c   : > { %2228 = vmatpush1.bf16.msra.mxu0 %v13288_v32  ;;  %2259 = vmatprep.mubr.bf16.mxu0 %v19970_v25  ;;  %v16150_v32 = vshrl.u32 %v2283_v28, 7  ;;  %v13425_v28 = vld [vmem:[%s15630_s16 + $0x6e0] ss:$16 sps:$4 sm:$0xff]   ;;  %v13790_v25 = vld [vmem:[%s15630_s16 + $0x538] ss:$16 sps:$4 sm:$0xff]  }
 0x11d   : > { %2229 = vmatprep.subr.bf16.mxu0 %v13293_v33 }
 0x11e   : > { %19998 = vst [vmem:[#allocation6_spill] sm:$0xff] %v16150_v32 }
 0x120   : > { %2230 = vmatpush1.bf16.msra.mxu0 %v13291_v34 }
 0x121   : > { %2231 = vmatprep.subr.bf16.mxu0 %v13296_v35 }
 0x124   : > { %2232 = vmatpush1.bf16.msra.mxu0 %v13294_v36 }
 0x125   : > { %2233 = vmatprep.subr.bf16.mxu0 %v13299_v37 }
 0x128   : > { %2234 = vmatpush1.bf16.msra.mxu0 %v13297_v38 }
 0x129   : > { %2235 = vmatprep.subr.bf16.mxu0 %v13302_v39 }
 0x12c   : > { %2236 = vmatpush1.bf16.msra.mxu0 %v13300_v40 }
 0x12d   : > { %2237 = vmatprep.subr.bf16.mxu0 %v13305_v41  ;;  %v16156_v41 = vsub.s32 %v2282_v31, %v16150_v32  ;;  %v13433_v31 = vld [vmem:[%s15630_s16 + $0x704] ss:$16 sps:$4 sm:$0xff]  }
 0x130   : > { %2238 = vmatpush1.bf16.msra.mxu0 %v13303_v42 }
 0x131   : > { %2239 = vmatprep.subr.bf16.mxu0 %v13308_v43 }
 0x134   : > { %2240 = vmatpush1.bf16.msra.mxu0 %v13306_v44 }
 0x135   : > { %2241 = vmatprep.subr.bf16.mxu0 %v13311_v45 }
 0x138   : > { %2242 = vmatpush1.bf16.msra.mxu0 %v13309_v46 }
 0x139   : > { %3692 = vmatprep.subr.bf16.mxu0 %v13320_v47 }
 0x13b   : > { %2260 = vmatmul.mubr.bf16.vlgmr.msra.gmra.mrb[0].mxu0 %v13312_v48 }
 0x13c   : > { %3693 = vmatpush1.bf16.msra.mxu0 %v13318_v49 }
 0x13d   : > { %3694 = vmatprep.subr.bf16.mxu0 %v13326_v50  ;;  %v16166_v50 = vsub.s32 0, %v16150_v32 }
 0x140   : > { %3695 = vmatpush1.bf16.msra.mxu0 %v13324_v51  ;;  %v16169_v51 = vsub.s32 1, %v16150_v32  ;;  %v13798_v32 = vld [vmem:[%s15630_s16 + $0x55c] ss:$16 sps:$4 sm:$0xff]  }
 0x141   : > { %3696 = vmatprep.subr.bf16.mxu0 %v13332_v52 }
 0x144   : > { %3697 = vmatpush1.bf16.msra.mxu0 %v13330_v53 }
 0x145   : > { %3698 = vmatprep.subr.bf16.mxu0 %v13338_v54 }
 0x148   : > { %3699 = vmatpush1.bf16.msra.mxu0 %v13336_v55 }
 0x149   : > { %3700 = vmatprep.subr.bf16.mxu0 %v13344_v56  ;;  %v13387_v56 = vld [vmem:[%s15630_s16 + $0x8] ss:$16 sps:$4 sm:$0xff]  }
 0x14c   : > { %3701 = vmatpush1.bf16.msra.mxu0 %v13342_v57 }
 0x14d   : > { %3702 = vmatprep.subr.bf16.mxu0 %v13350_v58 }
 0x150   : > { %3703 = vmatpush1.bf16.msra.mxu0 %v13348_v59  ;;  %v13394_v59 = vld [vmem:[%s15630_s16 + $0x2c] ss:$16 sps:$4 sm:$0xff]  }
 0x151   : > { %3704 = vmatprep.subr.bf16.mxu0 %v13356_v60 }
 0x154   : > { %3705 = vmatpush1.bf16.msra.mxu0 %v13354_v61 }
 0x155   : > { %3706 = vmatprep.subr.bf16.mxu0 %v13362_v62  ;;  %v13392_v62 = vld [vmem:[%s15630_s16 + $0x28] ss:$16 sps:$4 sm:$0xff]  }
 0x158   : > { %3707 = vmatpush1.bf16.msra.mxu0 %v13360_v63 }
 0x159   : > { %3708 = vmatprep.subr.bf16.mxu0 %v13368_v1 }
 0x15c   : > { %3709 = vmatpush1.bf16.msra.mxu0 %v13366_v2  ;;  %v13400_v2 = vld [vmem:[%s15630_s16 + $0x4c] ss:$16 sps:$4 sm:$0xff]  }
 0x15d   : > { %3710 = vmatprep.subr.bf16.mxu0 %v13374_v5  ;;  %v13398_v5 = vld [vmem:[%s15630_s16 + $0x48] ss:$16 sps:$4 sm:$0xff]  }
 0x160   : > { %3711 = vmatpush1.bf16.msra.mxu0 %v13372_v6  ;;  %v13401_v6 = vld [vmem:[%s15630_s16 + $0x660] ss:$16 sps:$4 sm:$0xff]  }
 0x161   : > { %3712 = vmatprep.subr.bf16.mxu0 %v13380_v9  ;;  %v13404_v9 = vld [vmem:[%s15630_s16 + $0x68] ss:$16 sps:$4 sm:$0xff]  }
 0x164   : > { %3713 = vmatpush1.bf16.msra.mxu0 %v13378_v10  ;;  %v13407_v10 = vld [vmem:[%s15630_s16 + $0x680] ss:$16 sps:$4 sm:$0xff]  }
 0x165   : > { %3714 = vmatprep.subr.bf16.mxu0 %v13385_v14  ;;  %v13410_v14 = vld [vmem:[%s15630_s16 + $0x88] ss:$16 sps:$4 sm:$0xff]  }
 0x168   : > { %3715 = vmatpush1.bf16.msra.mxu0 %v13383_v16  ;;  %v13418_v16 = vld [vmem:[%s15630_s16 + $0xac] ss:$16 sps:$4 sm:$0xff]  }
 0x169   : > { %11841 = vmatprep.subr.msk.bf16.mxu0 %vm2608_vm0, %v16137_v20 }
 0x16c   : > { %3717 = vmatpush1.bf16.msra.mxu0 %v16142_v22 }
 0x16d   : > { %4049 = vmatprep.subr.bf16.mxu0 %v13397_v23  ;;  %v13424_v23 = vld [vmem:[%s15630_s16 + $0xcc] ss:$16 sps:$4 sm:$0xff]  }
 0x20e   : > { %v2261_v29 = vpop.f32.mrb[0].mxu0 }
 0x20f   : > { %v13018_v33 = vadd.f32 %v2261_v29, %v16146_v24  ;;  %v2263_v34 = vpop.f32.mrb[1].mxu0  ;;  %v13430_v29 = vld [vmem:[%s15630_s16 + $0xec] ss:$16 sps:$4 sm:$0xff]  }
 0x210   : > { %v13019_v35 = vadd.f32 %v2263_v34, %v16146_v24  ;;  %v2265_v36 = vpop.f32.mrb[2].mxu0  ;;  %v13431_v34 = vld [vmem:[%s15630_s16 + $0x700] ss:$16 sps:$4 sm:$0xff]  }
 0x211   : > { %v2270_v37 = vmax.f32 %v13018_v33, 0.0  ;;  %v13020_v38 = vadd.f32 %v2265_v36, %v16148_v30  ;;  %v2267_v39 = vpop.f32.mrb[3].mxu0  ;;  %v13428_v33 = vld [vmem:[%s15630_s16 + $0xe8] ss:$16 sps:$4 sm:$0xff]   ;;  %v13439_v36 = vld [vmem:[%s15630_s16 + $0x724] ss:$16 sps:$4 sm:$0xff]  }
 0x212   : > { %v2271_v40 = vmax.f32 %v13019_v35, 0.0  ;;  %v13021_v42 = vadd.f32 %v2267_v39, %v16148_v30  ;;  %v13436_v35 = vld [vmem:[%s15630_s16 + $0x10c] ss:$16 sps:$4 sm:$0xff]  }
 0x213   : > { %v2272_v43 = vmax.f32 %v13020_v38, 0.0  ;;  %v13437_v38 = vld [vmem:[%s15630_s16 + $0x720] ss:$16 sps:$4 sm:$0xff]   ;;  %v13442_v39 = vld [vmem:[%s15630_s16 + $0x12c] ss:$16 sps:$4 sm:$0xff]  }
 0x214   : > { %v11617_v44 = vpack.c.bf16 %v2271_v40, %v2270_v37  ;;  %v2273_v45 = vmax.f32 %v13021_v42, 0.0  ;;  %v13434_v37 = vld [vmem:[%s15630_s16 + $0x108] ss:$16 sps:$4 sm:$0xff]   ;;  %v13445_v40 = vld [vmem:[%s15630_s16 + $0x744] ss:$16 sps:$4 sm:$0xff]  }
 0x215   : > { %v13440_v42 = vld [vmem:[%s15630_s16 + $0x128] ss:$16 sps:$4 sm:$0xff]  }
 0x216   : > { %v2286_v46 = vrot.slane %v11617_v44, %v16156_v41  ;;  %v16160_v47 = vpack.c.bf16 %v2273_v45, %v2272_v43  ;;  %v13443_v43 = vld [vmem:[%s15630_s16 + $0x740] ss:$16 sps:$4 sm:$0xff]   ;;  %v13448_v44 = vld [vmem:[%s15630_s16 + $0x14c] ss:$16 sps:$4 sm:$0xff]   ;;  %v13451_v45 = vld [vmem:[%s15630_s16 + $0x764] ss:$16 sps:$4 sm:$0xff]  }
 0x218   : > { %v2294_v48 = vcombine.high %v2286_v46, %v2286_v46  ;;  %v16163_v49 = vrot.slane %v2286_v46, %v16156_v41  ;;  %v13446_v46 = vld [vmem:[%s15630_s16 + $0x148] ss:$16 sps:$4 sm:$0xff]  }
 0x21a   : > { %v16172_v52 = vrot.slane %v2294_v48, %v16156_v41  ;;  %v11619_v53 = vpack.i.b16 %v16163_v49, %v16163_v49  ;;  %v16178_v54 = vcombine.high %v16163_v49, %v16163_v49  ;;  %v13449_v48 = vld [vmem:[%s15630_s16 + $0x760] ss:$16 sps:$4 sm:$0xff]  }
 0x21c   : > { %v2352_v55 = vrot.slane %v11619_v53, %v16169_v51  ;;  %v16183_v57 = vrot.slane %v11619_v53, %v16166_v50  ;;  %v2331_v58 = vunpack.i.h.s16 %v16172_v52  ;;  %v16191_v61 = vpack.i.b16 %v16178_v54, %v16178_v54  ;;  %v13454_v53 = vld [vmem:[%s15630_s16 + $0x16c] ss:$16 sps:$4 sm:$0xff]  }
 0x21e   : > { %11673 = vmatprep.mubr.msk.bf16.mxu1 %vm2604_vm1, %v2352_v55  ;;  %v3417_v60 = vpack.i.b16 %v2331_v58, %v2331_v58  ;;  %v16209_v4 = vrot.slane %v16191_v61, %v16169_v51  ;;  %v13452_v58 = vld [vmem:[%s15630_s16 + $0x168] ss:$16 sps:$4 sm:$0xff]  }
 0x21f   : > { %2654 = vmatmul.mubr.bf16.vlgmr.msra.gmra.mrb[0].mxu1 %v16183_v57 }
 0x220   : > { %2663 = vmatpush1.bf16.msra.mxu1 %v13387_v56  ;;  %11675 = vmatprep.mubr.msk.bf16.mxu1 %vm2604_vm1, %v2352_v55  ;;  %v16196_v63 = vrot.slane %v3417_v60, %v16169_v51  ;;  %v16200_v1 = vrot.slane %v3417_v60, %v16166_v50  ;;  %v13457_v55 = vld [vmem:[%s15630_s16 + $0x784] ss:$16 sps:$4 sm:$0xff]   ;;  %v384_v56 = vld [vmem:[%s15630_s16 + $0x188] sm:$0x33] }
 0x221   : > { %2664 = vmatprep.subr.bf16.mxu1 %v13394_v59  ;;  %v13455_v59 = vld [vmem:[%s15630_s16 + $0x780] ss:$16 sps:$4 sm:$0xff]   ;;  %v16252_v60 = vcombine.high %v384_v56, %v384_v56 }
 0x222   : > { %11842 = vmatprep.mubr.msk.bf16.mxu0 %vm2604_vm1, %v16196_v63 }
 0x223   : > { %3725 = vmatmul.mubr.bf16.vlgmr.msra.gmra.mrb[4].mxu0 %v16200_v1 }
 0x224   : > { %2665 = vmatpush1.bf16.msra.mxu1 %v13392_v62  ;;  %4050 = vmatpush1.bf16.msra.mxu0 %v13395_v0  ;;  %v13461_v62 = vld [vmem:[%s15630_s16 + $0x7a4] ss:$16 sps:$4 sm:$0xff]   ;;  %v11670_v0 = vcombine.low %v384_v56, %v384_v56  ;;  %v13507_v56 = vld [vmem:[%s15630_s16 + $0x890] ss:$16 sps:$4 sm:$0xff]  }
 0x225   : > { %11899 = vmatprep.mubr.msk.bf16.mxu0 %vm2604_vm1, %v16209_v4  ;;  %2666 = vmatprep.subr.bf16.mxu1 %v13400_v2  ;;  %v583_v2 = vld [vmem:[%s15630_s16 + $0x7c0] sm:$0x33] }
 0x226   : > { %4051 = vmatprep.subr.bf16.mxu0 %v13403_v3  ;;  %v2329_v3 = vunpack.i.h.s16 %v16163_v49  ;;  %v2333_v49 = vunpack.i.h.s16 %v16178_v54  ;;  %v13473_v54 = vld [vmem:[%s15630_s16 + $0x7d4] ss:$16 sps:$4 sm:$0xff]  }
 0x228   : > { %2667 = vmatpush1.bf16.msra.mxu1 %v13398_v5  ;;  %4052 = vmatpush1.bf16.msra.mxu0 %v13401_v6  ;;  %v13459_v5 = vld [vmem:[%s15630_s16 + $0x7a0] ss:$16 sps:$4 sm:$0xff]   ;;  %v16261_v6 = vsel %vm2608_vm0, %v11670_v0, 0 }
 0x229   : > { %2668 = vmatprep.subr.bf16.mxu1 %v13406_v7  ;;  %4053 = vmatprep.subr.bf16.mxu0 %v13409_v8  ;;  %v13465_v7 = vld [vmem:[%s15630_s16 + $0x194] ss:$16 sps:$4 sm:$0xff]   ;;  %v16264_v8 = vcombine.high %v583_v2, %v583_v2  ;;  %v13513_v0 = vld [vmem:[%s15630_s16 + $0x8b0] ss:$16 sps:$4 sm:$0xff]  }
 0x22c   : > { %2669 = vmatpush1.bf16.msra.mxu1 %v13404_v9  ;;  %4054 = vmatpush1.bf16.msra.mxu0 %v13407_v10  ;;  %v16266_v9 = vpack.i.b16 %v2329_v3, %v2329_v3  ;;  %v11894_v10 = vcombine.low %v583_v2, %v583_v2  ;;  %v13518_v2 = vld [vmem:[%s15630_s16 + $0x2b4] ss:$16 sps:$4 sm:$0xff]  }
 0x22d   : > { %2670 = vmatprep.subr.bf16.mxu1 %v13412_v11  ;;  %4055 = vmatprep.subr.bf16.mxu0 %v13415_v12  ;;  %v13463_v11 = vld [vmem:[%s15630_s16 + $0x190] ss:$16 sps:$4 sm:$0xff]   ;;  %v13470_v12 = vld [vmem:[%s15630_s16 + $0x1b4] ss:$16 sps:$4 sm:$0xff]  }
 0x22e   : > { %v13521_v3 = vld [vmem:[%s15630_s16 + $0x8d4] ss:$16 sps:$4 sm:$0xff]  }
 0x230   : > { %2671 = vmatpush1.bf16.msra.mxu1 %v13410_v14  ;;  %4056 = vmatpush1.bf16.msra.mxu0 %v13413_v15  ;;  %v16276_v14 = vrot.slane %v16266_v9, %v16169_v51  ;;  %v16279_v15 = vsel %vm2608_vm0, %v11894_v10, 0  ;;  %v13524_v10 = vld [vmem:[%s15630_s16 + $0x2d4] ss:$16 sps:$4 sm:$0xff]  }
 0x231   : > { %2672 = vmatprep.subr.bf16.mxu1 %v13418_v16  ;;  %4057 = vmatprep.subr.bf16.mxu0 %v13421_v18  ;;  %v16283_v16 = vpack.i.b16 %v2333_v49, %v2333_v49  ;;  %v13468_v18 = vld [vmem:[%s15630_s16 + $0x1b0] ss:$16 sps:$4 sm:$0xff]   ;;  %v13527_v49 = vld [vmem:[%s15630_s16 + $0x8f4] ss:$16 sps:$4 sm:$0xff]  }
 0x234   : > { %2673 = vmatpush1.bf16.msra.mxu1 %v13416_v19  ;;  %4058 = vmatpush1.bf16.msra.mxu0 %v13419_v21  ;;  %v13471_v19 = vld [vmem:[%s15630_s16 + $0x7d0] ss:$16 sps:$4 sm:$0xff]   ;;  %v16292_v21 = vrot.slane %v16191_v61, %v16166_v50 }
 0x235   : > { %2674 = vmatprep.subr.bf16.mxu1 %v13424_v23  ;;  %4059 = vmatprep.subr.bf16.mxu0 %v13427_v26  ;;  %v13479_v23 = vld [vmem:[%s15630_s16 + $0x7f4] ss:$16 sps:$4 sm:$0xff]   ;;  %v16298_v26 = vrot.slane %v16283_v16, %v16169_v51  ;;  %v13477_v61 = vld [vmem:[%s15630_s16 + $0x7f0] ss:$16 sps:$4 sm:$0xff]  }
 0x238   : > { %2675 = vmatpush1.bf16.msra.mxu1 %v13422_v27  ;;  %4060 = vmatpush1.bf16.msra.mxu0 %v13425_v28  ;;  %v13474_v27 = vld [vmem:[%s15630_s16 + $0x1d0] ss:$16 sps:$4 sm:$0xff]   ;;  %v13482_v28 = vld [vmem:[%s15630_s16 + $0x1f4] ss:$16 sps:$4 sm:$0xff]  }
 0x239   : > { %2676 = vmatprep.subr.bf16.mxu1 %v13430_v29  ;;  %4061 = vmatprep.subr.bf16.mxu0 %v13433_v31  ;;  %v13485_v29 = vld [vmem:[%s15630_s16 + $0x814] ss:$16 sps:$4 sm:$0xff]   ;;  %v13480_v31 = vld [vmem:[%s15630_s16 + $0x1f0] ss:$16 sps:$4 sm:$0xff]  }
 0x23c   : > { %2677 = vmatpush1.bf16.msra.mxu1 %v13428_v33  ;;  %4062 = vmatpush1.bf16.msra.mxu0 %v13431_v34  ;;  %v13483_v33 = vld [vmem:[%s15630_s16 + $0x810] ss:$16 sps:$4 sm:$0xff]   ;;  %v13488_v34 = vld [vmem:[%s15630_s16 + $0x214] ss:$16 sps:$4 sm:$0xff]  }
 0x23d   : > { %2678 = vmatprep.subr.bf16.mxu1 %v13436_v35  ;;  %4063 = vmatprep.subr.bf16.mxu0 %v13439_v36  ;;  %v13491_v35 = vld [vmem:[%s15630_s16 + $0x834] ss:$16 sps:$4 sm:$0xff]   ;;  %v13486_v36 = vld [vmem:[%s15630_s16 + $0x210] ss:$16 sps:$4 sm:$0xff]  }
 0x240   : > { %2679 = vmatpush1.bf16.msra.mxu1 %v13434_v37  ;;  %4064 = vmatpush1.bf16.msra.mxu0 %v13437_v38  ;;  %v13489_v37 = vld [vmem:[%s15630_s16 + $0x830] ss:$16 sps:$4 sm:$0xff]   ;;  %v13494_v38 = vld [vmem:[%s15630_s16 + $0x234] ss:$16 sps:$4 sm:$0xff]  }
 0x241   : > { %2680 = vmatprep.subr.bf16.mxu1 %v13442_v39  ;;  %4065 = vmatprep.subr.bf16.mxu0 %v13445_v40  ;;  %v13497_v39 = vld [vmem:[%s15630_s16 + $0x854] ss:$16 sps:$4 sm:$0xff]   ;;  %v13492_v40 = vld [vmem:[%s15630_s16 + $0x230] ss:$16 sps:$4 sm:$0xff]  }
 0x244   : > { %2681 = vmatpush1.bf16.msra.mxu1 %v13440_v42  ;;  %4066 = vmatpush1.bf16.msra.mxu0 %v13443_v43  ;;  %v13495_v42 = vld [vmem:[%s15630_s16 + $0x850] ss:$16 sps:$4 sm:$0xff]   ;;  %v13500_v43 = vld [vmem:[%s15630_s16 + $0x254] ss:$16 sps:$4 sm:$0xff]  }
 0x245   : > { %2682 = vmatprep.subr.bf16.mxu1 %v13448_v44  ;;  %4067 = vmatprep.subr.bf16.mxu0 %v13451_v45  ;;  %v13503_v44 = vld [vmem:[%s15630_s16 + $0x874] ss:$16 sps:$4 sm:$0xff]   ;;  %v13498_v45 = vld [vmem:[%s15630_s16 + $0x250] ss:$16 sps:$4 sm:$0xff]  }
 0x248   : > { %2683 = vmatpush1.bf16.msra.mxu1 %v13446_v46  ;;  %4068 = vmatpush1.bf16.msra.mxu0 %v13449_v48  ;;  %v13501_v46 = vld [vmem:[%s15630_s16 + $0x870] ss:$16 sps:$4 sm:$0xff]   ;;  %v13506_v48 = vld [vmem:[%s15630_s16 + $0x274] ss:$16 sps:$4 sm:$0xff]  }
 0x249   : > { %2684 = vmatprep.subr.bf16.mxu1 %v13454_v53  ;;  %4069 = vmatprep.subr.bf16.mxu0 %v13457_v55  ;;  %v13509_v53 = vld [vmem:[%s15630_s16 + $0x894] ss:$16 sps:$4 sm:$0xff]   ;;  %v13504_v55 = vld [vmem:[%s15630_s16 + $0x270] ss:$16 sps:$4 sm:$0xff]  }
 0x24c   : > { %2685 = vmatpush1.bf16.msra.mxu1 %v13452_v58  ;;  %4070 = vmatpush1.bf16.msra.mxu0 %v13455_v59  ;;  %v13512_v58 = vld [vmem:[%s15630_s16 + $0x294] ss:$16 sps:$4 sm:$0xff]  }
 0x24d   : > { %11674 = vmatprep.subr.msk.bf16.mxu1 %vm2608_vm0, %v16252_v60  ;;  %4071 = vmatprep.subr.bf16.mxu0 %v13461_v62  ;;  %v13515_v59 = vld [vmem:[%s15630_s16 + $0x8b4] ss:$16 sps:$4 sm:$0xff]   ;;  %v13510_v62 = vld [vmem:[%s15630_s16 + $0x290] ss:$16 sps:$4 sm:$0xff]  }
 0x250   : > { %2687 = vmatpush1.bf16.msra.mxu1 %v16261_v6  ;;  %4072 = vmatpush1.bf16.msra.mxu0 %v13459_v5  ;;  %v13516_v5 = vld [vmem:[%s15630_s16 + $0x2b0] ss:$16 sps:$4 sm:$0xff]  }
 0x251   : > { %2978 = vmatprep.subr.bf16.mxu1 %v13465_v7  ;;  %11898 = vmatprep.subr.msk.bf16.mxu0 %vm2608_vm0, %v16264_v8  ;;  %v13519_v7 = vld [vmem:[%s15630_s16 + $0x8d0] ss:$16 sps:$4 sm:$0xff]  }
 0x253   : > { %2695 = vmatmul.mubr.bf16.vlgmr.msra.gmra.mrb[4].mxu1 %v16183_v57  ;;  %v13476_v57 = vld [vmem:[%s15630_s16 + $0x1d4] ss:$16 sps:$4 sm:$0xff]  }
 0x254   : > { %2979 = vmatpush1.bf16.msra.mxu1 %v13463_v11  ;;  %11729 = vmatprep.mubr.msk.bf16.mxu1 %vm2604_vm1, %v16276_v14  ;;  %v13522_v11 = vld [vmem:[%s15630_s16 + $0x2d0] ss:$16 sps:$4 sm:$0xff]  }
 0x255   : > { %4074 = vmatpush1.bf16.msra.mxu0 %v16279_v15  ;;  %2980 = vmatprep.subr.bf16.mxu1 %v13470_v12  ;;  %v13525_v12 = vld [vmem:[%s15630_s16 + $0x8f0] ss:$16 sps:$4 sm:$0xff]  }
 0x256   : > { %4406 = vmatprep.subr.bf16.mxu0 %v13473_v54  ;;  %v13530_v54 = vld [vmem:[%s15630_s16 + $0x2f4] ss:$16 sps:$4 sm:$0xff]  }
 0x258   : > { %4082 = vmatmul.mubr.bf16.vlgmr.msra.gmra.mrb[8].mxu0 %v16292_v21  ;;  %2981 = vmatpush1.bf16.msra.mxu1 %v13468_v18  ;;  %v13533_v18 = vld [vmem:[%s15630_s16 + $0x914] ss:$16 sps:$4 sm:$0xff]  }
 0x259   : > { %4407 = vmatpush1.bf16.msra.mxu0 %v13471_v19  ;;  %11955 = vmatprep.mubr.msk.bf16.mxu0 %vm2604_vm1, %v16298_v26  ;;  %v433_v19 = vld [vmem:[%s15630_s16 + $0x310] sm:$0x33] }
 0x25a   : > { %2982 = vmatprep.subr.bf16.mxu1 %v13476_v57  ;;  %4408 = vmatprep.subr.bf16.mxu0 %v13479_v23  ;;  %v13528_v57 = vld [vmem:[%s15630_s16 + $0x2f0] ss:$16 sps:$4 sm:$0xff]  }
 0x25b   : > { %v13531_v23 = vld [vmem:[%s15630_s16 + $0x910] ss:$16 sps:$4 sm:$0xff]  }
 0x25c   : > { %2983 = vmatpush1.bf16.msra.mxu1 %v13474_v27  ;;  %v16342_v27 = vcombine.high %v433_v19, %v433_v19 }
 0x25d   : > { %4409 = vmatpush1.bf16.msra.mxu0 %v13477_v61  ;;  %2984 = vmatprep.subr.bf16.mxu1 %v13482_v28  ;;  %v11724_v61 = vcombine.low %v433_v19, %v433_v19  ;;  %v13537_v28 = vld [vmem:[%s15630_s16 + $0x934] ss:$16 sps:$4 sm:$0xff]   ;;  %v13577_v19 = vld [vmem:[%s15630_s16 + $0xa00] ss:$16 sps:$4 sm:$0xff]  }
 0x25e   : > { %4410 = vmatprep.subr.bf16.mxu0 %v13485_v29  ;;  %v633_v29 = vld [vmem:[%s15630_s16 + $0x950] sm:$0x33] }
 0x260   : > { %2985 = vmatpush1.bf16.msra.mxu1 %v13480_v31  ;;  %v13535_v31 = vld [vmem:[%s15630_s16 + $0x930] ss:$16 sps:$4 sm:$0xff]  }
 0x261   : > { %4411 = vmatpush1.bf16.msra.mxu0 %v13483_v33  ;;  %2986 = vmatprep.subr.bf16.mxu1 %v13488_v34  ;;  %v16350_v33 = vsel %vm2608_vm0, %v11724_v61, 0  ;;  %v13541_v34 = vld [vmem:[%s15630_s16 + $0x19c] ss:$16 sps:$4 sm:$0xff]   ;;  %v13580_v61 = vld [vmem:[%s15630_s16 + $0x278] ss:$16 sps:$4 sm:$0xff]  }
 0x262   : > { %4412 = vmatprep.subr.bf16.mxu0 %v13491_v35  ;;  %v16353_v35 = vcombine.high %v633_v29, %v633_v29 }
 0x264   : > { %2987 = vmatpush1.bf16.msra.mxu1 %v13486_v36  ;;  %v11950_v36 = vcombine.low %v633_v29, %v633_v29  ;;  %v13588_v29 = vld [vmem:[%s15630_s16 + $0x29c] ss:$16 sps:$4 sm:$0xff]  }
 0x265   : > { %4413 = vmatpush1.bf16.msra.mxu0 %v13489_v37  ;;  %2988 = vmatprep.subr.bf16.mxu1 %v13494_v38  ;;  %v16357_v37 = vcombine.high %v16172_v52, %v16172_v52  ;;  %v13539_v38 = vld [vmem:[%s15630_s16 + $0x198] ss:$16 sps:$4 sm:$0xff]  }
 0x266   : > { %4414 = vmatprep.subr.bf16.mxu0 %v13497_v39  ;;  %v16363_v39 = vrot.slane %v16266_v9, %v16166_v50  ;;  %v13544_v9 = vld [vmem:[%s15630_s16 + $0x1b8] ss:$16 sps:$4 sm:$0xff]  }
 0x268   : > { %2989 = vmatpush1.bf16.msra.mxu1 %v13492_v40  ;;  %v13546_v40 = vld [vmem:[%s15630_s16 + $0x1bc] ss:$16 sps:$4 sm:$0xff]  }
 0x269   : > { %4415 = vmatpush1.bf16.msra.mxu0 %v13495_v42  ;;  %2990 = vmatprep.subr.bf16.mxu1 %v13500_v43  ;;  %v16369_v42 = vsel %vm2608_vm0, %v11950_v36, 0  ;;  %v13549_v43 = vld [vmem:[%s15630_s16 + $0x964] ss:$16 sps:$4 sm:$0xff]   ;;  %v13589_v36 = vld [vmem:[%s15630_s16 + $0xa40] ss:$16 sps:$4 sm:$0xff]  }
 0x26a   : > { %4416 = vmatprep.subr.bf16.mxu0 %v13503_v44  ;;  %v16375_v44 = vpack.i.b16 %v16357_v37, %v16357_v37 }
 0x26c   : > { %2991 = vmatpush1.bf16.msra.mxu1 %v13498_v45  ;;  %v13547_v45 = vld [vmem:[%s15630_s16 + $0x960] ss:$16 sps:$4 sm:$0xff]  }
 0x26d   : > { %4417 = vmatpush1.bf16.msra.mxu0 %v13501_v46  ;;  %2992 = vmatprep.subr.bf16.mxu1 %v13506_v48  ;;  %v16384_v46 = vrot.slane %v16283_v16, %v16166_v50  ;;  %v13552_v48 = vld [vmem:[%s15630_s16 + $0x1dc] ss:$16 sps:$4 sm:$0xff]   ;;  %v13553_v16 = vld [vmem:[%s15630_s16 + $0x980] ss:$16 sps:$4 sm:$0xff]  }
 0x26e   : > { %4418 = vmatprep.subr.bf16.mxu0 %v13509_v53  ;;  %v13555_v53 = vld [vmem:[%s15630_s16 + $0x984] ss:$16 sps:$4 sm:$0xff]  }
 0x270   : > { %2993 = vmatpush1.bf16.msra.mxu1 %v13504_v55  ;;  %v16390_v55 = vrot.slane %v16375_v44, %v16169_v51 }
 0x271   : > { %4419 = vmatpush1.bf16.msra.mxu0 %v13507_v56  ;;  %2994 = vmatprep.subr.bf16.mxu1 %v13512_v58  ;;  %v13558_v56 = vld [vmem:[%s15630_s16 + $0x1fc] ss:$16 sps:$4 sm:$0xff]   ;;  %v13561_v58 = vld [vmem:[%s15630_s16 + $0x9a4] ss:$16 sps:$4 sm:$0xff]  }
 0x272   : > { %4420 = vmatprep.subr.bf16.mxu0 %v13515_v59  ;;  %v13556_v59 = vld [vmem:[%s15630_s16 + $0x1f8] ss:$16 sps:$4 sm:$0xff]  }
 0x274   : > { %2995 = vmatpush1.bf16.msra.mxu1 %v13510_v62  ;;  %v13559_v62 = vld [vmem:[%s15630_s16 + $0x9a0] ss:$16 sps:$4 sm:$0xff]  }
 0x275   : > { %4421 = vmatpush1.bf16.msra.mxu0 %v13513_v0  ;;  %2996 = vmatprep.subr.bf16.mxu1 %v13518_v2  ;;  %v13564_v0 = vld [vmem:[%s15630_s16 + $0x21c] ss:$16 sps:$4 sm:$0xff]   ;;  %v13567_v2 = vld [vmem:[%s15630_s16 + $0x9c4] ss:$16 sps:$4 sm:$0xff]  }
 0x276   : > { %4422 = vmatprep.subr.bf16.mxu0 %v13521_v3  ;;  %v13562_v3 = vld [vmem:[%s15630_s16 + $0x218] ss:$16 sps:$4 sm:$0xff]  }
 0x278   : > { %2997 = vmatpush1.bf16.msra.mxu1 %v13516_v5  ;;  %v13565_v5 = vld [vmem:[%s15630_s16 + $0x9c0] ss:$16 sps:$4 sm:$0xff]  }
 0x279   : > { %4423 = vmatpush1.bf16.msra.mxu0 %v13519_v7  ;;  %2998 = vmatprep.subr.bf16.mxu1 %v13524_v10  ;;  %v13570_v7 = vld [vmem:[%s15630_s16 + $0x23c] ss:$16 sps:$4 sm:$0xff]   ;;  %v13573_v10 = vld [vmem:[%s15630_s16 + $0x9e4] ss:$16 sps:$4 sm:$0xff]  }
 0x27a   : > { %4424 = vmatprep.subr.bf16.mxu0 %v13527_v49  ;;  %v13568_v49 = vld [vmem:[%s15630_s16 + $0x238] ss:$16 sps:$4 sm:$0xff]  }
 0x27c   : > { %2999 = vmatpush1.bf16.msra.mxu1 %v13522_v11  ;;  %v13571_v11 = vld [vmem:[%s15630_s16 + $0x9e0] ss:$16 sps:$4 sm:$0xff]  }
 0x27d   : > { %4425 = vmatpush1.bf16.msra.mxu0 %v13525_v12  ;;  %3000 = vmatprep.subr.bf16.mxu1 %v13530_v54  ;;  %v13576_v12 = vld [vmem:[%s15630_s16 + $0x25c] ss:$16 sps:$4 sm:$0xff]   ;;  %v13579_v54 = vld [vmem:[%s15630_s16 + $0xa04] ss:$16 sps:$4 sm:$0xff]  }
 0x27e   : > { %4426 = vmatprep.subr.bf16.mxu0 %v13533_v18  ;;  %v13574_v18 = vld [vmem:[%s15630_s16 + $0x258] ss:$16 sps:$4 sm:$0xff]  }
 0x280   : > { %3001 = vmatpush1.bf16.msra.mxu1 %v13528_v57  ;;  %v13582_v57 = vld [vmem:[%s15630_s16 + $0x27c] ss:$16 sps:$4 sm:$0xff]  }
 0x281   : > { %4427 = vmatpush1.bf16.msra.mxu0 %v13531_v23  ;;  %11728 = vmatprep.subr.msk.bf16.mxu1 %vm2608_vm0, %v16342_v27  ;;  %v13585_v23 = vld [vmem:[%s15630_s16 + $0xa24] ss:$16 sps:$4 sm:$0xff]  }
 0x282   : > { %4428 = vmatprep.subr.bf16.mxu0 %v13537_v28  ;;  %v13583_v28 = vld [vmem:[%s15630_s16 + $0xa20] ss:$16 sps:$4 sm:$0xff]  }
 0x284   : > { %3003 = vmatpush1.bf16.msra.mxu1 %v16350_v33 }
 0x285   : > { %4429 = vmatpush1.bf16.msra.mxu0 %v13535_v31  ;;  %3019 = vmatprep.subr.bf16.mxu1 %v13541_v34  ;;  %v13591_v31 = vld [vmem:[%s15630_s16 + $0xa44] ss:$16 sps:$4 sm:$0xff]   ;;  %v13586_v34 = vld [vmem:[%s15630_s16 + $0x298] ss:$16 sps:$4 sm:$0xff]  }
 0x286   : > { %11954 = vmatprep.subr.msk.bf16.mxu0 %vm2608_vm0, %v16353_v35 }
 0x287   : > { %3011 = vmatmul.mubr.bf16.vlgmr.msra.gmra.mrb[8].mxu1 %v16363_v39 }
 0x288   : > { %3020 = vmatpush1.bf16.msra.mxu1 %v13539_v38  ;;  %11731 = vmatprep.mubr.msk.bf16.mxu1 %vm2604_vm1, %v16276_v14  ;;  %v13550_v14 = vld [vmem:[%s15630_s16 + $0x1d8] ss:$16 sps:$4 sm:$0xff]   ;;  %v13594_v38 = vld [vmem:[%s15630_s16 + $0x2bc] ss:$16 sps:$4 sm:$0xff]  }
 0x289   : > { %4431 = vmatpush1.bf16.msra.mxu0 %v16369_v42  ;;  %3021 = vmatprep.subr.bf16.mxu1 %v13546_v40  ;;  %v13597_v40 = vld [vmem:[%s15630_s16 + $0xa64] ss:$16 sps:$4 sm:$0xff]  }
 0x28a   : > { %4763 = vmatprep.subr.bf16.mxu0 %v13549_v43  ;;  %v13592_v43 = vld [vmem:[%s15630_s16 + $0x2b8] ss:$16 sps:$4 sm:$0xff]  }
 0x28c   : > { %4439 = vmatmul.mubr.bf16.vlgmr.msra.gmra.mrb[12].mxu0 %v16384_v46  ;;  %3022 = vmatpush1.bf16.msra.mxu1 %v13544_v9  ;;  %v13595_v9 = vld [vmem:[%s15630_s16 + $0xa60] ss:$16 sps:$4 sm:$0xff]  }
 0x28d   : > { %4764 = vmatpush1.bf16.msra.mxu0 %v13547_v45  ;;  %12012 = vmatprep.mubr.msk.bf16.mxu0 %vm2604_vm1, %v16390_v55  ;;  %v13600_v45 = vld [vmem:[%s15630_s16 + $0x2dc] ss:$16 sps:$4 sm:$0xff]  }
 0x28e   : > { %3023 = vmatprep.subr.bf16.mxu1 %v13552_v48  ;;  %4765 = vmatprep.subr.bf16.mxu0 %v13555_v53  ;;  %v13603_v48 = vld [vmem:[%s15630_s16 + $0xa84] ss:$16 sps:$4 sm:$0xff]   ;;  %v13598_v53 = vld [vmem:[%s15630_s16 + $0x2d8] ss:$16 sps:$4 sm:$0xff]  }
 0x290   : > { %3024 = vmatpush1.bf16.msra.mxu1 %v13550_v14  ;;  %v13601_v14 = vld [vmem:[%s15630_s16 + $0xa80] ss:$16 sps:$4 sm:$0xff]  }
 0x291   : > { %4766 = vmatpush1.bf16.msra.mxu0 %v13553_v16  ;;  %3025 = vmatprep.subr.bf16.mxu1 %v13558_v56  ;;  %v13606_v16 = vld [vmem:[%s15630_s16 + $0x2fc] ss:$16 sps:$4 sm:$0xff]   ;;  %v13609_v56 = vld [vmem:[%s15630_s16 + $0xaa4] ss:$16 sps:$4 sm:$0xff]  }
 0x292   : > { %4767 = vmatprep.subr.bf16.mxu0 %v13561_v58  ;;  %v434_v58 = vld [vmem:[%s15630_s16 + $0x318] sm:$0x33] }
 0x294   : > { %3026 = vmatpush1.bf16.msra.mxu1 %v13556_v59  ;;  %v13604_v59 = vld [vmem:[%s15630_s16 + $0x2f8] ss:$16 sps:$4 sm:$0xff]  }
 0x295   : > { %4768 = vmatpush1.bf16.msra.mxu0 %v13559_v62  ;;  %3027 = vmatprep.subr.bf16.mxu1 %v13564_v0  ;;  %v13607_v62 = vld [vmem:[%s15630_s16 + $0xaa0] ss:$16 sps:$4 sm:$0xff]   ;;  %v16434_v0 = vcombine.high %v434_v58, %v434_v58 }
 0x296   : > { %4769 = vmatprep.subr.bf16.mxu0 %v13567_v2  ;;  %v11726_v2 = vcombine.low %v434_v58, %v434_v58  ;;  %v13649_v58 = vld [vmem:[%s15630_s16 + $0xb74] ss:$16 sps:$4 sm:$0xff]  }
 0x298   : > { %3028 = vmatpush1.bf16.msra.mxu1 %v13562_v3  ;;  %v13613_v3 = vld [vmem:[%s15630_s16 + $0xac4] ss:$16 sps:$4 sm:$0xff]  }
 0x299   : > { %4770 = vmatpush1.bf16.msra.mxu0 %v13565_v5  ;;  %3029 = vmatprep.subr.bf16.mxu1 %v13570_v7  ;;  %v683_v5 = vld [vmem:[%s15630_s16 + $0xae0] sm:$0x33] }
 0x29a   : > { %4771 = vmatprep.subr.bf16.mxu0 %v13573_v10  ;;  %v13611_v7 = vld [vmem:[%s15630_s16 + $0xac0] ss:$16 sps:$4 sm:$0xff]   ;;  %v16442_v10 = vsel %vm2608_vm0, %v11726_v2, 0  ;;  %v13652_v2 = vld [vmem:[%s15630_s16 + $0x3e4] ss:$16 sps:$4 sm:$0xff]  }
 0x29c   : > { %3030 = vmatpush1.bf16.msra.mxu1 %v13568_v49  ;;  %v13617_v49 = vld [vmem:[%s15630_s16 + $0x324] ss:$16 sps:$4 sm:$0xff]  }
 0x29d   : > { %4772 = vmatpush1.bf16.msra.mxu0 %v13571_v11  ;;  %3031 = vmatprep.subr.bf16.mxu1 %v13576_v12  ;;  %v16445_v11 = vcombine.high %v683_v5, %v683_v5  ;;  %v16449_v12 = vpack.i.b16 %v16172_v52, %v16172_v52 }
 0x29e   : > { %4773 = vmatprep.subr.bf16.mxu0 %v13579_v54  ;;  %v12007_v54 = vcombine.low %v683_v5, %v683_v5  ;;  %v13650_v5 = vld [vmem:[%s15630_s16 + $0x3e0] ss:$16 sps:$4 sm:$0xff]  }
 0x29f   : > { %v16459_v52 = vrot.slane %v16449_v12, %v16169_v51 }
 0x2a0   : > { %3032 = vmatpush1.bf16.msra.mxu1 %v13574_v18  ;;  %v2335_v18 = vunpack.i.h.s16 %v16357_v37  ;;  %v13625_v37 = vld [vmem:[%s15630_s16 + $0xaf4] ss:$16 sps:$4 sm:$0xff]  }
 0x2a1   : > { %4774 = vmatpush1.bf16.msra.mxu0 %v13577_v19  ;;  %3033 = vmatprep.subr.bf16.mxu1 %v13582_v57  ;;  %v13615_v19 = vld [vmem:[%s15630_s16 + $0x320] ss:$16 sps:$4 sm:$0xff]   ;;  %v13622_v57 = vld [vmem:[%s15630_s16 + $0x344] ss:$16 sps:$4 sm:$0xff]  }
 0x2a2   : > { %4775 = vmatprep.subr.bf16.mxu0 %v13585_v23  ;;  %v16462_v23 = vsel %vm2608_vm0, %v12007_v54, 0  ;;  %v13661_v54 = vld [vmem:[%s15630_s16 + $0xbb4] ss:$16 sps:$4 sm:$0xff]  }
 0x2a4   : > { %3034 = vmatpush1.bf16.msra.mxu1 %v13580_v61  ;;  %v16466_v61 = vpack.i.b16 %v2335_v18, %v2335_v18  ;;  %v13656_v18 = vld [vmem:[%s15630_s16 + $0x400] ss:$16 sps:$4 sm:$0xff]  }
 0x2a5   : > { %4776 = vmatpush1.bf16.msra.mxu0 %v13583_v28  ;;  %3035 = vmatprep.subr.bf16.mxu1 %v13588_v29  ;;  %v13620_v28 = vld [vmem:[%s15630_s16 + $0x340] ss:$16 sps:$4 sm:$0xff]  }
 0x2a6   : > { %4777 = vmatprep.subr.bf16.mxu0 %v13591_v31  ;;  %v13623_v29 = vld [vmem:[%s15630_s16 + $0xaf0] ss:$16 sps:$4 sm:$0xff]   ;;  %v16475_v31 = vrot.slane %v16375_v44, %v16166_v50 }
 0x2a7   : > { %v13629_v44 = vld [vmem:[%s15630_s16 + $0xb10] ss:$16 sps:$4 sm:$0xff]  }
 0x2a8   : > { %3036 = vmatpush1.bf16.msra.mxu1 %v13586_v34  ;;  %v13631_v34 = vld [vmem:[%s15630_s16 + $0xb14] ss:$16 sps:$4 sm:$0xff]  }
 0x2a9   : > { %4778 = vmatpush1.bf16.msra.mxu0 %v13589_v36  ;;  %3037 = vmatprep.subr.bf16.mxu1 %v13594_v38  ;;  %v16481_v36 = vrot.slane %v16466_v61, %v16169_v51  ;;  %v13626_v38 = vld [vmem:[%s15630_s16 + $0x360] ss:$16 sps:$4 sm:$0xff]  }
 0x2aa   : > { %4779 = vmatprep.subr.bf16.mxu0 %v13597_v40  ;;  %v13634_v40 = vld [vmem:[%s15630_s16 + $0x384] ss:$16 sps:$4 sm:$0xff]  }
 0x2ac   : > { %3038 = vmatpush1.bf16.msra.mxu1 %v13592_v43  ;;  %v13637_v43 = vld [vmem:[%s15630_s16 + $0xb34] ss:$16 sps:$4 sm:$0xff]  }
 0x2ad   : > { %4780 = vmatpush1.bf16.msra.mxu0 %v13595_v9  ;;  %3039 = vmatprep.subr.bf16.mxu1 %v13600_v45  ;;  %v13632_v9 = vld [vmem:[%s15630_s16 + $0x380] ss:$16 sps:$4 sm:$0xff]  }
 0x2ae   : > { %4781 = vmatprep.subr.bf16.mxu0 %v13603_v48  ;;  %v13635_v45 = vld [vmem:[%s15630_s16 + $0xb30] ss:$16 sps:$4 sm:$0xff]   ;;  %v13640_v48 = vld [vmem:[%s15630_s16 + $0x3a4] ss:$16 sps:$4 sm:$0xff]  }
 0x2b0   : > { %3040 = vmatpush1.bf16.msra.mxu1 %v13598_v53  ;;  %v13643_v53 = vld [vmem:[%s15630_s16 + $0xb54] ss:$16 sps:$4 sm:$0xff]  }
 0x2b1   : > { %4782 = vmatpush1.bf16.msra.mxu0 %v13601_v14  ;;  %3041 = vmatprep.subr.bf16.mxu1 %v13606_v16  ;;  %v13638_v14 = vld [vmem:[%s15630_s16 + $0x3a0] ss:$16 sps:$4 sm:$0xff]  }
 0x2b2   : > { %4783 = vmatprep.subr.bf16.mxu0 %v13609_v56  ;;  %v13641_v16 = vld [vmem:[%s15630_s16 + $0xb50] ss:$16 sps:$4 sm:$0xff]   ;;  %v13646_v56 = vld [vmem:[%s15630_s16 + $0x3c4] ss:$16 sps:$4 sm:$0xff]  }
 0x2b4   : > { %3042 = vmatpush1.bf16.msra.mxu1 %v13604_v59  ;;  %v13644_v59 = vld [vmem:[%s15630_s16 + $0x3c0] ss:$16 sps:$4 sm:$0xff]  }
 0x2b5   : > { %4784 = vmatpush1.bf16.msra.mxu0 %v13607_v62  ;;  %11730 = vmatprep.subr.msk.bf16.mxu1 %vm2608_vm0, %v16434_v0  ;;  %v13647_v62 = vld [vmem:[%s15630_s16 + $0xb70] ss:$16 sps:$4 sm:$0xff]  }
 0x2b6   : > { %4785 = vmatprep.subr.bf16.mxu0 %v13613_v3  ;;  %v13655_v3 = vld [vmem:[%s15630_s16 + $0xb94] ss:$16 sps:$4 sm:$0xff]  }
 0x2b8   : > { %3044 = vmatpush1.bf16.msra.mxu1 %v16442_v10 }
 0x2b9   : > { %4786 = vmatpush1.bf16.msra.mxu0 %v13611_v7  ;;  %3335 = vmatprep.subr.bf16.mxu1 %v13617_v49  ;;  %v13653_v7 = vld [vmem:[%s15630_s16 + $0xb90] ss:$16 sps:$4 sm:$0xff]   ;;  %v13658_v49 = vld [vmem:[%s15630_s16 + $0x404] ss:$16 sps:$4 sm:$0xff]  }
 0x2ba   : > { %12011 = vmatprep.subr.msk.bf16.mxu0 %vm2608_vm0, %v16445_v11 }
 0x2bb   : > { %3052 = vmatmul.mubr.bf16.vlgmr.msra.gmra.mrb[12].mxu1 %v16363_v39  ;;  %v13628_v39 = vld [vmem:[%s15630_s16 + $0x364] ss:$16 sps:$4 sm:$0xff]  }
 0x2bc   : > { %3336 = vmatpush1.bf16.msra.mxu1 %v13615_v19  ;;  %11786 = vmatprep.mubr.msk.bf16.mxu1 %vm2604_vm1, %v16459_v52  ;;  %v13659_v19 = vld [vmem:[%s15630_s16 + $0xbb0] ss:$16 sps:$4 sm:$0xff]  }
 0x2bd   : > { %4788 = vmatpush1.bf16.msra.mxu0 %v16462_v23  ;;  %3337 = vmatprep.subr.bf16.mxu1 %v13622_v57  ;;  %v13664_v57 = vld [vmem:[%s15630_s16 + $0x424] ss:$16 sps:$4 sm:$0xff]  }
 0x2be   : > { %5120 = vmatprep.subr.bf16.mxu0 %v13625_v37  ;;  %v13667_v37 = vld [vmem:[%s15630_s16 + $0xbd4] ss:$16 sps:$4 sm:$0xff]  }
 0x2c0   : > { %4796 = vmatmul.mubr.bf16.vlgmr.msra.gmra.mrb[16].mxu0 %v16475_v31  ;;  %3338 = vmatpush1.bf16.msra.mxu1 %v13620_v28  ;;  %v13662_v28 = vld [vmem:[%s15630_s16 + $0x420] ss:$16 sps:$4 sm:$0xff]  }
 0x2c1   : > { %5121 = vmatpush1.bf16.msra.mxu0 %v13623_v29  ;;  %12068 = vmatprep.mubr.msk.bf16.mxu0 %vm2604_vm1, %v16481_v36  ;;  %v13665_v29 = vld [vmem:[%s15630_s16 + $0xbd0] ss:$16 sps:$4 sm:$0xff]  }
 0x2c2   : > { %3339 = vmatprep.subr.bf16.mxu1 %v13628_v39  ;;  %5122 = vmatprep.subr.bf16.mxu0 %v13631_v34  ;;  %v13670_v39 = vld [vmem:[%s15630_s16 + $0x444] ss:$16 sps:$4 sm:$0xff]  }
 0x2c3   : > { %v13673_v34 = vld [vmem:[%s15630_s16 + $0xbf4] ss:$16 sps:$4 sm:$0xff]  }
 0x2c4   : > { %3340 = vmatpush1.bf16.msra.mxu1 %v13626_v38  ;;  %v13668_v38 = vld [vmem:[%s15630_s16 + $0x440] ss:$16 sps:$4 sm:$0xff]  }
 0x2c5   : > { %5123 = vmatpush1.bf16.msra.mxu0 %v13629_v44  ;;  %3341 = vmatprep.subr.bf16.mxu1 %v13634_v40  ;;  %v13671_v44 = vld [vmem:[%s15630_s16 + $0xbf0] ss:$16 sps:$4 sm:$0xff]   ;;  %v13676_v40 = vld [vmem:[%s15630_s16 + $0x464] ss:$16 sps:$4 sm:$0xff]  }
 0x2c6   : > { %5124 = vmatprep.subr.bf16.mxu0 %v13637_v43  ;;  %v13679_v43 = vld [vmem:[%s15630_s16 + $0xc14] ss:$16 sps:$4 sm:$0xff]  }
 0x2c8   : > { %3342 = vmatpush1.bf16.msra.mxu1 %v13632_v9  ;;  %v13674_v9 = vld [vmem:[%s15630_s16 + $0x460] ss:$16 sps:$4 sm:$0xff]  }
 0x2c9   : > { %5125 = vmatpush1.bf16.msra.mxu0 %v13635_v45  ;;  %3343 = vmatprep.subr.bf16.mxu1 %v13640_v48  ;;  %v13677_v45 = vld [vmem:[%s15630_s16 + $0xc10] ss:$16 sps:$4 sm:$0xff]   ;;  %v13682_v48 = vld [vmem:[%s15630_s16 + $0x484] ss:$16 sps:$4 sm:$0xff]  }
 0x2ca   : > { %5126 = vmatprep.subr.bf16.mxu0 %v13643_v53  ;;  %v13685_v53 = vld [vmem:[%s15630_s16 + $0xc34] ss:$16 sps:$4 sm:$0xff]  }
 0x2cc   : > { %3344 = vmatpush1.bf16.msra.mxu1 %v13638_v14  ;;  %v483_v14 = vld [vmem:[%s15630_s16 + $0x4a0] sm:$0x33] }
 0x2cd   : > { %5127 = vmatpush1.bf16.msra.mxu0 %v13641_v16  ;;  %3345 = vmatprep.subr.bf16.mxu1 %v13646_v56  ;;  %v13680_v16 = vld [vmem:[%s15630_s16 + $0x480] ss:$16 sps:$4 sm:$0xff]  }
 0x2ce   : > { %5128 = vmatprep.subr.bf16.mxu0 %v13649_v58  ;;  %v13683_v56 = vld [vmem:[%s15630_s16 + $0xc30] ss:$16 sps:$4 sm:$0xff]   ;;  %v16525_v58 = vcombine.high %v483_v14, %v483_v14 }
 0x2d0   : > { %3346 = vmatpush1.bf16.msra.mxu1 %v13644_v59  ;;  %v11781_v59 = vcombine.low %v483_v14, %v483_v14  ;;  %v13710_v14 = vld [vmem:[%s15630_s16 + $0x38c] ss:$16 sps:$4 sm:$0xff]  }
 0x2d1   : > { %5129 = vmatpush1.bf16.msra.mxu0 %v13647_v62  ;;  %3347 = vmatprep.subr.bf16.mxu1 %v13652_v2  ;;  %v13689_v62 = vld [vmem:[%s15630_s16 + $0xc54] ss:$16 sps:$4 sm:$0xff]   ;;  %v16530_v2 = vrot.slane %v16160_v47, %v16156_v41 }
 0x2d2   : > { %5130 = vmatprep.subr.bf16.mxu0 %v13655_v3  ;;  %v733_v3 = vld [vmem:[%s15630_s16 + $0xc70] sm:$0x33] }
 0x2d3   : > { %v16544_v47 = vrot.slane %v16530_v2, %v16156_v41 }
 0x2d4   : > { %3348 = vmatpush1.bf16.msra.mxu1 %v13650_v5  ;;  %v13687_v5 = vld [vmem:[%s15630_s16 + $0xc50] ss:$16 sps:$4 sm:$0xff]  }
 0x2d5   : > { %5131 = vmatpush1.bf16.msra.mxu0 %v13653_v7  ;;  %3349 = vmatprep.subr.bf16.mxu1 %v13658_v49  ;;  %v16537_v7 = vsel %vm2608_vm0, %v11781_v59, 0  ;;  %v13693_v49 = vld [vmem:[%s15630_s16 + $0x32c] ss:$16 sps:$4 sm:$0xff]  }
 0x2d6   : > { %5132 = vmatprep.subr.bf16.mxu0 %v13661_v54  ;;  %19999 = vst [vmem:[#allocation7_spill] sm:$0xff] %v16537_v7  ;;  %v16540_v54 = vcombine.high %v733_v3, %v733_v3 }
 0x2d8   : > { %3350 = vmatpush1.bf16.msra.mxu1 %v13656_v18  ;;  %20000 = vst [vmem:[#allocation8_spill] sm:$0xff] %v16540_v54  ;;  %v12063_v18 = vcombine.low %v733_v3, %v733_v3  ;;  %v13708_v3 = vld [vmem:[%s15630_s16 + $0x388] ss:$16 sps:$4 sm:$0xff]  }
 0x2d9   : > { %5133 = vmatpush1.bf16.msra.mxu0 %v13659_v19  ;;  %3351 = vmatprep.subr.bf16.mxu1 %v13664_v57  ;;  %v13691_v19 = vld [vmem:[%s15630_s16 + $0x328] ss:$16 sps:$4 sm:$0xff]   ;;  %v16550_v57 = vrot.slane %v16449_v12, %v16166_v50 }
 0x2da   : > { %5134 = vmatprep.subr.bf16.mxu0 %v13667_v37  ;;  %v13698_v37 = vld [vmem:[%s15630_s16 + $0x34c] ss:$16 sps:$4 sm:$0xff]   ;;  %v13696_v12 = vld [vmem:[%s15630_s16 + $0x348] ss:$16 sps:$4 sm:$0xff]  }
 0x2dc   : > { %3352 = vmatpush1.bf16.msra.mxu1 %v13662_v28  ;;  %v16556_v28 = vsel %vm2608_vm0, %v12063_v18, 0  ;;  %v13716_v18 = vld [vmem:[%s15630_s16 + $0x3ac] ss:$16 sps:$4 sm:$0xff]  }
 0x2dd   : > { %5135 = vmatpush1.bf16.msra.mxu0 %v13665_v29  ;;  %3353 = vmatprep.subr.bf16.mxu1 %v13670_v39  ;;  %20001 = vst [vmem:[#allocation9_spill] sm:$0xff] %v16556_v28  ;;  %v13701_v29 = vld [vmem:[%s15630_s16 + $0xc84] ss:$16 sps:$4 sm:$0xff]   ;;  %v16562_v39 = vpack.i.b16 %v16544_v47, %v16544_v47 }
 0x2de   : > { %5136 = vmatprep.subr.bf16.mxu0 %v13673_v34  ;;  %v13699_v34 = vld [vmem:[%s15630_s16 + $0xc80] ss:$16 sps:$4 sm:$0xff]  }
 0x2e0   : > { %3354 = vmatpush1.bf16.msra.mxu1 %v13668_v38 }
 0x2e1   : > { %5137 = vmatpush1.bf16.msra.mxu0 %v13671_v44  ;;  %3355 = vmatprep.subr.bf16.mxu1 %v13676_v40  ;;  %v16573_v44 = vrot.slane %v16466_v61, %v16166_v50  ;;  %v13704_v40 = vld [vmem:[%s15630_s16 + $0x36c] ss:$16 sps:$4 sm:$0xff]  }
 0x2e2   : > { %5138 = vmatprep.subr.bf16.mxu0 %v13679_v43  ;;  %v13707_v43 = vld [vmem:[%s15630_s16 + $0xca4] ss:$16 sps:$4 sm:$0xff]  }
 0x2e4   : > { %3356 = vmatpush1.bf16.msra.mxu1 %v13674_v9 }
 0x2e5   : > { %5139 = vmatpush1.bf16.msra.mxu0 %v13677_v45  ;;  %3357 = vmatprep.subr.bf16.mxu1 %v13682_v48  ;;  %v13702_v48 = vld [vmem:[%s15630_s16 + $0x368] ss:$16 sps:$4 sm:$0xff]  }
 0x2e6   : > { %5140 = vmatprep.subr.bf16.mxu0 %v13685_v53  ;;  %v13705_v53 = vld [vmem:[%s15630_s16 + $0xca0] ss:$16 sps:$4 sm:$0xff]  }
 0x2e8   : > { %3358 = vmatpush1.bf16.msra.mxu1 %v13680_v16 }
 0x2e9   : > { %5141 = vmatpush1.bf16.msra.mxu0 %v13683_v56  ;;  %11785 = vmatprep.subr.msk.bf16.mxu1 %vm2608_vm0, %v16525_v58  ;;  %v13713_v56 = vld [vmem:[%s15630_s16 + $0xcc4] ss:$16 sps:$4 sm:$0xff]  }
 0x2ea   : > { %5142 = vmatprep.subr.bf16.mxu0 %v13689_v62 }
 0x2ec   : > { %3360 = vmatpush1.bf16.msra.mxu1 %v16537_v7  ;;  %v14012_v7 = vld [vmem:[%s15630_s16 + $0x9c8] ss:$16 sps:$4 sm:$0xff]  }
 0x2ed   : > { %5143 = vmatpush1.bf16.msra.mxu0 %v13687_v5  ;;  %3376 = vmatprep.subr.bf16.mxu1 %v13693_v49  ;;  %v13711_v49 = vld [vmem:[%s15630_s16 + $0xcc0] ss:$16 sps:$4 sm:$0xff]  }
 0x2ee   : > { %12067 = vmatprep.subr.msk.bf16.mxu0 %vm2608_vm0, %v16540_v54 }
 0x2ef   : > { %3368 = vmatmul.mubr.bf16.vlgmr.msra.gmra.mrb[16].mxu1 %v16550_v57 }
 0x2f0   : > { %3377 = vmatpush1.bf16.msra.mxu1 %v13691_v19  ;;  %11788 = vmatprep.mubr.msk.bf16.mxu1 %vm2604_vm1, %v16459_v52  ;;  %v16581_v52 = vrot.slane %v16562_v39, %v16169_v51  ;;  %v13719_v19 = vld [vmem:[%s15630_s16 + $0xce4] ss:$16 sps:$4 sm:$0xff]  }
 0x2f1   : > { %5145 = vmatpush1.bf16.msra.mxu0 %v16556_v28  ;;  %3378 = vmatprep.subr.bf16.mxu1 %v13698_v37  ;;  %v13714_v37 = vld [vmem:[%s15630_s16 + $0x3a8] ss:$16 sps:$4 sm:$0xff]  }
 0x2f2   : > { %v16569_v38 = vpop.f32.mrb[0].mxu1  ;;  %5477 = vmatprep.subr.bf16.mxu0 %v13701_v29  ;;  %v13717_v29 = vld [vmem:[%s15630_s16 + $0xce0] ss:$16 sps:$4 sm:$0xff]  }
 0x2f3   : > { %v16577_v9 = vpop.f32.mrb[1].mxu1 }
 0x2f4   : > { %5153 = vmatmul.mubr.bf16.vlgmr.msra.gmra.mrb[20].mxu0 %v16573_v44  ;;  %3379 = vmatpush1.bf16.msra.mxu1 %v13696_v12  ;;  %v2659_v45 = vpop.f32.mrb[2].mxu1  ;;  %v13722_v12 = vld [vmem:[%s15630_s16 + $0x3cc] ss:$16 sps:$4 sm:$0xff]  }
 0x2f5   : > { %5478 = vmatpush1.bf16.msra.mxu0 %v13699_v34  ;;  %12125 = vmatprep.mubr.msk.bf16.mxu0 %vm2604_vm1, %v16581_v52  ;;  %v2660_v61 = vpop.f32.mrb[3].mxu1  ;;  %v13725_v34 = vld [vmem:[%s15630_s16 + $0xd04] ss:$16 sps:$4 sm:$0xff]   ;;  %v13728_v45 = vld [vmem:[%s15630_s16 + $0x3ec] ss:$16 sps:$4 sm:$0xff]  }
 0x2f6   : > { %3380 = vmatprep.subr.bf16.mxu1 %v13704_v40  ;;  %v16589_v16 = vpop.f32.mrb[4].mxu0  ;;  %5479 = vmatprep.subr.bf16.mxu0 %v13707_v43  ;;  %v13720_v40 = vld [vmem:[%s15630_s16 + $0x3c8] ss:$16 sps:$4 sm:$0xff]   ;;  %v13723_v43 = vld [vmem:[%s15630_s16 + $0xd00] ss:$16 sps:$4 sm:$0xff]  }
 0x2f7   : > { %v16592_v59 = vpop.f32.mrb[5].mxu0  ;;  %v13726_v61 = vld [vmem:[%s15630_s16 + $0x3e8] ss:$16 sps:$4 sm:$0xff]  }
 0x2f8   : > { %3381 = vmatpush1.bf16.msra.mxu1 %v13702_v48  ;;  %v3730_v62 = vpop.f32.mrb[6].mxu0  ;;  %v13731_v48 = vld [vmem:[%s15630_s16 + $0xd24] ss:$16 sps:$4 sm:$0xff]  }
 0x2f9   : > { %5480 = vmatpush1.bf16.msra.mxu0 %v13705_v53  ;;  %v3731_v5 = vpop.f32.mrb[7].mxu0  ;;  %3382 = vmatprep.subr.bf16.mxu1 %v13710_v14  ;;  %v13729_v53 = vld [vmem:[%s15630_s16 + $0xd20] ss:$16 sps:$4 sm:$0xff]   ;;  %v13734_v14 = vld [vmem:[%s15630_s16 + $0x40c] ss:$16 sps:$4 sm:$0xff]  }
 0x2fa   : > { %5481 = vmatprep.subr.bf16.mxu0 %v13713_v56  ;;  %v13737_v56 = vld [vmem:[%s15630_s16 + $0xd44] ss:$16 sps:$4 sm:$0xff]   ;;  %v13732_v62 = vld [vmem:[%s15630_s16 + $0x408] ss:$16 sps:$4 sm:$0xff]   ;;  %v13740_v5 = vld [vmem:[%s15630_s16 + $0x42c] ss:$16 sps:$4 sm:$0xff]  }
 0x2fc   : > { %3383 = vmatpush1.bf16.msra.mxu1 %v13708_v3  ;;  %v13735_v3 = vld [vmem:[%s15630_s16 + $0xd40] ss:$16 sps:$4 sm:$0xff]  }
 0x2fd   : > { %5482 = vmatpush1.bf16.msra.mxu0 %v13711_v49  ;;  %3384 = vmatprep.subr.bf16.mxu1 %v13716_v18  ;;  %v13743_v49 = vld [vmem:[%s15630_s16 + $0xd64] ss:$16 sps:$4 sm:$0xff]   ;;  %v13738_v18 = vld [vmem:[%s15630_s16 + $0x428] ss:$16 sps:$4 sm:$0xff]  }
 0x2fe   : > { %5483 = vmatprep.subr.bf16.mxu0 %v13719_v19  ;;  %v13741_v19 = vld [vmem:[%s15630_s16 + $0xd60] ss:$16 sps:$4 sm:$0xff]  }
 0x300   : > { %3385 = vmatpush1.bf16.msra.mxu1 %v13714_v37  ;;  %v13746_v37 = vld [vmem:[%s15630_s16 + $0x44c] ss:$16 sps:$4 sm:$0xff]  }
 0x301   : > { %5484 = vmatpush1.bf16.msra.mxu0 %v13717_v29  ;;  %3386 = vmatprep.subr.bf16.mxu1 %v13722_v12  ;;  %v13749_v29 = vld [vmem:[%s15630_s16 + $0xd84] ss:$16 sps:$4 sm:$0xff]   ;;  %v13744_v12 = vld [vmem:[%s15630_s16 + $0x448] ss:$16 sps:$4 sm:$0xff]  }
 0x302   : > { %5485 = vmatprep.subr.bf16.mxu0 %v13725_v34  ;;  %v13747_v34 = vld [vmem:[%s15630_s16 + $0xd80] ss:$16 sps:$4 sm:$0xff]  }
 0x304   : > { %3387 = vmatpush1.bf16.msra.mxu1 %v13720_v40  ;;  %v13752_v40 = vld [vmem:[%s15630_s16 + $0x46c] ss:$16 sps:$4 sm:$0xff]  }
 0x305   : > { %5486 = vmatpush1.bf16.msra.mxu0 %v13723_v43  ;;  %3388 = vmatprep.subr.bf16.mxu1 %v13728_v45  ;;  %v13755_v43 = vld [vmem:[%s15630_s16 + $0xda4] ss:$16 sps:$4 sm:$0xff]   ;;  %v13750_v45 = vld [vmem:[%s15630_s16 + $0x468] ss:$16 sps:$4 sm:$0xff]  }
 0x306   : > { %5487 = vmatprep.subr.bf16.mxu0 %v13731_v48  ;;  %v13753_v48 = vld [vmem:[%s15630_s16 + $0xda0] ss:$16 sps:$4 sm:$0xff]  }
 0x308   : > { %3389 = vmatpush1.bf16.msra.mxu1 %v13726_v61  ;;  %v13758_v61 = vld [vmem:[%s15630_s16 + $0x48c] ss:$16 sps:$4 sm:$0xff]  }
 0x309   : > { %5488 = vmatpush1.bf16.msra.mxu0 %v13729_v53  ;;  %3390 = vmatprep.subr.bf16.mxu1 %v13734_v14  ;;  %v13761_v53 = vld [vmem:[%s15630_s16 + $0xdc4] ss:$16 sps:$4 sm:$0xff]   ;;  %v484_v14 = vld [vmem:[%s15630_s16 + $0x4a8] sm:$0x33] }
 0x30a   : > { %5489 = vmatprep.subr.bf16.mxu0 %v13737_v56  ;;  %v13756_v56 = vld [vmem:[%s15630_s16 + $0x488] ss:$16 sps:$4 sm:$0xff]  }
 0x30c   : > { %3391 = vmatpush1.bf16.msra.mxu1 %v13732_v62  ;;  %v13759_v62 = vld [vmem:[%s15630_s16 + $0xdc0] ss:$16 sps:$4 sm:$0xff]  }
 0x30d   : > { %5490 = vmatpush1.bf16.msra.mxu0 %v13735_v3  ;;  %3392 = vmatprep.subr.bf16.mxu1 %v13740_v5  ;;  %v16629_v3 = vcombine.high %v484_v14, %v484_v14  ;;  %v11783_v5 = vcombine.low %v484_v14, %v484_v14  ;;  %v13772_v14 = vld [vmem:[%s15630_s16 + $0x4d8] ss:$16 sps:$4 sm:$0xff]  }
 0x30e   : > { %5491 = vmatprep.subr.bf16.mxu0 %v13743_v49  ;;  %v13765_v49 = vld [vmem:[%s15630_s16 + $0xde4] ss:$16 sps:$4 sm:$0xff]  }
 0x30f   : > { %20002 = vst [vmem:[#allocation10_spill] sm:$0xff] %v16629_v3 }
 0x310   : > { %3393 = vmatpush1.bf16.msra.mxu1 %v13738_v18  ;;  %v783_v18 = vld [vmem:[%s15630_s16 + $0xe00] sm:$0x33] }
 0x311   : > { %5492 = vmatpush1.bf16.msra.mxu0 %v13741_v19  ;;  %3394 = vmatprep.subr.bf16.mxu1 %v13746_v37  ;;  %v13763_v19 = vld [vmem:[%s15630_s16 + $0xde0] ss:$16 sps:$4 sm:$0xff]   ;;  %v16637_v37 = vsel %vm2608_vm0, %v11783_v5, 0  ;;  %v16664_v5 = vrot.slane %v16562_v39, %v16166_v50 }
 0x312   : > { %5493 = vmatprep.subr.bf16.mxu0 %v13749_v29  ;;  %20003 = vst [vmem:[#allocation11_spill] sm:$0xff] %v16637_v37  ;;  %v13769_v29 = vld [vmem:[%s15630_s16 + $0x4bc] ss:$16 sps:$4 sm:$0xff]  }
 0x314   : > { %3395 = vmatpush1.bf16.msra.mxu1 %v13744_v12  ;;  %v16640_v12 = vcombine.high %v783_v18, %v783_v18 }
 0x315   : > { %5494 = vmatpush1.bf16.msra.mxu0 %v13747_v34  ;;  %3396 = vmatprep.subr.bf16.mxu1 %v13752_v40  ;;  %v12120_v34 = vcombine.low %v783_v18, %v783_v18  ;;  %v2337_v40 = vunpack.i.h.s16 %v16544_v47 }
 0x316   : > { %5495 = vmatprep.subr.bf16.mxu0 %v13755_v43  ;;  %20004 = vst [vmem:[#allocation12_spill] sm:$0xff] %v16640_v12  ;;  %v13767_v43 = vld [vmem:[%s15630_s16 + $0x4b8] ss:$16 sps:$4 sm:$0xff]  }
 0x318   : > { %3397 = vmatpush1.bf16.msra.mxu1 %v13750_v45  ;;  %v13774_v45 = vld [vmem:[%s15630_s16 + $0x4dc] ss:$16 sps:$4 sm:$0xff]  }
 0x319   : > { %5496 = vmatpush1.bf16.msra.mxu0 %v13753_v48  ;;  %3398 = vmatprep.subr.bf16.mxu1 %v13758_v61  ;;  %v16649_v48 = vsel %vm2608_vm0, %v12120_v34, 0  ;;  %v13777_v61 = vld [vmem:[%s15630_s16 + $0xe14] ss:$16 sps:$4 sm:$0xff]   ;;  %v13781_v34 = vld [vmem:[%s15630_s16 + $0xe30] ss:$16 sps:$4 sm:$0xff]  }
 0x31a   : > { %5497 = vmatprep.subr.bf16.mxu0 %v13761_v53  ;;  %20005 = vst [vmem:[#allocation13_spill] sm:$0xff] %v16649_v48  ;;  %v16653_v53 = vpack.i.b16 %v2337_v40, %v2337_v40  ;;  %v13786_v40 = vld [vmem:[%s15630_s16 + $0x51c] ss:$16 sps:$4 sm:$0xff]  }
 0x31c   : > { %3399 = vmatpush1.bf16.msra.mxu1 %v13756_v56  ;;  %v13775_v56 = vld [vmem:[%s15630_s16 + $0xe10] ss:$16 sps:$4 sm:$0xff]  }
 0x31d   : > { %5498 = vmatpush1.bf16.msra.mxu0 %v13759_v62  ;;  %11787 = vmatprep.subr.msk.bf16.mxu1 %vm2608_vm0, %v16629_v3  ;;  %v13950_v3 = vld [vmem:[%s15630_s16 + $0x87c] ss:$16 sps:$4 sm:$0xff]  }
 0x31e   : > { %5499 = vmatprep.subr.bf16.mxu0 %v13765_v49  ;;  %v13783_v49 = vld [vmem:[%s15630_s16 + $0xe34] ss:$16 sps:$4 sm:$0xff]  }
 0x320   : > { %3401 = vmatpush1.bf16.msra.mxu1 %v16637_v37 }
 0x321   : > { %5500 = vmatpush1.bf16.msra.mxu0 %v13763_v19  ;;  %3733 = vmatprep.subr.bf16.mxu1 %v13769_v29  ;;  %v13778_v29 = vld [vmem:[%s15630_s16 + $0x4f8] ss:$16 sps:$4 sm:$0xff]  }
 0x322   : > { %12124 = vmatprep.subr.msk.bf16.mxu0 %vm2608_vm0, %v16640_v12  ;;  %v13874_v12 = vld [vmem:[%s15630_s16 + $0x6ec] ss:$16 sps:$4 sm:$0xff]  }
 0x323   : > { %3409 = vmatmul.mubr.bf16.vlgmr.msra.gmra.mrb[20].mxu1 %v16550_v57  ;;  %v13780_v57 = vld [vmem:[%s15630_s16 + $0x4fc] ss:$16 sps:$4 sm:$0xff]  }
 0x324   : > { %3734 = vmatpush1.bf16.msra.mxu1 %v13767_v43  ;;  %11844 = vmatprep.mubr.msk.bf16.mxu1 %vm2604_vm1, %v16196_v63  ;;  %v16672_v63 = vrot.slane %v16653_v53, %v16169_v51  ;;  %v13789_v43 = vld [vmem:[%s15630_s16 + $0xe54] ss:$16 sps:$4 sm:$0xff]  }
 0x325   : > { %5502 = vmatpush1.bf16.msra.mxu0 %v16649_v48  ;;  %3735 = vmatprep.subr.bf16.mxu1 %v13774_v45 }
 0x326   : > { %v16660_v62 = vpop.f32.mrb[4].mxu1  ;;  %5834 = vmatprep.subr.bf16.mxu0 %v13777_v61 }
 0x327   : > { %v16668_v18 = vpop.f32.mrb[5].mxu1 }
 0x328   : > { %5510 = vmatmul.mubr.bf16.vlgmr.msra.gmra.mrb[24].mxu0 %v16664_v5  ;;  %v2700_v19 = vpop.f32.mrb[6].mxu1  ;;  %3736 = vmatpush1.bf16.msra.mxu1 %v13772_v14  ;;  %v13784_v14 = vld [vmem:[%s15630_s16 + $0x518] ss:$16 sps:$4 sm:$0xff]  }
 0x329   : > { %5835 = vmatpush1.bf16.msra.mxu0 %v13775_v56  ;;  %12181 = vmatprep.mubr.msk.bf16.mxu0 %vm2604_vm1, %v16672_v63  ;;  %v2701_v39 = vpop.f32.mrb[7].mxu1  ;;  %v13787_v19 = vld [vmem:[%s15630_s16 + $0xe50] ss:$16 sps:$4 sm:$0xff]  }
 0x32a   : > { %3737 = vmatprep.subr.bf16.mxu1 %v13780_v57  ;;  %5836 = vmatprep.subr.bf16.mxu0 %v13783_v49  ;;  %v13792_v39 = vld [vmem:[%s15630_s16 + $0x53c] ss:$16 sps:$4 sm:$0xff]   ;;  %v13795_v49 = vld [vmem:[%s15630_s16 + $0xe74] ss:$16 sps:$4 sm:$0xff]  }
 0x32b   : > { %v16681_v45 = vpop.f32.mrb[8].mxu0 }
 0x32c   : > { %v16683_v61 = vpop.f32.mrb[9].mxu0  ;;  %3738 = vmatpush1.bf16.msra.mxu1 %v13778_v29  ;;  %v13793_v29 = vld [vmem:[%s15630_s16 + $0xe70] ss:$16 sps:$4 sm:$0xff]  }
 0x32d   : > { %v4087_v56 = vpop.f32.mrb[10].mxu0  ;;  %5837 = vmatpush1.bf16.msra.mxu0 %v13781_v34  ;;  %3739 = vmatprep.subr.bf16.mxu1 %v13786_v40  ;;  %v13801_v34 = vld [vmem:[%s15630_s16 + $0xe94] ss:$16 sps:$4 sm:$0xff]   ;;  %v13796_v40 = vld [vmem:[%s15630_s16 + $0x558] ss:$16 sps:$4 sm:$0xff]  }
 0x32e   : > { %v4088_v57 = vpop.f32.mrb[11].mxu0  ;;  %5838 = vmatprep.subr.bf16.mxu0 %v13789_v43  ;;  %v13799_v43 = vld [vmem:[%s15630_s16 + $0xe90] ss:$16 sps:$4 sm:$0xff]   ;;  %v13804_v56 = vld [vmem:[%s15630_s16 + $0x57c] ss:$16 sps:$4 sm:$0xff]  }
 0x32f   : > { %v13810_v57 = vld [vmem:[%s15630_s16 + $0x59c] ss:$16 sps:$4 sm:$0xff]  }
 0x330   : > { %3740 = vmatpush1.bf16.msra.mxu1 %v13784_v14  ;;  %v13807_v14 = vld [vmem:[%s15630_s16 + $0xeb4] ss:$16 sps:$4 sm:$0xff]  }
 0x331   : > { %5839 = vmatpush1.bf16.msra.mxu0 %v13787_v19  ;;  %3741 = vmatprep.subr.bf16.mxu1 %v13792_v39  ;;  %v13802_v19 = vld [vmem:[%s15630_s16 + $0x578] ss:$16 sps:$4 sm:$0xff]   ;;  %v13805_v39 = vld [vmem:[%s15630_s16 + $0xeb0] ss:$16 sps:$4 sm:$0xff]  }
 0x332   : > { %5840 = vmatprep.subr.bf16.mxu0 %v13795_v49  ;;  %v13811_v49 = vld [vmem:[%s15630_s16 + $0xed0] ss:$16 sps:$4 sm:$0xff]  }
 0x334   : > { %3742 = vmatpush1.bf16.msra.mxu1 %v13790_v25  ;;  %v13813_v25 = vld [vmem:[%s15630_s16 + $0xed4] ss:$16 sps:$4 sm:$0xff]  }
 0x335   : > { %5841 = vmatpush1.bf16.msra.mxu0 %v13793_v29  ;;  %3743 = vmatprep.subr.bf16.mxu1 %v13798_v32  ;;  %v13808_v32 = vld [vmem:[%s15630_s16 + $0x598] ss:$16 sps:$4 sm:$0xff]   ;;  %v13816_v29 = vld [vmem:[%s15630_s16 + $0x5bc] ss:$16 sps:$4 sm:$0xff]  }
 0x336   : > { %5842 = vmatprep.subr.bf16.mxu0 %v13801_v34  ;;  %v13819_v34 = vld [vmem:[%s15630_s16 + $0xef4] ss:$16 sps:$4 sm:$0xff]  }
 0x338   : > { %3744 = vmatpush1.bf16.msra.mxu1 %v13796_v40  ;;  %v13814_v40 = vld [vmem:[%s15630_s16 + $0x5b8] ss:$16 sps:$4 sm:$0xff]  }
 0x339   : > { %5843 = vmatpush1.bf16.msra.mxu0 %v13799_v43  ;;  %3745 = vmatprep.subr.bf16.mxu1 %v13804_v56  ;;  %v13817_v43 = vld [vmem:[%s15630_s16 + $0xef0] ss:$16 sps:$4 sm:$0xff]   ;;  %v13822_v56 = vld [vmem:[%s15630_s16 + $0x5dc] ss:$16 sps:$4 sm:$0xff]  }
 0x33a   : > { %5844 = vmatprep.subr.bf16.mxu0 %v13807_v14  ;;  %v13825_v14 = vld [vmem:[%s15630_s16 + $0xf14] ss:$16 sps:$4 sm:$0xff]  }
 0x33c   : > { %3746 = vmatpush1.bf16.msra.mxu1 %v13802_v19  ;;  %v13820_v19 = vld [vmem:[%s15630_s16 + $0x5d8] ss:$16 sps:$4 sm:$0xff]  }
 0x33d   : > { %5845 = vmatpush1.bf16.msra.mxu0 %v13805_v39  ;;  %3747 = vmatprep.subr.bf16.mxu1 %v13810_v57  ;;  %v13823_v39 = vld [vmem:[%s15630_s16 + $0xf10] ss:$16 sps:$4 sm:$0xff]   ;;  %v13828_v57 = vld [vmem:[%s15630_s16 + $0x5fc] ss:$16 sps:$4 sm:$0xff]  }
 0x33e   : > { %5846 = vmatprep.subr.bf16.mxu0 %v13813_v25  ;;  %v13831_v25 = vld [vmem:[%s15630_s16 + $0xf34] ss:$16 sps:$4 sm:$0xff]  }
 0x340   : > { %3748 = vmatpush1.bf16.msra.mxu1 %v13808_v32  ;;  %v13826_v32 = vld [vmem:[%s15630_s16 + $0x5f8] ss:$16 sps:$4 sm:$0xff]  }
 0x341   : > { %5847 = vmatpush1.bf16.msra.mxu0 %v13811_v49  ;;  %3749 = vmatprep.subr.bf16.mxu1 %v13816_v29  ;;  %v13829_v49 = vld [vmem:[%s15630_s16 + $0xf30] ss:$16 sps:$4 sm:$0xff]   ;;  %v13834_v29 = vld [vmem:[%s15630_s16 + $0x61c] ss:$16 sps:$4 sm:$0xff]  }
 0x342   : > { %5848 = vmatprep.subr.bf16.mxu0 %v13819_v34  ;;  %v13837_v34 = vld [vmem:[%s15630_s16 + $0xf54] ss:$16 sps:$4 sm:$0xff]  }
 0x344   : > { %3750 = vmatpush1.bf16.msra.mxu1 %v13814_v40  ;;  %v534_v40 = vld [vmem:[%s15630_s16 + $0x638] sm:$0x33] }
 0x345   : > { %5849 = vmatpush1.bf16.msra.mxu0 %v13817_v43  ;;  %3751 = vmatprep.subr.bf16.mxu1 %v13822_v56  ;;  %v13832_v43 = vld [vmem:[%s15630_s16 + $0x618] ss:$16 sps:$4 sm:$0xff]   ;;  %v13835_v56 = vld [vmem:[%s15630_s16 + $0xf50] ss:$16 sps:$4 sm:$0xff]  }
 0x346   : > { %5850 = vmatprep.subr.bf16.mxu0 %v13825_v14  ;;  %v16720_v14 = vcombine.high %v534_v40, %v534_v40 }
 0x348   : > { %3752 = vmatpush1.bf16.msra.mxu1 %v13820_v19  ;;  %20006 = vst [vmem:[#allocation14_spill] sm:$0xff] %v16720_v14  ;;  %v11839_v19 = vcombine.low %v534_v40, %v534_v40 }
 0x349   : > { %5851 = vmatpush1.bf16.msra.mxu0 %v13823_v39  ;;  %3753 = vmatprep.subr.bf16.mxu1 %v13828_v57  ;;  %v13841_v39 = vld [vmem:[%s15630_s16 + $0xf74] ss:$16 sps:$4 sm:$0xff]   ;;  %v2295_v57 = vcombine.high %v16530_v2, %v16530_v2 }
 0x34a   : > { %5852 = vmatprep.subr.bf16.mxu0 %v13831_v25  ;;  %v833_v25 = vld [vmem:[%s15630_s16 + $0xf90] sm:$0x33] }
 0x34b   : > { %v16733_v40 = vcombine.high %v833_v25, %v833_v25  ;;  %v16736_v2 = vrot.slane %v2295_v57, %v16156_v41 }
 0x34c   : > { %3754 = vmatpush1.bf16.msra.mxu1 %v13826_v32  ;;  %v13839_v32 = vld [vmem:[%s15630_s16 + $0xf70] ss:$16 sps:$4 sm:$0xff]  }
 0x34d   : > { %5853 = vmatpush1.bf16.msra.mxu0 %v13829_v49  ;;  %3755 = vmatprep.subr.bf16.mxu1 %v13834_v29  ;;  %v16730_v49 = vsel %vm2608_vm0, %v11839_v19, 0  ;;  %v13845_v29 = vld [vmem:[%s15630_s16 + $0x64c] ss:$16 sps:$4 sm:$0xff]   ;;  %20008 = vst [vmem:[#allocation16_spill] sm:$0xff] %v16733_v40  ;;  %v16750_v57 = vpack.i.b16 %v16736_v2, %v16736_v2 }
 0x34e   : > { %5854 = vmatprep.subr.bf16.mxu0 %v13837_v34  ;;  %20007 = vst [vmem:[#allocation15_spill] sm:$0xff] %v16730_v49  ;;  %v12176_v34 = vcombine.low %v833_v25, %v833_v25  ;;  %v13848_v25 = vld [vmem:[%s15630_s16 + $0x668] ss:$16 sps:$4 sm:$0xff]  }
 0x350   : > { %3756 = vmatpush1.bf16.msra.mxu1 %v13832_v43  ;;  %v13843_v43 = vld [vmem:[%s15630_s16 + $0x648] ss:$16 sps:$4 sm:$0xff]   ;;  %v16744_v19 = vsel %vm2608_vm0, %v12176_v34, 0  ;;  %v16759_v34 = vrot.slane %v16653_v53, %v16166_v50  ;;  %v8090_v53 = vsel %vm8058_vm2, %v16577_v9, 0.0  ;;  %v13857_v9 = vld [vmem:[%s15630_s16 + $0xfc0] ss:$16 sps:$4 sm:$0xff]  }
 0x351   : > { %5855 = vmatpush1.bf16.msra.mxu0 %v13835_v56  ;;  %11843 = vmatprep.subr.msk.bf16.mxu1 %vm2608_vm0, %v16720_v14  ;;  %v13850_v56 = vld [vmem:[%s15630_s16 + $0x66c] ss:$16 sps:$4 sm:$0xff]   ;;  %20009 = vst [vmem:[#allocation17_spill] sm:$0xff] %v16744_v19  ;;  %v13854_v14 = vld [vmem:[%s15630_s16 + $0x688] ss:$16 sps:$4 sm:$0xff]  }
 0x352   : > { %5856 = vmatprep.subr.bf16.mxu0 %v13841_v39  ;;  %v13853_v39 = vld [vmem:[%s15630_s16 + $0xfa4] ss:$16 sps:$4 sm:$0xff]  }
 0x354   : > { %3758 = vmatpush1.bf16.msra.mxu1 %v16730_v49 }
 0x355   : > { %5857 = vmatpush1.bf16.msra.mxu0 %v13839_v32  ;;  %4090 = vmatprep.subr.bf16.mxu1 %v13845_v29  ;;  %v13851_v32 = vld [vmem:[%s15630_s16 + $0xfa0] ss:$16 sps:$4 sm:$0xff]  }
 0x356   : > { %12180 = vmatprep.subr.msk.bf16.mxu0 %vm2608_vm0, %v16733_v40  ;;  %v13859_v40 = vld [vmem:[%s15630_s16 + $0xfc4] ss:$16 sps:$4 sm:$0xff]  }
 0x357   : > { %3766 = vmatmul.mubr.bf16.vlgmr.msra.gmra.mrb[24].mxu1 %v16200_v1  ;;  %v13856_v1 = vld [vmem:[%s15630_s16 + $0x68c] ss:$16 sps:$4 sm:$0xff]  }
 0x358   : > { %4091 = vmatpush1.bf16.msra.mxu1 %v13843_v43  ;;  %11901 = vmatprep.mubr.msk.bf16.mxu1 %vm2604_vm1, %v16209_v4  ;;  %v8059_v43 = vsel %vm8058_vm2, %v16569_v38, 0.0 }
 0x359   : > { %5859 = vmatpush1.bf16.msra.mxu0 %v16744_v19  ;;  %4092 = vmatprep.subr.bf16.mxu1 %v13850_v56  ;;  %v16768_v56 = vrot.slane %v16750_v57, %v16169_v51 }
 0x35a   : > { %v3012_v29 = vpop.f32.mrb[8].mxu1  ;;  %6191 = vmatprep.subr.bf16.mxu0 %v13853_v39 }
 0x35b   : > { %v8060_v4 = vsel %vm8058_vm2, %v3012_v29, 0.0  ;;  %v3014_v49 = vpop.f32.mrb[9].mxu1 }
 0x35c   : > { %v16772_v19 = vadd.f32 %v8060_v4, %v8059_v43  ;;  %v8091_v39 = vsel %vm8058_vm2, %v3014_v49, 0.0  ;;  %5867 = vmatmul.mubr.bf16.vlgmr.msra.gmra.mrb[28].mxu0 %v16759_v34  ;;  %v3016_v38 = vpop.f32.mrb[10].mxu1  ;;  %4093 = vmatpush1.bf16.msra.mxu1 %v13848_v25  ;;  %v13862_v43 = vld [vmem:[%s15630_s16 + $0x6ac] ss:$16 sps:$4 sm:$0xff]   ;;  %v13865_v49 = vld [vmem:[%s15630_s16 + $0xfe4] ss:$16 sps:$4 sm:$0xff]  }
 0x35d   : > { %v16777_v29 = vadd.f32 %v8091_v39, %v8090_v53  ;;  %6192 = vmatpush1.bf16.msra.mxu0 %v13851_v32  ;;  %12238 = vmatprep.mubr.msk.bf16.mxu0 %vm2604_vm1, %v16768_v56  ;;  %v3017_v48 = vpop.f32.mrb[11].mxu1  ;;  %v13860_v32 = vld [vmem:[%s15630_s16 + $0x6a8] ss:$16 sps:$4 sm:$0xff]   ;;  %v13868_v39 = vld [vmem:[%s15630_s16 + $0x6cc] ss:$16 sps:$4 sm:$0xff]  }
 0x35e   : > { %4094 = vmatprep.subr.bf16.mxu1 %v13856_v1  ;;  %6193 = vmatprep.subr.bf16.mxu0 %v13859_v40  ;;  %v13863_v48 = vld [vmem:[%s15630_s16 + $0xfe0] ss:$16 sps:$4 sm:$0xff]   ;;  %v13871_v40 = vld [vmem:[%s15630_s16 + $0x1004] ss:$16 sps:$4 sm:$0xff]   ;;  %v13866_v38 = vld [vmem:[%s15630_s16 + $0x6c8] ss:$16 sps:$4 sm:$0xff]  }
 0x35f   : > { %v16784_v4 = vpop.f32.mrb[12].mxu0 }
 0x360   : > { %v16786_v25 = vpop.f32.mrb[13].mxu0  ;;  %4095 = vmatpush1.bf16.msra.mxu1 %v13854_v14  ;;  %v13869_v14 = vld [vmem:[%s15630_s16 + $0x1000] ss:$16 sps:$4 sm:$0xff]  }
 0x361   : > { %v4444_v53 = vpop.f32.mrb[14].mxu0  ;;  %6194 = vmatpush1.bf16.msra.mxu0 %v13857_v9  ;;  %4096 = vmatprep.subr.bf16.mxu1 %v13862_v43  ;;  %v13877_v9 = vld [vmem:[%s15630_s16 + $0x1024] ss:$16 sps:$4 sm:$0xff]   ;;  %v13872_v43 = vld [vmem:[%s15630_s16 + $0x6e8] ss:$16 sps:$4 sm:$0xff]  }
 0x362   : > { %v4445_v1 = vpop.f32.mrb[15].mxu0  ;;  %6195 = vmatprep.subr.bf16.mxu0 %v13865_v49  ;;  %v13875_v49 = vld [vmem:[%s15630_s16 + $0x1020] ss:$16 sps:$4 sm:$0xff]   ;;  %v13880_v53 = vld [vmem:[%s15630_s16 + $0x70c] ss:$16 sps:$4 sm:$0xff]  }
 0x363   : > { %v13886_v1 = vld [vmem:[%s15630_s16 + $0x72c] ss:$16 sps:$4 sm:$0xff]  }
 0x364   : > { %4097 = vmatpush1.bf16.msra.mxu1 %v13860_v32  ;;  %v13883_v32 = vld [vmem:[%s15630_s16 + $0x1044] ss:$16 sps:$4 sm:$0xff]  }
 0x365   : > { %6196 = vmatpush1.bf16.msra.mxu0 %v13863_v48  ;;  %4098 = vmatprep.subr.bf16.mxu1 %v13868_v39  ;;  %v13878_v48 = vld [vmem:[%s15630_s16 + $0x708] ss:$16 sps:$4 sm:$0xff]   ;;  %v13881_v39 = vld [vmem:[%s15630_s16 + $0x1040] ss:$16 sps:$4 sm:$0xff]  }
 0x366   : > { %6197 = vmatprep.subr.bf16.mxu0 %v13871_v40  ;;  %v13889_v40 = vld [vmem:[%s15630_s16 + $0x1064] ss:$16 sps:$4 sm:$0xff]  }
 0x368   : > { %4099 = vmatpush1.bf16.msra.mxu1 %v13866_v38  ;;  %v13887_v38 = vld [vmem:[%s15630_s16 + $0x1060] ss:$16 sps:$4 sm:$0xff]  }
 0x369   : > { %6198 = vmatpush1.bf16.msra.mxu0 %v13869_v14  ;;  %4100 = vmatprep.subr.bf16.mxu1 %v13874_v12  ;;  %v13884_v12 = vld [vmem:[%s15630_s16 + $0x728] ss:$16 sps:$4 sm:$0xff]   ;;  %v13892_v14 = vld [vmem:[%s15630_s16 + $0x74c] ss:$16 sps:$4 sm:$0xff]  }
 0x36a   : > { %6199 = vmatprep.subr.bf16.mxu0 %v13877_v9  ;;  %v13895_v9 = vld [vmem:[%s15630_s16 + $0x1084] ss:$16 sps:$4 sm:$0xff]  }
 0x36c   : > { %4101 = vmatpush1.bf16.msra.mxu1 %v13872_v43  ;;  %v13890_v43 = vld [vmem:[%s15630_s16 + $0x748] ss:$16 sps:$4 sm:$0xff]  }
 0x36d   : > { %6200 = vmatpush1.bf16.msra.mxu0 %v13875_v49  ;;  %4102 = vmatprep.subr.bf16.mxu1 %v13880_v53  ;;  %v13893_v49 = vld [vmem:[%s15630_s16 + $0x1080] ss:$16 sps:$4 sm:$0xff]   ;;  %v13898_v53 = vld [vmem:[%s15630_s16 + $0x76c] ss:$16 sps:$4 sm:$0xff]  }
 0x36e   : > { %6201 = vmatprep.subr.bf16.mxu0 %v13883_v32  ;;  %v13901_v32 = vld [vmem:[%s15630_s16 + $0x10a4] ss:$16 sps:$4 sm:$0xff]  }
 0x370   : > { %4103 = vmatpush1.bf16.msra.mxu1 %v13878_v48  ;;  %v13896_v48 = vld [vmem:[%s15630_s16 + $0x768] ss:$16 sps:$4 sm:$0xff]  }
 0x371   : > { %6202 = vmatpush1.bf16.msra.mxu0 %v13881_v39  ;;  %4104 = vmatprep.subr.bf16.mxu1 %v13886_v1  ;;  %v13899_v39 = vld [vmem:[%s15630_s16 + $0x10a0] ss:$16 sps:$4 sm:$0xff]   ;;  %v13904_v1 = vld [vmem:[%s15630_s16 + $0x78c] ss:$16 sps:$4 sm:$0xff]  }
 0x372   : > { %6203 = vmatprep.subr.bf16.mxu0 %v13889_v40  ;;  %v13907_v40 = vld [vmem:[%s15630_s16 + $0x10c4] ss:$16 sps:$4 sm:$0xff]  }
 0x374   : > { %4105 = vmatpush1.bf16.msra.mxu1 %v13884_v12  ;;  %v13902_v12 = vld [vmem:[%s15630_s16 + $0x788] ss:$16 sps:$4 sm:$0xff]  }
 0x375   : > { %6204 = vmatpush1.bf16.msra.mxu0 %v13887_v38  ;;  %4106 = vmatprep.subr.bf16.mxu1 %v13892_v14  ;;  %v13905_v38 = vld [vmem:[%s15630_s16 + $0x10c0] ss:$16 sps:$4 sm:$0xff]   ;;  %v13910_v14 = vld [vmem:[%s15630_s16 + $0x7ac] ss:$16 sps:$4 sm:$0xff]  }
 0x376   : > { %6205 = vmatprep.subr.bf16.mxu0 %v13895_v9  ;;  %v13913_v9 = vld [vmem:[%s15630_s16 + $0x10e4] ss:$16 sps:$4 sm:$0xff]  }
 0x378   : > { %4107 = vmatpush1.bf16.msra.mxu1 %v13890_v43  ;;  %v584_v43 = vld [vmem:[%s15630_s16 + $0x7c8] sm:$0x33] }
 0x379   : > { %6206 = vmatpush1.bf16.msra.mxu0 %v13893_v49  ;;  %4108 = vmatprep.subr.bf16.mxu1 %v13898_v53  ;;  %v13908_v49 = vld [vmem:[%s15630_s16 + $0x7a8] ss:$16 sps:$4 sm:$0xff]   ;;  %v13911_v53 = vld [vmem:[%s15630_s16 + $0x10e0] ss:$16 sps:$4 sm:$0xff]  }
 0x37a   : > { %6207 = vmatprep.subr.bf16.mxu0 %v13901_v32  ;;  %v16823_v32 = vcombine.high %v584_v43, %v584_v43 }
 0x37c   : > { %4109 = vmatpush1.bf16.msra.mxu1 %v13896_v48  ;;  %20010 = vst [vmem:[#allocation18_spill] sm:$0xff] %v16823_v32  ;;  %v11896_v48 = vcombine.low %v584_v43, %v584_v43 }
 0x37d   : > { %6208 = vmatpush1.bf16.msra.mxu0 %v13899_v39  ;;  %4110 = vmatprep.subr.bf16.mxu1 %v13904_v1  ;;  %v13917_v39 = vld [vmem:[%s15630_s16 + $0x1104] ss:$16 sps:$4 sm:$0xff]  }
 0x37e   : > { %6209 = vmatprep.subr.bf16.mxu0 %v13907_v40  ;;  %v883_v1 = vld [vmem:[%s15630_s16 + $0x1120] sm:$0x33] }
 0x37f   : > { %v13915_v40 = vld [vmem:[%s15630_s16 + $0x1100] ss:$16 sps:$4 sm:$0xff]   ;;  %v12233_v43 = vcombine.low %v883_v1, %v883_v1 }
 0x380   : > { %4111 = vmatpush1.bf16.msra.mxu1 %v13902_v12  ;;  %v16831_v12 = vsel %vm2608_vm0, %v11896_v48, 0 }
 0x381   : > { %6210 = vmatpush1.bf16.msra.mxu0 %v13905_v38  ;;  %4112 = vmatprep.subr.bf16.mxu1 %v13910_v14  ;;  %20011 = vst [vmem:[#allocation19_spill] sm:$0xff] %v16831_v12  ;;  %v13921_v38 = vld [vmem:[%s15630_s16 + $0x7dc] ss:$16 sps:$4 sm:$0xff]   ;;  %v16834_v14 = vcombine.high %v883_v1, %v883_v1  ;;  %v16843_v48 = vsel %vm2608_vm0, %v12233_v43, 0  ;;  %v16856_v43 = vrot.slane %v16750_v57, %v16166_v50  ;;  %v8152_v57 = vsel %vm8058_vm2, %v16668_v18, 0.0 }
 0x382   : > { %6211 = vmatprep.subr.bf16.mxu0 %v13913_v9  ;;  %v2339_v9 = vunpack.i.h.s16 %v16736_v2  ;;  %20013 = vst [vmem:[#allocation21_spill] sm:$0xff] %v16843_v48  ;;  %v13933_v18 = vld [vmem:[%s15630_s16 + $0x1150] ss:$16 sps:$4 sm:$0xff]  }
 0x383   : > { %20012 = vst [vmem:[#allocation20_spill] sm:$0xff] %v16834_v14 }
 0x384   : > { %4113 = vmatpush1.bf16.msra.mxu1 %v13908_v49  ;;  %v13919_v49 = vld [vmem:[%s15630_s16 + $0x7d8] ss:$16 sps:$4 sm:$0xff]   ;;  %v16847_v1 = vpack.i.b16 %v2339_v9, %v2339_v9  ;;  %v8121_v9 = vsel %vm8058_vm2, %v16660_v62, 0.0 }
 0x385   : > { %6212 = vmatpush1.bf16.msra.mxu0 %v13911_v53  ;;  %11900 = vmatprep.subr.msk.bf16.mxu1 %vm2608_vm0, %v16823_v32  ;;  %v13926_v53 = vld [vmem:[%s15630_s16 + $0x7fc] ss:$16 sps:$4 sm:$0xff]   ;;  %v13930_v32 = vld [vmem:[%s15630_s16 + $0x818] ss:$16 sps:$4 sm:$0xff]  }
 0x386   : > { %6213 = vmatprep.subr.bf16.mxu0 %v13917_v39  ;;  %v13929_v39 = vld [vmem:[%s15630_s16 + $0x1134] ss:$16 sps:$4 sm:$0xff]  }
 0x388   : > { %4115 = vmatpush1.bf16.msra.mxu1 %v16831_v12 }
 0x389   : > { %6214 = vmatpush1.bf16.msra.mxu0 %v13915_v40  ;;  %4447 = vmatprep.subr.bf16.mxu1 %v13921_v38  ;;  %v13924_v40 = vld [vmem:[%s15630_s16 + $0x7f8] ss:$16 sps:$4 sm:$0xff]   ;;  %v13927_v38 = vld [vmem:[%s15630_s16 + $0x1130] ss:$16 sps:$4 sm:$0xff]  }
 0x38a   : > { %12237 = vmatprep.subr.msk.bf16.mxu0 %vm2608_vm0, %v16834_v14  ;;  %v13932_v14 = vld [vmem:[%s15630_s16 + $0x81c] ss:$16 sps:$4 sm:$0xff]  }
 0x38b   : > { %4123 = vmatmul.mubr.bf16.vlgmr.msra.gmra.mrb[28].mxu1 %v16292_v21  ;;  %v13935_v21 = vld [vmem:[%s15630_s16 + $0x1154] ss:$16 sps:$4 sm:$0xff]  }
 0x38c   : > { %4448 = vmatpush1.bf16.msra.mxu1 %v13919_v49  ;;  %11957 = vmatprep.mubr.msk.bf16.mxu1 %vm2604_vm1, %v16298_v26 }
 0x38d   : > { %6216 = vmatpush1.bf16.msra.mxu0 %v16843_v48  ;;  %4449 = vmatprep.subr.bf16.mxu1 %v13926_v53  ;;  %v16865_v53 = vrot.slane %v16847_v1, %v16169_v51 }
 0x38e   : > { %v3053_v12 = vpop.f32.mrb[12].mxu1  ;;  %6548 = vmatprep.subr.bf16.mxu0 %v13929_v39 }
 0x38f   : > { %v8122_v26 = vsel %vm8058_vm2, %v3053_v12, 0.0  ;;  %v3055_v49 = vpop.f32.mrb[13].mxu1 }
 0x390   : > { %v16869_v48 = vadd.f32 %v8122_v26, %v8121_v9  ;;  %v8153_v39 = vsel %vm8058_vm2, %v3055_v49, 0.0  ;;  %6224 = vmatmul.mubr.bf16.vlgmr.msra.gmra.mrb[32].mxu0 %v16856_v43  ;;  %v3057_v62 = vpop.f32.mrb[14].mxu1  ;;  %4450 = vmatpush1.bf16.msra.mxu1 %v13924_v40  ;;  %v13938_v9 = vld [vmem:[%s15630_s16 + $0x83c] ss:$16 sps:$4 sm:$0xff]   ;;  %v13941_v26 = vld [vmem:[%s15630_s16 + $0x1174] ss:$16 sps:$4 sm:$0xff]  }
 0x391   : > { %v16874_v12 = vadd.f32 %v8153_v39, %v8152_v57  ;;  %6549 = vmatpush1.bf16.msra.mxu0 %v13927_v38  ;;  %12294 = vmatprep.mubr.msk.bf16.mxu0 %vm2604_vm1, %v16865_v53  ;;  %v3058_v37 = vpop.f32.mrb[15].mxu1  ;;  %v13936_v38 = vld [vmem:[%s15630_s16 + $0x838] ss:$16 sps:$4 sm:$0xff]   ;;  %v13944_v39 = vld [vmem:[%s15630_s16 + $0x85c] ss:$16 sps:$4 sm:$0xff]  }
 0x392   : > { %4451 = vmatprep.subr.bf16.mxu1 %v13932_v14  ;;  %6550 = vmatprep.subr.bf16.mxu0 %v13935_v21  ;;  %v13939_v37 = vld [vmem:[%s15630_s16 + $0x1170] ss:$16 sps:$4 sm:$0xff]   ;;  %v13947_v21 = vld [vmem:[%s15630_s16 + $0x1194] ss:$16 sps:$4 sm:$0xff]   ;;  %v13942_v62 = vld [vmem:[%s15630_s16 + $0x858] ss:$16 sps:$4 sm:$0xff]  }
 0x393   : > { %v16881_v49 = vpop.f32.mrb[16].mxu0 }
 0x394   : > { %v16883_v40 = vpop.f32.mrb[17].mxu0  ;;  %4452 = vmatpush1.bf16.msra.mxu1 %v13930_v32  ;;  %v13945_v32 = vld [vmem:[%s15630_s16 + $0x1190] ss:$16 sps:$4 sm:$0xff]  }
 0x395   : > { %v4801_v57 = vpop.f32.mrb[18].mxu0  ;;  %6551 = vmatpush1.bf16.msra.mxu0 %v13933_v18  ;;  %4453 = vmatprep.subr.bf16.mxu1 %v13938_v9  ;;  %v13953_v18 = vld [vmem:[%s15630_s16 + $0x11b4] ss:$16 sps:$4 sm:$0xff]   ;;  %v13948_v9 = vld [vmem:[%s15630_s16 + $0x878] ss:$16 sps:$4 sm:$0xff]  }
 0x396   : > { %v4802_v14 = vpop.f32.mrb[19].mxu0  ;;  %6552 = vmatprep.subr.bf16.mxu0 %v13941_v26  ;;  %v13951_v26 = vld [vmem:[%s15630_s16 + $0x11b0] ss:$16 sps:$4 sm:$0xff]   ;;  %v13956_v57 = vld [vmem:[%s15630_s16 + $0x89c] ss:$16 sps:$4 sm:$0xff]  }
 0x397   : > { %v13962_v14 = vld [vmem:[%s15630_s16 + $0x8bc] ss:$16 sps:$4 sm:$0xff]  }
 0x398   : > { %4454 = vmatpush1.bf16.msra.mxu1 %v13936_v38  ;;  %v13959_v38 = vld [vmem:[%s15630_s16 + $0x11d4] ss:$16 sps:$4 sm:$0xff]  }
 0x399   : > { %6553 = vmatpush1.bf16.msra.mxu0 %v13939_v37  ;;  %4455 = vmatprep.subr.bf16.mxu1 %v13944_v39  ;;  %v13954_v37 = vld [vmem:[%s15630_s16 + $0x898] ss:$16 sps:$4 sm:$0xff]   ;;  %v13957_v39 = vld [vmem:[%s15630_s16 + $0x11d0] ss:$16 sps:$4 sm:$0xff]  }
 0x39a   : > { %6554 = vmatprep.subr.bf16.mxu0 %v13947_v21  ;;  %v13965_v21 = vld [vmem:[%s15630_s16 + $0x11f4] ss:$16 sps:$4 sm:$0xff]  }
 0x39c   : > { %4456 = vmatpush1.bf16.msra.mxu1 %v13942_v62  ;;  %v13963_v62 = vld [vmem:[%s15630_s16 + $0x11f0] ss:$16 sps:$4 sm:$0xff]  }
 0x39d   : > { %6555 = vmatpush1.bf16.msra.mxu0 %v13945_v32  ;;  %4457 = vmatprep.subr.bf16.mxu1 %v13950_v3  ;;  %v13960_v3 = vld [vmem:[%s15630_s16 + $0x8b8] ss:$16 sps:$4 sm:$0xff]   ;;  %v13968_v32 = vld [vmem:[%s15630_s16 + $0x8dc] ss:$16 sps:$4 sm:$0xff]  }
 0x39e   : > { %6556 = vmatprep.subr.bf16.mxu0 %v13953_v18  ;;  %v13971_v18 = vld [vmem:[%s15630_s16 + $0x1214] ss:$16 sps:$4 sm:$0xff]  }
 0x3a0   : > { %4458 = vmatpush1.bf16.msra.mxu1 %v13948_v9  ;;  %v13966_v9 = vld [vmem:[%s15630_s16 + $0x8d8] ss:$16 sps:$4 sm:$0xff]  }
 0x3a1   : > { %6557 = vmatpush1.bf16.msra.mxu0 %v13951_v26  ;;  %4459 = vmatprep.subr.bf16.mxu1 %v13956_v57  ;;  %v13969_v26 = vld [vmem:[%s15630_s16 + $0x1210] ss:$16 sps:$4 sm:$0xff]   ;;  %v13974_v57 = vld [vmem:[%s15630_s16 + $0x8fc] ss:$16 sps:$4 sm:$0xff]  }
 0x3a2   : > { %6558 = vmatprep.subr.bf16.mxu0 %v13959_v38  ;;  %v13977_v38 = vld [vmem:[%s15630_s16 + $0x1234] ss:$16 sps:$4 sm:$0xff]  }
 0x3a4   : > { %4460 = vmatpush1.bf16.msra.mxu1 %v13954_v37  ;;  %v13972_v37 = vld [vmem:[%s15630_s16 + $0x8f8] ss:$16 sps:$4 sm:$0xff]  }
 0x3a5   : > { %6559 = vmatpush1.bf16.msra.mxu0 %v13957_v39  ;;  %4461 = vmatprep.subr.bf16.mxu1 %v13962_v14  ;;  %v13975_v39 = vld [vmem:[%s15630_s16 + $0x1230] ss:$16 sps:$4 sm:$0xff]   ;;  %v13980_v14 = vld [vmem:[%s15630_s16 + $0x91c] ss:$16 sps:$4 sm:$0xff]  }
 0x3a6   : > { %6560 = vmatprep.subr.bf16.mxu0 %v13965_v21  ;;  %v13983_v21 = vld [vmem:[%s15630_s16 + $0x1254] ss:$16 sps:$4 sm:$0xff]  }
 0x3a8   : > { %4462 = vmatpush1.bf16.msra.mxu1 %v13960_v3  ;;  %v13978_v3 = vld [vmem:[%s15630_s16 + $0x918] ss:$16 sps:$4 sm:$0xff]  }
 0x3a9   : > { %6561 = vmatpush1.bf16.msra.mxu0 %v13963_v62  ;;  %4463 = vmatprep.subr.bf16.mxu1 %v13968_v32  ;;  %v13981_v62 = vld [vmem:[%s15630_s16 + $0x1250] ss:$16 sps:$4 sm:$0xff]   ;;  %v13986_v32 = vld [vmem:[%s15630_s16 + $0x93c] ss:$16 sps:$4 sm:$0xff]  }
 0x3aa   : > { %6562 = vmatprep.subr.bf16.mxu0 %v13971_v18  ;;  %v13989_v18 = vld [vmem:[%s15630_s16 + $0x1274] ss:$16 sps:$4 sm:$0xff]  }
 0x3ac   : > { %4464 = vmatpush1.bf16.msra.mxu1 %v13966_v9  ;;  %v634_v9 = vld [vmem:[%s15630_s16 + $0x958] sm:$0x33] }
 0x3ad   : > { %6563 = vmatpush1.bf16.msra.mxu0 %v13969_v26  ;;  %4465 = vmatprep.subr.bf16.mxu1 %v13974_v57  ;;  %v13984_v26 = vld [vmem:[%s15630_s16 + $0x938] ss:$16 sps:$4 sm:$0xff]   ;;  %v13987_v57 = vld [vmem:[%s15630_s16 + $0x1270] ss:$16 sps:$4 sm:$0xff]  }
 0x3ae   : > { %6564 = vmatprep.subr.bf16.mxu0 %v13977_v38  ;;  %v16920_v38 = vcombine.high %v634_v9, %v634_v9 }
 0x3b0   : > { %4466 = vmatpush1.bf16.msra.mxu1 %v13972_v37  ;;  %20014 = vst [vmem:[#allocation22_spill] sm:$0xff] %v16920_v38  ;;  %v11952_v37 = vcombine.low %v634_v9, %v634_v9 }
 0x3b1   : > { %6565 = vmatpush1.bf16.msra.mxu0 %v13975_v39  ;;  %4467 = vmatprep.subr.bf16.mxu1 %v13980_v14  ;;  %v13993_v39 = vld [vmem:[%s15630_s16 + $0x1294] ss:$16 sps:$4 sm:$0xff]  }
 0x3b2   : > { %6566 = vmatprep.subr.bf16.mxu0 %v13983_v21  ;;  %v933_v14 = vld [vmem:[%s15630_s16 + $0x12b0] sm:$0x33] }
 0x3b3   : > { %v13991_v21 = vld [vmem:[%s15630_s16 + $0x1290] ss:$16 sps:$4 sm:$0xff]   ;;  %v12289_v9 = vcombine.low %v933_v14, %v933_v14 }
 0x3b4   : > { %4468 = vmatpush1.bf16.msra.mxu1 %v13978_v3  ;;  %v16928_v3 = vsel %vm2608_vm0, %v11952_v37, 0 }
 0x3b5   : > { %6567 = vmatpush1.bf16.msra.mxu0 %v13981_v62  ;;  %4469 = vmatprep.subr.bf16.mxu1 %v13986_v32  ;;  %20015 = vst [vmem:[#allocation23_spill] sm:$0xff] %v16928_v3  ;;  %v13997_v62 = vld [vmem:[%s15630_s16 + $0x96c] ss:$16 sps:$4 sm:$0xff]   ;;  %v16931_v32 = vcombine.high %v933_v14, %v933_v14  ;;  %v16943_v37 = vsel %vm2608_vm0, %v12289_v9, 0  ;;  %v14000_v14 = vld [vmem:[%s15630_s16 + $0x988] ss:$16 sps:$4 sm:$0xff]   ;;  %v16958_v9 = vrot.slane %v16847_v1, %v16166_v50 }
 0x3b6   : > { %6568 = vmatprep.subr.bf16.mxu0 %v13989_v18  ;;  %v16935_v18 = vcombine.high %v16544_v47, %v16544_v47  ;;  %20017 = vst [vmem:[#allocation25_spill] sm:$0xff] %v16943_v37 }
 0x3b7   : > { %20016 = vst [vmem:[#allocation24_spill] sm:$0xff] %v16931_v32 }
 0x3b8   : > { %4470 = vmatpush1.bf16.msra.mxu1 %v13984_v26  ;;  %v13995_v26 = vld [vmem:[%s15630_s16 + $0x968] ss:$16 sps:$4 sm:$0xff]   ;;  %v16949_v47 = vpack.i.b16 %v16935_v18, %v16935_v18 }
 0x3b9   : > { %6569 = vmatpush1.bf16.msra.mxu0 %v13987_v57  ;;  %11956 = vmatprep.subr.msk.bf16.mxu1 %vm2608_vm0, %v16920_v38  ;;  %v14002_v57 = vld [vmem:[%s15630_s16 + $0x98c] ss:$16 sps:$4 sm:$0xff]   ;;  %v8064_v38 = vsel %vm8058_vm2, %v16589_v16, 0.0  ;;  %v8066_v16 = vsel %vm8058_vm2, %v16681_v45, 0.0 }
 0x3ba   : > { %6570 = vmatprep.subr.bf16.mxu0 %v13993_v39  ;;  %v14005_v39 = vld [vmem:[%s15630_s16 + $0x12c4] ss:$16 sps:$4 sm:$0xff]   ;;  %v14020_v45 = vld [vmem:[%s15630_s16 + $0x9ec] ss:$16 sps:$4 sm:$0xff]  }
 0x3bc   : > { %4472 = vmatpush1.bf16.msra.mxu1 %v16928_v3 }
 0x3bd   : > { %6571 = vmatpush1.bf16.msra.mxu0 %v13991_v21  ;;  %4804 = vmatprep.subr.bf16.mxu1 %v13997_v62  ;;  %v14003_v21 = vld [vmem:[%s15630_s16 + $0x12c0] ss:$16 sps:$4 sm:$0xff]  }
 0x3be   : > { %12293 = vmatprep.subr.msk.bf16.mxu0 %vm2608_vm0, %v16931_v32  ;;  %v14011_v32 = vld [vmem:[%s15630_s16 + $0x12e4] ss:$16 sps:$4 sm:$0xff]  }
 0x3bf   : > { %4480 = vmatmul.mubr.bf16.vlgmr.msra.gmra.mrb[32].mxu1 %v16384_v46  ;;  %v14008_v46 = vld [vmem:[%s15630_s16 + $0x9ac] ss:$16 sps:$4 sm:$0xff]  }
 0x3c0   : > { %4805 = vmatpush1.bf16.msra.mxu1 %v13995_v26  ;;  %12014 = vmatprep.mubr.msk.bf16.mxu1 %vm2604_vm1, %v16390_v55  ;;  %v16965_v55 = vrot.slane %v16949_v47, %v16169_v51 }
 0x3c1   : > { %6573 = vmatpush1.bf16.msra.mxu0 %v16943_v37  ;;  %4806 = vmatprep.subr.bf16.mxu1 %v14002_v57 }
 0x3c2   : > { %v3369_v62 = vpop.f32.mrb[16].mxu1  ;;  %6905 = vmatprep.subr.bf16.mxu0 %v14005_v39  ;;  %v14006_v39 = vld [vmem:[%s15630_s16 + $0x9a8] ss:$16 sps:$4 sm:$0xff]  }
 0x3c3   : > { %v8062_v26 = vsel %vm8058_vm2, %v3369_v62, 0.0  ;;  %v3371_v3 = vpop.f32.mrb[17].mxu1 }
 0x3c4   : > { %v8063_v57 = vadd.f32 %v8062_v26, %v16772_v19  ;;  %v8093_v37 = vsel %vm8058_vm2, %v3371_v3, 0.0  ;;  %6581 = vmatmul.mubr.bf16.vlgmr.msra.gmra.mrb[36].mxu0 %v16958_v9  ;;  %v3373_v1 = vpop.f32.mrb[18].mxu1  ;;  %4807 = vmatpush1.bf16.msra.mxu1 %v14000_v14  ;;  %v14009_v19 = vld [vmem:[%s15630_s16 + $0x12e0] ss:$16 sps:$4 sm:$0xff]   ;;  %v14014_v26 = vld [vmem:[%s15630_s16 + $0x9cc] ss:$16 sps:$4 sm:$0xff]  }
 0x3c5   : > { %v8094_v62 = vadd.f32 %v8093_v37, %v16777_v29  ;;  %6906 = vmatpush1.bf16.msra.mxu0 %v14003_v21  ;;  %12351 = vmatprep.mubr.msk.bf16.mxu0 %vm2604_vm1, %v16965_v55  ;;  %v3374_v28 = vpop.f32.mrb[19].mxu1  ;;  %v8095_v3 = vsel %vm8058_vm2, %v16592_v59, 0.0  ;;  %v14017_v14 = vld [vmem:[%s15630_s16 + $0x1304] ss:$16 sps:$4 sm:$0xff]   ;;  %v8097_v21 = vsel %vm8058_vm2, %v16683_v61, 0.0  ;;  %v8068_v59 = vsel %vm8058_vm2, %v16784_v4, 0.0 }
 0x3c6   : > { %v8065_v54 = vadd.f32 %v8064_v38, %v8063_v57  ;;  %4808 = vmatprep.subr.bf16.mxu1 %v14008_v46  ;;  %6907 = vmatprep.subr.bf16.mxu0 %v14011_v32  ;;  %v14015_v46 = vld [vmem:[%s15630_s16 + $0x1300] ss:$16 sps:$4 sm:$0xff]   ;;  %v8099_v57 = vsel %vm8058_vm2, %v16786_v25, 0.0  ;;  %v8070_v4 = vsel %vm8058_vm2, %v16881_v49, 0.0 }
 0x3c7   : > { %v8096_v29 = vadd.f32 %v8095_v3, %v8094_v62  ;;  %v5154_v37 = vpop.f32.mrb[20].mxu0  ;;  %v14018_v3 = vld [vmem:[%s15630_s16 + $0x9e8] ss:$16 sps:$4 sm:$0xff]  }
 0x3c8   : > { %v8067_v28 = vadd.f32 %v8066_v16, %v8065_v54  ;;  %v5156_v1 = vpop.f32.mrb[21].mxu0  ;;  %4809 = vmatpush1.bf16.msra.mxu1 %v14006_v39  ;;  %v14023_v39 = vld [vmem:[%s15630_s16 + $0x1324] ss:$16 sps:$4 sm:$0xff]   ;;  %v8072_v25 = vsel %vm8058_vm2, %v5154_v37, 0.0  ;;  %v14024_v37 = vld [vmem:[%s15630_s16 + $0xa08] ss:$16 sps:$4 sm:$0xff]  }
 0x3c9   : > { %v8098_v38 = vadd.f32 %v8097_v21, %v8096_v29  ;;  %v5158_v32 = vpop.f32.mrb[22].mxu0  ;;  %6908 = vmatpush1.bf16.msra.mxu0 %v14009_v19  ;;  %4810 = vmatprep.subr.bf16.mxu1 %v14014_v26  ;;  %v8101_v19 = vsel %vm8058_vm2, %v16883_v40, 0.0  ;;  %v14026_v29 = vld [vmem:[%s15630_s16 + $0xa0c] ss:$16 sps:$4 sm:$0xff]   ;;  %v8103_v21 = vsel %vm8058_vm2, %v5156_v1, 0.0 }
 0x3ca   : > { %v8069_v61 = vadd.f32 %v8068_v59, %v8067_v28  ;;  %v5159_v54 = vpop.f32.mrb[23].mxu0  ;;  %6909 = vmatprep.subr.bf16.mxu0 %v14017_v14  ;;  %v14021_v14 = vld [vmem:[%s15630_s16 + $0x1320] ss:$16 sps:$4 sm:$0xff]   ;;  %v14032_v59 = vld [vmem:[%s15630_s16 + $0xa2c] ss:$16 sps:$4 sm:$0xff]  }
 0x3cb   : > { %v8100_v62 = vadd.f32 %v8099_v57, %v8098_v38  ;;  %v14027_v28 = vld [vmem:[%s15630_s16 + $0x1340] ss:$16 sps:$4 sm:$0xff]   ;;  %v14035_v38 = vld [vmem:[%s15630_s16 + $0x1364] ss:$16 sps:$4 sm:$0xff]   ;;  %v14030_v1 = vld [vmem:[%s15630_s16 + $0xa28] ss:$16 sps:$4 sm:$0xff]  }
 0x3cc   : > { %v8071_v26 = vadd.f32 %v8070_v4, %v8069_v61  ;;  %4811 = vmatpush1.bf16.msra.mxu1 %v14012_v7  ;;  %v14029_v7 = vld [vmem:[%s15630_s16 + $0x1344] ss:$16 sps:$4 sm:$0xff]   ;;  %v14033_v32 = vld [vmem:[%s15630_s16 + $0x1360] ss:$16 sps:$4 sm:$0xff]   ;;  %v14036_v57 = vld [vmem:[%s15630_s16 + $0xa48] ss:$16 sps:$4 sm:$0xff]  }
 0x3cd   : > { %v8102_v16 = vadd.f32 %v8101_v19, %v8100_v62  ;;  %6910 = vmatpush1.bf16.msra.mxu0 %v14015_v46  ;;  %4812 = vmatprep.subr.bf16.mxu1 %v14020_v45  ;;  %v14038_v46 = vld [vmem:[%s15630_s16 + $0xa4c] ss:$16 sps:$4 sm:$0xff]   ;;  %v14041_v45 = vld [vmem:[%s15630_s16 + $0x1384] ss:$16 sps:$4 sm:$0xff]   ;;  %v14039_v61 = vld [vmem:[%s15630_s16 + $0x1380] ss:$16 sps:$4 sm:$0xff]  }
 0x3ce   : > { %v17001_v49 = vadd.f32 %v8072_v25, %v8071_v26  ;;  %6911 = vmatprep.subr.bf16.mxu0 %v14023_v39  ;;  %v14044_v54 = vld [vmem:[%s15630_s16 + $0xa6c] ss:$16 sps:$4 sm:$0xff]   ;;  %v14047_v39 = vld [vmem:[%s15630_s16 + $0x13a4] ss:$16 sps:$4 sm:$0xff]   ;;  %v14042_v4 = vld [vmem:[%s15630_s16 + $0xa68] ss:$16 sps:$4 sm:$0xff]  }
 0x3cf   : > { %v17005_v40 = vadd.f32 %v8103_v21, %v8102_v16  ;;  %v14045_v62 = vld [vmem:[%s15630_s16 + $0x13a0] ss:$16 sps:$4 sm:$0xff]   ;;  %v14050_v19 = vld [vmem:[%s15630_s16 + $0xa8c] ss:$16 sps:$4 sm:$0xff]   ;;  %v14053_v26 = vld [vmem:[%s15630_s16 + $0x13c4] ss:$16 sps:$4 sm:$0xff]  }
 0x3d0   : > { %4813 = vmatpush1.bf16.msra.mxu1 %v14018_v3  ;;  %v14048_v3 = vld [vmem:[%s15630_s16 + $0xa88] ss:$16 sps:$4 sm:$0xff]   ;;  %v14051_v25 = vld [vmem:[%s15630_s16 + $0x13c0] ss:$16 sps:$4 sm:$0xff]   ;;  %v14056_v16 = vld [vmem:[%s15630_s16 + $0xaac] ss:$16 sps:$4 sm:$0xff]  }
 0x3d1   : > { %6912 = vmatpush1.bf16.msra.mxu0 %v14021_v14  ;;  %4814 = vmatprep.subr.bf16.mxu1 %v14026_v29  ;;  %v14059_v14 = vld [vmem:[%s15630_s16 + $0x13e4] ss:$16 sps:$4 sm:$0xff]   ;;  %v14054_v29 = vld [vmem:[%s15630_s16 + $0xaa8] ss:$16 sps:$4 sm:$0xff]   ;;  %v14057_v21 = vld [vmem:[%s15630_s16 + $0x13e0] ss:$16 sps:$4 sm:$0xff]  }
 0x3d2   : > { %6913 = vmatprep.subr.bf16.mxu0 %v14029_v7  ;;  %v14062_v7 = vld [vmem:[%s15630_s16 + $0xacc] ss:$16 sps:$4 sm:$0xff]  }
 0x3d4   : > { %4815 = vmatpush1.bf16.msra.mxu1 %v14024_v37  ;;  %v14065_v37 = vld [vmem:[%s15630_s16 + $0x1404] ss:$16 sps:$4 sm:$0xff]  }
 0x3d5   : > { %6914 = vmatpush1.bf16.msra.mxu0 %v14027_v28  ;;  %4816 = vmatprep.subr.bf16.mxu1 %v14032_v59  ;;  %v684_v28 = vld [vmem:[%s15630_s16 + $0xae8] sm:$0x33] }
 0x3d6   : > { %6915 = vmatprep.subr.bf16.mxu0 %v14035_v38  ;;  %v14060_v59 = vld [vmem:[%s15630_s16 + $0xac8] ss:$16 sps:$4 sm:$0xff]   ;;  %v14063_v38 = vld [vmem:[%s15630_s16 + $0x1400] ss:$16 sps:$4 sm:$0xff]  }
 0x3d8   : > { %4817 = vmatpush1.bf16.msra.mxu1 %v14030_v1  ;;  %v17034_v1 = vcombine.high %v684_v28, %v684_v28 }
 0x3d9   : > { %6916 = vmatpush1.bf16.msra.mxu0 %v14033_v32  ;;  %4818 = vmatprep.subr.bf16.mxu1 %v14038_v46  ;;  %v12009_v32 = vcombine.low %v684_v28, %v684_v28  ;;  %v14069_v46 = vld [vmem:[%s15630_s16 + $0x1424] ss:$16 sps:$4 sm:$0xff]  }
 0x3da   : > { %6917 = vmatprep.subr.bf16.mxu0 %v14041_v45  ;;  %v983_v45 = vld [vmem:[%s15630_s16 + $0x1440] sm:$0x33] }
 0x3dc   : > { %4819 = vmatpush1.bf16.msra.mxu1 %v14036_v57  ;;  %v14067_v57 = vld [vmem:[%s15630_s16 + $0x1420] ss:$16 sps:$4 sm:$0xff]  }
 0x3dd   : > { %6918 = vmatpush1.bf16.msra.mxu0 %v14039_v61  ;;  %4820 = vmatprep.subr.bf16.mxu1 %v14044_v54  ;;  %v17042_v61 = vsel %vm2608_vm0, %v12009_v32, 0  ;;  %v14073_v54 = vld [vmem:[%s15630_s16 + $0xafc] ss:$16 sps:$4 sm:$0xff]   ;;  %v14082_v32 = vld [vmem:[%s15630_s16 + $0xb38] ss:$16 sps:$4 sm:$0xff]  }
 0x3de   : > { %6919 = vmatprep.subr.bf16.mxu0 %v14047_v39  ;;  %v17045_v39 = vcombine.high %v983_v45, %v983_v45 }
 0x3e0   : > { %4821 = vmatpush1.bf16.msra.mxu1 %v14042_v4  ;;  %v12346_v4 = vcombine.low %v983_v45, %v983_v45 }
 0x3e1   : > { %6920 = vmatpush1.bf16.msra.mxu0 %v14045_v62  ;;  %4822 = vmatprep.subr.bf16.mxu1 %v14050_v19  ;;  %v2341_v62 = vunpack.i.h.s16 %v16935_v18  ;;  %v14071_v19 = vld [vmem:[%s15630_s16 + $0xaf8] ss:$16 sps:$4 sm:$0xff]  }
 0x3e2   : > { %6921 = vmatprep.subr.bf16.mxu0 %v14053_v26  ;;  %v14078_v26 = vld [vmem:[%s15630_s16 + $0xb1c] ss:$16 sps:$4 sm:$0xff]   ;;  %v14076_v18 = vld [vmem:[%s15630_s16 + $0xb18] ss:$16 sps:$4 sm:$0xff]  }
 0x3e4   : > { %4823 = vmatpush1.bf16.msra.mxu1 %v14048_v3  ;;  %v17054_v3 = vsel %vm2608_vm0, %v12346_v4, 0 }
 0x3e5   : > { %6922 = vmatpush1.bf16.msra.mxu0 %v14051_v25  ;;  %4824 = vmatprep.subr.bf16.mxu1 %v14056_v16  ;;  %v14081_v25 = vld [vmem:[%s15630_s16 + $0x1454] ss:$16 sps:$4 sm:$0xff]   ;;  %v17058_v16 = vpack.i.b16 %v2341_v62, %v2341_v62 }
 0x3e6   : > { %6923 = vmatprep.subr.bf16.mxu0 %v14059_v14  ;;  %v14079_v14 = vld [vmem:[%s15630_s16 + $0x1450] ss:$16 sps:$4 sm:$0xff]  }
 0x3e8   : > { %4825 = vmatpush1.bf16.msra.mxu1 %v14054_v29 }
 0x3e9   : > { %6924 = vmatpush1.bf16.msra.mxu0 %v14057_v21  ;;  %4826 = vmatprep.subr.bf16.mxu1 %v14062_v7  ;;  %v17067_v21 = vrot.slane %v16949_v47, %v16166_v50  ;;  %v14087_v7 = vld [vmem:[%s15630_s16 + $0x1474] ss:$16 sps:$4 sm:$0xff]  }
 0x3ea   : > { %6925 = vmatprep.subr.bf16.mxu0 %v14065_v37 }
 0x3ec   : > { %4827 = vmatpush1.bf16.msra.mxu1 %v14060_v59 }
 0x3ed   : > { %6926 = vmatpush1.bf16.msra.mxu0 %v14063_v38  ;;  %12013 = vmatprep.subr.msk.bf16.mxu1 %vm2608_vm0, %v17034_v1 }
 0x3ee   : > { %6927 = vmatprep.subr.bf16.mxu0 %v14069_v46 }
 0x3f0   : > { %4829 = vmatpush1.bf16.msra.mxu1 %v17042_v61 }
 0x3f1   : > { %6928 = vmatpush1.bf16.msra.mxu0 %v14067_v57  ;;  %5161 = vmatprep.subr.bf16.mxu1 %v14073_v54  ;;  %v14085_v57 = vld [vmem:[%s15630_s16 + $0x1470] ss:$16 sps:$4 sm:$0xff]   ;;  %v14093_v54 = vld [vmem:[%s15630_s16 + $0x1494] ss:$16 sps:$4 sm:$0xff]  }
 0x3f2   : > { %12350 = vmatprep.subr.msk.bf16.mxu0 %vm2608_vm0, %v17045_v39 }
 0x3f3   : > { %4837 = vmatmul.mubr.bf16.vlgmr.msra.gmra.mrb[36].mxu1 %v16475_v31  ;;  %v14084_v31 = vld [vmem:[%s15630_s16 + $0xb3c] ss:$16 sps:$4 sm:$0xff]  }
 0x3f4   : > { %5162 = vmatpush1.bf16.msra.mxu1 %v14071_v19  ;;  %12070 = vmatprep.mubr.msk.bf16.mxu1 %vm2604_vm1, %v16481_v36  ;;  %v17074_v36 = vrot.slane %v17058_v16, %v16169_v51 }
 0x3f5   : > { %6930 = vmatpush1.bf16.msra.mxu0 %v17054_v3  ;;  %5163 = vmatprep.subr.bf16.mxu1 %v14078_v26 }
 0x3f6   : > { %v3410_v29 = vpop.f32.mrb[20].mxu1  ;;  %7262 = vmatprep.subr.bf16.mxu0 %v14081_v25 }
 0x3f7   : > { %v8124_v37 = vsel %vm8058_vm2, %v3410_v29, 0.0  ;;  %v3412_v28 = vpop.f32.mrb[21].mxu1  ;;  %v14096_v29 = vld [vmem:[%s15630_s16 + $0xb7c] ss:$16 sps:$4 sm:$0xff]  }
 0x3f8   : > { %v17077_v59 = vadd.f32 %v8124_v37, %v16869_v48  ;;  %v8155_v38 = vsel %vm8058_vm2, %v3412_v28, 0.0  ;;  %6938 = vmatmul.mubr.bf16.vlgmr.msra.gmra.mrb[40].mxu0 %v17067_v21  ;;  %v3414_v47 = vpop.f32.mrb[22].mxu1  ;;  %5164 = vmatpush1.bf16.msra.mxu1 %v14076_v18  ;;  %v14090_v48 = vld [vmem:[%s15630_s16 + $0xb5c] ss:$16 sps:$4 sm:$0xff]   ;;  %v14099_v37 = vld [vmem:[%s15630_s16 + $0x14b4] ss:$16 sps:$4 sm:$0xff]  }
 0x3f9   : > { %v17083_v46 = vadd.f32 %v8155_v38, %v16874_v12  ;;  %7263 = vmatpush1.bf16.msra.mxu0 %v14079_v14  ;;  %12407 = vmatprep.mubr.msk.bf16.mxu0 %vm2604_vm1, %v17074_v36  ;;  %v3415_v45 = vpop.f32.mrb[23].mxu1  ;;  %v14088_v12 = vld [vmem:[%s15630_s16 + $0xb58] ss:$16 sps:$4 sm:$0xff]   ;;  %v14091_v14 = vld [vmem:[%s15630_s16 + $0x1490] ss:$16 sps:$4 sm:$0xff]  }
 0x3fa   : > { %5165 = vmatprep.subr.bf16.mxu1 %v14084_v31  ;;  %7264 = vmatprep.subr.bf16.mxu0 %v14087_v7  ;;  %v14097_v28 = vld [vmem:[%s15630_s16 + $0x14b0] ss:$16 sps:$4 sm:$0xff]   ;;  %v14102_v38 = vld [vmem:[%s15630_s16 + $0xb9c] ss:$16 sps:$4 sm:$0xff]   ;;  %v14105_v47 = vld [vmem:[%s15630_s16 + $0x14d4] ss:$16 sps:$4 sm:$0xff]  }
 0x3fb   : > { %v5511_v4 = vpop.f32.mrb[24].mxu0  ;;  %v14108_v45 = vld [vmem:[%s15630_s16 + $0xbbc] ss:$16 sps:$4 sm:$0xff]  }
 0x3fc   : > { %v8074_v62 = vsel %vm8058_vm2, %v5511_v4, 0.0  ;;  %v5513_v19 = vpop.f32.mrb[25].mxu0  ;;  %5166 = vmatpush1.bf16.msra.mxu1 %v14082_v32  ;;  %v14103_v32 = vld [vmem:[%s15630_s16 + $0x14d0] ss:$16 sps:$4 sm:$0xff]   ;;  %v14114_v4 = vld [vmem:[%s15630_s16 + $0xbdc] ss:$16 sps:$4 sm:$0xff]  }
 0x3fd   : > { %v17093_v26 = vadd.f32 %v8074_v62, %v17001_v49  ;;  %v8105_v25 = vsel %vm8058_vm2, %v5513_v19, 0.0  ;;  %v5515_v18 = vpop.f32.mrb[26].mxu0  ;;  %7265 = vmatpush1.bf16.msra.mxu0 %v14085_v57  ;;  %5167 = vmatprep.subr.bf16.mxu1 %v14090_v48  ;;  %v14094_v49 = vld [vmem:[%s15630_s16 + $0xb78] ss:$16 sps:$4 sm:$0xff]   ;;  %v14111_v57 = vld [vmem:[%s15630_s16 + $0x14f4] ss:$16 sps:$4 sm:$0xff]  }
 0x3fe   : > { %v17099_v31 = vadd.f32 %v8105_v25, %v17005_v40  ;;  %v5516_v7 = vpop.f32.mrb[27].mxu0  ;;  %7266 = vmatprep.subr.bf16.mxu0 %v14093_v54  ;;  %v14100_v40 = vld [vmem:[%s15630_s16 + $0xb98] ss:$16 sps:$4 sm:$0xff]   ;;  %v14109_v54 = vld [vmem:[%s15630_s16 + $0x14f0] ss:$16 sps:$4 sm:$0xff]  }
 0x3ff   : > { %v14106_v48 = vld [vmem:[%s15630_s16 + $0xbb8] ss:$16 sps:$4 sm:$0xff]   ;;  %v14117_v62 = vld [vmem:[%s15630_s16 + $0x1514] ss:$16 sps:$4 sm:$0xff]   ;;  %v14120_v25 = vld [vmem:[%s15630_s16 + $0xbfc] ss:$16 sps:$4 sm:$0xff]  }
 0x400   : > { %5168 = vmatpush1.bf16.msra.mxu1 %v14088_v12  ;;  %v14112_v19 = vld [vmem:[%s15630_s16 + $0xbd8] ss:$16 sps:$4 sm:$0xff]   ;;  %v14115_v12 = vld [vmem:[%s15630_s16 + $0x1510] ss:$16 sps:$4 sm:$0xff]   ;;  %v14123_v18 = vld [vmem:[%s15630_s16 + $0x1534] ss:$16 sps:$4 sm:$0xff]  }
 0x401   : > { %7267 = vmatpush1.bf16.msra.mxu0 %v14091_v14  ;;  %5169 = vmatprep.subr.bf16.mxu1 %v14096_v29  ;;  %v14118_v14 = vld [vmem:[%s15630_s16 + $0xbf8] ss:$16 sps:$4 sm:$0xff]   ;;  %v14121_v29 = vld [vmem:[%s15630_s16 + $0x1530] ss:$16 sps:$4 sm:$0xff]   ;;  %v14126_v7 = vld [vmem:[%s15630_s16 + $0xc1c] ss:$16 sps:$4 sm:$0xff]  }
 0x402   : > { %7268 = vmatprep.subr.bf16.mxu0 %v14099_v37  ;;  %v14129_v37 = vld [vmem:[%s15630_s16 + $0x1554] ss:$16 sps:$4 sm:$0xff]  }
 0x404   : > { %5170 = vmatpush1.bf16.msra.mxu1 %v14094_v49  ;;  %v14124_v49 = vld [vmem:[%s15630_s16 + $0xc18] ss:$16 sps:$4 sm:$0xff]  }
 0x405   : > { %7269 = vmatpush1.bf16.msra.mxu0 %v14097_v28  ;;  %5171 = vmatprep.subr.bf16.mxu1 %v14102_v38  ;;  %v14127_v28 = vld [vmem:[%s15630_s16 + $0x1550] ss:$16 sps:$4 sm:$0xff]   ;;  %v14132_v38 = vld [vmem:[%s15630_s16 + $0xc3c] ss:$16 sps:$4 sm:$0xff]  }
 0x406   : > { %7270 = vmatprep.subr.bf16.mxu0 %v14105_v47  ;;  %v14135_v47 = vld [vmem:[%s15630_s16 + $0x1574] ss:$16 sps:$4 sm:$0xff]  }
 0x408   : > { %5172 = vmatpush1.bf16.msra.mxu1 %v14100_v40  ;;  %v14130_v40 = vld [vmem:[%s15630_s16 + $0xc38] ss:$16 sps:$4 sm:$0xff]  }
 0x409   : > { %7271 = vmatpush1.bf16.msra.mxu0 %v14103_v32  ;;  %5173 = vmatprep.subr.bf16.mxu1 %v14108_v45  ;;  %v14133_v32 = vld [vmem:[%s15630_s16 + $0x1570] ss:$16 sps:$4 sm:$0xff]   ;;  %v14138_v45 = vld [vmem:[%s15630_s16 + $0xc5c] ss:$16 sps:$4 sm:$0xff]  }
 0x40a   : > { %7272 = vmatprep.subr.bf16.mxu0 %v14111_v57  ;;  %v14141_v57 = vld [vmem:[%s15630_s16 + $0x1594] ss:$16 sps:$4 sm:$0xff]  }
 0x40c   : > { %5174 = vmatpush1.bf16.msra.mxu1 %v14106_v48  ;;  %v734_v48 = vld [vmem:[%s15630_s16 + $0xc78] sm:$0x33] }
 0x40d   : > { %7273 = vmatpush1.bf16.msra.mxu0 %v14109_v54  ;;  %5175 = vmatprep.subr.bf16.mxu1 %v14114_v4  ;;  %v14136_v54 = vld [vmem:[%s15630_s16 + $0xc58] ss:$16 sps:$4 sm:$0xff]   ;;  %v14139_v4 = vld [vmem:[%s15630_s16 + $0x1590] ss:$16 sps:$4 sm:$0xff]  }
 0x40e   : > { %7274 = vmatprep.subr.bf16.mxu0 %v14117_v62  ;;  %v17133_v62 = vcombine.high %v734_v48, %v734_v48 }
 0x410   : > { %5176 = vmatpush1.bf16.msra.mxu1 %v14112_v19  ;;  %v12065_v19 = vcombine.low %v734_v48, %v734_v48  ;;  %v17171_v48 = vrot.slane %v17058_v16, %v16166_v50 }
 0x411   : > { %7275 = vmatpush1.bf16.msra.mxu0 %v14115_v12  ;;  %5177 = vmatprep.subr.bf16.mxu1 %v14120_v25  ;;  %v14145_v12 = vld [vmem:[%s15630_s16 + $0x15b4] ss:$16 sps:$4 sm:$0xff]  }
 0x412   : > { %7276 = vmatprep.subr.bf16.mxu0 %v14123_v18  ;;  %v1033_v25 = vld [vmem:[%s15630_s16 + $0x15d0] sm:$0x33] }
 0x413   : > { %v14143_v18 = vld [vmem:[%s15630_s16 + $0x15b0] ss:$16 sps:$4 sm:$0xff]  }
 0x414   : > { %5178 = vmatpush1.bf16.msra.mxu1 %v14118_v14  ;;  %v17141_v14 = vsel %vm2608_vm0, %v12065_v19, 0 }
 0x415   : > { %7277 = vmatpush1.bf16.msra.mxu0 %v14121_v29  ;;  %5179 = vmatprep.subr.bf16.mxu1 %v14126_v7  ;;  %v14149_v29 = vld [vmem:[%s15630_s16 + $0xc8c] ss:$16 sps:$4 sm:$0xff]   ;;  %v17144_v7 = vcombine.high %v1033_v25, %v1033_v25 }
 0x416   : > { %7278 = vmatprep.subr.bf16.mxu0 %v14129_v37  ;;  %v12402_v37 = vcombine.low %v1033_v25, %v1033_v25 }
 0x418   : > { %5180 = vmatpush1.bf16.msra.mxu1 %v14124_v49  ;;  %v17148_v49 = vcombine.high %v16736_v2, %v16736_v2 }
 0x419   : > { %7279 = vmatpush1.bf16.msra.mxu0 %v14127_v28  ;;  %5181 = vmatprep.subr.bf16.mxu1 %v14132_v38  ;;  %v14147_v28 = vld [vmem:[%s15630_s16 + $0xc88] ss:$16 sps:$4 sm:$0xff]   ;;  %v14154_v38 = vld [vmem:[%s15630_s16 + $0xcac] ss:$16 sps:$4 sm:$0xff]  }
 0x41a   : > { %7280 = vmatprep.subr.bf16.mxu0 %v14135_v47  ;;  %v17156_v47 = vsel %vm2608_vm0, %v12402_v37, 0  ;;  %v17162_v2 = vpack.i.b16 %v17148_v49, %v17148_v49 }
 0x41c   : > { %5182 = vmatpush1.bf16.msra.mxu1 %v14130_v40  ;;  %v14157_v40 = vld [vmem:[%s15630_s16 + $0x15e4] ss:$16 sps:$4 sm:$0xff]  }
 0x41d   : > { %7281 = vmatpush1.bf16.msra.mxu0 %v14133_v32  ;;  %5183 = vmatprep.subr.bf16.mxu1 %v14138_v45  ;;  %v14152_v32 = vld [vmem:[%s15630_s16 + $0xca8] ss:$16 sps:$4 sm:$0xff]   ;;  %v14155_v45 = vld [vmem:[%s15630_s16 + $0x15e0] ss:$16 sps:$4 sm:$0xff]  }
 0x41e   : > { %7282 = vmatprep.subr.bf16.mxu0 %v14141_v57 }
 0x420   : > { %5184 = vmatpush1.bf16.msra.mxu1 %v14136_v54  ;;  %v14163_v54 = vld [vmem:[%s15630_s16 + $0x1604] ss:$16 sps:$4 sm:$0xff]  }
 0x421   : > { %7283 = vmatpush1.bf16.msra.mxu0 %v14139_v4  ;;  %12069 = vmatprep.subr.msk.bf16.mxu1 %vm2608_vm0, %v17133_v62 }
 0x422   : > { %7284 = vmatprep.subr.bf16.mxu0 %v14145_v12 }
 0x424   : > { %5186 = vmatpush1.bf16.msra.mxu1 %v17141_v14 }
 0x425   : > { %7285 = vmatpush1.bf16.msra.mxu0 %v14143_v18  ;;  %5518 = vmatprep.subr.bf16.mxu1 %v14149_v29  ;;  %v14158_v18 = vld [vmem:[%s15630_s16 + $0xcc8] ss:$16 sps:$4 sm:$0xff]  }
 0x426   : > { %12406 = vmatprep.subr.msk.bf16.mxu0 %vm2608_vm0, %v17144_v7 }
 0x427   : > { %5194 = vmatmul.mubr.bf16.vlgmr.msra.gmra.mrb[40].mxu1 %v16573_v44  ;;  %v14160_v44 = vld [vmem:[%s15630_s16 + $0xccc] ss:$16 sps:$4 sm:$0xff]  }
 0x428   : > { %5519 = vmatpush1.bf16.msra.mxu1 %v14147_v28  ;;  %12127 = vmatprep.mubr.msk.bf16.mxu1 %vm2604_vm1, %v16581_v52  ;;  %v17178_v52 = vrot.slane %v17162_v2, %v16169_v51  ;;  %v14161_v28 = vld [vmem:[%s15630_s16 + $0x1600] ss:$16 sps:$4 sm:$0xff]  }
 0x429   : > { %7287 = vmatpush1.bf16.msra.mxu0 %v17156_v47  ;;  %5520 = vmatprep.subr.bf16.mxu1 %v14154_v38  ;;  %v14169_v38 = vld [vmem:[%s15630_s16 + $0x1624] ss:$16 sps:$4 sm:$0xff]  }
 0x42a   : > { %v3767_v57 = vpop.f32.mrb[24].mxu1  ;;  %7619 = vmatprep.subr.bf16.mxu0 %v14157_v40 }
 0x42b   : > { %v8126_v4 = vsel %vm8058_vm2, %v3767_v57, 0.0  ;;  %v3769_v19 = vpop.f32.mrb[25].mxu1 }
 0x42c   : > { %v17181_v12 = vadd.f32 %v8126_v4, %v17077_v59  ;;  %v8157_v25 = vsel %vm8058_vm2, %v3769_v19, 0.0  ;;  %7295 = vmatmul.mubr.bf16.vlgmr.msra.gmra.mrb[44].mxu0 %v17171_v48  ;;  %v3771_v16 = vpop.f32.mrb[26].mxu1  ;;  %5521 = vmatpush1.bf16.msra.mxu1 %v14152_v32  ;;  %v14166_v59 = vld [vmem:[%s15630_s16 + $0xcec] ss:$16 sps:$4 sm:$0xff]  }
 0x42d   : > { %v17187_v29 = vadd.f32 %v8157_v25, %v17083_v46  ;;  %7620 = vmatpush1.bf16.msra.mxu0 %v14155_v45  ;;  %12464 = vmatprep.mubr.msk.bf16.mxu0 %vm2604_vm1, %v17178_v52  ;;  %v3772_v37 = vpop.f32.mrb[27].mxu1  ;;  %v14164_v46 = vld [vmem:[%s15630_s16 + $0xce8] ss:$16 sps:$4 sm:$0xff]  }
 0x42e   : > { %5522 = vmatprep.subr.bf16.mxu1 %v14160_v44  ;;  %7621 = vmatprep.subr.bf16.mxu0 %v14163_v54  ;;  %v14167_v44 = vld [vmem:[%s15630_s16 + $0x1620] ss:$16 sps:$4 sm:$0xff]   ;;  %v14172_v54 = vld [vmem:[%s15630_s16 + $0xd0c] ss:$16 sps:$4 sm:$0xff]  }
 0x42f   : > { %v5868_v40 = vpop.f32.mrb[28].mxu0  ;;  %v14173_v37 = vld [vmem:[%s15630_s16 + $0x1640] ss:$16 sps:$4 sm:$0xff]  }
 0x430   : > { %v8076_v32 = vsel %vm8058_vm2, %v5868_v40, 0.0  ;;  %v5870_v57 = vpop.f32.mrb[29].mxu0  ;;  %5523 = vmatpush1.bf16.msra.mxu1 %v14158_v18  ;;  %v14175_v18 = vld [vmem:[%s15630_s16 + $0x1644] ss:$16 sps:$4 sm:$0xff]   ;;  %v14184_v40 = vld [vmem:[%s15630_s16 + $0xd4c] ss:$16 sps:$4 sm:$0xff]  }
 0x431   : > { %v17197_v45 = vadd.f32 %v8076_v32, %v17093_v26  ;;  %v8107_v4 = vsel %vm8058_vm2, %v5870_v57, 0.0  ;;  %v5872_v19 = vpop.f32.mrb[30].mxu0  ;;  %7622 = vmatpush1.bf16.msra.mxu0 %v14161_v28  ;;  %5524 = vmatprep.subr.bf16.mxu1 %v14166_v59  ;;  %v14170_v26 = vld [vmem:[%s15630_s16 + $0xd08] ss:$16 sps:$4 sm:$0xff]   ;;  %v14178_v28 = vld [vmem:[%s15630_s16 + $0xd2c] ss:$16 sps:$4 sm:$0xff]  }
 0x432   : > { %v17203_v25 = vadd.f32 %v8107_v4, %v17099_v31  ;;  %v5873_v16 = vpop.f32.mrb[31].mxu0  ;;  %7623 = vmatprep.subr.bf16.mxu0 %v14169_v38  ;;  %v14181_v59 = vld [vmem:[%s15630_s16 + $0x1664] ss:$16 sps:$4 sm:$0xff]   ;;  %v14176_v31 = vld [vmem:[%s15630_s16 + $0xd28] ss:$16 sps:$4 sm:$0xff]  }
 0x433   : > { %v14179_v38 = vld [vmem:[%s15630_s16 + $0x1660] ss:$16 sps:$4 sm:$0xff]   ;;  %v14187_v32 = vld [vmem:[%s15630_s16 + $0x1684] ss:$16 sps:$4 sm:$0xff]   ;;  %v14182_v57 = vld [vmem:[%s15630_s16 + $0xd48] ss:$16 sps:$4 sm:$0xff]  }
 0x434   : > { %5525 = vmatpush1.bf16.msra.mxu1 %v14164_v46  ;;  %v14185_v46 = vld [vmem:[%s15630_s16 + $0x1680] ss:$16 sps:$4 sm:$0xff]   ;;  %v14190_v4 = vld [vmem:[%s15630_s16 + $0xd6c] ss:$16 sps:$4 sm:$0xff]   ;;  %v14193_v19 = vld [vmem:[%s15630_s16 + $0x16a4] ss:$16 sps:$4 sm:$0xff]  }
 0x435   : > { %7624 = vmatpush1.bf16.msra.mxu0 %v14167_v44  ;;  %5526 = vmatprep.subr.bf16.mxu1 %v14172_v54  ;;  %v14188_v44 = vld [vmem:[%s15630_s16 + $0xd68] ss:$16 sps:$4 sm:$0xff]   ;;  %v14191_v54 = vld [vmem:[%s15630_s16 + $0x16a0] ss:$16 sps:$4 sm:$0xff]   ;;  %v14196_v16 = vld [vmem:[%s15630_s16 + $0xd8c] ss:$16 sps:$4 sm:$0xff]  }
 0x436   : > { %7625 = vmatprep.subr.bf16.mxu0 %v14175_v18  ;;  %v14199_v18 = vld [vmem:[%s15630_s16 + $0x16c4] ss:$16 sps:$4 sm:$0xff]  }
 0x438   : > { %5527 = vmatpush1.bf16.msra.mxu1 %v14170_v26  ;;  %v14194_v26 = vld [vmem:[%s15630_s16 + $0xd88] ss:$16 sps:$4 sm:$0xff]  }
 0x439   : > { %7626 = vmatpush1.bf16.msra.mxu0 %v14173_v37  ;;  %5528 = vmatprep.subr.bf16.mxu1 %v14178_v28  ;;  %v14197_v37 = vld [vmem:[%s15630_s16 + $0x16c0] ss:$16 sps:$4 sm:$0xff]   ;;  %v14202_v28 = vld [vmem:[%s15630_s16 + $0xdac] ss:$16 sps:$4 sm:$0xff]  }
 0x43a   : > { %7627 = vmatprep.subr.bf16.mxu0 %v14181_v59  ;;  %v14205_v59 = vld [vmem:[%s15630_s16 + $0x16e4] ss:$16 sps:$4 sm:$0xff]  }
 0x43c   : > { %5529 = vmatpush1.bf16.msra.mxu1 %v14176_v31  ;;  %v14200_v31 = vld [vmem:[%s15630_s16 + $0xda8] ss:$16 sps:$4 sm:$0xff]  }
 0x43d   : > { %7628 = vmatpush1.bf16.msra.mxu0 %v14179_v38  ;;  %5530 = vmatprep.subr.bf16.mxu1 %v14184_v40  ;;  %v14203_v38 = vld [vmem:[%s15630_s16 + $0x16e0] ss:$16 sps:$4 sm:$0xff]   ;;  %v14208_v40 = vld [vmem:[%s15630_s16 + $0xdcc] ss:$16 sps:$4 sm:$0xff]  }
 0x43e   : > { %7629 = vmatprep.subr.bf16.mxu0 %v14187_v32  ;;  %v14211_v32 = vld [vmem:[%s15630_s16 + $0x1704] ss:$16 sps:$4 sm:$0xff]  }
 0x440   : > { %5531 = vmatpush1.bf16.msra.mxu1 %v14182_v57  ;;  %v14206_v57 = vld [vmem:[%s15630_s16 + $0xdc8] ss:$16 sps:$4 sm:$0xff]  }
 0x441   : > { %7630 = vmatpush1.bf16.msra.mxu0 %v14185_v46  ;;  %5532 = vmatprep.subr.bf16.mxu1 %v14190_v4  ;;  %v14209_v46 = vld [vmem:[%s15630_s16 + $0x1700] ss:$16 sps:$4 sm:$0xff]   ;;  %v14214_v4 = vld [vmem:[%s15630_s16 + $0xdec] ss:$16 sps:$4 sm:$0xff]  }
 0x442   : > { %7631 = vmatprep.subr.bf16.mxu0 %v14193_v19  ;;  %v14217_v19 = vld [vmem:[%s15630_s16 + $0x1724] ss:$16 sps:$4 sm:$0xff]  }
 0x444   : > { %5533 = vmatpush1.bf16.msra.mxu1 %v14188_v44  ;;  %v784_v44 = vld [vmem:[%s15630_s16 + $0xe08] sm:$0x33] }
 0x445   : > { %7632 = vmatpush1.bf16.msra.mxu0 %v14191_v54  ;;  %5534 = vmatprep.subr.bf16.mxu1 %v14196_v16  ;;  %v14212_v54 = vld [vmem:[%s15630_s16 + $0xde8] ss:$16 sps:$4 sm:$0xff]   ;;  %v14215_v16 = vld [vmem:[%s15630_s16 + $0x1720] ss:$16 sps:$4 sm:$0xff]  }
 0x446   : > { %7633 = vmatprep.subr.bf16.mxu0 %v14199_v18  ;;  %v17237_v18 = vcombine.high %v784_v44, %v784_v44 }
 0x448   : > { %5535 = vmatpush1.bf16.msra.mxu1 %v14194_v26  ;;  %v12122_v26 = vcombine.low %v784_v44, %v784_v44  ;;  %v14233_v44 = vld [vmem:[%s15630_s16 + $0x1774] ss:$16 sps:$4 sm:$0xff]  }
 0x449   : > { %7634 = vmatpush1.bf16.msra.mxu0 %v14197_v37  ;;  %5536 = vmatprep.subr.bf16.mxu1 %v14202_v28  ;;  %v14221_v37 = vld [vmem:[%s15630_s16 + $0x1744] ss:$16 sps:$4 sm:$0xff]  }
 0x44a   : > { %7635 = vmatprep.subr.bf16.mxu0 %v14205_v59  ;;  %v1083_v28 = vld [vmem:[%s15630_s16 + $0x1760] sm:$0x33] }
 0x44b   : > { %v14219_v59 = vld [vmem:[%s15630_s16 + $0x1740] ss:$16 sps:$4 sm:$0xff]  }
 0x44c   : > { %5537 = vmatpush1.bf16.msra.mxu1 %v14200_v31  ;;  %v17245_v31 = vsel %vm2608_vm0, %v12122_v26, 0 }
 0x44d   : > { %7636 = vmatpush1.bf16.msra.mxu0 %v14203_v38  ;;  %5538 = vmatprep.subr.bf16.mxu1 %v14208_v40  ;;  %v14225_v38 = vld [vmem:[%s15630_s16 + $0xe1c] ss:$16 sps:$4 sm:$0xff]   ;;  %v17248_v40 = vcombine.high %v1083_v28, %v1083_v28 }
 0x44e   : > { %7637 = vmatprep.subr.bf16.mxu0 %v14211_v32  ;;  %v12459_v32 = vcombine.low %v1083_v28, %v1083_v28  ;;  %v14239_v28 = vld [vmem:[%s15630_s16 + $0x1794] ss:$16 sps:$4 sm:$0xff]  }
 0x450   : > { %5539 = vmatpush1.bf16.msra.mxu1 %v14206_v57  ;;  %v2343_v57 = vunpack.i.h.s16 %v17148_v49  ;;  %v14228_v49 = vld [vmem:[%s15630_s16 + $0xe38] ss:$16 sps:$4 sm:$0xff]  }
 0x451   : > { %7638 = vmatpush1.bf16.msra.mxu0 %v14209_v46  ;;  %5540 = vmatprep.subr.bf16.mxu1 %v14214_v4  ;;  %v14223_v46 = vld [vmem:[%s15630_s16 + $0xe18] ss:$16 sps:$4 sm:$0xff]   ;;  %v14230_v4 = vld [vmem:[%s15630_s16 + $0xe3c] ss:$16 sps:$4 sm:$0xff]  }
 0x452   : > { %7639 = vmatprep.subr.bf16.mxu0 %v14217_v19  ;;  %v17257_v19 = vsel %vm2608_vm0, %v12459_v32, 0 }
 0x453   : > { %20018 = vst [vmem:[#allocation26_spill] sm:$0xff] %v17257_v19 }
 0x454   : > { %5541 = vmatpush1.bf16.msra.mxu1 %v14212_v54  ;;  %v17261_v54 = vpack.i.b16 %v2343_v57, %v2343_v57 }
 0x455   : > { %7640 = vmatpush1.bf16.msra.mxu0 %v14215_v16  ;;  %12126 = vmatprep.subr.msk.bf16.mxu1 %vm2608_vm0, %v17237_v18  ;;  %v14231_v16 = vld [vmem:[%s15630_s16 + $0x1770] ss:$16 sps:$4 sm:$0xff]  }
 0x456   : > { %7641 = vmatprep.subr.bf16.mxu0 %v14221_v37  ;;  %v17270_v37 = vrot.slane %v17162_v2, %v16166_v50 }
 0x458   : > { %5543 = vmatpush1.bf16.msra.mxu1 %v17245_v31 }
 0x459   : > { %7642 = vmatpush1.bf16.msra.mxu0 %v14219_v59  ;;  %5875 = vmatprep.subr.bf16.mxu1 %v14225_v38 }
 0x45a   : > { %12463 = vmatprep.subr.msk.bf16.mxu0 %vm2608_vm0, %v17248_v40 }
 0x45b   : > { %5551 = vmatmul.mubr.bf16.vlgmr.msra.gmra.mrb[44].mxu1 %v16664_v5  ;;  %v14236_v5 = vld [vmem:[%s15630_s16 + $0xe5c] ss:$16 sps:$4 sm:$0xff]  }
 0x45c   : > { %5876 = vmatpush1.bf16.msra.mxu1 %v14223_v46  ;;  %12183 = vmatprep.mubr.msk.bf16.mxu1 %vm2604_vm1, %v16672_v63  ;;  %v17277_v63 = vrot.slane %v17261_v54, %v16169_v51  ;;  %v14234_v46 = vld [vmem:[%s15630_s16 + $0xe58] ss:$16 sps:$4 sm:$0xff]  }
 0x45d   : > { %7644 = vmatpush1.bf16.msra.mxu0 %v17257_v19  ;;  %5877 = vmatprep.subr.bf16.mxu1 %v14230_v4  ;;  %v14251_v19 = vld [vmem:[%s15630_s16 + $0x17d4] ss:$16 sps:$4 sm:$0xff]  }
 0x45e   : > { %v4124_v26 = vpop.f32.mrb[28].mxu1  ;;  %7976 = vmatprep.subr.bf16.mxu0 %v14233_v44 }
 0x45f   : > { %v8128_v59 = vsel %vm8058_vm2, %v4124_v26, 0.0  ;;  %v4126_v38 = vpop.f32.mrb[29].mxu1  ;;  %v14237_v26 = vld [vmem:[%s15630_s16 + $0x1790] ss:$16 sps:$4 sm:$0xff]  }
 0x460   : > { %v17280_v32 = vadd.f32 %v8128_v59, %v17181_v12  ;;  %v8159_v57 = vsel %vm8058_vm2, %v4126_v38, 0.0  ;;  %7652 = vmatmul.mubr.bf16.vlgmr.msra.gmra.mrb[48].mxu0 %v17270_v37  ;;  %v4128_v2 = vpop.f32.mrb[30].mxu1  ;;  %5878 = vmatpush1.bf16.msra.mxu1 %v14228_v49  ;;  %v14242_v12 = vld [vmem:[%s15630_s16 + $0xe7c] ss:$16 sps:$4 sm:$0xff]   ;;  %v14245_v59 = vld [vmem:[%s15630_s16 + $0x17b4] ss:$16 sps:$4 sm:$0xff]  }
 0x461   : > { %v17286_v4 = vadd.f32 %v8159_v57, %v17187_v29  ;;  %7977 = vmatpush1.bf16.msra.mxu0 %v14231_v16  ;;  %12520 = vmatprep.mubr.msk.bf16.mxu0 %vm2604_vm1, %v17277_v63  ;;  %v4129_v44 = vpop.f32.mrb[31].mxu1  ;;  %v14240_v29 = vld [vmem:[%s15630_s16 + $0xe78] ss:$16 sps:$4 sm:$0xff]  }
 0x462   : > { %5879 = vmatprep.subr.bf16.mxu1 %v14236_v5  ;;  %7978 = vmatprep.subr.bf16.mxu0 %v14239_v28  ;;  %v14243_v5 = vld [vmem:[%s15630_s16 + $0x17b0] ss:$16 sps:$4 sm:$0xff]   ;;  %v14248_v28 = vld [vmem:[%s15630_s16 + $0xe9c] ss:$16 sps:$4 sm:$0xff]  }
 0x463   : > { %v6225_v38 = vpop.f32.mrb[32].mxu0 }
 0x464   : > { %v8078_v49 = vsel %vm8058_vm2, %v6225_v38, 0.0  ;;  %v6227_v2 = vpop.f32.mrb[33].mxu0  ;;  %5880 = vmatpush1.bf16.msra.mxu1 %v14234_v46 }
 0x465   : > { %v17296_v16 = vadd.f32 %v8078_v49, %v17197_v45  ;;  %v8109_v57 = vsel %vm8058_vm2, %v6227_v2, 0.0  ;;  %v6229_v44 = vpop.f32.mrb[34].mxu0  ;;  %7979 = vmatpush1.bf16.msra.mxu0 %v14237_v26  ;;  %5881 = vmatprep.subr.bf16.mxu1 %v14242_v12  ;;  %v14246_v45 = vld [vmem:[%s15630_s16 + $0xe98] ss:$16 sps:$4 sm:$0xff]   ;;  %v14249_v49 = vld [vmem:[%s15630_s16 + $0x17d0] ss:$16 sps:$4 sm:$0xff]  }
 0x466   : > { %v17302_v38 = vadd.f32 %v8109_v57, %v17203_v25  ;;  %v6230_v46 = vpop.f32.mrb[35].mxu0  ;;  %7980 = vmatprep.subr.bf16.mxu0 %v14245_v59  ;;  %v14254_v26 = vld [vmem:[%s15630_s16 + $0xebc] ss:$16 sps:$4 sm:$0xff]   ;;  %v14257_v12 = vld [vmem:[%s15630_s16 + $0x17f4] ss:$16 sps:$4 sm:$0xff]  }
 0x467   : > { %v14252_v25 = vld [vmem:[%s15630_s16 + $0xeb8] ss:$16 sps:$4 sm:$0xff]   ;;  %v14255_v59 = vld [vmem:[%s15630_s16 + $0x17f0] ss:$16 sps:$4 sm:$0xff]   ;;  %v14260_v2 = vld [vmem:[%s15630_s16 + $0xedc] ss:$16 sps:$4 sm:$0xff]  }
 0x468   : > { %5882 = vmatpush1.bf16.msra.mxu1 %v14240_v29  ;;  %v14263_v29 = vld [vmem:[%s15630_s16 + $0x1814] ss:$16 sps:$4 sm:$0xff]   ;;  %v14258_v57 = vld [vmem:[%s15630_s16 + $0xed8] ss:$16 sps:$4 sm:$0xff]   ;;  %v14266_v44 = vld [vmem:[%s15630_s16 + $0xefc] ss:$16 sps:$4 sm:$0xff]  }
 0x469   : > { %7981 = vmatpush1.bf16.msra.mxu0 %v14243_v5  ;;  %5883 = vmatprep.subr.bf16.mxu1 %v14248_v28  ;;  %v14269_v5 = vld [vmem:[%s15630_s16 + $0x1834] ss:$16 sps:$4 sm:$0xff]   ;;  %v14264_v28 = vld [vmem:[%s15630_s16 + $0xef8] ss:$16 sps:$4 sm:$0xff]   ;;  %v14267_v46 = vld [vmem:[%s15630_s16 + $0x1830] ss:$16 sps:$4 sm:$0xff]  }
 0x46a   : > { %7982 = vmatprep.subr.bf16.mxu0 %v14251_v19  ;;  %v14261_v19 = vld [vmem:[%s15630_s16 + $0x1810] ss:$16 sps:$4 sm:$0xff]  }
 0x46c   : > { %5884 = vmatpush1.bf16.msra.mxu1 %v14246_v45  ;;  %v14272_v45 = vld [vmem:[%s15630_s16 + $0xf1c] ss:$16 sps:$4 sm:$0xff]  }
 0x46d   : > { %7983 = vmatpush1.bf16.msra.mxu0 %v14249_v49  ;;  %5885 = vmatprep.subr.bf16.mxu1 %v14254_v26  ;;  %v14275_v49 = vld [vmem:[%s15630_s16 + $0x1854] ss:$16 sps:$4 sm:$0xff]   ;;  %v14270_v26 = vld [vmem:[%s15630_s16 + $0xf18] ss:$16 sps:$4 sm:$0xff]  }
 0x46e   : > { %7984 = vmatprep.subr.bf16.mxu0 %v14257_v12  ;;  %v14273_v12 = vld [vmem:[%s15630_s16 + $0x1850] ss:$16 sps:$4 sm:$0xff]  }
 0x470   : > { %5886 = vmatpush1.bf16.msra.mxu1 %v14252_v25  ;;  %v14278_v25 = vld [vmem:[%s15630_s16 + $0xf3c] ss:$16 sps:$4 sm:$0xff]  }
 0x471   : > { %7985 = vmatpush1.bf16.msra.mxu0 %v14255_v59  ;;  %5887 = vmatprep.subr.bf16.mxu1 %v14260_v2  ;;  %v14281_v59 = vld [vmem:[%s15630_s16 + $0x1874] ss:$16 sps:$4 sm:$0xff]   ;;  %v14276_v2 = vld [vmem:[%s15630_s16 + $0xf38] ss:$16 sps:$4 sm:$0xff]  }
 0x472   : > { %7986 = vmatprep.subr.bf16.mxu0 %v14263_v29  ;;  %v14279_v29 = vld [vmem:[%s15630_s16 + $0x1870] ss:$16 sps:$4 sm:$0xff]  }
 0x474   : > { %5888 = vmatpush1.bf16.msra.mxu1 %v14258_v57  ;;  %v14284_v57 = vld [vmem:[%s15630_s16 + $0xf5c] ss:$16 sps:$4 sm:$0xff]  }
 0x475   : > { %7987 = vmatpush1.bf16.msra.mxu0 %v14261_v19  ;;  %5889 = vmatprep.subr.bf16.mxu1 %v14266_v44  ;;  %v14287_v19 = vld [vmem:[%s15630_s16 + $0x1894] ss:$16 sps:$4 sm:$0xff]   ;;  %v14282_v44 = vld [vmem:[%s15630_s16 + $0xf58] ss:$16 sps:$4 sm:$0xff]  }
 0x476   : > { %7988 = vmatprep.subr.bf16.mxu0 %v14269_v5  ;;  %v14285_v5 = vld [vmem:[%s15630_s16 + $0x1890] ss:$16 sps:$4 sm:$0xff]  }
 0x478   : > { %5890 = vmatpush1.bf16.msra.mxu1 %v14264_v28  ;;  %v14290_v28 = vld [vmem:[%s15630_s16 + $0xf7c] ss:$16 sps:$4 sm:$0xff]  }
 0x479   : > { %7989 = vmatpush1.bf16.msra.mxu0 %v14267_v46  ;;  %5891 = vmatprep.subr.bf16.mxu1 %v14272_v45  ;;  %v14293_v46 = vld [vmem:[%s15630_s16 + $0x18b4] ss:$16 sps:$4 sm:$0xff]   ;;  %v834_v45 = vld [vmem:[%s15630_s16 + $0xf98] sm:$0x33] }
 0x47a   : > { %7990 = vmatprep.subr.bf16.mxu0 %v14275_v49  ;;  %v14288_v49 = vld [vmem:[%s15630_s16 + $0xf78] ss:$16 sps:$4 sm:$0xff]  }
 0x47c   : > { %5892 = vmatpush1.bf16.msra.mxu1 %v14270_v26  ;;  %v14291_v26 = vld [vmem:[%s15630_s16 + $0x18b0] ss:$16 sps:$4 sm:$0xff]  }
 0x47d   : > { %7991 = vmatpush1.bf16.msra.mxu0 %v14273_v12  ;;  %5893 = vmatprep.subr.bf16.mxu1 %v14278_v25  ;;  %v17336_v12 = vcombine.high %v834_v45, %v834_v45  ;;  %v12178_v25 = vcombine.low %v834_v45, %v834_v45 }
 0x47e   : > { %7992 = vmatprep.subr.bf16.mxu0 %v14281_v59  ;;  %v14297_v59 = vld [vmem:[%s15630_s16 + $0x18d4] ss:$16 sps:$4 sm:$0xff]  }
 0x480   : > { %5894 = vmatpush1.bf16.msra.mxu1 %v14276_v2  ;;  %v1133_v2 = vld [vmem:[%s15630_s16 + $0x18f0] sm:$0x33] }
 0x481   : > { %7993 = vmatpush1.bf16.msra.mxu0 %v14279_v29  ;;  %5895 = vmatprep.subr.bf16.mxu1 %v14284_v57  ;;  %v14295_v29 = vld [vmem:[%s15630_s16 + $0x18d0] ss:$16 sps:$4 sm:$0xff]   ;;  %v17344_v57 = vsel %vm2608_vm0, %v12178_v25, 0 }
 0x482   : > { %7994 = vmatprep.subr.bf16.mxu0 %v14287_v19  ;;  %v14301_v19 = vld [vmem:[%s15630_s16 + $0xfac] ss:$16 sps:$4 sm:$0xff]   ;;  %v14307_v25 = vld [vmem:[%s19962_s0 + $0x480] ss:$8 sps:$4 sm:$0xff]  }
 0x484   : > { %5896 = vmatpush1.bf16.msra.mxu1 %v14282_v44  ;;  %v17347_v44 = vcombine.high %v1133_v2, %v1133_v2 }
 0x485   : > { %7995 = vmatpush1.bf16.msra.mxu0 %v14285_v5  ;;  %5897 = vmatprep.subr.bf16.mxu1 %v14290_v28  ;;  %v12515_v5 = vcombine.low %v1133_v2, %v1133_v2  ;;  %v14299_v28 = vld [vmem:[%s15630_s16 + $0xfa8] ss:$16 sps:$4 sm:$0xff]  }
 0x486   : > { %7996 = vmatprep.subr.bf16.mxu0 %v14293_v46  ;;  %v14306_v46 = vld [vmem:[%s15630_s16 + $0xfcc] ss:$16 sps:$4 sm:$0xff]  }
 0x487   : > { %v17355_v45 = vsel %vm2608_vm0, %v12515_v5, 0 }
 0x488   : > { %5898 = vmatpush1.bf16.msra.mxu1 %v14288_v49  ;;  %20019 = vst [vmem:[#allocation27_spill] sm:$0xff] %v17355_v45  ;;  %v14309_v49 = vld [vmem:[%s19962_s0 + $0x484] ss:$8 sps:$4 sm:$0xff]  }
 0x489   : > { %7997 = vmatpush1.bf16.msra.mxu0 %v14291_v26  ;;  %12182 = vmatprep.subr.msk.bf16.mxu1 %vm2608_vm0, %v17336_v12  ;;  %v14304_v26 = vld [vmem:[%s15630_s16 + $0xfc8] ss:$16 sps:$4 sm:$0xff]  }
 0x48a   : > { %7998 = vmatprep.subr.bf16.mxu0 %v14297_v59  ;;  %v14312_v59 = vld [vmem:[%s15630_s16 + $0xfec] ss:$16 sps:$4 sm:$0xff]  }
 0x48c   : > { %5900 = vmatpush1.bf16.msra.mxu1 %v17344_v57 }
 0x48d   : > { %7999 = vmatpush1.bf16.msra.mxu0 %v14295_v29  ;;  %6232 = vmatprep.subr.bf16.mxu1 %v14301_v19  ;;  %v17371_v29 = vrot.slane %v17261_v54, %v16166_v50  ;;  %v14310_v54 = vld [vmem:[%s15630_s16 + $0xfe8] ss:$16 sps:$4 sm:$0xff]  }
 0x48e   : > { %12519 = vmatprep.subr.msk.bf16.mxu0 %vm2608_vm0, %v17347_v44 }
 0x48f   : > { %5908 = vmatmul.mubr.bf16.vlgmr.msra.gmra.mrb[48].mxu1 %v16759_v34  ;;  %v14315_v34 = vld [vmem:[%s19962_s0 + $0x494] ss:$8 sps:$4 sm:$0xff]  }
 0x490   : > { %6233 = vmatpush1.bf16.msra.mxu1 %v14299_v28  ;;  %12240 = vmatprep.mubr.msk.bf16.mxu1 %vm2604_vm1, %v16768_v56 }
 0x491   : > { %8001 = vmatpush1.bf16.msra.mxu0 %v17355_v45  ;;  %6234 = vmatprep.subr.bf16.mxu1 %v14306_v46 }
 0x492   : > { %v4481_v2 = vpop.f32.mrb[32].mxu1  ;;  %9048 = vmatprep.subr.bf16.mxu0 %v14309_v49 }
 0x493   : > { %v8130_v56 = vsel %vm8058_vm2, %v4481_v2, 0.0  ;;  %v4483_v19 = vpop.f32.mrb[33].mxu1  ;;  %v14313_v2 = vld [vmem:[%s19962_s0 + $0x490] ss:$8 sps:$4 sm:$0xff]  }
 0x494   : > { %v17378_v5 = vadd.f32 %v8130_v56, %v17280_v32  ;;  %v8161_v28 = vsel %vm8058_vm2, %v4483_v19, 0.0  ;;  %8009 = vmatmul.mubr.bf16.vlgmr.msra.gmra.mrb[52].mxu0 %v17371_v29  ;;  %v4485_v46 = vpop.f32.mrb[34].mxu1  ;;  %6235 = vmatpush1.bf16.msra.mxu1 %v14304_v26  ;;  %v14318_v32 = vld [vmem:[%s15630_s16 + $0x100c] ss:$16 sps:$4 sm:$0xff]   ;;  %v14745_v26 = vld [vmem:[%s15625_s13 + $0x4] ss:$36 sps:$4 sm:$0xff]  }
 0x495   : > { %v17384_v49 = vadd.f32 %v8161_v28, %v17286_v4  ;;  %9049 = vmatpush1.bf16.msra.mxu0 %v14307_v25  ;;  %v4486_v45 = vpop.f32.mrb[35].mxu1  ;;  %6236 = vmatprep.subr.bf16.mxu1 %v14312_v59  ;;  %v14321_v56 = vld [vmem:[%s19962_s0 + $0x4a4] ss:$8 sps:$4 sm:$0xff]   ;;  %v14319_v46 = vld [vmem:[%s19962_s0 + $0x4a0] ss:$8 sps:$4 sm:$0xff]  }
 0x496   : > { %9050 = vmatprep.subr.bf16.mxu0 %v14315_v34  ;;  %9080 = vmatprep.mubr.bf16.mxu0 %v14745_v26  ;;  %v14316_v45 = vld [vmem:[%s15630_s16 + $0x1008] ss:$16 sps:$4 sm:$0xff]   ;;  %v14324_v26 = vld [vmem:[%s15630_s16 + $0x102c] ss:$16 sps:$4 sm:$0xff]  }
 0x497   : > { %v6582_v19 = vpop.f32.mrb[36].mxu0 }
 0x498   : > { %v8080_v4 = vsel %vm8058_vm2, %v6582_v19, 0.0  ;;  %v6584_v25 = vpop.f32.mrb[37].mxu0  ;;  %6237 = vmatpush1.bf16.msra.mxu1 %v14310_v54 }
 0x499   : > { %v17397_v59 = vadd.f32 %v8080_v4, %v17296_v16  ;;  %v8111_v28 = vsel %vm8058_vm2, %v6584_v25, 0.0  ;;  %v6586_v34 = vpop.f32.mrb[38].mxu0  ;;  %9051 = vmatpush1.bf16.msra.mxu0 %v14313_v2  ;;  %6238 = vmatprep.subr.bf16.mxu1 %v14318_v32  ;;  %v14327_v16 = vld [vmem:[%s19962_s0 + $0x4b4] ss:$8 sps:$4 sm:$0xff]   ;;  %v14322_v4 = vld [vmem:[%s15630_s16 + $0x1028] ss:$16 sps:$4 sm:$0xff]  }
 0x49a   : > { %v17405_v19 = vadd.f32 %v8111_v28, %v17302_v38  ;;  %v6587_v54 = vpop.f32.mrb[39].mxu0  ;;  %9052 = vmatprep.subr.bf16.mxu0 %v14321_v56  ;;  %v14325_v2 = vld [vmem:[%s19962_s0 + $0x4b0] ss:$8 sps:$4 sm:$0xff]   ;;  %v14330_v32 = vld [vmem:[%s15630_s16 + $0x104c] ss:$16 sps:$4 sm:$0xff]  }
 0x49b   : > { %v14333_v38 = vld [vmem:[%s19962_s0 + $0x4c4] ss:$8 sps:$4 sm:$0xff]   ;;  %v14328_v56 = vld [vmem:[%s15630_s16 + $0x1048] ss:$16 sps:$4 sm:$0xff]   ;;  %v14339_v28 = vld [vmem:[%s19962_s0 + $0x4d4] ss:$8 sps:$4 sm:$0xff]  }
 0x49c   : > { %6239 = vmatpush1.bf16.msra.mxu1 %v14316_v45  ;;  %v14331_v25 = vld [vmem:[%s19962_s0 + $0x4c0] ss:$8 sps:$4 sm:$0xff]   ;;  %v14336_v45 = vld [vmem:[%s15630_s16 + $0x106c] ss:$16 sps:$4 sm:$0xff]  }
 0x49d   : > { %9053 = vmatpush1.bf16.msra.mxu0 %v14319_v46  ;;  %6240 = vmatprep.subr.bf16.mxu1 %v14324_v26  ;;  %v14334_v34 = vld [vmem:[%s15630_s16 + $0x1068] ss:$16 sps:$4 sm:$0xff]   ;;  %v14342_v26 = vld [vmem:[%s15630_s16 + $0x108c] ss:$16 sps:$4 sm:$0xff]  }
 0x49e   : > { %9054 = vmatprep.subr.bf16.mxu0 %v14327_v16  ;;  %v14337_v46 = vld [vmem:[%s19962_s0 + $0x4d0] ss:$8 sps:$4 sm:$0xff]   ;;  %v14345_v54 = vld [vmem:[%s19962_s0 + $0x4e4] ss:$8 sps:$4 sm:$0xff]  }
 0x49f   : > { %v14340_v16 = vld [vmem:[%s15630_s16 + $0x1088] ss:$16 sps:$4 sm:$0xff]  }
 0x4a0   : > { %6241 = vmatpush1.bf16.msra.mxu1 %v14322_v4  ;;  %v14343_v4 = vld [vmem:[%s19962_s0 + $0x4e0] ss:$8 sps:$4 sm:$0xff]  }
 0x4a1   : > { %9055 = vmatpush1.bf16.msra.mxu0 %v14325_v2  ;;  %6242 = vmatprep.subr.bf16.mxu1 %v14330_v32  ;;  %v14348_v2 = vld [vmem:[%s15630_s16 + $0x10ac] ss:$16 sps:$4 sm:$0xff]  }
 0x4a2   : > { %9056 = vmatprep.subr.bf16.mxu0 %v14333_v38  ;;  %v14351_v32 = vld [vmem:[%s19962_s0 + $0x4f4] ss:$8 sps:$4 sm:$0xff]   ;;  %v14346_v38 = vld [vmem:[%s15630_s16 + $0x10a8] ss:$16 sps:$4 sm:$0xff]  }
 0x4a4   : > { %6243 = vmatpush1.bf16.msra.mxu1 %v14328_v56  ;;  %v14349_v56 = vld [vmem:[%s19962_s0 + $0x4f0] ss:$8 sps:$4 sm:$0xff]  }
 0x4a5   : > { %9057 = vmatpush1.bf16.msra.mxu0 %v14331_v25  ;;  %6244 = vmatprep.subr.bf16.mxu1 %v14336_v45  ;;  %v14354_v25 = vld [vmem:[%s15630_s16 + $0x10cc] ss:$16 sps:$4 sm:$0xff]  }
 0x4a6   : > { %9058 = vmatprep.subr.bf16.mxu0 %v14339_v28  ;;  %v14357_v45 = vld [vmem:[%s19962_s0 + $0x504] ss:$8 sps:$4 sm:$0xff]   ;;  %v14352_v28 = vld [vmem:[%s15630_s16 + $0x10c8] ss:$16 sps:$4 sm:$0xff]  }
 0x4a8   : > { %6245 = vmatpush1.bf16.msra.mxu1 %v14334_v34  ;;  %v14355_v34 = vld [vmem:[%s19962_s0 + $0x500] ss:$8 sps:$4 sm:$0xff]  }
 0x4a9   : > { %9059 = vmatpush1.bf16.msra.mxu0 %v14337_v46  ;;  %6246 = vmatprep.subr.bf16.mxu1 %v14342_v26  ;;  %v14360_v46 = vld [vmem:[%s15630_s16 + $0x10ec] ss:$16 sps:$4 sm:$0xff]  }
 0x4aa   : > { %9060 = vmatprep.subr.bf16.mxu0 %v14345_v54  ;;  %v14363_v26 = vld [vmem:[%s19962_s0 + $0x514] ss:$8 sps:$4 sm:$0xff]   ;;  %v14358_v54 = vld [vmem:[%s15630_s16 + $0x10e8] ss:$16 sps:$4 sm:$0xff]  }
 0x4ac   : > { %6247 = vmatpush1.bf16.msra.mxu1 %v14340_v16  ;;  %v14361_v16 = vld [vmem:[%s19962_s0 + $0x510] ss:$8 sps:$4 sm:$0xff]  }
 0x4ad   : > { %9061 = vmatpush1.bf16.msra.mxu0 %v14343_v4  ;;  %6248 = vmatprep.subr.bf16.mxu1 %v14348_v2  ;;  %v14366_v4 = vld [vmem:[%s15630_s16 + $0x110c] ss:$16 sps:$4 sm:$0xff]  }
 0x4ae   : > { %9062 = vmatprep.subr.bf16.mxu0 %v14351_v32  ;;  %v14369_v2 = vld [vmem:[%s19962_s0 + $0x524] ss:$8 sps:$4 sm:$0xff]  }
 0x4af   : > { %v884_v32 = vld [vmem:[%s15630_s16 + $0x1128] sm:$0x33] }
 0x4b0   : > { %6249 = vmatpush1.bf16.msra.mxu1 %v14346_v38  ;;  %v14364_v38 = vld [vmem:[%s15630_s16 + $0x1108] ss:$16 sps:$4 sm:$0xff]  }
 0x4b1   : > { %9063 = vmatpush1.bf16.msra.mxu0 %v14349_v56  ;;  %6250 = vmatprep.subr.bf16.mxu1 %v14354_v25  ;;  %v14367_v56 = vld [vmem:[%s19962_s0 + $0x520] ss:$8 sps:$4 sm:$0xff]   ;;  %v17471_v25 = vcombine.high %v884_v32, %v884_v32 }
 0x4b2   : > { %9064 = vmatprep.subr.bf16.mxu0 %v14357_v45  ;;  %v12235_v45 = vcombine.low %v884_v32, %v884_v32  ;;  %v14386_v32 = vld [vmem:[%s19962_s0 + $0x554] ss:$8 sps:$4 sm:$0xff]  }
 0x4b4   : > { %6251 = vmatpush1.bf16.msra.mxu1 %v14352_v28  ;;  %v14373_v28 = vld [vmem:[%s19962_s0 + $0x534] ss:$8 sps:$4 sm:$0xff]  }
 0x4b5   : > { %9065 = vmatpush1.bf16.msra.mxu0 %v14355_v34  ;;  %6252 = vmatprep.subr.bf16.mxu1 %v14360_v46  ;;  %v14371_v34 = vld [vmem:[%s19962_s0 + $0x530] ss:$8 sps:$4 sm:$0xff]   ;;  %v17482_v46 = vsel %vm2608_vm0, %v12235_v45, 0  ;;  %v14389_v45 = vld [vmem:[%s15630_s16 + $0x117c] ss:$16 sps:$4 sm:$0xff]  }
 0x4b6   : > { %9066 = vmatprep.subr.bf16.mxu0 %v14363_v26  ;;  %20020 = vst [vmem:[#allocation28_spill] sm:$0xff] %v17482_v46  ;;  %v14377_v26 = vld [vmem:[%s15630_s16 + $0x113c] ss:$16 sps:$4 sm:$0xff]  }
 0x4b8   : > { %6253 = vmatpush1.bf16.msra.mxu1 %v14358_v54  ;;  %v14380_v54 = vld [vmem:[%s19962_s0 + $0x544] ss:$8 sps:$4 sm:$0xff]  }
 0x4b9   : > { %9067 = vmatpush1.bf16.msra.mxu0 %v14361_v16  ;;  %6254 = vmatprep.subr.bf16.mxu1 %v14366_v4  ;;  %v14375_v16 = vld [vmem:[%s15630_s16 + $0x1138] ss:$16 sps:$4 sm:$0xff]  }
 0x4ba   : > { %9068 = vmatprep.subr.bf16.mxu0 %v14369_v2  ;;  %v14378_v4 = vld [vmem:[%s19962_s0 + $0x540] ss:$8 sps:$4 sm:$0xff]   ;;  %v14383_v2 = vld [vmem:[%s15630_s16 + $0x115c] ss:$16 sps:$4 sm:$0xff]  }
 0x4bc   : > { %6255 = vmatpush1.bf16.msra.mxu1 %v14364_v38  ;;  %v14381_v38 = vld [vmem:[%s15630_s16 + $0x1158] ss:$16 sps:$4 sm:$0xff]  }
 0x4bd   : > { %9069 = vmatpush1.bf16.msra.mxu0 %v14367_v56  ;;  %12239 = vmatprep.subr.msk.bf16.mxu1 %vm2608_vm0, %v17471_v25  ;;  %v14384_v56 = vld [vmem:[%s19962_s0 + $0x550] ss:$8 sps:$4 sm:$0xff]  }
 0x4be   : > { %9070 = vmatprep.subr.bf16.mxu0 %v14373_v28 }
 0x4c0   : > { %6257 = vmatpush1.bf16.msra.mxu1 %v17482_v46  ;;  %v14395_v46 = vld [vmem:[%s15630_s16 + $0x119c] ss:$16 sps:$4 sm:$0xff]  }
 0x4c1   : > { %9071 = vmatpush1.bf16.msra.mxu0 %v14371_v34  ;;  %6589 = vmatprep.subr.bf16.mxu1 %v14377_v26 }
 0x4c2   : > { %9072 = vmatprep.subr.bf16.mxu0 %v14380_v54 }
 0x4c3   : > { %6265 = vmatmul.mubr.bf16.vlgmr.msra.gmra.mrb[52].mxu1 %v16856_v43  ;;  %v14392_v43 = vld [vmem:[%s19962_s0 + $0x564] ss:$8 sps:$4 sm:$0xff]  }
 0x4c4   : > { %6590 = vmatpush1.bf16.msra.mxu1 %v14375_v16  ;;  %12296 = vmatprep.mubr.msk.bf16.mxu1 %vm2604_vm1, %v16865_v53 }
 0x4c5   : > { %9073 = vmatpush1.bf16.msra.mxu0 %v14378_v4  ;;  %6591 = vmatprep.subr.bf16.mxu1 %v14383_v2  ;;  %v14387_v4 = vld [vmem:[%s15630_s16 + $0x1178] ss:$16 sps:$4 sm:$0xff]  }
 0x4c6   : > { %v4838_v28 = vpop.f32.mrb[36].mxu1  ;;  %9074 = vmatprep.subr.bf16.mxu0 %v14386_v32 }
 0x4c7   : > { %v8132_v34 = vsel %vm8058_vm2, %v4838_v28, 0.0  ;;  %v4840_v26 = vpop.f32.mrb[37].mxu1  ;;  %v14390_v28 = vld [vmem:[%s19962_s0 + $0x560] ss:$8 sps:$4 sm:$0xff]  }
 0x4c8   : > { %v17510_v53 = vadd.f32 %v8132_v34, %v17378_v5  ;;  %v8163_v54 = vsel %vm8058_vm2, %v4840_v26, 0.0  ;;  %v4842_v16 = vpop.f32.mrb[38].mxu1  ;;  %6592 = vmatpush1.bf16.msra.mxu1 %v14381_v38  ;;  %v14398_v5 = vld [vmem:[%s19962_s0 + $0x574] ss:$8 sps:$4 sm:$0xff]  }
 0x4c9   : > { %v17515_v2 = vadd.f32 %v8163_v54, %v17384_v49  ;;  %9075 = vmatpush1.bf16.msra.mxu0 %v14384_v56  ;;  %v4843_v32 = vpop.f32.mrb[39].mxu1  ;;  %6593 = vmatprep.subr.bf16.mxu1 %v14389_v45  ;;  %v14393_v56 = vld [vmem:[%s15630_s16 + $0x1198] ss:$16 sps:$4 sm:$0xff]   ;;  %v14401_v16 = vld [vmem:[%s15630_s16 + $0x11bc] ss:$16 sps:$4 sm:$0xff]  }
 0x4ca   : > { %9076 = vmatprep.subr.bf16.mxu0 %v14392_v43  ;;  %v14396_v43 = vld [vmem:[%s19962_s0 + $0x570] ss:$8 sps:$4 sm:$0xff]  }
 0x4cb   : > { %v6939_v34 = vpop.f32.mrb[40].mxu0 }
 0x4cc   : > { %v8082_v38 = vsel %vm8058_vm2, %v6939_v34, 0.0  ;;  %v6941_v49 = vpop.f32.mrb[41].mxu0  ;;  %6594 = vmatpush1.bf16.msra.mxu1 %v14387_v4  ;;  %v14407_v34 = vld [vmem:[%s15630_s16 + $0x11dc] ss:$16 sps:$4 sm:$0xff]  }
 0x4cd   : > { %v17527_v45 = vadd.f32 %v8082_v38, %v17397_v59  ;;  %v8113_v26 = vsel %vm8058_vm2, %v6941_v49, 0.0  ;;  %v6943_v54 = vpop.f32.mrb[42].mxu0  ;;  %9077 = vmatpush1.bf16.msra.mxu0 %v14390_v28  ;;  %6595 = vmatprep.subr.bf16.mxu1 %v14395_v46  ;;  %v14404_v59 = vld [vmem:[%s19962_s0 + $0x584] ss:$8 sps:$4 sm:$0xff]   ;;  %v14399_v28 = vld [vmem:[%s15630_s16 + $0x11b8] ss:$16 sps:$4 sm:$0xff]  }
 0x4ce   : > { %v17535_v32 = vadd.f32 %v8113_v26, %v17405_v19  ;;  %v6944_v4 = vpop.f32.mrb[43].mxu0  ;;  %9078 = vmatprep.subr.bf16.mxu0 %v14398_v5  ;;  %v14402_v46 = vld [vmem:[%s19962_s0 + $0x580] ss:$8 sps:$4 sm:$0xff]   ;;  %v14410_v19 = vld [vmem:[%s19962_s0 + $0x594] ss:$8 sps:$4 sm:$0xff]  }
 0x4cf   : > { %v14746_v5 = vld [vmem:[%s15625_s13] ss:$36 sps:$4 sm:$0xff]   ;;  %v14405_v38 = vld [vmem:[%s15630_s16 + $0x11d8] ss:$16 sps:$4 sm:$0xff]   ;;  %v14747_v54 = vld [vmem:[%s15625_s13 + $0xc] ss:$36 sps:$4 sm:$0xff]  }
 0x4d0   : > { %6596 = vmatpush1.bf16.msra.mxu1 %v14393_v56  ;;  %v14408_v49 = vld [vmem:[%s19962_s0 + $0x590] ss:$8 sps:$4 sm:$0xff]   ;;  %v14413_v56 = vld [vmem:[%s15630_s16 + $0x11fc] ss:$16 sps:$4 sm:$0xff]  }
 0x4d1   : > { %9079 = vmatpush1.bf16.msra.mxu0 %v14396_v43  ;;  %6597 = vmatprep.subr.bf16.mxu1 %v14401_v16  ;;  %v14416_v26 = vld [vmem:[%s19962_s0 + $0x5a4] ss:$8 sps:$4 sm:$0xff]   ;;  %v14411_v43 = vld [vmem:[%s15630_s16 + $0x11f8] ss:$16 sps:$4 sm:$0xff]  }
 0x4d2   : > { %9091 = vmatprep.subr.bf16.mxu0 %v14404_v59  ;;  %v14414_v16 = vld [vmem:[%s19962_s0 + $0x5a0] ss:$8 sps:$4 sm:$0xff]   ;;  %v14419_v4 = vld [vmem:[%s15630_s16 + $0x121c] ss:$16 sps:$4 sm:$0xff]  }
 0x4d3   : > { %v14422_v59 = vld [vmem:[%s19962_s0 + $0x5b4] ss:$8 sps:$4 sm:$0xff]  }
 0x4d4   : > { %6598 = vmatpush1.bf16.msra.mxu1 %v14399_v28  ;;  %9081 = vmatmul.mubr.bf16.vlgmr.msra.gmra.mrb[56].mxu0 %v14746_v5  ;;  %v14417_v28 = vld [vmem:[%s15630_s16 + $0x1218] ss:$16 sps:$4 sm:$0xff]  }
 0x4d5   : > { %9092 = vmatpush1.bf16.msra.mxu0 %v14402_v46  ;;  %6599 = vmatprep.subr.bf16.mxu1 %v14407_v34  ;;  %v14420_v46 = vld [vmem:[%s19962_s0 + $0x5b0] ss:$8 sps:$4 sm:$0xff]   ;;  %v14425_v34 = vld [vmem:[%s15630_s16 + $0x123c] ss:$16 sps:$4 sm:$0xff]  }
 0x4d6   : > { %9093 = vmatprep.subr.bf16.mxu0 %v14410_v19  ;;  %9123 = vmatprep.mubr.bf16.mxu0 %v14747_v54  ;;  %v14428_v19 = vld [vmem:[%s19962_s0 + $0x5c4] ss:$8 sps:$4 sm:$0xff]   ;;  %v14423_v5 = vld [vmem:[%s15630_s16 + $0x1238] ss:$16 sps:$4 sm:$0xff]  }
 0x4d7   : > { %v14432_v54 = vld [vmem:[%s19962_s0 + $0x5d0] ss:$8 sps:$4 sm:$0xff]  }
 0x4d8   : > { %6600 = vmatpush1.bf16.msra.mxu1 %v14405_v38  ;;  %v14426_v38 = vld [vmem:[%s19962_s0 + $0x5c0] ss:$8 sps:$4 sm:$0xff]  }
 0x4d9   : > { %9094 = vmatpush1.bf16.msra.mxu0 %v14408_v49  ;;  %6601 = vmatprep.subr.bf16.mxu1 %v14413_v56  ;;  %v14431_v49 = vld [vmem:[%s15630_s16 + $0x125c] ss:$16 sps:$4 sm:$0xff]  }
 0x4da   : > { %9095 = vmatprep.subr.bf16.mxu0 %v14416_v26  ;;  %v14434_v56 = vld [vmem:[%s19962_s0 + $0x5d4] ss:$8 sps:$4 sm:$0xff]   ;;  %v14429_v26 = vld [vmem:[%s15630_s16 + $0x1258] ss:$16 sps:$4 sm:$0xff]  }
 0x4dc   : > { %6602 = vmatpush1.bf16.msra.mxu1 %v14411_v43  ;;  %v14437_v43 = vld [vmem:[%s15630_s16 + $0x127c] ss:$16 sps:$4 sm:$0xff]  }
 0x4dd   : > { %9096 = vmatpush1.bf16.msra.mxu0 %v14414_v16  ;;  %6603 = vmatprep.subr.bf16.mxu1 %v14419_v4  ;;  %v14440_v16 = vld [vmem:[%s19962_s0 + $0x5e4] ss:$8 sps:$4 sm:$0xff]   ;;  %v14435_v4 = vld [vmem:[%s15630_s16 + $0x1278] ss:$16 sps:$4 sm:$0xff]  }
 0x4de   : > { %9097 = vmatprep.subr.bf16.mxu0 %v14422_v59  ;;  %v14438_v59 = vld [vmem:[%s19962_s0 + $0x5e0] ss:$8 sps:$4 sm:$0xff]  }
 0x4e0   : > { %6604 = vmatpush1.bf16.msra.mxu1 %v14417_v28  ;;  %v14443_v28 = vld [vmem:[%s15630_s16 + $0x129c] ss:$16 sps:$4 sm:$0xff]  }
 0x4e1   : > { %9098 = vmatpush1.bf16.msra.mxu0 %v14420_v46  ;;  %6605 = vmatprep.subr.bf16.mxu1 %v14425_v34  ;;  %v14446_v46 = vld [vmem:[%s19962_s0 + $0x5f4] ss:$8 sps:$4 sm:$0xff]  }
 0x4e2   : > { %9099 = vmatprep.subr.bf16.mxu0 %v14428_v19  ;;  %v934_v34 = vld [vmem:[%s15630_s16 + $0x12b8] sm:$0x33] }
 0x4e3   : > { %v14441_v19 = vld [vmem:[%s15630_s16 + $0x1298] ss:$16 sps:$4 sm:$0xff]  }
 0x4e4   : > { %6606 = vmatpush1.bf16.msra.mxu1 %v14423_v5  ;;  %v14444_v5 = vld [vmem:[%s19962_s0 + $0x5f0] ss:$8 sps:$4 sm:$0xff]  }
 0x4e5   : > { %9100 = vmatpush1.bf16.msra.mxu0 %v14426_v38  ;;  %6607 = vmatprep.subr.bf16.mxu1 %v14431_v49  ;;  %v17603_v38 = vcombine.high %v934_v34, %v934_v34  ;;  %v12291_v49 = vcombine.low %v934_v34, %v934_v34  ;;  %v14458_v34 = vld [vmem:[%s15630_s16 + $0x12e8] ss:$16 sps:$4 sm:$0xff]  }
 0x4e6   : > { %9101 = vmatprep.subr.bf16.mxu0 %v14434_v56  ;;  %v14450_v56 = vld [vmem:[%s19962_s0 + $0x604] ss:$8 sps:$4 sm:$0xff]  }
 0x4e8   : > { %6608 = vmatpush1.bf16.msra.mxu1 %v14429_v26  ;;  %v14448_v26 = vld [vmem:[%s19962_s0 + $0x600] ss:$8 sps:$4 sm:$0xff]  }
 0x4e9   : > { %9102 = vmatpush1.bf16.msra.mxu0 %v14432_v54  ;;  %6609 = vmatprep.subr.bf16.mxu1 %v14437_v43  ;;  %v17614_v54 = vsel %vm2608_vm0, %v12291_v49, 0  ;;  %v14454_v43 = vld [vmem:[%s15630_s16 + $0x12cc] ss:$16 sps:$4 sm:$0xff]  }
 0x4ea   : > { %9103 = vmatprep.subr.bf16.mxu0 %v14440_v16  ;;  %v14457_v16 = vld [vmem:[%s19962_s0 + $0x614] ss:$8 sps:$4 sm:$0xff]  }
 0x4ec   : > { %6610 = vmatpush1.bf16.msra.mxu1 %v14435_v4  ;;  %v14452_v4 = vld [vmem:[%s15630_s16 + $0x12c8] ss:$16 sps:$4 sm:$0xff]  }
 0x4ed   : > { %9104 = vmatpush1.bf16.msra.mxu0 %v14438_v59  ;;  %6611 = vmatprep.subr.bf16.mxu1 %v14443_v28  ;;  %v14455_v59 = vld [vmem:[%s19962_s0 + $0x610] ss:$8 sps:$4 sm:$0xff]   ;;  %v14460_v28 = vld [vmem:[%s15630_s16 + $0x12ec] ss:$16 sps:$4 sm:$0xff]  }
 0x4ee   : > { %9105 = vmatprep.subr.bf16.mxu0 %v14446_v46  ;;  %v14463_v46 = vld [vmem:[%s19962_s0 + $0x624] ss:$8 sps:$4 sm:$0xff]  }
 0x4f0   : > { %6612 = vmatpush1.bf16.msra.mxu1 %v14441_v19  ;;  %v14461_v19 = vld [vmem:[%s19962_s0 + $0x620] ss:$8 sps:$4 sm:$0xff]  }
 0x4f1   : > { %9106 = vmatpush1.bf16.msra.mxu0 %v14444_v5  ;;  %12295 = vmatprep.subr.msk.bf16.mxu1 %vm2608_vm0, %v17603_v38  ;;  %v14466_v5 = vld [vmem:[%s15630_s16 + $0x130c] ss:$16 sps:$4 sm:$0xff]  }
 0x4f2   : > { %9107 = vmatprep.subr.bf16.mxu0 %v14450_v56 }
 0x4f4   : > { %6614 = vmatpush1.bf16.msra.mxu1 %v17614_v54 }
 0x4f5   : > { %9108 = vmatpush1.bf16.msra.mxu0 %v14448_v26  ;;  %6946 = vmatprep.subr.bf16.mxu1 %v14454_v43 }
 0x4f6   : > { %9109 = vmatprep.subr.bf16.mxu0 %v14457_v16 }
 0x4f7   : > { %6622 = vmatmul.mubr.bf16.vlgmr.msra.gmra.mrb[56].mxu1 %v16958_v9  ;;  %v14469_v9 = vld [vmem:[%s19962_s0 + $0x634] ss:$8 sps:$4 sm:$0xff]  }
 0x4f8   : > { %6947 = vmatpush1.bf16.msra.mxu1 %v14452_v4  ;;  %12353 = vmatprep.mubr.msk.bf16.mxu1 %vm2604_vm1, %v16965_v55  ;;  %v14464_v4 = vld [vmem:[%s15630_s16 + $0x1308] ss:$16 sps:$4 sm:$0xff]  }
 0x4f9   : > { %9110 = vmatpush1.bf16.msra.mxu0 %v14455_v59  ;;  %6948 = vmatprep.subr.bf16.mxu1 %v14460_v28 }
 0x4fa   : > { %v5195_v49 = vpop.f32.mrb[40].mxu1  ;;  %9111 = vmatprep.subr.bf16.mxu0 %v14463_v46  ;;  %v14467_v46 = vld [vmem:[%s19962_s0 + $0x630] ss:$8 sps:$4 sm:$0xff]  }
 0x4fb   : > { %v8134_v56 = vsel %vm8058_vm2, %v5195_v49, 0.0  ;;  %v5197_v26 = vpop.f32.mrb[41].mxu1  ;;  %v14472_v49 = vld [vmem:[%s15630_s16 + $0x132c] ss:$16 sps:$4 sm:$0xff]  }
 0x4fc   : > { %v17642_v55 = vadd.f32 %v8134_v56, %v17510_v53  ;;  %v8165_v43 = vsel %vm8058_vm2, %v5197_v26, 0.0  ;;  %v5199_v16 = vpop.f32.mrb[42].mxu1  ;;  %6949 = vmatpush1.bf16.msra.mxu1 %v14458_v34  ;;  %v14475_v53 = vld [vmem:[%s19962_s0 + $0x644] ss:$8 sps:$4 sm:$0xff]  }
 0x4fd   : > { %v17647_v59 = vadd.f32 %v8165_v43, %v17515_v2  ;;  %9112 = vmatpush1.bf16.msra.mxu0 %v14461_v19  ;;  %v5200_v28 = vpop.f32.mrb[43].mxu1  ;;  %6950 = vmatprep.subr.bf16.mxu1 %v14466_v5  ;;  %v14470_v19 = vld [vmem:[%s15630_s16 + $0x1328] ss:$16 sps:$4 sm:$0xff]   ;;  %v14478_v16 = vld [vmem:[%s15630_s16 + $0x134c] ss:$16 sps:$4 sm:$0xff]  }
 0x4fe   : > { %9113 = vmatprep.subr.bf16.mxu0 %v14469_v9  ;;  %v14473_v9 = vld [vmem:[%s19962_s0 + $0x640] ss:$8 sps:$4 sm:$0xff]  }
 0x4ff   : > { %v7296_v56 = vpop.f32.mrb[44].mxu0 }
 0x500   : > { %v8084_v34 = vsel %vm8058_vm2, %v7296_v56, 0.0  ;;  %v7298_v2 = vpop.f32.mrb[45].mxu0  ;;  %6951 = vmatpush1.bf16.msra.mxu1 %v14464_v4  ;;  %v14476_v56 = vld [vmem:[%s15630_s16 + $0x1348] ss:$16 sps:$4 sm:$0xff]  }
 0x501   : > { %v17659_v5 = vadd.f32 %v8084_v34, %v17527_v45  ;;  %v8115_v26 = vsel %vm8058_vm2, %v7298_v2, 0.0  ;;  %v7300_v43 = vpop.f32.mrb[46].mxu0  ;;  %9114 = vmatpush1.bf16.msra.mxu0 %v14467_v46  ;;  %6952 = vmatprep.subr.bf16.mxu1 %v14472_v49  ;;  %v14481_v45 = vld [vmem:[%s19962_s0 + $0x654] ss:$8 sps:$4 sm:$0xff]   ;;  %v14479_v46 = vld [vmem:[%s19962_s0 + $0x650] ss:$8 sps:$4 sm:$0xff]  }
 0x502   : > { %v17667_v28 = vadd.f32 %v8115_v26, %v17535_v32  ;;  %v7301_v4 = vpop.f32.mrb[47].mxu0  ;;  %9115 = vmatprep.subr.bf16.mxu0 %v14475_v53  ;;  %v14484_v49 = vld [vmem:[%s15630_s16 + $0x136c] ss:$16 sps:$4 sm:$0xff]   ;;  %v14482_v53 = vld [vmem:[%s15630_s16 + $0x1368] ss:$16 sps:$4 sm:$0xff]  }
 0x503   : > { %v14487_v32 = vld [vmem:[%s19962_s0 + $0x664] ss:$8 sps:$4 sm:$0xff]   ;;  %v14485_v34 = vld [vmem:[%s19962_s0 + $0x660] ss:$8 sps:$4 sm:$0xff]   ;;  %v14491_v43 = vld [vmem:[%s19962_s0 + $0x670] ss:$8 sps:$4 sm:$0xff]  }
 0x504   : > { %6953 = vmatpush1.bf16.msra.mxu1 %v14470_v19  ;;  %v14490_v2 = vld [vmem:[%s15630_s16 + $0x138c] ss:$16 sps:$4 sm:$0xff]   ;;  %v14488_v26 = vld [vmem:[%s15630_s16 + $0x1388] ss:$16 sps:$4 sm:$0xff]  }
 0x505   : > { %9116 = vmatpush1.bf16.msra.mxu0 %v14473_v9  ;;  %6954 = vmatprep.subr.bf16.mxu1 %v14478_v16  ;;  %v14493_v19 = vld [vmem:[%s19962_s0 + $0x674] ss:$8 sps:$4 sm:$0xff]   ;;  %v14499_v16 = vld [vmem:[%s19962_s0 + $0x684] ss:$8 sps:$4 sm:$0xff]   ;;  %v14494_v4 = vld [vmem:[%s15630_s16 + $0x13a8] ss:$16 sps:$4 sm:$0xff]  }
 0x506   : > { %9117 = vmatprep.subr.bf16.mxu0 %v14481_v45  ;;  %v14496_v9 = vld [vmem:[%s15630_s16 + $0x13ac] ss:$16 sps:$4 sm:$0xff]   ;;  %v14497_v45 = vld [vmem:[%s19962_s0 + $0x680] ss:$8 sps:$4 sm:$0xff]  }
 0x508   : > { %6955 = vmatpush1.bf16.msra.mxu1 %v14476_v56  ;;  %v14502_v56 = vld [vmem:[%s15630_s16 + $0x13cc] ss:$16 sps:$4 sm:$0xff]  }
 0x509   : > { %9118 = vmatpush1.bf16.msra.mxu0 %v14479_v46  ;;  %6956 = vmatprep.subr.bf16.mxu1 %v14484_v49  ;;  %v14505_v46 = vld [vmem:[%s19962_s0 + $0x694] ss:$8 sps:$4 sm:$0xff]   ;;  %v14748_v49 = vld [vmem:[%s15625_s13 + $0x8] ss:$36 sps:$4 sm:$0xff]  }
 0x50a   : > { %9119 = vmatprep.subr.bf16.mxu0 %v14487_v32  ;;  %v14500_v32 = vld [vmem:[%s15630_s16 + $0x13c8] ss:$16 sps:$4 sm:$0xff]  }
 0x50c   : > { %6957 = vmatpush1.bf16.msra.mxu1 %v14482_v53  ;;  %v14503_v53 = vld [vmem:[%s19962_s0 + $0x690] ss:$8 sps:$4 sm:$0xff]  }
 0x50d   : > { %9120 = vmatpush1.bf16.msra.mxu0 %v14485_v34  ;;  %6958 = vmatprep.subr.bf16.mxu1 %v14490_v2  ;;  %v14508_v34 = vld [vmem:[%s15630_s16 + $0x13ec] ss:$16 sps:$4 sm:$0xff]  }
 0x50e   : > { %9121 = vmatprep.subr.bf16.mxu0 %v14493_v19  ;;  %v14511_v2 = vld [vmem:[%s19962_s0 + $0x6a4] ss:$8 sps:$4 sm:$0xff]   ;;  %v14749_v19 = vld [vmem:[%s15625_s13 + $0x14] ss:$36 sps:$4 sm:$0xff]  }
 0x510   : > { %6959 = vmatpush1.bf16.msra.mxu1 %v14488_v26  ;;  %v14506_v26 = vld [vmem:[%s15630_s16 + $0x13e8] ss:$16 sps:$4 sm:$0xff]  }
 0x511   : > { %9122 = vmatpush1.bf16.msra.mxu0 %v14491_v43  ;;  %6960 = vmatprep.subr.bf16.mxu1 %v14496_v9  ;;  %v14509_v43 = vld [vmem:[%s19962_s0 + $0x6a0] ss:$8 sps:$4 sm:$0xff]   ;;  %v14514_v9 = vld [vmem:[%s15630_s16 + $0x140c] ss:$16 sps:$4 sm:$0xff]  }
 0x512   : > { %9134 = vmatprep.subr.bf16.mxu0 %v14499_v16  ;;  %v14517_v16 = vld [vmem:[%s19962_s0 + $0x6b4] ss:$8 sps:$4 sm:$0xff]  }
 0x514   : > { %6961 = vmatpush1.bf16.msra.mxu1 %v14494_v4  ;;  %9124 = vmatmul.mubr.bf16.vlgmr.msra.gmra.mrb[56].mxu0 %v14748_v49  ;;  %v14512_v4 = vld [vmem:[%s15630_s16 + $0x1408] ss:$16 sps:$4 sm:$0xff]  }
 0x515   : > { %9135 = vmatpush1.bf16.msra.mxu0 %v14497_v45  ;;  %6962 = vmatprep.subr.bf16.mxu1 %v14502_v56  ;;  %v14515_v45 = vld [vmem:[%s19962_s0 + $0x6b0] ss:$8 sps:$4 sm:$0xff]   ;;  %v14520_v56 = vld [vmem:[%s15630_s16 + $0x142c] ss:$16 sps:$4 sm:$0xff]  }
 0x516   : > { %9136 = vmatprep.subr.bf16.mxu0 %v14505_v46  ;;  %9166 = vmatprep.mubr.bf16.mxu0 %v14749_v19  ;;  %v14523_v46 = vld [vmem:[%s19962_s0 + $0x6c4] ss:$8 sps:$4 sm:$0xff]   ;;  %v14527_v19 = vld [vmem:[%s19962_s0 + $0x6d4] ss:$8 sps:$4 sm:$0xff]  }
 0x517   : > { %v984_v49 = vld [vmem:[%s15630_s16 + $0x1448] sm:$0x33] }
 0x518   : > { %6963 = vmatpush1.bf16.msra.mxu1 %v14500_v32  ;;  %v14518_v32 = vld [vmem:[%s15630_s16 + $0x1428] ss:$16 sps:$4 sm:$0xff]  }
 0x519   : > { %9137 = vmatpush1.bf16.msra.mxu0 %v14503_v53  ;;  %6964 = vmatprep.subr.bf16.mxu1 %v14508_v34  ;;  %v14521_v53 = vld [vmem:[%s19962_s0 + $0x6c0] ss:$8 sps:$4 sm:$0xff]   ;;  %v17735_v34 = vcombine.high %v984_v49, %v984_v49 }
 0x51a   : > { %9138 = vmatprep.subr.bf16.mxu0 %v14511_v2  ;;  %v12348_v2 = vcombine.low %v984_v49, %v984_v49  ;;  %v14535_v49 = vld [vmem:[%s15630_s16 + $0x1478] ss:$16 sps:$4 sm:$0xff]  }
 0x51c   : > { %6965 = vmatpush1.bf16.msra.mxu1 %v14506_v26  ;;  %v14525_v26 = vld [vmem:[%s19962_s0 + $0x6d0] ss:$8 sps:$4 sm:$0xff]  }
 0x51d   : > { %9139 = vmatpush1.bf16.msra.mxu0 %v14509_v43  ;;  %6966 = vmatprep.subr.bf16.mxu1 %v14514_v9  ;;  %v17746_v43 = vsel %vm2608_vm0, %v12348_v2, 0  ;;  %v14531_v9 = vld [vmem:[%s15630_s16 + $0x145c] ss:$16 sps:$4 sm:$0xff]  }
 0x51e   : > { %9140 = vmatprep.subr.bf16.mxu0 %v14517_v16  ;;  %v14534_v16 = vld [vmem:[%s19962_s0 + $0x6e4] ss:$8 sps:$4 sm:$0xff]  }
 0x520   : > { %6967 = vmatpush1.bf16.msra.mxu1 %v14512_v4  ;;  %v14529_v4 = vld [vmem:[%s15630_s16 + $0x1458] ss:$16 sps:$4 sm:$0xff]  }
 0x521   : > { %9141 = vmatpush1.bf16.msra.mxu0 %v14515_v45  ;;  %6968 = vmatprep.subr.bf16.mxu1 %v14520_v56  ;;  %v14532_v45 = vld [vmem:[%s19962_s0 + $0x6e0] ss:$8 sps:$4 sm:$0xff]   ;;  %v14537_v56 = vld [vmem:[%s15630_s16 + $0x147c] ss:$16 sps:$4 sm:$0xff]  }
 0x522   : > { %9142 = vmatprep.subr.bf16.mxu0 %v14523_v46  ;;  %v14540_v46 = vld [vmem:[%s19962_s0 + $0x6f4] ss:$8 sps:$4 sm:$0xff]  }
 0x524   : > { %6969 = vmatpush1.bf16.msra.mxu1 %v14518_v32  ;;  %v14538_v32 = vld [vmem:[%s19962_s0 + $0x6f0] ss:$8 sps:$4 sm:$0xff]  }
 0x525   : > { %9143 = vmatpush1.bf16.msra.mxu0 %v14521_v53  ;;  %12352 = vmatprep.subr.msk.bf16.mxu1 %vm2608_vm0, %v17735_v34  ;;  %v14543_v53 = vld [vmem:[%s15630_s16 + $0x149c] ss:$16 sps:$4 sm:$0xff]  }
 0x526   : > { %9144 = vmatprep.subr.bf16.mxu0 %v14527_v19 }
 0x528   : > { %6971 = vmatpush1.bf16.msra.mxu1 %v17746_v43 }
 0x529   : > { %9145 = vmatpush1.bf16.msra.mxu0 %v14525_v26  ;;  %7303 = vmatprep.subr.bf16.mxu1 %v14531_v9 }
 0x52a   : > { %9146 = vmatprep.subr.bf16.mxu0 %v14534_v16 }
 0x52b   : > { %6979 = vmatmul.mubr.bf16.vlgmr.msra.gmra.mrb[60].mxu1 %v17067_v21  ;;  %v14546_v21 = vld [vmem:[%s19962_s0 + $0x704] ss:$8 sps:$4 sm:$0xff]  }
 0x52c   : > { %7304 = vmatpush1.bf16.msra.mxu1 %v14529_v4  ;;  %12409 = vmatprep.mubr.msk.bf16.mxu1 %vm2604_vm1, %v17074_v36  ;;  %v14541_v4 = vld [vmem:[%s15630_s16 + $0x1498] ss:$16 sps:$4 sm:$0xff]  }
 0x52d   : > { %9147 = vmatpush1.bf16.msra.mxu0 %v14532_v45  ;;  %7305 = vmatprep.subr.bf16.mxu1 %v14537_v56 }
 0x52e   : > { %v5552_v2 = vpop.f32.mrb[44].mxu1  ;;  %9148 = vmatprep.subr.bf16.mxu0 %v14540_v46  ;;  %v14544_v46 = vld [vmem:[%s19962_s0 + $0x700] ss:$8 sps:$4 sm:$0xff]  }
 0x52f   : > { %v8136_v19 = vsel %vm8058_vm2, %v5552_v2, 0.0  ;;  %v5554_v26 = vpop.f32.mrb[45].mxu1  ;;  %v14549_v2 = vld [vmem:[%s15630_s16 + $0x14bc] ss:$16 sps:$4 sm:$0xff]  }
 0x530   : > { %v17774_v36 = vadd.f32 %v8136_v19, %v17642_v55  ;;  %v8167_v9 = vsel %vm8058_vm2, %v5554_v26, 0.0  ;;  %v5556_v16 = vpop.f32.mrb[46].mxu1  ;;  %7306 = vmatpush1.bf16.msra.mxu1 %v14535_v49  ;;  %v14552_v55 = vld [vmem:[%s19962_s0 + $0x714] ss:$8 sps:$4 sm:$0xff]  }
 0x531   : > { %v17779_v45 = vadd.f32 %v8167_v9, %v17647_v59  ;;  %9149 = vmatpush1.bf16.msra.mxu0 %v14538_v32  ;;  %v5557_v56 = vpop.f32.mrb[47].mxu1  ;;  %7307 = vmatprep.subr.bf16.mxu1 %v14543_v53  ;;  %v14547_v32 = vld [vmem:[%s15630_s16 + $0x14b8] ss:$16 sps:$4 sm:$0xff]   ;;  %v14555_v16 = vld [vmem:[%s15630_s16 + $0x14dc] ss:$16 sps:$4 sm:$0xff]  }
 0x532   : > { %9150 = vmatprep.subr.bf16.mxu0 %v14546_v21  ;;  %v14550_v21 = vld [vmem:[%s19962_s0 + $0x710] ss:$8 sps:$4 sm:$0xff]  }
 0x533   : > { %v7653_v19 = vpop.f32.mrb[48].mxu0 }
 0x534   : > { %v8086_v49 = vsel %vm8058_vm2, %v7653_v19, 0.0  ;;  %v7655_v59 = vpop.f32.mrb[49].mxu0  ;;  %7308 = vmatpush1.bf16.msra.mxu1 %v14541_v4  ;;  %v14553_v19 = vld [vmem:[%s15630_s16 + $0x14d8] ss:$16 sps:$4 sm:$0xff]  }
 0x535   : > { %v17791_v53 = vadd.f32 %v8086_v49, %v17659_v5  ;;  %v8117_v26 = vsel %vm8058_vm2, %v7655_v59, 0.0  ;;  %v7657_v9 = vpop.f32.mrb[50].mxu0  ;;  %9151 = vmatpush1.bf16.msra.mxu0 %v14544_v46  ;;  %7309 = vmatprep.subr.bf16.mxu1 %v14549_v2  ;;  %v14558_v5 = vld [vmem:[%s19962_s0 + $0x724] ss:$8 sps:$4 sm:$0xff]   ;;  %v14556_v46 = vld [vmem:[%s19962_s0 + $0x720] ss:$8 sps:$4 sm:$0xff]  }
 0x536   : > { %v17799_v56 = vadd.f32 %v8117_v26, %v17667_v28  ;;  %v7658_v4 = vpop.f32.mrb[51].mxu0  ;;  %9152 = vmatprep.subr.bf16.mxu0 %v14552_v55  ;;  %v14561_v2 = vld [vmem:[%s15630_s16 + $0x14fc] ss:$16 sps:$4 sm:$0xff]   ;;  %v14559_v55 = vld [vmem:[%s15630_s16 + $0x14f8] ss:$16 sps:$4 sm:$0xff]  }
 0x537   : > { %v14564_v28 = vld [vmem:[%s19962_s0 + $0x734] ss:$8 sps:$4 sm:$0xff]   ;;  %v14562_v49 = vld [vmem:[%s19962_s0 + $0x730] ss:$8 sps:$4 sm:$0xff]   ;;  %v14568_v9 = vld [vmem:[%s19962_s0 + $0x740] ss:$8 sps:$4 sm:$0xff]  }
 0x538   : > { %7310 = vmatpush1.bf16.msra.mxu1 %v14547_v32  ;;  %v14567_v59 = vld [vmem:[%s15630_s16 + $0x151c] ss:$16 sps:$4 sm:$0xff]   ;;  %v14565_v26 = vld [vmem:[%s15630_s16 + $0x1518] ss:$16 sps:$4 sm:$0xff]  }
 0x539   : > { %9153 = vmatpush1.bf16.msra.mxu0 %v14550_v21  ;;  %7311 = vmatprep.subr.bf16.mxu1 %v14555_v16  ;;  %v14570_v32 = vld [vmem:[%s19962_s0 + $0x744] ss:$8 sps:$4 sm:$0xff]   ;;  %v14576_v16 = vld [vmem:[%s19962_s0 + $0x754] ss:$8 sps:$4 sm:$0xff]   ;;  %v14571_v4 = vld [vmem:[%s15630_s16 + $0x1538] ss:$16 sps:$4 sm:$0xff]  }
 0x53a   : > { %9154 = vmatprep.subr.bf16.mxu0 %v14558_v5  ;;  %v14573_v21 = vld [vmem:[%s15630_s16 + $0x153c] ss:$16 sps:$4 sm:$0xff]   ;;  %v14574_v5 = vld [vmem:[%s19962_s0 + $0x750] ss:$8 sps:$4 sm:$0xff]  }
 0x53c   : > { %7312 = vmatpush1.bf16.msra.mxu1 %v14553_v19  ;;  %v14579_v19 = vld [vmem:[%s15630_s16 + $0x155c] ss:$16 sps:$4 sm:$0xff]  }
 0x53d   : > { %9155 = vmatpush1.bf16.msra.mxu0 %v14556_v46  ;;  %7313 = vmatprep.subr.bf16.mxu1 %v14561_v2  ;;  %v14582_v46 = vld [vmem:[%s19962_s0 + $0x764] ss:$8 sps:$4 sm:$0xff]   ;;  %v14577_v2 = vld [vmem:[%s15630_s16 + $0x1558] ss:$16 sps:$4 sm:$0xff]  }
 0x53e   : > { %9156 = vmatprep.subr.bf16.mxu0 %v14564_v28  ;;  %v14580_v28 = vld [vmem:[%s19962_s0 + $0x760] ss:$8 sps:$4 sm:$0xff]  }
 0x540   : > { %7314 = vmatpush1.bf16.msra.mxu1 %v14559_v55  ;;  %v14585_v55 = vld [vmem:[%s15630_s16 + $0x157c] ss:$16 sps:$4 sm:$0xff]  }
 0x541   : > { %9157 = vmatpush1.bf16.msra.mxu0 %v14562_v49  ;;  %7315 = vmatprep.subr.bf16.mxu1 %v14567_v59  ;;  %v14588_v49 = vld [vmem:[%s19962_s0 + $0x774] ss:$8 sps:$4 sm:$0xff]   ;;  %v14583_v59 = vld [vmem:[%s15630_s16 + $0x1578] ss:$16 sps:$4 sm:$0xff]  }
 0x542   : > { %9158 = vmatprep.subr.bf16.mxu0 %v14570_v32  ;;  %v14586_v32 = vld [vmem:[%s19962_s0 + $0x770] ss:$8 sps:$4 sm:$0xff]  }
 0x544   : > { %7316 = vmatpush1.bf16.msra.mxu1 %v14565_v26  ;;  %v14591_v26 = vld [vmem:[%s15630_s16 + $0x159c] ss:$16 sps:$4 sm:$0xff]  }
 0x545   : > { %9159 = vmatpush1.bf16.msra.mxu0 %v14568_v9  ;;  %7317 = vmatprep.subr.bf16.mxu1 %v14573_v21  ;;  %v14594_v9 = vld [vmem:[%s19962_s0 + $0x784] ss:$8 sps:$4 sm:$0xff]   ;;  %v14589_v21 = vld [vmem:[%s15630_s16 + $0x1598] ss:$16 sps:$4 sm:$0xff]  }
 0x546   : > { %9160 = vmatprep.subr.bf16.mxu0 %v14576_v16  ;;  %v14592_v16 = vld [vmem:[%s19962_s0 + $0x780] ss:$8 sps:$4 sm:$0xff]  }
 0x548   : > { %7318 = vmatpush1.bf16.msra.mxu1 %v14571_v4  ;;  %v14597_v4 = vld [vmem:[%s15630_s16 + $0x15bc] ss:$16 sps:$4 sm:$0xff]  }
 0x549   : > { %9161 = vmatpush1.bf16.msra.mxu0 %v14574_v5  ;;  %7319 = vmatprep.subr.bf16.mxu1 %v14579_v19  ;;  %v14600_v5 = vld [vmem:[%s19962_s0 + $0x794] ss:$8 sps:$4 sm:$0xff]  }
 0x54a   : > { %9162 = vmatprep.subr.bf16.mxu0 %v14582_v46  ;;  %v1034_v19 = vld [vmem:[%s15630_s16 + $0x15d8] sm:$0x33]  ;;  %v14750_v46 = vld [vmem:[%s15625_s13 + $0x10] ss:$36 sps:$4 sm:$0xff]  }
 0x54c   : > { %7320 = vmatpush1.bf16.msra.mxu1 %v14577_v2  ;;  %v14595_v2 = vld [vmem:[%s15630_s16 + $0x15b8] ss:$16 sps:$4 sm:$0xff]  }
 0x54d   : > { %9163 = vmatpush1.bf16.msra.mxu0 %v14580_v28  ;;  %7321 = vmatprep.subr.bf16.mxu1 %v14585_v55  ;;  %v14598_v28 = vld [vmem:[%s19962_s0 + $0x790] ss:$8 sps:$4 sm:$0xff]   ;;  %v17866_v55 = vcombine.high %v1034_v19, %v1034_v19 }
 0x54e   : > { %9164 = vmatprep.subr.bf16.mxu0 %v14588_v49  ;;  %v12404_v49 = vcombine.low %v1034_v19, %v1034_v19  ;;  %v14614_v19 = vld [vmem:[%s15630_s16 + $0x160c] ss:$16 sps:$4 sm:$0xff]  }
 0x550   : > { %7322 = vmatpush1.bf16.msra.mxu1 %v14583_v59  ;;  %v14604_v59 = vld [vmem:[%s19962_s0 + $0x7a4] ss:$8 sps:$4 sm:$0xff]  }
 0x551   : > { %9165 = vmatpush1.bf16.msra.mxu0 %v14586_v32  ;;  %7323 = vmatprep.subr.bf16.mxu1 %v14591_v26  ;;  %v14751_v32 = vld [vmem:[%s15625_s13 + $0x1c] ss:$36 sps:$4 sm:$0xff]  }
 0x552   : > { %9177 = vmatprep.subr.bf16.mxu0 %v14594_v9  ;;  %v14602_v26 = vld [vmem:[%s19962_s0 + $0x7a0] ss:$8 sps:$4 sm:$0xff]   ;;  %v17878_v9 = vsel %vm2608_vm0, %v12404_v49, 0  ;;  %v14620_v49 = vld [vmem:[%s15630_s16 + $0x162c] ss:$16 sps:$4 sm:$0xff]  }
 0x554   : > { %7324 = vmatpush1.bf16.msra.mxu1 %v14589_v21  ;;  %9167 = vmatmul.mubr.bf16.vlgmr.msra.gmra.mrb[56].mxu0 %v14750_v46  ;;  %v14608_v21 = vld [vmem:[%s15630_s16 + $0x15ec] ss:$16 sps:$4 sm:$0xff]  }
 0x555   : > { %9178 = vmatpush1.bf16.msra.mxu0 %v14592_v16  ;;  %7325 = vmatprep.subr.bf16.mxu1 %v14597_v4  ;;  %v14611_v16 = vld [vmem:[%s19962_s0 + $0x7b4] ss:$8 sps:$4 sm:$0xff]   ;;  %v14606_v4 = vld [vmem:[%s15630_s16 + $0x15e8] ss:$16 sps:$4 sm:$0xff]   ;;  %v14617_v46 = vld [vmem:[%s19962_s0 + $0x7c4] ss:$8 sps:$4 sm:$0xff]  }
 0x556   : > { %9179 = vmatprep.subr.bf16.mxu0 %v14600_v5  ;;  %9209 = vmatprep.mubr.bf16.mxu0 %v14751_v32  ;;  %v14609_v5 = vld [vmem:[%s19962_s0 + $0x7b0] ss:$8 sps:$4 sm:$0xff]  }
 0x558   : > { %7326 = vmatpush1.bf16.msra.mxu1 %v14595_v2  ;;  %v14612_v2 = vld [vmem:[%s15630_s16 + $0x1608] ss:$16 sps:$4 sm:$0xff]  }
 0x559   : > { %9180 = vmatpush1.bf16.msra.mxu0 %v14598_v28  ;;  %12408 = vmatprep.subr.msk.bf16.mxu1 %vm2608_vm0, %v17866_v55  ;;  %v14615_v28 = vld [vmem:[%s19962_s0 + $0x7c0] ss:$8 sps:$4 sm:$0xff]  }
 0x55a   : > { %9181 = vmatprep.subr.bf16.mxu0 %v14604_v59 }
 0x55c   : > { %7328 = vmatpush1.bf16.msra.mxu1 %v17878_v9 }
 0x55d   : > { %9182 = vmatpush1.bf16.msra.mxu0 %v14602_v26  ;;  %7660 = vmatprep.subr.bf16.mxu1 %v14608_v21 }
 0x55e   : > { %9183 = vmatprep.subr.bf16.mxu0 %v14611_v16 }
 0x55f   : > { %7336 = vmatmul.mubr.bf16.vlgmr.msra.gmra.mrb[64].mxu1 %v17171_v48  ;;  %v14623_v48 = vld [vmem:[%s19962_s0 + $0x7d4] ss:$8 sps:$4 sm:$0xff]  }
 0x560   : > { %7661 = vmatpush1.bf16.msra.mxu1 %v14606_v4  ;;  %12466 = vmatprep.mubr.msk.bf16.mxu1 %vm2604_vm1, %v17178_v52  ;;  %v14618_v4 = vld [vmem:[%s15630_s16 + $0x1628] ss:$16 sps:$4 sm:$0xff]  }
 0x561   : > { %9184 = vmatpush1.bf16.msra.mxu0 %v14609_v5  ;;  %7662 = vmatprep.subr.bf16.mxu1 %v14614_v19 }
 0x562   : > { %v5909_v59 = vpop.f32.mrb[48].mxu1  ;;  %9185 = vmatprep.subr.bf16.mxu0 %v14617_v46  ;;  %v14621_v46 = vld [vmem:[%s19962_s0 + $0x7d0] ss:$8 sps:$4 sm:$0xff]  }
 0x563   : > { %v8138_v32 = vsel %vm8058_vm2, %v5909_v59, 0.0  ;;  %v5911_v26 = vpop.f32.mrb[49].mxu1  ;;  %v14626_v59 = vld [vmem:[%s15630_s16 + $0x164c] ss:$16 sps:$4 sm:$0xff]  }
 0x564   : > { %v17906_v52 = vadd.f32 %v8138_v32, %v17774_v36  ;;  %v8169_v21 = vsel %vm8058_vm2, %v5911_v26, 0.0  ;;  %v5913_v16 = vpop.f32.mrb[50].mxu1  ;;  %7663 = vmatpush1.bf16.msra.mxu1 %v14612_v2  ;;  %v14629_v36 = vld [vmem:[%s19962_s0 + $0x7e4] ss:$8 sps:$4 sm:$0xff]  }
 0x565   : > { %v17911_v5 = vadd.f32 %v8169_v21, %v17779_v45  ;;  %9186 = vmatpush1.bf16.msra.mxu0 %v14615_v28  ;;  %v5914_v19 = vpop.f32.mrb[51].mxu1  ;;  %7664 = vmatprep.subr.bf16.mxu1 %v14620_v49  ;;  %v14624_v28 = vld [vmem:[%s15630_s16 + $0x1648] ss:$16 sps:$4 sm:$0xff]   ;;  %v14632_v16 = vld [vmem:[%s15630_s16 + $0x166c] ss:$16 sps:$4 sm:$0xff]  }
 0x566   : > { %9187 = vmatprep.subr.bf16.mxu0 %v14623_v48  ;;  %v14627_v48 = vld [vmem:[%s19962_s0 + $0x7e0] ss:$8 sps:$4 sm:$0xff]  }
 0x567   : > { %v8010_v32 = vpop.f32.mrb[52].mxu0 }
 0x568   : > { %v8088_v2 = vsel %vm8058_vm2, %v8010_v32, 0.0  ;;  %v8012_v45 = vpop.f32.mrb[53].mxu0  ;;  %7665 = vmatpush1.bf16.msra.mxu1 %v14618_v4  ;;  %v14630_v32 = vld [vmem:[%s15630_s16 + $0x1668] ss:$16 sps:$4 sm:$0xff]  }
 0x569   : > { %v17923_v49 = vadd.f32 %v8088_v2, %v17791_v53  ;;  %v8119_v26 = vsel %vm8058_vm2, %v8012_v45, 0.0  ;;  %v8014_v21 = vpop.f32.mrb[54].mxu0  ;;  %9188 = vmatpush1.bf16.msra.mxu0 %v14621_v46  ;;  %7666 = vmatprep.subr.bf16.mxu1 %v14626_v59  ;;  %v14635_v53 = vld [vmem:[%s19962_s0 + $0x7f4] ss:$8 sps:$4 sm:$0xff]   ;;  %v14633_v46 = vld [vmem:[%s19962_s0 + $0x7f0] ss:$8 sps:$4 sm:$0xff]  }
 0x56a   : > { %v17931_v19 = vadd.f32 %v8119_v26, %v17799_v56  ;;  %v8015_v4 = vpop.f32.mrb[55].mxu0  ;;  %9189 = vmatprep.subr.bf16.mxu0 %v14629_v36  ;;  %v14638_v59 = vld [vmem:[%s15630_s16 + $0x168c] ss:$16 sps:$4 sm:$0xff]   ;;  %v14636_v36 = vld [vmem:[%s15630_s16 + $0x1688] ss:$16 sps:$4 sm:$0xff]  }
 0x56b   : > { %v14641_v56 = vld [vmem:[%s19962_s0 + $0x804] ss:$8 sps:$4 sm:$0xff]   ;;  %v14639_v2 = vld [vmem:[%s19962_s0 + $0x800] ss:$8 sps:$4 sm:$0xff]   ;;  %v14645_v21 = vld [vmem:[%s19962_s0 + $0x810] ss:$8 sps:$4 sm:$0xff]  }
 0x56c   : > { %7667 = vmatpush1.bf16.msra.mxu1 %v14624_v28  ;;  %v14644_v45 = vld [vmem:[%s15630_s16 + $0x16ac] ss:$16 sps:$4 sm:$0xff]   ;;  %v14642_v26 = vld [vmem:[%s15630_s16 + $0x16a8] ss:$16 sps:$4 sm:$0xff]  }
 0x56d   : > { %9190 = vmatpush1.bf16.msra.mxu0 %v14627_v48  ;;  %7668 = vmatprep.subr.bf16.mxu1 %v14632_v16  ;;  %v14647_v28 = vld [vmem:[%s19962_s0 + $0x814] ss:$8 sps:$4 sm:$0xff]   ;;  %v14653_v16 = vld [vmem:[%s19962_s0 + $0x824] ss:$8 sps:$4 sm:$0xff]   ;;  %v14648_v4 = vld [vmem:[%s15630_s16 + $0x16c8] ss:$16 sps:$4 sm:$0xff]  }
 0x56e   : > { %9191 = vmatprep.subr.bf16.mxu0 %v14635_v53  ;;  %v14650_v48 = vld [vmem:[%s15630_s16 + $0x16cc] ss:$16 sps:$4 sm:$0xff]   ;;  %v14651_v53 = vld [vmem:[%s19962_s0 + $0x820] ss:$8 sps:$4 sm:$0xff]  }
 0x570   : > { %7669 = vmatpush1.bf16.msra.mxu1 %v14630_v32  ;;  %v14656_v32 = vld [vmem:[%s15630_s16 + $0x16ec] ss:$16 sps:$4 sm:$0xff]  }
 0x571   : > { %9192 = vmatpush1.bf16.msra.mxu0 %v14633_v46  ;;  %7670 = vmatprep.subr.bf16.mxu1 %v14638_v59  ;;  %v14659_v46 = vld [vmem:[%s19962_s0 + $0x834] ss:$8 sps:$4 sm:$0xff]   ;;  %v14654_v59 = vld [vmem:[%s15630_s16 + $0x16e8] ss:$16 sps:$4 sm:$0xff]  }
 0x572   : > { %9193 = vmatprep.subr.bf16.mxu0 %v14641_v56  ;;  %v14657_v56 = vld [vmem:[%s19962_s0 + $0x830] ss:$8 sps:$4 sm:$0xff]  }
 0x574   : > { %7671 = vmatpush1.bf16.msra.mxu1 %v14636_v36  ;;  %v14662_v36 = vld [vmem:[%s15630_s16 + $0x170c] ss:$16 sps:$4 sm:$0xff]  }
 0x575   : > { %9194 = vmatpush1.bf16.msra.mxu0 %v14639_v2  ;;  %7672 = vmatprep.subr.bf16.mxu1 %v14644_v45  ;;  %v14665_v2 = vld [vmem:[%s19962_s0 + $0x844] ss:$8 sps:$4 sm:$0xff]   ;;  %v14660_v45 = vld [vmem:[%s15630_s16 + $0x1708] ss:$16 sps:$4 sm:$0xff]  }
 0x576   : > { %9195 = vmatprep.subr.bf16.mxu0 %v14647_v28  ;;  %v14663_v28 = vld [vmem:[%s19962_s0 + $0x840] ss:$8 sps:$4 sm:$0xff]  }
 0x578   : > { %7673 = vmatpush1.bf16.msra.mxu1 %v14642_v26  ;;  %v14668_v26 = vld [vmem:[%s15630_s16 + $0x172c] ss:$16 sps:$4 sm:$0xff]  }
 0x579   : > { %9196 = vmatpush1.bf16.msra.mxu0 %v14645_v21  ;;  %7674 = vmatprep.subr.bf16.mxu1 %v14650_v48  ;;  %v14671_v21 = vld [vmem:[%s19962_s0 + $0x854] ss:$8 sps:$4 sm:$0xff]   ;;  %v14666_v48 = vld [vmem:[%s15630_s16 + $0x1728] ss:$16 sps:$4 sm:$0xff]  }
 0x57a   : > { %9197 = vmatprep.subr.bf16.mxu0 %v14653_v16  ;;  %v14669_v16 = vld [vmem:[%s19962_s0 + $0x850] ss:$8 sps:$4 sm:$0xff]  }
 0x57c   : > { %7675 = vmatpush1.bf16.msra.mxu1 %v14648_v4  ;;  %v14674_v4 = vld [vmem:[%s15630_s16 + $0x174c] ss:$16 sps:$4 sm:$0xff]  }
 0x57d   : > { %9198 = vmatpush1.bf16.msra.mxu0 %v14651_v53  ;;  %7676 = vmatprep.subr.bf16.mxu1 %v14656_v32  ;;  %v14677_v53 = vld [vmem:[%s19962_s0 + $0x864] ss:$8 sps:$4 sm:$0xff]  }
 0x57e   : > { %9199 = vmatprep.subr.bf16.mxu0 %v14659_v46  ;;  %v1084_v32 = vld [vmem:[%s15630_s16 + $0x1768] sm:$0x33] }
 0x57f   : > { %v14672_v46 = vld [vmem:[%s15630_s16 + $0x1748] ss:$16 sps:$4 sm:$0xff]  }
 0x580   : > { %7677 = vmatpush1.bf16.msra.mxu1 %v14654_v59  ;;  %v14675_v59 = vld [vmem:[%s19962_s0 + $0x860] ss:$8 sps:$4 sm:$0xff]  }
 0x581   : > { %9200 = vmatpush1.bf16.msra.mxu0 %v14657_v56  ;;  %7678 = vmatprep.subr.bf16.mxu1 %v14662_v36  ;;  %v17997_v56 = vcombine.high %v1084_v32, %v1084_v32  ;;  %v12461_v36 = vcombine.low %v1084_v32, %v1084_v32  ;;  %v14689_v32 = vld [vmem:[%s15630_s16 + $0x1798] ss:$16 sps:$4 sm:$0xff]  }
 0x582   : > { %9201 = vmatprep.subr.bf16.mxu0 %v14665_v2  ;;  %v14681_v2 = vld [vmem:[%s19962_s0 + $0x874] ss:$8 sps:$4 sm:$0xff]  }
 0x584   : > { %7679 = vmatpush1.bf16.msra.mxu1 %v14660_v45  ;;  %v14679_v45 = vld [vmem:[%s19962_s0 + $0x870] ss:$8 sps:$4 sm:$0xff]  }
 0x585   : > { %9202 = vmatpush1.bf16.msra.mxu0 %v14663_v28  ;;  %7680 = vmatprep.subr.bf16.mxu1 %v14668_v26  ;;  %v18008_v28 = vsel %vm2608_vm0, %v12461_v36, 0  ;;  %v14685_v26 = vld [vmem:[%s15630_s16 + $0x177c] ss:$16 sps:$4 sm:$0xff]  }
 0x586   : > { %9203 = vmatprep.subr.bf16.mxu0 %v14671_v21  ;;  %20021 = vst [vmem:[#allocation29_spill] sm:$0xff] %v18008_v28  ;;  %v14688_v21 = vld [vmem:[%s19962_s0 + $0x884] ss:$8 sps:$4 sm:$0xff]  }
 0x588   : > { %7681 = vmatpush1.bf16.msra.mxu1 %v14666_v48  ;;  %v14683_v48 = vld [vmem:[%s15630_s16 + $0x1778] ss:$16 sps:$4 sm:$0xff]  }
 0x589   : > { %9204 = vmatpush1.bf16.msra.mxu0 %v14669_v16  ;;  %7682 = vmatprep.subr.bf16.mxu1 %v14674_v4  ;;  %v14691_v16 = vld [vmem:[%s15630_s16 + $0x179c] ss:$16 sps:$4 sm:$0xff]   ;;  %v14686_v4 = vld [vmem:[%s19962_s0 + $0x880] ss:$8 sps:$4 sm:$0xff]  }
 0x58a   : > { %9205 = vmatprep.subr.bf16.mxu0 %v14677_v53  ;;  %v14694_v53 = vld [vmem:[%s19962_s0 + $0x894] ss:$8 sps:$4 sm:$0xff]  }
 0x58c   : > { %7683 = vmatpush1.bf16.msra.mxu1 %v14672_v46  ;;  %v14752_v46 = vld [vmem:[%s15625_s13 + $0x18] ss:$36 sps:$4 sm:$0xff]  }
 0x58d   : > { %9206 = vmatpush1.bf16.msra.mxu0 %v14675_v59  ;;  %12465 = vmatprep.subr.msk.bf16.mxu1 %vm2608_vm0, %v17997_v56  ;;  %v14697_v59 = vld [vmem:[%s15630_s16 + $0x17bc] ss:$16 sps:$4 sm:$0xff]  }
 0x58e   : > { %9207 = vmatprep.subr.bf16.mxu0 %v14681_v2  ;;  %v20022_v2 = vmov 0  }
 0x590   : > { %7685 = vmatpush1.bf16.msra.mxu1 %v18008_v28  ;;  %v15194_v28 = vld [vmem:[%s15630_s16 + $0x9a8] ss:$16 sps:$4 sm:$0xff]  }
 0x591   : > { %9208 = vmatpush1.bf16.msra.mxu0 %v14679_v45  ;;  %8017 = vmatprep.subr.bf16.mxu1 %v14685_v26 }
 0x592   : > { %9220 = vmatprep.subr.bf16.mxu0 %v14688_v21 }
 0x593   : > { %7693 = vmatmul.mubr.bf16.vlgmr.msra.gmra.mrb[68].mxu1 %v17270_v37  ;;  %v14692_v37 = vld [vmem:[%s19962_s0 + $0x890] ss:$8 sps:$4 sm:$0xff]  }
 0x594   : > { %8018 = vmatpush1.bf16.msra.mxu1 %v14683_v48  ;;  %12522 = vmatprep.mubr.msk.bf16.mxu1 %vm2604_vm1, %v17277_v63  ;;  %v14700_v63 = vld [vmem:[%s19962_s0 + $0x8a4] ss:$8 sps:$4 sm:$0xff]  }
 0x595   : > { %9210 = vmatmul.mubr.bf16.vlgmr.msra.gmra.mrb[56].mxu0 %v14752_v46  ;;  %8019 = vmatprep.subr.bf16.mxu1 %v14691_v16 }
 0x596   : > { %9221 = vmatpush1.bf16.msra.mxu0 %v14686_v4  ;;  %v6266_v36 = vpop.f32.mrb[52].mxu1  ;;  %9252 = vmatprep.mubr.bf16.mxu0 %v20022_v2  ;;  %v14695_v4 = vld [vmem:[%s15630_s16 + $0x17b8] ss:$16 sps:$4 sm:$0xff]   ;;  %v14706_v2 = vld [vmem:[%s19962_s0 + $0x8b4] ss:$8 sps:$4 sm:$0xff]  }
 0x597   : > { %v8140_v45 = vsel %vm8058_vm2, %v6266_v36, 0.0  ;;  %v6268_v26 = vpop.f32.mrb[53].mxu1  ;;  %9222 = vmatprep.subr.bf16.mxu0 %v14694_v53  ;;  %v14703_v53 = vld [vmem:[%s15630_s16 + $0x17dc] ss:$16 sps:$4 sm:$0xff]  }
 0x598   : > { %v18038_v21 = vadd.f32 %v8140_v45, %v17906_v52  ;;  %v8171_v48 = vsel %vm8058_vm2, %v6268_v26, 0.0  ;;  %v6270_v16 = vpop.f32.mrb[54].mxu1  ;;  %8020 = vmatpush1.bf16.msra.mxu1 %v14689_v32  ;;  %v14698_v52 = vld [vmem:[%s19962_s0 + $0x8a0] ss:$8 sps:$4 sm:$0xff]   ;;  %v14715_v26 = vld [vmem:[%s15630_s16 + $0x181c] ss:$16 sps:$4 sm:$0xff]  }
 0x599   : > { %v18043_v46 = vadd.f32 %v8171_v48, %v17911_v5  ;;  %v6271_v36 = vpop.f32.mrb[55].mxu1  ;;  %8021 = vmatprep.subr.bf16.mxu1 %v14697_v59  ;;  %v14701_v32 = vld [vmem:[%s15630_s16 + $0x17d8] ss:$16 sps:$4 sm:$0xff]   ;;  %v14709_v5 = vld [vmem:[%s15630_s16 + $0x17fc] ss:$16 sps:$4 sm:$0xff]  }
 0x59a   : > { %9223 = vmatpush1.bf16.msra.mxu0 %v14692_v37  ;;  %v14704_v59 = vld [vmem:[%s19962_s0 + $0x8b0] ss:$8 sps:$4 sm:$0xff]   ;;  %v14712_v37 = vld [vmem:[%s19962_s0 + $0x8c4] ss:$8 sps:$4 sm:$0xff]   ;;  %v14718_v48 = vld [vmem:[%s19962_s0 + $0x8d4] ss:$8 sps:$4 sm:$0xff]  }
 0x59b   : > { %9224 = vmatprep.subr.bf16.mxu0 %v14700_v63  ;;  %v14707_v45 = vld [vmem:[%s15630_s16 + $0x17f8] ss:$16 sps:$4 sm:$0xff]  }
 0x59c   : > { %8022 = vmatpush1.bf16.msra.mxu1 %v14695_v4  ;;  %v14710_v63 = vld [vmem:[%s19962_s0 + $0x8c0] ss:$8 sps:$4 sm:$0xff]   ;;  %v14721_v4 = vld [vmem:[%s15630_s16 + $0x183c] ss:$16 sps:$4 sm:$0xff]   ;;  %v14716_v36 = vld [vmem:[%s19962_s0 + $0x8d0] ss:$8 sps:$4 sm:$0xff]  }
 0x59d   : > { %8023 = vmatprep.subr.bf16.mxu1 %v14703_v53  ;;  %v14713_v16 = vld [vmem:[%s15630_s16 + $0x1818] ss:$16 sps:$4 sm:$0xff]   ;;  %v14724_v53 = vld [vmem:[%s19962_s0 + $0x8e4] ss:$8 sps:$4 sm:$0xff]  }
 0x59e   : > { %9225 = vmatpush1.bf16.msra.mxu0 %v14698_v52  ;;  %v14719_v52 = vld [vmem:[%s15630_s16 + $0x1838] ss:$16 sps:$4 sm:$0xff]  }
 0x59f   : > { %9226 = vmatprep.subr.bf16.mxu0 %v14706_v2  ;;  %v14727_v2 = vld [vmem:[%s15630_s16 + $0x185c] ss:$16 sps:$4 sm:$0xff]  }
 0x5a0   : > { %8024 = vmatpush1.bf16.msra.mxu1 %v14701_v32  ;;  %v14722_v32 = vld [vmem:[%s19962_s0 + $0x8e0] ss:$8 sps:$4 sm:$0xff]  }
 0x5a1   : > { %8025 = vmatprep.subr.bf16.mxu1 %v14709_v5  ;;  %v14730_v5 = vld [vmem:[%s19962_s0 + $0x8f4] ss:$8 sps:$4 sm:$0xff]  }
 0x5a2   : > { %9227 = vmatpush1.bf16.msra.mxu0 %v14704_v59  ;;  %v14725_v59 = vld [vmem:[%s15630_s16 + $0x1858] ss:$16 sps:$4 sm:$0xff]  }
 0x5a3   : > { %9228 = vmatprep.subr.bf16.mxu0 %v14712_v37  ;;  %v14733_v37 = vld [vmem:[%s15630_s16 + $0x187c] ss:$16 sps:$4 sm:$0xff]  }
 0x5a4   : > { %8026 = vmatpush1.bf16.msra.mxu1 %v14707_v45  ;;  %v14728_v45 = vld [vmem:[%s19962_s0 + $0x8f0] ss:$8 sps:$4 sm:$0xff]  }
 0x5a5   : > { %8027 = vmatprep.subr.bf16.mxu1 %v14715_v26  ;;  %v14731_v26 = vld [vmem:[%s15630_s16 + $0x1878] ss:$16 sps:$4 sm:$0xff]  }
 0x5a6   : > { %9229 = vmatpush1.bf16.msra.mxu0 %v14710_v63  ;;  %v14736_v63 = vld [vmem:[%s15630_s16 + $0x189c] ss:$16 sps:$4 sm:$0xff]  }
 0x5a7   : > { %9230 = vmatprep.subr.bf16.mxu0 %v14718_v48  ;;  %v14753_v48 = vld [vmem:[%s15630_s16 + $0x4b4] ss:$16 sps:$4 sm:$0xff]  }
 0x5a8   : > { %8028 = vmatpush1.bf16.msra.mxu1 %v14713_v16  ;;  %v14734_v16 = vld [vmem:[%s15630_s16 + $0x1898] ss:$16 sps:$4 sm:$0xff]  }
 0x5a9   : > { %8029 = vmatprep.subr.bf16.mxu1 %v14721_v4  ;;  %v14754_v4 = vld [vmem:[%s15625_s13 + $0x20] ss:$36 sps:$4 sm:$0xff]  }
 0x5aa   : > { %9231 = vmatpush1.bf16.msra.mxu0 %v14716_v36  ;;  %v14739_v36 = vld [vmem:[%s15630_s16 + $0x18bc] ss:$16 sps:$4 sm:$0xff]  }
 0x5ab   : > { %9232 = vmatprep.subr.bf16.mxu0 %v14724_v53  ;;  %v14755_v53 = vld [vmem:[%s15630_s16 + $0x4b0] ss:$16 sps:$4 sm:$0xff]  }
 0x5ac   : > { %8030 = vmatpush1.bf16.msra.mxu1 %v14719_v52  ;;  %v14756_v52 = vld [vmem:[%s15630_s16 + $0x4d4] ss:$16 sps:$4 sm:$0xff]  }
 0x5ad   : > { %8031 = vmatprep.subr.bf16.mxu1 %v14727_v2  ;;  %v14737_v2 = vld [vmem:[%s15630_s16 + $0x18b8] ss:$16 sps:$4 sm:$0xff]  }
 0x5ae   : > { %9233 = vmatpush1.bf16.msra.mxu0 %v14722_v32  ;;  %v14742_v32 = vld [vmem:[%s15630_s16 + $0x18dc] ss:$16 sps:$4 sm:$0xff]  }
 0x5af   : > { %9234 = vmatprep.subr.bf16.mxu0 %v14730_v5  ;;  %v1134_v5 = vld [vmem:[%s15630_s16 + $0x18f8] sm:$0x33] }
 0x5b0   : > { %8032 = vmatpush1.bf16.msra.mxu1 %v14725_v59  ;;  %v14757_v59 = vld [vmem:[%s15630_s16 + $0x4d0] ss:$16 sps:$4 sm:$0xff]  }
 0x5b1   : > { %8033 = vmatprep.subr.bf16.mxu1 %v14733_v37  ;;  %v14758_v37 = vld [vmem:[%s15630_s16 + $0x4f4] ss:$16 sps:$4 sm:$0xff]  }
 0x5b2   : > { %9235 = vmatpush1.bf16.msra.mxu0 %v14728_v45  ;;  %v14740_v45 = vld [vmem:[%s15630_s16 + $0x18d8] ss:$16 sps:$4 sm:$0xff]  }
 0x5b3   : > { %9635 = vmatprep.subr.bf16.mxu0 %v14753_v48  ;;  %v14759_v48 = vld [vmem:[%s15630_s16 + $0x4f0] ss:$16 sps:$4 sm:$0xff]  }
 0x5b4   : > { %8034 = vmatpush1.bf16.msra.mxu1 %v14731_v26  ;;  %v18103_v26 = vcombine.high %v1134_v5, %v1134_v5 }
 0x5b5   : > { %9253 = vmatmul.mubr.bf16.vlgmr.msra.gmra.mrb[56].mxu0 %v14754_v4  ;;  %8035 = vmatprep.subr.bf16.mxu1 %v14736_v63  ;;  %v12517_v63 = vcombine.low %v1134_v5, %v1134_v5  ;;  %v14766_v5 = vld [vmem:[%s15630_s16] ss:$16 sps:$4 sm:$0xff]  }
 0x5b6   : > { %9636 = vmatpush1.bf16.msra.mxu0 %v14755_v53  ;;  %20023 = vst [vmem:[#allocation30_spill] sm:$0xff] %v18103_v26  ;;  %v14762_v53 = vld [vmem:[%s15630_s16 + $0x534] ss:$16 sps:$4 sm:$0xff]  }
 0x5b7   : > { %9637 = vmatprep.subr.bf16.mxu0 %v14756_v52  ;;  %v18110_v4 = vsel %vm2608_vm0, %v12517_v63, 0  ;;  %v14763_v52 = vld [vmem:[%s15630_s16 + $0x4] ss:$16 sps:$4 sm:$0xff]  }
 0x5b8   : > { %8036 = vmatpush1.bf16.msra.mxu1 %v14734_v16  ;;  %v14760_v16 = vld [vmem:[%s15630_s16 + $0x514] ss:$16 sps:$4 sm:$0xff]   ;;  %20024 = vst [vmem:[#allocation31_spill] sm:$0xff] %v18110_v4 }
 0x5b9   : > { %8037 = vmatprep.subr.bf16.mxu1 %v14739_v36  ;;  %v14761_v36 = vld [vmem:[%s15630_s16 + $0x510] ss:$16 sps:$4 sm:$0xff]  }
 0x5ba   : > { %9638 = vmatpush1.bf16.msra.mxu0 %v14757_v59  ;;  %v14767_v59 = vld [vmem:[%s15630_s16 + $0x24] ss:$16 sps:$4 sm:$0xff]  }
 0x5bb   : > { %9639 = vmatprep.subr.bf16.mxu0 %v14758_v37 }
 0x5bc   : > { %8038 = vmatpush1.bf16.msra.mxu1 %v14737_v2  ;;  %v14764_v2 = vld [vmem:[%s15630_s16 + $0x530] ss:$16 sps:$4 sm:$0xff]  }
 0x5bd   : > { %8039 = vmatprep.subr.bf16.mxu1 %v14742_v32  ;;  %v14765_v32 = vld [vmem:[%s15630_s16 + $0x554] ss:$16 sps:$4 sm:$0xff]  }
 0x5be   : > { %9640 = vmatpush1.bf16.msra.mxu0 %v14759_v48 }
 0x5bf   : > { %9641 = vmatprep.subr.bf16.mxu0 %v14760_v16  ;;  %v14769_v16 = vld [vmem:[%s15630_s16 + $0x574] ss:$16 sps:$4 sm:$0xff]  }
 0x5c0   : > { %8040 = vmatpush1.bf16.msra.mxu1 %v14740_v45  ;;  %v14768_v45 = vld [vmem:[%s15630_s16 + $0x550] ss:$16 sps:$4 sm:$0xff]  }
 0x5c1   : > { %12521 = vmatprep.subr.msk.bf16.mxu1 %vm2608_vm0, %v18103_v26 }
 0x5c2   : > { %9642 = vmatpush1.bf16.msra.mxu0 %v14761_v36 }
 0x5c3   : > { %9643 = vmatprep.subr.bf16.mxu0 %v14762_v53 }
 0x5c4   : > { %8042 = vmatpush1.bf16.msra.mxu1 %v18110_v4 }
 0x5c5   : > { %9350 = vmatprep.subr.bf16.mxu1 %v14763_v52  ;;  %v14770_v52 = vld [vmem:[%s15630_s16 + $0x20] ss:$16 sps:$4 sm:$0xff]  }
 0x5c6   : > { %9644 = vmatpush1.bf16.msra.mxu0 %v14764_v2 }
 0x5c7   : > { %8050 = vmatmul.mubr.bf16.vlgmr.msra.gmra.mrb[72].mxu1 %v17371_v29  ;;  %9645 = vmatprep.subr.bf16.mxu0 %v14765_v32 }
 0x5c8   : > { %9351 = vmatpush1.bf16.msra.mxu1 %v14766_v5  ;;  %v14771_v5 = vld [vmem:[%s15630_s16 + $0x44] ss:$16 sps:$4 sm:$0xff]  }
 0x5c9   : > { %9352 = vmatprep.subr.bf16.mxu1 %v14767_v59  ;;  %v14772_v59 = vld [vmem:[%s15630_s16 + $0x570] ss:$16 sps:$4 sm:$0xff]  }
 0x5ca   : > { %v6623_v37 = vpop.f32.mrb[56].mxu1  ;;  %9646 = vmatpush1.bf16.msra.mxu0 %v14768_v45  ;;  %v14775_v45 = vld [vmem:[%s15630_s16 + $0x64] ss:$16 sps:$4 sm:$0xff]  }
 0x5cb   : > { %v8142_v63 = vsel %vm8058_vm2, %v6623_v37, 0.0  ;;  %v6625_v48 = vpop.f32.mrb[57].mxu1  ;;  %9647 = vmatprep.subr.bf16.mxu0 %v14769_v16  ;;  %v14774_v37 = vld [vmem:[%s15630_s16 + $0x40] ss:$16 sps:$4 sm:$0xff]   ;;  %v14779_v16 = vld [vmem:[%s15630_s16 + $0x84] ss:$16 sps:$4 sm:$0xff]  }
 0x5cc   : > { %v18125_v29 = vadd.f32 %v8142_v63, %v18038_v21  ;;  %v8173_v36 = vsel %vm8058_vm2, %v6625_v48, 0.0  ;;  %v6627_v53 = vpop.f32.mrb[58].mxu1  ;;  %9353 = vmatpush1.bf16.msra.mxu1 %v14770_v52  ;;  %v14773_v21 = vld [vmem:[%s15630_s16 + $0x594] ss:$16 sps:$4 sm:$0xff]   ;;  %v14776_v63 = vld [vmem:[%s15630_s16 + $0x590] ss:$16 sps:$4 sm:$0xff]  }
 0x5cd   : > { %v18130_v2 = vadd.f32 %v8173_v36, %v18043_v46  ;;  %v6628_v32 = vpop.f32.mrb[59].mxu1  ;;  %9354 = vmatprep.subr.bf16.mxu1 %v14771_v5  ;;  %v14777_v46 = vld [vmem:[%s15630_s16 + $0x5b4] ss:$16 sps:$4 sm:$0xff]   ;;  %v14778_v48 = vld [vmem:[%s15630_s16 + $0x60] ss:$16 sps:$4 sm:$0xff]  }
 0x5ce   : > { %9648 = vmatpush1.bf16.msra.mxu0 %v14772_v59  ;;  %v14780_v36 = vld [vmem:[%s15630_s16 + $0x5b0] ss:$16 sps:$4 sm:$0xff]   ;;  %v14781_v53 = vld [vmem:[%s15630_s16 + $0x5d4] ss:$16 sps:$4 sm:$0xff]  }
 0x5cf   : > { %9649 = vmatprep.subr.bf16.mxu0 %v14773_v21  ;;  %v14782_v52 = vld [vmem:[%s15630_s16 + $0x80] ss:$16 sps:$4 sm:$0xff]   ;;  %v14783_v32 = vld [vmem:[%s15630_s16 + $0xa4] ss:$16 sps:$4 sm:$0xff]  }
 0x5d0   : > { %9355 = vmatpush1.bf16.msra.mxu1 %v14774_v37  ;;  %v14784_v5 = vld [vmem:[%s15630_s16 + $0x5d0] ss:$16 sps:$4 sm:$0xff]   ;;  %v14785_v59 = vld [vmem:[%s15630_s16 + $0x5f4] ss:$16 sps:$4 sm:$0xff]  }
 0x5d1   : > { %9356 = vmatprep.subr.bf16.mxu1 %v14775_v45  ;;  %v14786_v21 = vld [vmem:[%s15630_s16 + $0xa0] ss:$16 sps:$4 sm:$0xff]   ;;  %v14787_v37 = vld [vmem:[%s15630_s16 + $0xc4] ss:$16 sps:$4 sm:$0xff]  }
 0x5d2   : > { %9650 = vmatpush1.bf16.msra.mxu0 %v14776_v63  ;;  %v14788_v45 = vld [vmem:[%s15630_s16 + $0x5f0] ss:$16 sps:$4 sm:$0xff]   ;;  %v14789_v63 = vld [vmem:[%s15630_s16 + $0x614] ss:$16 sps:$4 sm:$0xff]  }
 0x5d3   : > { %9651 = vmatprep.subr.bf16.mxu0 %v14777_v46  ;;  %v14790_v46 = vld [vmem:[%s15630_s16 + $0xc0] ss:$16 sps:$4 sm:$0xff]  }
 0x5d4   : > { %9357 = vmatpush1.bf16.msra.mxu1 %v14778_v48  ;;  %v14791_v48 = vld [vmem:[%s15630_s16 + $0xe4] ss:$16 sps:$4 sm:$0xff]  }
 0x5d5   : > { %9358 = vmatprep.subr.bf16.mxu1 %v14779_v16  ;;  %v14792_v16 = vld [vmem:[%s15630_s16 + $0x610] ss:$16 sps:$4 sm:$0xff]  }
 0x5d6   : > { %9652 = vmatpush1.bf16.msra.mxu0 %v14780_v36  ;;  %v14793_v36 = vld [vmem:[%s15630_s16 + $0xe0] ss:$16 sps:$4 sm:$0xff]  }
 0x5d7   : > { %9653 = vmatprep.subr.bf16.mxu0 %v14781_v53  ;;  %v14794_v53 = vld [vmem:[%s15630_s16 + $0x104] ss:$16 sps:$4 sm:$0xff]  }
 0x5d8   : > { %9359 = vmatpush1.bf16.msra.mxu1 %v14782_v52  ;;  %v14795_v52 = vld [vmem:[%s15630_s16 + $0x644] ss:$16 sps:$4 sm:$0xff]  }
 0x5d9   : > { %9360 = vmatprep.subr.bf16.mxu1 %v14783_v32  ;;  %v14796_v32 = vld [vmem:[%s15630_s16 + $0x100] ss:$16 sps:$4 sm:$0xff]  }
 0x5da   : > { %9654 = vmatpush1.bf16.msra.mxu0 %v14784_v5  ;;  %v14797_v5 = vld [vmem:[%s15630_s16 + $0x124] ss:$16 sps:$4 sm:$0xff]  }
 0x5db   : > { %9655 = vmatprep.subr.bf16.mxu0 %v14785_v59  ;;  %v14798_v59 = vld [vmem:[%s15630_s16 + $0x120] ss:$16 sps:$4 sm:$0xff]  }
 0x5dc   : > { %9361 = vmatpush1.bf16.msra.mxu1 %v14786_v21  ;;  %v14799_v21 = vld [vmem:[%s15630_s16 + $0x144] ss:$16 sps:$4 sm:$0xff]  }
 0x5dd   : > { %9362 = vmatprep.subr.bf16.mxu1 %v14787_v37  ;;  %v14801_v37 = vld [vmem:[%s15630_s16 + $0x164] ss:$16 sps:$4 sm:$0xff]  }
 0x5de   : > { %9656 = vmatpush1.bf16.msra.mxu0 %v14788_v45  ;;  %v14802_v45 = vld [vmem:[%s15630_s16 + $0x160] ss:$16 sps:$4 sm:$0xff]  }
 0x5df   : > { %9657 = vmatprep.subr.bf16.mxu0 %v14789_v63 }
 0x5e0   : > { %9363 = vmatpush1.bf16.msra.mxu1 %v14790_v46 }
 0x5e1   : > { %9364 = vmatprep.subr.bf16.mxu1 %v14791_v48 }
 0x5e2   : > { %9658 = vmatpush1.bf16.msra.mxu0 %v14792_v16 }
 0x5e3   : > { %12827 = vmatprep.subr.msk.bf16.mxu0 %vm2608_vm0, %v16137_v20  ;;  %v14800_v20 = vld [vmem:[%s15630_s16 + $0x140] ss:$16 sps:$4 sm:$0xff]  }
 0x5e4   : > { %9365 = vmatpush1.bf16.msra.mxu1 %v14793_v36 }
 0x5e5   : > { %9366 = vmatprep.subr.bf16.mxu1 %v14794_v53 }
 0x5e6   : > { %9660 = vmatpush1.bf16.msra.mxu0 %v16142_v22  ;;  %v14803_v22 = vld [vmem:[%s15630_s16 + $0xc] ss:$16 sps:$4 sm:$0xff]  }
 0x5e7   : > { %9730 = vmatprep.subr.bf16.mxu0 %v14795_v52 }
 0x5e8   : > { %9367 = vmatpush1.bf16.msra.mxu1 %v14796_v32 }
 0x5e9   : > { %9368 = vmatprep.subr.bf16.mxu1 %v14797_v5 }
 0x5ec   : > { %9369 = vmatpush1.bf16.msra.mxu1 %v14798_v59 }
 0x5ed   : > { %9370 = vmatprep.subr.bf16.mxu1 %v14799_v21 }
 0x5f0   : > { %9371 = vmatpush1.bf16.msra.mxu1 %v14800_v20 }
 0x5f1   : > { %9372 = vmatprep.subr.bf16.mxu1 %v14801_v37 }
 0x5f4   : > { %9373 = vmatpush1.bf16.msra.mxu1 %v14802_v45 }
 0x5f5   : > { %12814 = vmatprep.subr.msk.bf16.mxu1 %vm2608_vm0, %v16125_v13 }
 0x5f8   : > { %9375 = vmatpush1.bf16.msra.mxu1 %v16132_v17 }
 0x5f9   : > { %9391 = vmatprep.subr.bf16.mxu1 %v14803_v22 }
 0x5fe   : > { %v6980_v63 = vpop.f32.mrb[60].mxu1 }
 0x5ff   : > { %v8144_v46 = vsel %vm8058_vm2, %v6980_v63, 0.0  ;;  %v6982_v48 = vpop.f32.mrb[61].mxu1 }
 0x600   : > { %v8145_v16 = vadd.f32 %v8144_v46, %v18125_v29  ;;  %v8175_v36 = vsel %vm8058_vm2, %v6982_v48, 0.0  ;;  %v6984_v53 = vpop.f32.mrb[62].mxu1 }
 0x601   : > { %v8176_v52 = vadd.f32 %v8175_v36, %v18130_v2  ;;  %v6985_v32 = vpop.f32.mrb[63].mxu1 }
 0x632   : > { %v7337_v5 = vpop.f32.mrb[64].mxu1 }
 0x633   : > { %v8146_v59 = vsel %vm8058_vm2, %v7337_v5, 0.0  ;;  %v7339_v13 = vpop.f32.mrb[65].mxu1 }
 0x634   : > { %v8147_v21 = vadd.f32 %v8146_v59, %v8145_v16  ;;  %v8177_v17 = vsel %vm8058_vm2, %v7339_v13, 0.0  ;;  %v7341_v20 = vpop.f32.mrb[66].mxu1 }
 0x635   : > { %v8178_v37 = vadd.f32 %v8177_v17, %v8176_v52  ;;  %v7342_v45 = vpop.f32.mrb[67].mxu1 }
 0x666   : > { %v7694_v22 = vpop.f32.mrb[68].mxu1 }
 0x667   : > { %v8148_v63 = vsel %vm8058_vm2, %v7694_v22, 0.0  ;;  %v7696_v29 = vpop.f32.mrb[69].mxu1 }
 0x668   : > { %v8149_v46 = vadd.f32 %v8148_v63, %v8147_v21  ;;  %v8179_v48 = vsel %vm8058_vm2, %v7696_v29, 0.0  ;;  %v7698_v53 = vpop.f32.mrb[70].mxu1 }
 0x669   : > { %v8180_v2 = vadd.f32 %v8179_v48, %v8178_v37  ;;  %v7699_v36 = vpop.f32.mrb[71].mxu1 }
 0x688   : > { %v9254_v32 = vpop.f32.mrb[56].mxu0 }
 0x689   : > { %v13022_v5 = vadd.f32 %v9254_v32, %v16146_v24  ;;  %v9256_v4 = vpop.f32.mrb[57].mxu0 }
 0x68a   : > { %v13023_v16 = vadd.f32 %v9256_v4, %v16146_v24  ;;  %v9258_v59 = vpop.f32.mrb[58].mxu0 }
 0x68b   : > { %v9263_v13 = vmax.f32 %v13022_v5, 0.0  ;;  %v13024_v52 = vadd.f32 %v9258_v59, %v16148_v30  ;;  %v9260_v17 = vpop.f32.mrb[59].mxu0 }
 0x68c   : > { %v9264_v20 = vmax.f32 %v13023_v16, 0.0  ;;  %v13025_v45 = vadd.f32 %v9260_v17, %v16148_v30 }
 0x68d   : > { %v9265_v21 = vmax.f32 %v13024_v52, 0.0 }
 0x68e   : > { %v12811_v22 = vpack.c.bf16 %v9264_v20, %v9263_v13  ;;  %v9266_v63 = vmax.f32 %v13025_v45, 0.0  ;;  %v14804_v13 = vld [vmem:[%s15630_s16 + $0x8] ss:$16 sps:$4 sm:$0xff]  }
 0x690   : > { %v9279_v37 = vrot.slane %v12811_v22, %v16156_v41  ;;  %v18184_v29 = vpack.c.bf16 %v9266_v63, %v9265_v21  ;;  %v14805_v21 = vld [vmem:[%s15630_s16 + $0x2c] ss:$16 sps:$4 sm:$0xff]  }
 0x692   : > { %v9287_v48 = vcombine.high %v9279_v37, %v9279_v37  ;;  %v18187_v53 = vrot.slane %v9279_v37, %v16156_v41 }
 0x694   : > { %v18190_v24 = vrot.slane %v9287_v48, %v16156_v41  ;;  %v12813_v4 = vpack.i.b16 %v18187_v53, %v18187_v53  ;;  %v18196_v30 = vcombine.high %v18187_v53, %v18187_v53 }
 0x696   : > { %v9345_v36 = vrot.slane %v12813_v4, %v16169_v51  ;;  %v18200_v32 = vrot.slane %v12813_v4, %v16166_v50  ;;  %v9324_v5 = vunpack.i.h.s16 %v18190_v24  ;;  %v18207_v59 = vpack.i.b16 %v18196_v30, %v18196_v30 }
 0x698   : > { %12815 = vmatprep.mubr.msk.bf16.mxu1 %vm2604_vm1, %v9345_v36  ;;  %v9622_v16 = vpack.i.b16 %v9324_v5, %v9324_v5 }
 0x699   : > { %9383 = vmatmul.mubr.bf16.vlgmr.msra.gmra.mrb[76].mxu1 %v18200_v32 }
 0x69a   : > { %9392 = vmatpush1.bf16.msra.mxu1 %v14804_v13  ;;  %12817 = vmatprep.mubr.msk.bf16.mxu1 %vm2604_vm1, %v9345_v36  ;;  %v8051_v52 = vpop.f32.mrb[72].mxu1  ;;  %v18212_v17 = vrot.slane %v9622_v16, %v16169_v51  ;;  %v18215_v20 = vrot.slane %v9622_v16, %v16166_v50  ;;  %v18229_v36 = vrot.slane %v18207_v59, %v16169_v51  ;;  %v14807_v16 = vld [vmem:[%s15630_s16 + $0x640] ss:$16 sps:$4 sm:$0xff]   ;;  %v14809_v13 = vld [vmem:[%s15630_s16 + $0x664] ss:$16 sps:$4 sm:$0xff]  }
 0x69b   : > { %v8150_v45 = vsel %vm8058_vm2, %v8051_v52, 0.0  ;;  %9393 = vmatprep.subr.bf16.mxu1 %v14805_v21  ;;  %v8053_v22 = vpop.f32.mrb[73].mxu1  ;;  %v14810_v52 = vld [vmem:[%s15630_s16 + $0x48] ss:$16 sps:$4 sm:$0xff]   ;;  %v14812_v21 = vld [vmem:[%s15630_s16 + $0x6c] ss:$16 sps:$4 sm:$0xff]  }
 0x69c   : > { %v18219_v63 = vadd.f32 %v8150_v45, %v8149_v46  ;;  %12828 = vmatprep.mubr.msk.bf16.mxu0 %vm2604_vm1, %v18212_v17  ;;  %v8181_v37 = vsel %vm8058_vm2, %v8053_v22, 0.0  ;;  %v8055_v48 = vpop.f32.mrb[74].mxu1  ;;  %v14806_v46 = vld [vmem:[%s15630_s16 + $0x28] ss:$16 sps:$4 sm:$0xff]   ;;  %v14811_v45 = vld [vmem:[%s15630_s16 + $0x660] ss:$16 sps:$4 sm:$0xff]  }
 0x69d   : > { %v18224_v4 = vadd.f32 %v8181_v37, %v8180_v2  ;;  %9668 = vmatmul.mubr.bf16.vlgmr.msra.gmra.mrb[60].mxu0 %v18215_v20  ;;  %v8056_v5 = vpop.f32.mrb[75].mxu1  ;;  %v14808_v2 = vld [vmem:[%s15630_s16 + $0x4c] ss:$16 sps:$4 sm:$0xff]   ;;  %v14813_v22 = vld [vmem:[%s15630_s16 + $0x684] ss:$16 sps:$4 sm:$0xff]  }
 0x69e   : > { %20025 = vst [vmem:[#allocation32_spill] sm:$0xff] %v18219_v63  ;;  %9394 = vmatpush1.bf16.msra.mxu1 %v14806_v46  ;;  %9731 = vmatpush1.bf16.msra.mxu0 %v14807_v16  ;;  %v14814_v37 = vld [vmem:[%s15630_s16 + $0x68] ss:$16 sps:$4 sm:$0xff]   ;;  %v14815_v48 = vld [vmem:[%s15630_s16 + $0x680] ss:$16 sps:$4 sm:$0xff]  }
 0x69f   : > { %20026 = vst [vmem:[#allocation33_spill] sm:$0xff] %v18224_v4  ;;  %12833 = vmatprep.mubr.msk.bf16.mxu0 %vm2604_vm1, %v18229_v36  ;;  %9395 = vmatprep.subr.bf16.mxu1 %v14808_v2  ;;  %v14816_v5 = vld [vmem:[%s15630_s16 + $0x8c] ss:$16 sps:$4 sm:$0xff]   ;;  %v14817_v46 = vld [vmem:[%s15630_s16 + $0x6a4] ss:$16 sps:$4 sm:$0xff]  }
 0x6a0   : > { %9732 = vmatprep.subr.bf16.mxu0 %v14809_v13  ;;  %v14818_v16 = vld [vmem:[%s15630_s16 + $0x88] ss:$16 sps:$4 sm:$0xff]   ;;  %v14819_v2 = vld [vmem:[%s15630_s16 + $0x6a0] ss:$16 sps:$4 sm:$0xff]   ;;  %v14820_v13 = vld [vmem:[%s15630_s16 + $0xac] ss:$16 sps:$4 sm:$0xff]  }
 0x6a1   : > { %v15151_v4 = vld [vmem:[%s15630_s16 + $0x1170] ss:$16 sps:$4 sm:$0xff]   ;;  %v15152_v63 = vld [vmem:[%s15630_s16 + $0x85c] ss:$16 sps:$4 sm:$0xff]  }
 0x6a2   : > { %9396 = vmatpush1.bf16.msra.mxu1 %v14810_v52  ;;  %9733 = vmatpush1.bf16.msra.mxu0 %v14811_v45  ;;  %v14821_v52 = vld [vmem:[%s15630_s16 + $0x6c4] ss:$16 sps:$4 sm:$0xff]   ;;  %v14822_v45 = vld [vmem:[%s15630_s16 + $0xa8] ss:$16 sps:$4 sm:$0xff]  }
 0x6a3   : > { %9397 = vmatprep.subr.bf16.mxu1 %v14812_v21  ;;  %9734 = vmatprep.subr.bf16.mxu0 %v14813_v22  ;;  %v14823_v21 = vld [vmem:[%s15630_s16 + $0x6c0] ss:$16 sps:$4 sm:$0xff]   ;;  %v14824_v22 = vld [vmem:[%s15630_s16 + $0xcc] ss:$16 sps:$4 sm:$0xff]  }
 0x6a6   : > { %9398 = vmatpush1.bf16.msra.mxu1 %v14814_v37  ;;  %9735 = vmatpush1.bf16.msra.mxu0 %v14815_v48  ;;  %v14825_v37 = vld [vmem:[%s15630_s16 + $0x6e4] ss:$16 sps:$4 sm:$0xff]   ;;  %v14826_v48 = vld [vmem:[%s15630_s16 + $0xc8] ss:$16 sps:$4 sm:$0xff]  }
 0x6a7   : > { %9399 = vmatprep.subr.bf16.mxu1 %v14816_v5  ;;  %9736 = vmatprep.subr.bf16.mxu0 %v14817_v46  ;;  %v14827_v5 = vld [vmem:[%s15630_s16 + $0x6e0] ss:$16 sps:$4 sm:$0xff]   ;;  %v14828_v46 = vld [vmem:[%s15630_s16 + $0xec] ss:$16 sps:$4 sm:$0xff]  }
 0x6aa   : > { %9400 = vmatpush1.bf16.msra.mxu1 %v14818_v16  ;;  %9737 = vmatpush1.bf16.msra.mxu0 %v14819_v2  ;;  %v14829_v16 = vld [vmem:[%s15630_s16 + $0x704] ss:$16 sps:$4 sm:$0xff]   ;;  %v14830_v2 = vld [vmem:[%s15630_s16 + $0xe8] ss:$16 sps:$4 sm:$0xff]  }
 0x6ab   : > { %9401 = vmatprep.subr.bf16.mxu1 %v14820_v13  ;;  %9738 = vmatprep.subr.bf16.mxu0 %v14821_v52  ;;  %v14831_v13 = vld [vmem:[%s15630_s16 + $0x700] ss:$16 sps:$4 sm:$0xff]   ;;  %v14832_v52 = vld [vmem:[%s15630_s16 + $0x10c] ss:$16 sps:$4 sm:$0xff]  }
 0x6ae   : > { %9402 = vmatpush1.bf16.msra.mxu1 %v14822_v45  ;;  %9739 = vmatpush1.bf16.msra.mxu0 %v14823_v21  ;;  %v14833_v45 = vld [vmem:[%s15630_s16 + $0x724] ss:$16 sps:$4 sm:$0xff]   ;;  %v14834_v21 = vld [vmem:[%s15630_s16 + $0x108] ss:$16 sps:$4 sm:$0xff]  }
 0x6af   : > { %9403 = vmatprep.subr.bf16.mxu1 %v14824_v22  ;;  %9740 = vmatprep.subr.bf16.mxu0 %v14825_v37  ;;  %v14835_v22 = vld [vmem:[%s15630_s16 + $0x720] ss:$16 sps:$4 sm:$0xff]   ;;  %v14836_v37 = vld [vmem:[%s15630_s16 + $0x12c] ss:$16 sps:$4 sm:$0xff]  }
 0x6b2   : > { %9404 = vmatpush1.bf16.msra.mxu1 %v14826_v48  ;;  %9741 = vmatpush1.bf16.msra.mxu0 %v14827_v5  ;;  %v14837_v48 = vld [vmem:[%s15630_s16 + $0x744] ss:$16 sps:$4 sm:$0xff]   ;;  %v14838_v5 = vld [vmem:[%s15630_s16 + $0x128] ss:$16 sps:$4 sm:$0xff]  }
 0x6b3   : > { %9405 = vmatprep.subr.bf16.mxu1 %v14828_v46  ;;  %9742 = vmatprep.subr.bf16.mxu0 %v14829_v16  ;;  %v14839_v46 = vld [vmem:[%s15630_s16 + $0x740] ss:$16 sps:$4 sm:$0xff]   ;;  %v14840_v16 = vld [vmem:[%s15630_s16 + $0x14c] ss:$16 sps:$4 sm:$0xff]  }
 0x6b6   : > { %9406 = vmatpush1.bf16.msra.mxu1 %v14830_v2  ;;  %9743 = vmatpush1.bf16.msra.mxu0 %v14831_v13  ;;  %v14841_v2 = vld [vmem:[%s15630_s16 + $0x764] ss:$16 sps:$4 sm:$0xff]   ;;  %v14842_v13 = vld [vmem:[%s15630_s16 + $0x148] ss:$16 sps:$4 sm:$0xff]  }
 0x6b7   : > { %9407 = vmatprep.subr.bf16.mxu1 %v14832_v52  ;;  %9744 = vmatprep.subr.bf16.mxu0 %v14833_v45  ;;  %v14843_v52 = vld [vmem:[%s15630_s16 + $0x760] ss:$16 sps:$4 sm:$0xff]   ;;  %v14844_v45 = vld [vmem:[%s15630_s16 + $0x16c] ss:$16 sps:$4 sm:$0xff]  }
 0x6ba   : > { %9408 = vmatpush1.bf16.msra.mxu1 %v14834_v21  ;;  %9745 = vmatpush1.bf16.msra.mxu0 %v14835_v22  ;;  %v14845_v21 = vld [vmem:[%s15630_s16 + $0x784] ss:$16 sps:$4 sm:$0xff]   ;;  %v9322_v22 = vunpack.i.h.s16 %v18187_v53 }
 0x6bb   : > { %9409 = vmatprep.subr.bf16.mxu1 %v14836_v37  ;;  %9746 = vmatprep.subr.bf16.mxu0 %v14837_v48  ;;  %v14846_v37 = vld [vmem:[%s15630_s16 + $0x168] ss:$16 sps:$4 sm:$0xff]   ;;  %v14847_v48 = vld [vmem:[%s15630_s16 + $0x780] ss:$16 sps:$4 sm:$0xff]   ;;  %v14850_v53 = vld [vmem:[%s15630_s16 + $0x194] ss:$16 sps:$4 sm:$0xff]  }
 0x6be   : > { %9410 = vmatpush1.bf16.msra.mxu1 %v14838_v5  ;;  %9747 = vmatpush1.bf16.msra.mxu0 %v14839_v46  ;;  %v14848_v5 = vld [vmem:[%s15630_s16 + $0x7a4] ss:$16 sps:$4 sm:$0xff]   ;;  %v18279_v46 = vpack.i.b16 %v9322_v22, %v9322_v22  ;;  %v14858_v22 = vld [vmem:[%s15630_s16 + $0x1d0] ss:$16 sps:$4 sm:$0xff]  }
 0x6bf   : > { %9411 = vmatprep.subr.bf16.mxu1 %v14840_v16  ;;  %9748 = vmatprep.subr.bf16.mxu0 %v14841_v2  ;;  %v9326_v16 = vunpack.i.h.s16 %v18196_v30  ;;  %v14849_v2 = vld [vmem:[%s15630_s16 + $0x7a0] ss:$16 sps:$4 sm:$0xff]  }
 0x6c0   : > { %v14851_v30 = vld [vmem:[%s15630_s16 + $0x190] ss:$16 sps:$4 sm:$0xff]  }
 0x6c2   : > { %9412 = vmatpush1.bf16.msra.mxu1 %v14842_v13  ;;  %9749 = vmatpush1.bf16.msra.mxu0 %v14843_v52  ;;  %v18292_v13 = vpack.i.b16 %v9326_v16, %v9326_v16  ;;  %v14862_v16 = vld [vmem:[%s15630_s16 + $0x1f0] ss:$16 sps:$4 sm:$0xff]  }
 0x6c3   : > { %9413 = vmatprep.subr.bf16.mxu1 %v14844_v45  ;;  %9750 = vmatprep.subr.bf16.mxu0 %v14845_v21  ;;  %v14854_v45 = vld [vmem:[%s15630_s16 + $0x1b0] ss:$16 sps:$4 sm:$0xff]   ;;  %v14857_v21 = vld [vmem:[%s15630_s16 + $0x7f4] ss:$16 sps:$4 sm:$0xff]  }
 0x6c4   : > { %v18306_v52 = vrot.slane %v18292_v13, %v16169_v51 }
 0x6c6   : > { %9414 = vmatpush1.bf16.msra.mxu1 %v14846_v37  ;;  %9751 = vmatpush1.bf16.msra.mxu0 %v14847_v48  ;;  %v14859_v37 = vld [vmem:[%s15630_s16 + $0x7f0] ss:$16 sps:$4 sm:$0xff]   ;;  %v14860_v48 = vld [vmem:[%s15630_s16 + $0x1f4] ss:$16 sps:$4 sm:$0xff]  }
 0x6c7   : > { %12816 = vmatprep.subr.msk.bf16.mxu1 %vm2608_vm0, %v16252_v60  ;;  %9752 = vmatprep.subr.bf16.mxu0 %v14848_v5  ;;  %v18289_v60 = vrot.slane %v18279_v46, %v16169_v51  ;;  %v14861_v5 = vld [vmem:[%s15630_s16 + $0x814] ss:$16 sps:$4 sm:$0xff]  }
 0x6ca   : > { %9416 = vmatpush1.bf16.msra.mxu1 %v16261_v6  ;;  %9753 = vmatpush1.bf16.msra.mxu0 %v14849_v2  ;;  %v14852_v6 = vld [vmem:[%s15630_s16 + $0x1b4] ss:$16 sps:$4 sm:$0xff]   ;;  %v14863_v2 = vld [vmem:[%s15630_s16 + $0x810] ss:$16 sps:$4 sm:$0xff]  }
 0x6cb   : > { %9445 = vmatprep.subr.bf16.mxu1 %v14850_v53  ;;  %12832 = vmatprep.subr.msk.bf16.mxu0 %vm2608_vm0, %v16264_v8  ;;  %v18301_v8 = vrot.slane %v18207_v59, %v16166_v50  ;;  %v14856_v59 = vld [vmem:[%s15630_s16 + $0x1d4] ss:$16 sps:$4 sm:$0xff]  }
 0x6cc   : > { %v14864_v53 = vld [vmem:[%s15630_s16 + $0x214] ss:$16 sps:$4 sm:$0xff]  }
 0x6cd   : > { %9424 = vmatmul.mubr.bf16.vlgmr.msra.gmra.mrb[80].mxu1 %v18200_v32  ;;  %v14853_v32 = vld [vmem:[%s15630_s16 + $0x7d4] ss:$16 sps:$4 sm:$0xff]  }
 0x6ce   : > { %9446 = vmatpush1.bf16.msra.mxu1 %v14851_v30  ;;  %12819 = vmatprep.mubr.msk.bf16.mxu1 %vm2604_vm1, %v18289_v60  ;;  %v14865_v30 = vld [vmem:[%s15630_s16 + $0x834] ss:$16 sps:$4 sm:$0xff]  }
 0x6cf   : > { %9755 = vmatpush1.bf16.msra.mxu0 %v16279_v15  ;;  %9447 = vmatprep.subr.bf16.mxu1 %v14852_v6  ;;  %v14855_v15 = vld [vmem:[%s15630_s16 + $0x7d0] ss:$16 sps:$4 sm:$0xff]  }
 0x6d0   : > { %9825 = vmatprep.subr.bf16.mxu0 %v14853_v32  ;;  %v14866_v6 = vld [vmem:[%s15630_s16 + $0x210] ss:$16 sps:$4 sm:$0xff]  }
 0x6d1   : > { %v14867_v32 = vld [vmem:[%s15630_s16 + $0x830] ss:$16 sps:$4 sm:$0xff]  }
 0x6d2   : > { %9763 = vmatmul.mubr.bf16.vlgmr.msra.gmra.mrb[64].mxu0 %v18301_v8  ;;  %9448 = vmatpush1.bf16.msra.mxu1 %v14854_v45  ;;  %v14868_v45 = vld [vmem:[%s15630_s16 + $0x234] ss:$16 sps:$4 sm:$0xff]  }
 0x6d3   : > { %9826 = vmatpush1.bf16.msra.mxu0 %v14855_v15  ;;  %12837 = vmatprep.mubr.msk.bf16.mxu0 %vm2604_vm1, %v18306_v52  ;;  %v14869_v15 = vld [vmem:[%s15630_s16 + $0x854] ss:$16 sps:$4 sm:$0xff]  }
 0x6d4   : > { %9449 = vmatprep.subr.bf16.mxu1 %v14856_v59  ;;  %9827 = vmatprep.subr.bf16.mxu0 %v14857_v21  ;;  %v14870_v59 = vld [vmem:[%s15630_s16 + $0x230] ss:$16 sps:$4 sm:$0xff]  }
 0x6d5   : > { %v14871_v21 = vld [vmem:[%s15630_s16 + $0x850] ss:$16 sps:$4 sm:$0xff]  }
 0x6d6   : > { %9450 = vmatpush1.bf16.msra.mxu1 %v14858_v22  ;;  %v14872_v22 = vld [vmem:[%s15630_s16 + $0x254] ss:$16 sps:$4 sm:$0xff]  }
 0x6d7   : > { %9828 = vmatpush1.bf16.msra.mxu0 %v14859_v37  ;;  %9451 = vmatprep.subr.bf16.mxu1 %v14860_v48  ;;  %v14873_v37 = vld [vmem:[%s15630_s16 + $0x874] ss:$16 sps:$4 sm:$0xff]   ;;  %v14874_v48 = vld [vmem:[%s15630_s16 + $0x250] ss:$16 sps:$4 sm:$0xff]  }
 0x6d8   : > { %9829 = vmatprep.subr.bf16.mxu0 %v14861_v5  ;;  %v14875_v5 = vld [vmem:[%s15630_s16 + $0x870] ss:$16 sps:$4 sm:$0xff]  }
 0x6da   : > { %9452 = vmatpush1.bf16.msra.mxu1 %v14862_v16  ;;  %v14876_v16 = vld [vmem:[%s15630_s16 + $0x274] ss:$16 sps:$4 sm:$0xff]  }
 0x6db   : > { %9830 = vmatpush1.bf16.msra.mxu0 %v14863_v2  ;;  %9453 = vmatprep.subr.bf16.mxu1 %v14864_v53  ;;  %v14877_v2 = vld [vmem:[%s15630_s16 + $0x894] ss:$16 sps:$4 sm:$0xff]   ;;  %v14878_v53 = vld [vmem:[%s15630_s16 + $0x270] ss:$16 sps:$4 sm:$0xff]  }
 0x6dc   : > { %9831 = vmatprep.subr.bf16.mxu0 %v14865_v30  ;;  %v14879_v30 = vld [vmem:[%s15630_s16 + $0x890] ss:$16 sps:$4 sm:$0xff]  }
 0x6de   : > { %9454 = vmatpush1.bf16.msra.mxu1 %v14866_v6  ;;  %v14880_v6 = vld [vmem:[%s15630_s16 + $0x294] ss:$16 sps:$4 sm:$0xff]  }
 0x6df   : > { %9832 = vmatpush1.bf16.msra.mxu0 %v14867_v32  ;;  %9455 = vmatprep.subr.bf16.mxu1 %v14868_v45  ;;  %v14881_v32 = vld [vmem:[%s15630_s16 + $0x8b4] ss:$16 sps:$4 sm:$0xff]   ;;  %v14882_v45 = vld [vmem:[%s15630_s16 + $0x290] ss:$16 sps:$4 sm:$0xff]  }
 0x6e0   : > { %9833 = vmatprep.subr.bf16.mxu0 %v14869_v15  ;;  %v14883_v15 = vld [vmem:[%s15630_s16 + $0x8b0] ss:$16 sps:$4 sm:$0xff]  }
 0x6e2   : > { %9456 = vmatpush1.bf16.msra.mxu1 %v14870_v59  ;;  %v14884_v59 = vld [vmem:[%s15630_s16 + $0x2b4] ss:$16 sps:$4 sm:$0xff]  }
 0x6e3   : > { %9834 = vmatpush1.bf16.msra.mxu0 %v14871_v21  ;;  %9457 = vmatprep.subr.bf16.mxu1 %v14872_v22  ;;  %v14885_v21 = vld [vmem:[%s15630_s16 + $0x8d4] ss:$16 sps:$4 sm:$0xff]   ;;  %v14886_v22 = vld [vmem:[%s15630_s16 + $0x2b0] ss:$16 sps:$4 sm:$0xff]  }
 0x6e4   : > { %9835 = vmatprep.subr.bf16.mxu0 %v14873_v37  ;;  %v14887_v37 = vld [vmem:[%s15630_s16 + $0x8d0] ss:$16 sps:$4 sm:$0xff]  }
 0x6e6   : > { %9458 = vmatpush1.bf16.msra.mxu1 %v14874_v48  ;;  %v14888_v48 = vld [vmem:[%s15630_s16 + $0x2d4] ss:$16 sps:$4 sm:$0xff]  }
 0x6e7   : > { %9836 = vmatpush1.bf16.msra.mxu0 %v14875_v5  ;;  %9459 = vmatprep.subr.bf16.mxu1 %v14876_v16  ;;  %v14889_v5 = vld [vmem:[%s15630_s16 + $0x8f4] ss:$16 sps:$4 sm:$0xff]   ;;  %v14890_v16 = vld [vmem:[%s15630_s16 + $0x2d0] ss:$16 sps:$4 sm:$0xff]  }
 0x6e8   : > { %9837 = vmatprep.subr.bf16.mxu0 %v14877_v2  ;;  %v14891_v2 = vld [vmem:[%s15630_s16 + $0x8f0] ss:$16 sps:$4 sm:$0xff]  }
 0x6ea   : > { %9460 = vmatpush1.bf16.msra.mxu1 %v14878_v53  ;;  %v14892_v53 = vld [vmem:[%s15630_s16 + $0x2f4] ss:$16 sps:$4 sm:$0xff]  }
 0x6eb   : > { %9838 = vmatpush1.bf16.msra.mxu0 %v14879_v30  ;;  %9461 = vmatprep.subr.bf16.mxu1 %v14880_v6  ;;  %v14893_v30 = vld [vmem:[%s15630_s16 + $0x914] ss:$16 sps:$4 sm:$0xff]   ;;  %v14894_v6 = vld [vmem:[%s15630_s16 + $0x2f0] ss:$16 sps:$4 sm:$0xff]  }
 0x6ec   : > { %9839 = vmatprep.subr.bf16.mxu0 %v14881_v32  ;;  %v14895_v32 = vld [vmem:[%s15630_s16 + $0x910] ss:$16 sps:$4 sm:$0xff]  }
 0x6ee   : > { %9462 = vmatpush1.bf16.msra.mxu1 %v14882_v45  ;;  %v14896_v45 = vld [vmem:[%s15630_s16 + $0x934] ss:$16 sps:$4 sm:$0xff]  }
 0x6ef   : > { %9840 = vmatpush1.bf16.msra.mxu0 %v14883_v15  ;;  %9463 = vmatprep.subr.bf16.mxu1 %v14884_v59  ;;  %v18358_v15 = vcombine.high %v18190_v24, %v18190_v24  ;;  %v14897_v59 = vld [vmem:[%s15630_s16 + $0x930] ss:$16 sps:$4 sm:$0xff]  }
 0x6f0   : > { %9841 = vmatprep.subr.bf16.mxu0 %v14885_v21  ;;  %v18364_v21 = vrot.slane %v18279_v46, %v16166_v50  ;;  %v14900_v46 = vld [vmem:[%s15630_s16 + $0x1bc] ss:$16 sps:$4 sm:$0xff]  }
 0x6f2   : > { %9464 = vmatpush1.bf16.msra.mxu1 %v14886_v22  ;;  %v14898_v22 = vld [vmem:[%s15630_s16 + $0x19c] ss:$16 sps:$4 sm:$0xff]  }
 0x6f3   : > { %9842 = vmatpush1.bf16.msra.mxu0 %v14887_v37  ;;  %9465 = vmatprep.subr.bf16.mxu1 %v14888_v48  ;;  %v14901_v37 = vld [vmem:[%s15630_s16 + $0x964] ss:$16 sps:$4 sm:$0xff]  }
 0x6f4   : > { %9843 = vmatprep.subr.bf16.mxu0 %v14889_v5  ;;  %v14905_v5 = vld [vmem:[%s15630_s16 + $0x984] ss:$16 sps:$4 sm:$0xff]  }
 0x6f6   : > { %9466 = vmatpush1.bf16.msra.mxu1 %v14890_v16  ;;  %v14906_v16 = vld [vmem:[%s15630_s16 + $0x1d8] ss:$16 sps:$4 sm:$0xff]  }
 0x6f7   : > { %9844 = vmatpush1.bf16.msra.mxu0 %v14891_v2  ;;  %9467 = vmatprep.subr.bf16.mxu1 %v14892_v53  ;;  %v14907_v2 = vld [vmem:[%s15630_s16 + $0x980] ss:$16 sps:$4 sm:$0xff]   ;;  %v14908_v53 = vld [vmem:[%s15630_s16 + $0x1fc] ss:$16 sps:$4 sm:$0xff]  }
 0x6f8   : > { %9845 = vmatprep.subr.bf16.mxu0 %v14893_v30  ;;  %v14909_v30 = vld [vmem:[%s15630_s16 + $0x9a4] ss:$16 sps:$4 sm:$0xff]  }
 0x6fa   : > { %9468 = vmatpush1.bf16.msra.mxu1 %v14894_v6  ;;  %v14910_v6 = vld [vmem:[%s15630_s16 + $0x1f8] ss:$16 sps:$4 sm:$0xff]  }
 0x6fb   : > { %9846 = vmatpush1.bf16.msra.mxu0 %v14895_v32  ;;  %12818 = vmatprep.subr.msk.bf16.mxu1 %vm2608_vm0, %v16342_v27  ;;  %v18372_v27 = vpack.i.b16 %v18358_v15, %v18358_v15  ;;  %v14911_v32 = vld [vmem:[%s15630_s16 + $0x9a0] ss:$16 sps:$4 sm:$0xff]  }
 0x6fc   : > { %9847 = vmatprep.subr.bf16.mxu0 %v14896_v45  ;;  %v14912_v45 = vld [vmem:[%s15630_s16 + $0x21c] ss:$16 sps:$4 sm:$0xff]  }
 0x6fd   : > { %v18386_v48 = vrot.slane %v18372_v27, %v16169_v51 }
 0x6fe   : > { %9470 = vmatpush1.bf16.msra.mxu1 %v16350_v33  ;;  %v14899_v33 = vld [vmem:[%s15630_s16 + $0x198] ss:$16 sps:$4 sm:$0xff]  }
 0x6ff   : > { %9848 = vmatpush1.bf16.msra.mxu0 %v14897_v59  ;;  %9486 = vmatprep.subr.bf16.mxu1 %v14898_v22  ;;  %v14913_v59 = vld [vmem:[%s15630_s16 + $0x9c4] ss:$16 sps:$4 sm:$0xff]   ;;  %v14914_v22 = vld [vmem:[%s15630_s16 + $0x218] ss:$16 sps:$4 sm:$0xff]  }
 0x700   : > { %12836 = vmatprep.subr.msk.bf16.mxu0 %vm2608_vm0, %v16353_v35  ;;  %v18381_v35 = vrot.slane %v18292_v13, %v16166_v50  ;;  %v14904_v13 = vld [vmem:[%s15630_s16 + $0x1dc] ss:$16 sps:$4 sm:$0xff]  }
 0x701   : > { %9478 = vmatmul.mubr.bf16.vlgmr.msra.gmra.mrb[84].mxu1 %v18364_v21 }
 0x702   : > { %9487 = vmatpush1.bf16.msra.mxu1 %v14899_v33  ;;  %12821 = vmatprep.mubr.msk.bf16.mxu1 %vm2604_vm1, %v18289_v60  ;;  %v14902_v60 = vld [vmem:[%s15630_s16 + $0x1b8] ss:$16 sps:$4 sm:$0xff]   ;;  %v14915_v33 = vld [vmem:[%s15630_s16 + $0x9c0] ss:$16 sps:$4 sm:$0xff]  }
 0x703   : > { %9850 = vmatpush1.bf16.msra.mxu0 %v16369_v42  ;;  %9488 = vmatprep.subr.bf16.mxu1 %v14900_v46  ;;  %v14903_v42 = vld [vmem:[%s15630_s16 + $0x960] ss:$16 sps:$4 sm:$0xff]   ;;  %v14916_v46 = vld [vmem:[%s15630_s16 + $0x23c] ss:$16 sps:$4 sm:$0xff]  }
 0x704   : > { %9920 = vmatprep.subr.bf16.mxu0 %v14901_v37  ;;  %v14917_v37 = vld [vmem:[%s15630_s16 + $0x9e4] ss:$16 sps:$4 sm:$0xff]  }
 0x706   : > { %9858 = vmatmul.mubr.bf16.vlgmr.msra.gmra.mrb[68].mxu0 %v18381_v35  ;;  %9489 = vmatpush1.bf16.msra.mxu1 %v14902_v60  ;;  %v14918_v60 = vld [vmem:[%s15630_s16 + $0x238] ss:$16 sps:$4 sm:$0xff]  }
 0x707   : > { %9921 = vmatpush1.bf16.msra.mxu0 %v14903_v42  ;;  %12842 = vmatprep.mubr.msk.bf16.mxu0 %vm2604_vm1, %v18386_v48  ;;  %v14919_v42 = vld [vmem:[%s15630_s16 + $0x9e0] ss:$16 sps:$4 sm:$0xff]  }
 0x708   : > { %9490 = vmatprep.subr.bf16.mxu1 %v14904_v13  ;;  %9922 = vmatprep.subr.bf16.mxu0 %v14905_v5  ;;  %v14920_v13 = vld [vmem:[%s15630_s16 + $0x25c] ss:$16 sps:$4 sm:$0xff]   ;;  %v14921_v5 = vld [vmem:[%s15630_s16 + $0xa04] ss:$16 sps:$4 sm:$0xff]  }
 0x70a   : > { %9491 = vmatpush1.bf16.msra.mxu1 %v14906_v16  ;;  %v14922_v16 = vld [vmem:[%s15630_s16 + $0x258] ss:$16 sps:$4 sm:$0xff]  }
 0x70b   : > { %9923 = vmatpush1.bf16.msra.mxu0 %v14907_v2  ;;  %9492 = vmatprep.subr.bf16.mxu1 %v14908_v53  ;;  %v14923_v2 = vld [vmem:[%s15630_s16 + $0xa00] ss:$16 sps:$4 sm:$0xff]   ;;  %v14924_v53 = vld [vmem:[%s15630_s16 + $0x27c] ss:$16 sps:$4 sm:$0xff]  }
 0x70c   : > { %9924 = vmatprep.subr.bf16.mxu0 %v14909_v30  ;;  %v14925_v30 = vld [vmem:[%s15630_s16 + $0xa24] ss:$16 sps:$4 sm:$0xff]  }
 0x70e   : > { %9493 = vmatpush1.bf16.msra.mxu1 %v14910_v6  ;;  %v14926_v6 = vld [vmem:[%s15630_s16 + $0x278] ss:$16 sps:$4 sm:$0xff]  }
 0x70f   : > { %9925 = vmatpush1.bf16.msra.mxu0 %v14911_v32  ;;  %9494 = vmatprep.subr.bf16.mxu1 %v14912_v45  ;;  %v14927_v32 = vld [vmem:[%s15630_s16 + $0xa20] ss:$16 sps:$4 sm:$0xff]   ;;  %v14928_v45 = vld [vmem:[%s15630_s16 + $0x29c] ss:$16 sps:$4 sm:$0xff]  }
 0x710   : > { %9926 = vmatprep.subr.bf16.mxu0 %v14913_v59  ;;  %v14929_v59 = vld [vmem:[%s15630_s16 + $0xa44] ss:$16 sps:$4 sm:$0xff]  }
 0x712   : > { %9495 = vmatpush1.bf16.msra.mxu1 %v14914_v22  ;;  %v14930_v22 = vld [vmem:[%s15630_s16 + $0x298] ss:$16 sps:$4 sm:$0xff]  }
 0x713   : > { %9927 = vmatpush1.bf16.msra.mxu0 %v14915_v33  ;;  %9496 = vmatprep.subr.bf16.mxu1 %v14916_v46  ;;  %v14931_v33 = vld [vmem:[%s15630_s16 + $0xa40] ss:$16 sps:$4 sm:$0xff]   ;;  %v14932_v46 = vld [vmem:[%s15630_s16 + $0x2bc] ss:$16 sps:$4 sm:$0xff]  }
 0x714   : > { %9928 = vmatprep.subr.bf16.mxu0 %v14917_v37  ;;  %v14933_v37 = vld [vmem:[%s15630_s16 + $0xa64] ss:$16 sps:$4 sm:$0xff]  }
 0x716   : > { %9497 = vmatpush1.bf16.msra.mxu1 %v14918_v60  ;;  %v14934_v60 = vld [vmem:[%s15630_s16 + $0x2b8] ss:$16 sps:$4 sm:$0xff]  }
 0x717   : > { %9929 = vmatpush1.bf16.msra.mxu0 %v14919_v42  ;;  %9498 = vmatprep.subr.bf16.mxu1 %v14920_v13  ;;  %v14935_v42 = vld [vmem:[%s15630_s16 + $0xa60] ss:$16 sps:$4 sm:$0xff]   ;;  %v14936_v13 = vld [vmem:[%s15630_s16 + $0x2dc] ss:$16 sps:$4 sm:$0xff]  }
 0x718   : > { %9930 = vmatprep.subr.bf16.mxu0 %v14921_v5  ;;  %v14937_v5 = vld [vmem:[%s15630_s16 + $0xa84] ss:$16 sps:$4 sm:$0xff]  }
 0x71a   : > { %9499 = vmatpush1.bf16.msra.mxu1 %v14922_v16  ;;  %v14938_v16 = vld [vmem:[%s15630_s16 + $0x2d8] ss:$16 sps:$4 sm:$0xff]  }
 0x71b   : > { %9931 = vmatpush1.bf16.msra.mxu0 %v14923_v2  ;;  %9500 = vmatprep.subr.bf16.mxu1 %v14924_v53  ;;  %v14939_v2 = vld [vmem:[%s15630_s16 + $0xa80] ss:$16 sps:$4 sm:$0xff]   ;;  %v14940_v53 = vld [vmem:[%s15630_s16 + $0x2fc] ss:$16 sps:$4 sm:$0xff]  }
 0x71c   : > { %9932 = vmatprep.subr.bf16.mxu0 %v14925_v30  ;;  %v14941_v30 = vld [vmem:[%s15630_s16 + $0xaa4] ss:$16 sps:$4 sm:$0xff]  }
 0x71e   : > { %9501 = vmatpush1.bf16.msra.mxu1 %v14926_v6  ;;  %v14942_v6 = vld [vmem:[%s15630_s16 + $0x2f8] ss:$16 sps:$4 sm:$0xff]  }
 0x71f   : > { %9933 = vmatpush1.bf16.msra.mxu0 %v14927_v32  ;;  %9502 = vmatprep.subr.bf16.mxu1 %v14928_v45  ;;  %v14943_v32 = vld [vmem:[%s15630_s16 + $0xaa0] ss:$16 sps:$4 sm:$0xff]   ;;  %v14944_v45 = vld [vmem:[%s15630_s16 + $0xac4] ss:$16 sps:$4 sm:$0xff]  }
 0x720   : > { %9934 = vmatprep.subr.bf16.mxu0 %v14929_v59  ;;  %v18438_v59 = vpack.i.b16 %v18190_v24, %v18190_v24 }
 0x722   : > { %9503 = vmatpush1.bf16.msra.mxu1 %v14930_v22  ;;  %v9328_v22 = vunpack.i.h.s16 %v18358_v15  ;;  %v14947_v15 = vld [vmem:[%s15630_s16 + $0x320] ss:$16 sps:$4 sm:$0xff]  }
 0x723   : > { %9935 = vmatpush1.bf16.msra.mxu0 %v14931_v33  ;;  %9504 = vmatprep.subr.bf16.mxu1 %v14932_v46  ;;  %v14945_v33 = vld [vmem:[%s15630_s16 + $0xac0] ss:$16 sps:$4 sm:$0xff]   ;;  %v14946_v46 = vld [vmem:[%s15630_s16 + $0x324] ss:$16 sps:$4 sm:$0xff]  }
 0x724   : > { %9936 = vmatprep.subr.bf16.mxu0 %v14933_v37  ;;  %v18451_v24 = vpack.i.b16 %v9328_v22, %v9328_v22  ;;  %v14963_v22 = vld [vmem:[%s15630_s16 + $0xb50] ss:$16 sps:$4 sm:$0xff]  }
 0x726   : > { %9505 = vmatpush1.bf16.msra.mxu1 %v14934_v60  ;;  %v18465_v37 = vrot.slane %v18451_v24, %v16169_v51  ;;  %v14950_v60 = vld [vmem:[%s15630_s16 + $0x340] ss:$16 sps:$4 sm:$0xff]  }
 0x727   : > { %9937 = vmatpush1.bf16.msra.mxu0 %v14935_v42  ;;  %9506 = vmatprep.subr.bf16.mxu1 %v14936_v13  ;;  %v14953_v42 = vld [vmem:[%s15630_s16 + $0xb14] ss:$16 sps:$4 sm:$0xff]   ;;  %v14954_v13 = vld [vmem:[%s15630_s16 + $0x360] ss:$16 sps:$4 sm:$0xff]  }
 0x728   : > { %9938 = vmatprep.subr.bf16.mxu0 %v14937_v5  ;;  %v14955_v5 = vld [vmem:[%s15630_s16 + $0xb10] ss:$16 sps:$4 sm:$0xff]  }
 0x72a   : > { %9507 = vmatpush1.bf16.msra.mxu1 %v14938_v16  ;;  %v14956_v16 = vld [vmem:[%s15630_s16 + $0x384] ss:$16 sps:$4 sm:$0xff]  }
 0x72b   : > { %9939 = vmatpush1.bf16.msra.mxu0 %v14939_v2  ;;  %9508 = vmatprep.subr.bf16.mxu1 %v14940_v53  ;;  %v14957_v2 = vld [vmem:[%s15630_s16 + $0xb34] ss:$16 sps:$4 sm:$0xff]   ;;  %v14958_v53 = vld [vmem:[%s15630_s16 + $0x380] ss:$16 sps:$4 sm:$0xff]  }
 0x72c   : > { %9940 = vmatprep.subr.bf16.mxu0 %v14941_v30  ;;  %v14959_v30 = vld [vmem:[%s15630_s16 + $0xb30] ss:$16 sps:$4 sm:$0xff]  }
 0x72e   : > { %9509 = vmatpush1.bf16.msra.mxu1 %v14942_v6  ;;  %v14960_v6 = vld [vmem:[%s15630_s16 + $0x3a4] ss:$16 sps:$4 sm:$0xff]  }
 0x72f   : > { %9941 = vmatpush1.bf16.msra.mxu0 %v14943_v32  ;;  %12820 = vmatprep.subr.msk.bf16.mxu1 %vm2608_vm0, %v16434_v0  ;;  %v18448_v0 = vrot.slane %v18438_v59, %v16169_v51  ;;  %v14961_v32 = vld [vmem:[%s15630_s16 + $0xb54] ss:$16 sps:$4 sm:$0xff]  }
 0x730   : > { %9942 = vmatprep.subr.bf16.mxu0 %v14944_v45  ;;  %v14962_v45 = vld [vmem:[%s15630_s16 + $0x3a0] ss:$16 sps:$4 sm:$0xff]  }
 0x732   : > { %9511 = vmatpush1.bf16.msra.mxu1 %v16442_v10  ;;  %v14948_v10 = vld [vmem:[%s15630_s16 + $0x344] ss:$16 sps:$4 sm:$0xff]  }
 0x733   : > { %9943 = vmatpush1.bf16.msra.mxu0 %v14945_v33  ;;  %9540 = vmatprep.subr.bf16.mxu1 %v14946_v46  ;;  %v14964_v33 = vld [vmem:[%s15630_s16 + $0x3c4] ss:$16 sps:$4 sm:$0xff]  }
 0x734   : > { %12841 = vmatprep.subr.msk.bf16.mxu0 %vm2608_vm0, %v16445_v11  ;;  %v18460_v11 = vrot.slane %v18372_v27, %v16166_v50  ;;  %v14952_v27 = vld [vmem:[%s15630_s16 + $0x364] ss:$16 sps:$4 sm:$0xff]  }
 0x735   : > { %9519 = vmatmul.mubr.bf16.vlgmr.msra.gmra.mrb[88].mxu1 %v18364_v21  ;;  %v14949_v21 = vld [vmem:[%s15630_s16 + $0xaf4] ss:$16 sps:$4 sm:$0xff]  }
 0x736   : > { %9541 = vmatpush1.bf16.msra.mxu1 %v14947_v15  ;;  %12824 = vmatprep.mubr.msk.bf16.mxu1 %vm2604_vm1, %v18448_v0  ;;  %v14965_v46 = vld [vmem:[%s15630_s16 + $0xb74] ss:$16 sps:$4 sm:$0xff]   ;;  %v14966_v15 = vld [vmem:[%s15630_s16 + $0x3c0] ss:$16 sps:$4 sm:$0xff]  }
 0x737   : > { %9945 = vmatpush1.bf16.msra.mxu0 %v16462_v23  ;;  %9542 = vmatprep.subr.bf16.mxu1 %v14948_v10  ;;  %v14951_v23 = vld [vmem:[%s15630_s16 + $0xaf0] ss:$16 sps:$4 sm:$0xff]  }
 0x738   : > { %10015 = vmatprep.subr.bf16.mxu0 %v14949_v21  ;;  %v14967_v10 = vld [vmem:[%s15630_s16 + $0xb70] ss:$16 sps:$4 sm:$0xff]   ;;  %v14968_v21 = vld [vmem:[%s15630_s16 + $0x3e4] ss:$16 sps:$4 sm:$0xff]  }
 0x73a   : > { %9953 = vmatmul.mubr.bf16.vlgmr.msra.gmra.mrb[72].mxu0 %v18460_v11  ;;  %9543 = vmatpush1.bf16.msra.mxu1 %v14950_v60  ;;  %v14969_v60 = vld [vmem:[%s15630_s16 + $0xb94] ss:$16 sps:$4 sm:$0xff]  }
 0x73b   : > { %10016 = vmatpush1.bf16.msra.mxu0 %v14951_v23  ;;  %12846 = vmatprep.mubr.msk.bf16.mxu0 %vm2604_vm1, %v18465_v37  ;;  %v14970_v23 = vld [vmem:[%s15630_s16 + $0x3e0] ss:$16 sps:$4 sm:$0xff]  }
 0x73c   : > { %9544 = vmatprep.subr.bf16.mxu1 %v14952_v27  ;;  %10017 = vmatprep.subr.bf16.mxu0 %v14953_v42  ;;  %v14971_v27 = vld [vmem:[%s15630_s16 + $0xb90] ss:$16 sps:$4 sm:$0xff]   ;;  %v14972_v42 = vld [vmem:[%s15630_s16 + $0x404] ss:$16 sps:$4 sm:$0xff]  }
 0x73e   : > { %9545 = vmatpush1.bf16.msra.mxu1 %v14954_v13  ;;  %v14973_v13 = vld [vmem:[%s15630_s16 + $0xbb4] ss:$16 sps:$4 sm:$0xff]  }
 0x73f   : > { %10018 = vmatpush1.bf16.msra.mxu0 %v14955_v5  ;;  %9546 = vmatprep.subr.bf16.mxu1 %v14956_v16  ;;  %v14974_v5 = vld [vmem:[%s15630_s16 + $0x400] ss:$16 sps:$4 sm:$0xff]  }
 0x740   : > { %10019 = vmatprep.subr.bf16.mxu0 %v14957_v2  ;;  %v14975_v16 = vld [vmem:[%s15630_s16 + $0xbb0] ss:$16 sps:$4 sm:$0xff]   ;;  %v14976_v2 = vld [vmem:[%s15630_s16 + $0x424] ss:$16 sps:$4 sm:$0xff]  }
 0x742   : > { %9547 = vmatpush1.bf16.msra.mxu1 %v14958_v53  ;;  %v14977_v53 = vld [vmem:[%s15630_s16 + $0xbd4] ss:$16 sps:$4 sm:$0xff]  }
 0x743   : > { %10020 = vmatpush1.bf16.msra.mxu0 %v14959_v30  ;;  %9548 = vmatprep.subr.bf16.mxu1 %v14960_v6  ;;  %v14978_v30 = vld [vmem:[%s15630_s16 + $0x420] ss:$16 sps:$4 sm:$0xff]  }
 0x744   : > { %10021 = vmatprep.subr.bf16.mxu0 %v14961_v32  ;;  %v14979_v6 = vld [vmem:[%s15630_s16 + $0xbd0] ss:$16 sps:$4 sm:$0xff]   ;;  %v14980_v32 = vld [vmem:[%s15630_s16 + $0x444] ss:$16 sps:$4 sm:$0xff]  }
 0x746   : > { %9549 = vmatpush1.bf16.msra.mxu1 %v14962_v45  ;;  %v14981_v45 = vld [vmem:[%s15630_s16 + $0xbf4] ss:$16 sps:$4 sm:$0xff]  }
 0x747   : > { %10022 = vmatpush1.bf16.msra.mxu0 %v14963_v22  ;;  %9550 = vmatprep.subr.bf16.mxu1 %v14964_v33  ;;  %v14982_v22 = vld [vmem:[%s15630_s16 + $0x440] ss:$16 sps:$4 sm:$0xff]  }
 0x748   : > { %10023 = vmatprep.subr.bf16.mxu0 %v14965_v46  ;;  %v14983_v33 = vld [vmem:[%s15630_s16 + $0xbf0] ss:$16 sps:$4 sm:$0xff]   ;;  %v14984_v46 = vld [vmem:[%s15630_s16 + $0x464] ss:$16 sps:$4 sm:$0xff]  }
 0x74a   : > { %9551 = vmatpush1.bf16.msra.mxu1 %v14966_v15  ;;  %v14985_v15 = vld [vmem:[%s15630_s16 + $0xc14] ss:$16 sps:$4 sm:$0xff]  }
 0x74b   : > { %10024 = vmatpush1.bf16.msra.mxu0 %v14967_v10  ;;  %9552 = vmatprep.subr.bf16.mxu1 %v14968_v21  ;;  %v14986_v10 = vld [vmem:[%s15630_s16 + $0x460] ss:$16 sps:$4 sm:$0xff]  }
 0x74c   : > { %10025 = vmatprep.subr.bf16.mxu0 %v14969_v60  ;;  %v14987_v21 = vld [vmem:[%s15630_s16 + $0xc10] ss:$16 sps:$4 sm:$0xff]   ;;  %v14988_v60 = vld [vmem:[%s15630_s16 + $0x484] ss:$16 sps:$4 sm:$0xff]  }
 0x74e   : > { %9553 = vmatpush1.bf16.msra.mxu1 %v14970_v23  ;;  %v14989_v23 = vld [vmem:[%s15630_s16 + $0xc34] ss:$16 sps:$4 sm:$0xff]  }
 0x74f   : > { %10026 = vmatpush1.bf16.msra.mxu0 %v14971_v27  ;;  %9554 = vmatprep.subr.bf16.mxu1 %v14972_v42  ;;  %v18512_v27 = vrot.slane %v18184_v29, %v16156_v41  ;;  %v14990_v42 = vld [vmem:[%s15630_s16 + $0x480] ss:$16 sps:$4 sm:$0xff]   ;;  %v18527_v29 = vrot.slane %v18438_v59, %v16166_v50  ;;  %v20029_v59 = vld [vmem:[#allocation9_spill] sm:$0xff] }
 0x750   : > { %10027 = vmatprep.subr.bf16.mxu0 %v14973_v13  ;;  %v14991_v13 = vld [vmem:[%s15630_s16 + $0xc30] ss:$16 sps:$4 sm:$0xff]  }
 0x752   : > { %9555 = vmatpush1.bf16.msra.mxu1 %v14974_v5  ;;  %v14992_v5 = vld [vmem:[%s15630_s16 + $0xc54] ss:$16 sps:$4 sm:$0xff]  }
 0x753   : > { %10028 = vmatpush1.bf16.msra.mxu0 %v14975_v16  ;;  %9556 = vmatprep.subr.bf16.mxu1 %v14976_v2  ;;  %v18521_v16 = vrot.slane %v18512_v27, %v16156_v41  ;;  %v20027_v2 = vld [vmem:[#allocation7_spill] sm:$0xff] }
 0x754   : > { %10029 = vmatprep.subr.bf16.mxu0 %v14977_v53  ;;  %v14993_v53 = vld [vmem:[%s15630_s16 + $0xc50] ss:$16 sps:$4 sm:$0xff]  }
 0x756   : > { %9557 = vmatpush1.bf16.msra.mxu1 %v14978_v30  ;;  %v14994_v30 = vld [vmem:[%s15630_s16 + $0x32c] ss:$16 sps:$4 sm:$0xff]  }
 0x757   : > { %10030 = vmatpush1.bf16.msra.mxu0 %v14979_v6  ;;  %9558 = vmatprep.subr.bf16.mxu1 %v14980_v32  ;;  %v20028_v6 = vld [vmem:[#allocation8_spill] sm:$0xff]  ;;  %v14995_v32 = vld [vmem:[%s15630_s16 + $0x328] ss:$16 sps:$4 sm:$0xff]  }
 0x758   : > { %10031 = vmatprep.subr.bf16.mxu0 %v14981_v45  ;;  %v14996_v45 = vld [vmem:[%s15630_s16 + $0x34c] ss:$16 sps:$4 sm:$0xff]  }
 0x75a   : > { %9559 = vmatpush1.bf16.msra.mxu1 %v14982_v22 }
 0x75b   : > { %10032 = vmatpush1.bf16.msra.mxu0 %v14983_v33  ;;  %9560 = vmatprep.subr.bf16.mxu1 %v14984_v46  ;;  %v18546_v33 = vrot.slane %v18451_v24, %v16166_v50  ;;  %v14997_v46 = vld [vmem:[%s15630_s16 + $0xc84] ss:$16 sps:$4 sm:$0xff]  }
 0x75c   : > { %10033 = vmatprep.subr.bf16.mxu0 %v14985_v15 }
 0x75e   : > { %9561 = vmatpush1.bf16.msra.mxu1 %v14986_v10  ;;  %v14998_v10 = vld [vmem:[%s15630_s16 + $0x348] ss:$16 sps:$4 sm:$0xff]  }
 0x75f   : > { %10034 = vmatpush1.bf16.msra.mxu0 %v14987_v21  ;;  %9562 = vmatprep.subr.bf16.mxu1 %v14988_v60  ;;  %v14999_v60 = vld [vmem:[%s15630_s16 + $0xc80] ss:$16 sps:$4 sm:$0xff]  }
 0x760   : > { %10035 = vmatprep.subr.bf16.mxu0 %v14989_v23  ;;  %v15000_v23 = vld [vmem:[%s15630_s16 + $0x36c] ss:$16 sps:$4 sm:$0xff]  }
 0x762   : > { %9563 = vmatpush1.bf16.msra.mxu1 %v14990_v42 }
 0x763   : > { %10036 = vmatpush1.bf16.msra.mxu0 %v14991_v13  ;;  %12823 = vmatprep.subr.msk.bf16.mxu1 %vm2608_vm0, %v16525_v58  ;;  %v18535_v58 = vpack.i.b16 %v18521_v16, %v18521_v16  ;;  %v15001_v13 = vld [vmem:[%s15630_s16 + $0xca4] ss:$16 sps:$4 sm:$0xff]  }
 0x764   : > { %10037 = vmatprep.subr.bf16.mxu0 %v14992_v5 }
 0x766   : > { %9565 = vmatpush1.bf16.msra.mxu1 %v20027_v2  ;;  %v15002_v2 = vld [vmem:[%s15630_s16 + $0x368] ss:$16 sps:$4 sm:$0xff]  }
 0x767   : > { %10038 = vmatpush1.bf16.msra.mxu0 %v14993_v53  ;;  %9581 = vmatprep.subr.bf16.mxu1 %v14994_v30  ;;  %v15003_v30 = vld [vmem:[%s15630_s16 + $0xca0] ss:$16 sps:$4 sm:$0xff]  }
 0x768   : > { %12845 = vmatprep.subr.msk.bf16.mxu0 %vm2608_vm0, %v20028_v6 }
 0x769   : > { %9573 = vmatmul.mubr.bf16.vlgmr.msra.gmra.mrb[92].mxu1 %v18527_v29 }
 0x76a   : > { %9582 = vmatpush1.bf16.msra.mxu1 %v14995_v32  ;;  %12826 = vmatprep.mubr.msk.bf16.mxu1 %vm2604_vm1, %v18448_v0  ;;  %v18553_v0 = vrot.slane %v18535_v58, %v16169_v51  ;;  %v15004_v32 = vld [vmem:[%s15630_s16 + $0x38c] ss:$16 sps:$4 sm:$0xff]  }
 0x76b   : > { %10040 = vmatpush1.bf16.msra.mxu0 %v20029_v59  ;;  %9583 = vmatprep.subr.bf16.mxu1 %v14996_v45  ;;  %v15005_v59 = vld [vmem:[%s15630_s16 + $0xcc4] ss:$16 sps:$4 sm:$0xff]   ;;  %v15006_v45 = vld [vmem:[%s15630_s16 + $0x388] ss:$16 sps:$4 sm:$0xff]  }
 0x76c   : > { %v18542_v22 = vpop.f32.mrb[76].mxu1  ;;  %10110 = vmatprep.subr.bf16.mxu0 %v14997_v46  ;;  %v15007_v46 = vld [vmem:[%s15630_s16 + $0xcc0] ss:$16 sps:$4 sm:$0xff]  }
 0x76d   : > { %v18549_v15 = vpop.f32.mrb[77].mxu1 }
 0x76e   : > { %10048 = vmatmul.mubr.bf16.vlgmr.msra.gmra.mrb[76].mxu0 %v18546_v33  ;;  %9584 = vmatpush1.bf16.msra.mxu1 %v14998_v10  ;;  %v9388_v21 = vpop.f32.mrb[78].mxu1  ;;  %v15008_v10 = vld [vmem:[%s15630_s16 + $0x3ac] ss:$16 sps:$4 sm:$0xff]  }
 0x76f   : > { %10111 = vmatpush1.bf16.msra.mxu0 %v14999_v60  ;;  %12851 = vmatprep.mubr.msk.bf16.mxu0 %vm2604_vm1, %v18553_v0  ;;  %v9389_v24 = vpop.f32.mrb[79].mxu1  ;;  %v15009_v21 = vld [vmem:[%s15630_s16 + $0xce4] ss:$16 sps:$4 sm:$0xff]   ;;  %v15010_v60 = vld [vmem:[%s15630_s16 + $0x3a8] ss:$16 sps:$4 sm:$0xff]  }
 0x770   : > { %9585 = vmatprep.subr.bf16.mxu1 %v15000_v23  ;;  %v18561_v42 = vpop.f32.mrb[60].mxu0  ;;  %10112 = vmatprep.subr.bf16.mxu0 %v15001_v13  ;;  %v15011_v24 = vld [vmem:[%s15630_s16 + $0xce0] ss:$16 sps:$4 sm:$0xff]   ;;  %v15012_v23 = vld [vmem:[%s15630_s16 + $0x3cc] ss:$16 sps:$4 sm:$0xff]  }
 0x771   : > { %v18564_v5 = vpop.f32.mrb[61].mxu0  ;;  %v15013_v13 = vld [vmem:[%s15630_s16 + $0xd04] ss:$16 sps:$4 sm:$0xff]  }
 0x772   : > { %9586 = vmatpush1.bf16.msra.mxu1 %v15002_v2  ;;  %v9673_v53 = vpop.f32.mrb[62].mxu0  ;;  %v15014_v2 = vld [vmem:[%s15630_s16 + $0x3c8] ss:$16 sps:$4 sm:$0xff]  }
 0x773   : > { %10113 = vmatpush1.bf16.msra.mxu0 %v15003_v30  ;;  %v9674_v6 = vpop.f32.mrb[63].mxu0  ;;  %9587 = vmatprep.subr.bf16.mxu1 %v15004_v32  ;;  %v15015_v53 = vld [vmem:[%s15630_s16 + $0xd00] ss:$16 sps:$4 sm:$0xff]   ;;  %v15016_v30 = vld [vmem:[%s15630_s16 + $0x3ec] ss:$16 sps:$4 sm:$0xff]  }
 0x774   : > { %10114 = vmatprep.subr.bf16.mxu0 %v15005_v59  ;;  %v15017_v6 = vld [vmem:[%s15630_s16 + $0xd24] ss:$16 sps:$4 sm:$0xff]   ;;  %v15018_v32 = vld [vmem:[%s15630_s16 + $0x3e8] ss:$16 sps:$4 sm:$0xff]   ;;  %v15019_v59 = vld [vmem:[%s15630_s16 + $0xd20] ss:$16 sps:$4 sm:$0xff]  }
 0x776   : > { %9588 = vmatpush1.bf16.msra.mxu1 %v15006_v45  ;;  %v15020_v45 = vld [vmem:[%s15630_s16 + $0x40c] ss:$16 sps:$4 sm:$0xff]  }
 0x777   : > { %10115 = vmatpush1.bf16.msra.mxu0 %v15007_v46  ;;  %9589 = vmatprep.subr.bf16.mxu1 %v15008_v10  ;;  %v15021_v46 = vld [vmem:[%s15630_s16 + $0xd44] ss:$16 sps:$4 sm:$0xff]   ;;  %v15022_v10 = vld [vmem:[%s15630_s16 + $0x408] ss:$16 sps:$4 sm:$0xff]  }
 0x778   : > { %10116 = vmatprep.subr.bf16.mxu0 %v15009_v21  ;;  %v15023_v21 = vld [vmem:[%s15630_s16 + $0xd40] ss:$16 sps:$4 sm:$0xff]  }
 0x77a   : > { %9590 = vmatpush1.bf16.msra.mxu1 %v15010_v60  ;;  %v15024_v60 = vld [vmem:[%s15630_s16 + $0x42c] ss:$16 sps:$4 sm:$0xff]  }
 0x77b   : > { %10117 = vmatpush1.bf16.msra.mxu0 %v15011_v24  ;;  %9591 = vmatprep.subr.bf16.mxu1 %v15012_v23  ;;  %v15025_v24 = vld [vmem:[%s15630_s16 + $0xd64] ss:$16 sps:$4 sm:$0xff]   ;;  %v15026_v23 = vld [vmem:[%s15630_s16 + $0x428] ss:$16 sps:$4 sm:$0xff]  }
 0x77c   : > { %10118 = vmatprep.subr.bf16.mxu0 %v15013_v13  ;;  %v15027_v13 = vld [vmem:[%s15630_s16 + $0xd60] ss:$16 sps:$4 sm:$0xff]  }
 0x77e   : > { %9592 = vmatpush1.bf16.msra.mxu1 %v15014_v2  ;;  %v15028_v2 = vld [vmem:[%s15630_s16 + $0x44c] ss:$16 sps:$4 sm:$0xff]  }
 0x77f   : > { %10119 = vmatpush1.bf16.msra.mxu0 %v15015_v53  ;;  %9593 = vmatprep.subr.bf16.mxu1 %v15016_v30  ;;  %v15029_v53 = vld [vmem:[%s15630_s16 + $0xd84] ss:$16 sps:$4 sm:$0xff]   ;;  %v15030_v30 = vld [vmem:[%s15630_s16 + $0x448] ss:$16 sps:$4 sm:$0xff]  }
 0x780   : > { %10120 = vmatprep.subr.bf16.mxu0 %v15017_v6  ;;  %v15031_v6 = vld [vmem:[%s15630_s16 + $0xd80] ss:$16 sps:$4 sm:$0xff]  }
 0x782   : > { %9594 = vmatpush1.bf16.msra.mxu1 %v15018_v32  ;;  %v15032_v32 = vld [vmem:[%s15630_s16 + $0x46c] ss:$16 sps:$4 sm:$0xff]  }
 0x783   : > { %10121 = vmatpush1.bf16.msra.mxu0 %v15019_v59  ;;  %9595 = vmatprep.subr.bf16.mxu1 %v15020_v45  ;;  %v15033_v59 = vld [vmem:[%s15630_s16 + $0xda4] ss:$16 sps:$4 sm:$0xff]   ;;  %v15034_v45 = vld [vmem:[%s15630_s16 + $0x468] ss:$16 sps:$4 sm:$0xff]  }
 0x784   : > { %10122 = vmatprep.subr.bf16.mxu0 %v15021_v46  ;;  %v15035_v46 = vld [vmem:[%s15630_s16 + $0xda0] ss:$16 sps:$4 sm:$0xff]  }
 0x786   : > { %9596 = vmatpush1.bf16.msra.mxu1 %v15022_v10  ;;  %v15036_v10 = vld [vmem:[%s15630_s16 + $0x48c] ss:$16 sps:$4 sm:$0xff]  }
 0x787   : > { %10123 = vmatpush1.bf16.msra.mxu0 %v15023_v21  ;;  %9597 = vmatprep.subr.bf16.mxu1 %v15024_v60  ;;  %v15037_v21 = vld [vmem:[%s15630_s16 + $0xdc4] ss:$16 sps:$4 sm:$0xff]   ;;  %v15038_v60 = vld [vmem:[%s15630_s16 + $0x488] ss:$16 sps:$4 sm:$0xff]  }
 0x788   : > { %10124 = vmatprep.subr.bf16.mxu0 %v15025_v24  ;;  %v15039_v24 = vld [vmem:[%s15630_s16 + $0xdc0] ss:$16 sps:$4 sm:$0xff]  }
 0x78a   : > { %9598 = vmatpush1.bf16.msra.mxu1 %v15026_v23  ;;  %v20030_v23 = vld [vmem:[#allocation10_spill] sm:$0xff] }
 0x78b   : > { %10125 = vmatpush1.bf16.msra.mxu0 %v15027_v13  ;;  %9599 = vmatprep.subr.bf16.mxu1 %v15028_v2  ;;  %v15040_v13 = vld [vmem:[%s15630_s16 + $0xde4] ss:$16 sps:$4 sm:$0xff]   ;;  %v9330_v2 = vunpack.i.h.s16 %v18521_v16 }
 0x78c   : > { %10126 = vmatprep.subr.bf16.mxu0 %v15029_v53  ;;  %v20031_v53 = vld [vmem:[#allocation11_spill] sm:$0xff] }
 0x78e   : > { %9600 = vmatpush1.bf16.msra.mxu1 %v15030_v30  ;;  %v15041_v30 = vld [vmem:[%s15630_s16 + $0xde0] ss:$16 sps:$4 sm:$0xff]  }
 0x78f   : > { %10127 = vmatpush1.bf16.msra.mxu0 %v15031_v6  ;;  %9601 = vmatprep.subr.bf16.mxu1 %v15032_v32  ;;  %v15042_v6 = vld [vmem:[%s15630_s16 + $0x4bc] ss:$16 sps:$4 sm:$0xff]  }
 0x790   : > { %10128 = vmatprep.subr.bf16.mxu0 %v15033_v59  ;;  %v20032_v32 = vld [vmem:[#allocation12_spill] sm:$0xff]  ;;  %v18614_v59 = vpack.i.b16 %v9330_v2, %v9330_v2 }
 0x791   : > { %v15047_v2 = vld [vmem:[%s15630_s16 + $0xe10] ss:$16 sps:$4 sm:$0xff]  }
 0x792   : > { %9602 = vmatpush1.bf16.msra.mxu1 %v15034_v45  ;;  %v15043_v45 = vld [vmem:[%s15630_s16 + $0x4b8] ss:$16 sps:$4 sm:$0xff]  }
 0x793   : > { %10129 = vmatpush1.bf16.msra.mxu0 %v15035_v46  ;;  %9603 = vmatprep.subr.bf16.mxu1 %v15036_v10  ;;  %v20033_v46 = vld [vmem:[#allocation13_spill] sm:$0xff]  ;;  %v15044_v10 = vld [vmem:[%s15630_s16 + $0x4dc] ss:$16 sps:$4 sm:$0xff]  }
 0x794   : > { %10130 = vmatprep.subr.bf16.mxu0 %v15037_v21 }
 0x796   : > { %9604 = vmatpush1.bf16.msra.mxu1 %v15038_v60  ;;  %v15045_v60 = vld [vmem:[%s15630_s16 + $0xe14] ss:$16 sps:$4 sm:$0xff]  }
 0x797   : > { %10131 = vmatpush1.bf16.msra.mxu0 %v15039_v24  ;;  %12825 = vmatprep.subr.msk.bf16.mxu1 %vm2608_vm0, %v20030_v23 }
 0x798   : > { %10132 = vmatprep.subr.bf16.mxu0 %v15040_v13  ;;  %v15046_v13 = vld [vmem:[%s15630_s16 + $0x4d8] ss:$16 sps:$4 sm:$0xff]  }
 0x79a   : > { %9606 = vmatpush1.bf16.msra.mxu1 %v20031_v53  ;;  %v15048_v53 = vld [vmem:[%s15630_s16 + $0x4fc] ss:$16 sps:$4 sm:$0xff]  }
 0x79b   : > { %10133 = vmatpush1.bf16.msra.mxu0 %v15041_v30  ;;  %9676 = vmatprep.subr.bf16.mxu1 %v15042_v6  ;;  %v15049_v30 = vld [vmem:[%s15630_s16 + $0xe34] ss:$16 sps:$4 sm:$0xff]  }
 0x79c   : > { %12850 = vmatprep.subr.msk.bf16.mxu0 %vm2608_vm0, %v20032_v32 }
 0x79d   : > { %9614 = vmatmul.mubr.bf16.vlgmr.msra.gmra.mrb[96].mxu1 %v18527_v29  ;;  %v18625_v29 = vrot.slane %v18535_v58, %v16166_v50 }
 0x79e   : > { %9677 = vmatpush1.bf16.msra.mxu1 %v15043_v45  ;;  %12830 = vmatprep.mubr.msk.bf16.mxu1 %vm2604_vm1, %v18212_v17  ;;  %v18632_v17 = vrot.slane %v18614_v59, %v16169_v51  ;;  %v15050_v45 = vld [vmem:[%s15630_s16 + $0x4f8] ss:$16 sps:$4 sm:$0xff]  }
 0x79f   : > { %10135 = vmatpush1.bf16.msra.mxu0 %v20033_v46  ;;  %9678 = vmatprep.subr.bf16.mxu1 %v15044_v10  ;;  %v15051_v10 = vld [vmem:[%s15630_s16 + $0xe30] ss:$16 sps:$4 sm:$0xff]  }
 0x7a0   : > { %v18621_v21 = vpop.f32.mrb[80].mxu1  ;;  %10205 = vmatprep.subr.bf16.mxu0 %v15045_v60  ;;  %v15052_v60 = vld [vmem:[%s15630_s16 + $0x51c] ss:$16 sps:$4 sm:$0xff]  }
 0x7a1   : > { %v18628_v24 = vpop.f32.mrb[81].mxu1 }
 0x7a2   : > { %10143 = vmatmul.mubr.bf16.vlgmr.msra.gmra.mrb[80].mxu0 %v18625_v29  ;;  %v9429_v23 = vpop.f32.mrb[82].mxu1  ;;  %9679 = vmatpush1.bf16.msra.mxu1 %v15046_v13  ;;  %v15053_v13 = vld [vmem:[%s15630_s16 + $0xe54] ss:$16 sps:$4 sm:$0xff]  }
 0x7a3   : > { %10206 = vmatpush1.bf16.msra.mxu0 %v15047_v2  ;;  %12855 = vmatprep.mubr.msk.bf16.mxu0 %vm2604_vm1, %v18632_v17  ;;  %v9430_v58 = vpop.f32.mrb[83].mxu1  ;;  %v15054_v2 = vld [vmem:[%s15630_s16 + $0x518] ss:$16 sps:$4 sm:$0xff]  }
 0x7a4   : > { %9680 = vmatprep.subr.bf16.mxu1 %v15048_v53  ;;  %10207 = vmatprep.subr.bf16.mxu0 %v15049_v30  ;;  %v15055_v58 = vld [vmem:[%s15630_s16 + $0xe50] ss:$16 sps:$4 sm:$0xff]   ;;  %v15056_v53 = vld [vmem:[%s15630_s16 + $0x53c] ss:$16 sps:$4 sm:$0xff]   ;;  %v15057_v30 = vld [vmem:[%s15630_s16 + $0xe74] ss:$16 sps:$4 sm:$0xff]  }
 0x7a5   : > { %v18641_v6 = vpop.f32.mrb[64].mxu0 }
 0x7a6   : > { %v18643_v32 = vpop.f32.mrb[65].mxu0  ;;  %9681 = vmatpush1.bf16.msra.mxu1 %v15050_v45  ;;  %v15058_v45 = vld [vmem:[%s15630_s16 + $0x538] ss:$16 sps:$4 sm:$0xff]  }
 0x7a7   : > { %v9768_v46 = vpop.f32.mrb[66].mxu0  ;;  %10208 = vmatpush1.bf16.msra.mxu0 %v15051_v10  ;;  %9682 = vmatprep.subr.bf16.mxu1 %v15052_v60  ;;  %v15060_v10 = vld [vmem:[%s15630_s16 + $0x55c] ss:$16 sps:$4 sm:$0xff]   ;;  %v15061_v60 = vld [vmem:[%s15630_s16 + $0xe94] ss:$16 sps:$4 sm:$0xff]  }
 0x7a8   : > { %v9769_v23 = vpop.f32.mrb[67].mxu0  ;;  %10209 = vmatprep.subr.bf16.mxu0 %v15053_v13  ;;  %v15059_v46 = vld [vmem:[%s15630_s16 + $0xe70] ss:$16 sps:$4 sm:$0xff]  }
 0x7a9   : > { %v15062_v23 = vld [vmem:[%s15630_s16 + $0x558] ss:$16 sps:$4 sm:$0xff]   ;;  %v15063_v13 = vld [vmem:[%s15630_s16 + $0xe90] ss:$16 sps:$4 sm:$0xff]  }
 0x7aa   : > { %9683 = vmatpush1.bf16.msra.mxu1 %v15054_v2  ;;  %v15064_v2 = vld [vmem:[%s15630_s16 + $0x57c] ss:$16 sps:$4 sm:$0xff]  }
 0x7ab   : > { %10210 = vmatpush1.bf16.msra.mxu0 %v15055_v58  ;;  %9684 = vmatprep.subr.bf16.mxu1 %v15056_v53  ;;  %v15065_v58 = vld [vmem:[%s15630_s16 + $0xeb4] ss:$16 sps:$4 sm:$0xff]   ;;  %v15066_v53 = vld [vmem:[%s15630_s16 + $0x578] ss:$16 sps:$4 sm:$0xff]  }
 0x7ac   : > { %10211 = vmatprep.subr.bf16.mxu0 %v15057_v30  ;;  %v15067_v30 = vld [vmem:[%s15630_s16 + $0xeb0] ss:$16 sps:$4 sm:$0xff]  }
 0x7ae   : > { %9685 = vmatpush1.bf16.msra.mxu1 %v15058_v45  ;;  %v15068_v45 = vld [vmem:[%s15630_s16 + $0x59c] ss:$16 sps:$4 sm:$0xff]  }
 0x7af   : > { %10212 = vmatpush1.bf16.msra.mxu0 %v15059_v46  ;;  %9686 = vmatprep.subr.bf16.mxu1 %v15060_v10  ;;  %v15069_v46 = vld [vmem:[%s15630_s16 + $0xed4] ss:$16 sps:$4 sm:$0xff]   ;;  %v15070_v10 = vld [vmem:[%s15630_s16 + $0x598] ss:$16 sps:$4 sm:$0xff]  }
 0x7b0   : > { %10213 = vmatprep.subr.bf16.mxu0 %v15061_v60  ;;  %v15071_v60 = vld [vmem:[%s15630_s16 + $0xed0] ss:$16 sps:$4 sm:$0xff]  }
 0x7b2   : > { %9687 = vmatpush1.bf16.msra.mxu1 %v15062_v23  ;;  %v15072_v23 = vld [vmem:[%s15630_s16 + $0x5bc] ss:$16 sps:$4 sm:$0xff]  }
 0x7b3   : > { %10214 = vmatpush1.bf16.msra.mxu0 %v15063_v13  ;;  %9688 = vmatprep.subr.bf16.mxu1 %v15064_v2  ;;  %v15073_v13 = vld [vmem:[%s15630_s16 + $0xef4] ss:$16 sps:$4 sm:$0xff]   ;;  %v15074_v2 = vld [vmem:[%s15630_s16 + $0x5b8] ss:$16 sps:$4 sm:$0xff]  }
 0x7b4   : > { %10215 = vmatprep.subr.bf16.mxu0 %v15065_v58  ;;  %v15075_v58 = vld [vmem:[%s15630_s16 + $0xef0] ss:$16 sps:$4 sm:$0xff]  }
 0x7b6   : > { %9689 = vmatpush1.bf16.msra.mxu1 %v15066_v53  ;;  %v15076_v53 = vld [vmem:[%s15630_s16 + $0x5dc] ss:$16 sps:$4 sm:$0xff]  }
 0x7b7   : > { %10216 = vmatpush1.bf16.msra.mxu0 %v15067_v30  ;;  %9690 = vmatprep.subr.bf16.mxu1 %v15068_v45  ;;  %v15077_v30 = vld [vmem:[%s15630_s16 + $0xf14] ss:$16 sps:$4 sm:$0xff]   ;;  %v15078_v45 = vld [vmem:[%s15630_s16 + $0x5d8] ss:$16 sps:$4 sm:$0xff]  }
 0x7b8   : > { %10217 = vmatprep.subr.bf16.mxu0 %v15069_v46  ;;  %v15079_v46 = vld [vmem:[%s15630_s16 + $0xf10] ss:$16 sps:$4 sm:$0xff]  }
 0x7ba   : > { %9691 = vmatpush1.bf16.msra.mxu1 %v15070_v10  ;;  %v15080_v10 = vld [vmem:[%s15630_s16 + $0x5fc] ss:$16 sps:$4 sm:$0xff]  }
 0x7bb   : > { %10218 = vmatpush1.bf16.msra.mxu0 %v15071_v60  ;;  %9692 = vmatprep.subr.bf16.mxu1 %v15072_v23  ;;  %v15081_v60 = vld [vmem:[%s15630_s16 + $0xf34] ss:$16 sps:$4 sm:$0xff]   ;;  %v15082_v23 = vld [vmem:[%s15630_s16 + $0x5f8] ss:$16 sps:$4 sm:$0xff]  }
 0x7bc   : > { %10219 = vmatprep.subr.bf16.mxu0 %v15073_v13  ;;  %v15083_v13 = vld [vmem:[%s15630_s16 + $0xf30] ss:$16 sps:$4 sm:$0xff]  }
 0x7be   : > { %9693 = vmatpush1.bf16.msra.mxu1 %v15074_v2  ;;  %v15084_v2 = vld [vmem:[%s15630_s16 + $0x61c] ss:$16 sps:$4 sm:$0xff]  }
 0x7bf   : > { %10220 = vmatpush1.bf16.msra.mxu0 %v15075_v58  ;;  %9694 = vmatprep.subr.bf16.mxu1 %v15076_v53  ;;  %v15085_v58 = vld [vmem:[%s15630_s16 + $0xf54] ss:$16 sps:$4 sm:$0xff]   ;;  %v9288_v53 = vcombine.high %v18512_v27, %v18512_v27  ;;  %v15090_v27 = vld [vmem:[%s15630_s16 + $0x64c] ss:$16 sps:$4 sm:$0xff]  }
 0x7c0   : > { %10221 = vmatprep.subr.bf16.mxu0 %v15077_v30  ;;  %v15086_v30 = vld [vmem:[%s15630_s16 + $0x618] ss:$16 sps:$4 sm:$0xff]  }
 0x7c2   : > { %9695 = vmatpush1.bf16.msra.mxu1 %v15078_v45  ;;  %v15087_v45 = vld [vmem:[%s15630_s16 + $0xf50] ss:$16 sps:$4 sm:$0xff]  }
 0x7c3   : > { %10222 = vmatpush1.bf16.msra.mxu0 %v15079_v46  ;;  %9696 = vmatprep.subr.bf16.mxu1 %v15080_v10  ;;  %v20034_v46 = vld [vmem:[#allocation14_spill] sm:$0xff]  ;;  %v15088_v10 = vld [vmem:[%s15630_s16 + $0xf74] ss:$16 sps:$4 sm:$0xff]  }
 0x7c4   : > { %10223 = vmatprep.subr.bf16.mxu0 %v15081_v60  ;;  %v18689_v60 = vrot.slane %v9288_v53, %v16156_v41  ;;  %v20037_v41 = vld [vmem:[#allocation17_spill] sm:$0xff]  ;;  %v15092_v53 = vld [vmem:[%s15630_s16 + $0x66c] ss:$16 sps:$4 sm:$0xff]  }
 0x7c6   : > { %9697 = vmatpush1.bf16.msra.mxu1 %v15082_v23  ;;  %v20035_v23 = vld [vmem:[#allocation15_spill] sm:$0xff] }
 0x7c7   : > { %10224 = vmatpush1.bf16.msra.mxu0 %v15083_v13  ;;  %9698 = vmatprep.subr.bf16.mxu1 %v15084_v2  ;;  %v15089_v13 = vld [vmem:[%s15630_s16 + $0xf70] ss:$16 sps:$4 sm:$0xff]  }
 0x7c8   : > { %10225 = vmatprep.subr.bf16.mxu0 %v15085_v58  ;;  %v20036_v2 = vld [vmem:[#allocation16_spill] sm:$0xff]  ;;  %v18699_v58 = vpack.i.b16 %v18689_v60, %v18689_v60 }
 0x7ca   : > { %9699 = vmatpush1.bf16.msra.mxu1 %v15086_v30  ;;  %v15091_v30 = vld [vmem:[%s15630_s16 + $0x648] ss:$16 sps:$4 sm:$0xff]  }
 0x7cb   : > { %10226 = vmatpush1.bf16.msra.mxu0 %v15087_v45  ;;  %12829 = vmatprep.subr.msk.bf16.mxu1 %vm2608_vm0, %v20034_v46  ;;  %v18708_v46 = vrot.slane %v18614_v59, %v16166_v50 }
 0x7cc   : > { %10227 = vmatprep.subr.bf16.mxu0 %v15088_v10  ;;  %v10857_v10 = vsel %vm8058_vm2, %v18542_v22, 0.0 }
 0x7ce   : > { %9701 = vmatpush1.bf16.msra.mxu1 %v20035_v23 }
 0x7cf   : > { %10228 = vmatpush1.bf16.msra.mxu0 %v15089_v13  ;;  %9771 = vmatprep.subr.bf16.mxu1 %v15090_v27  ;;  %v18716_v13 = vrot.slane %v18699_v58, %v16169_v51  ;;  %v10888_v27 = vsel %vm8058_vm2, %v18549_v15, 0.0 }
 0x7d0   : > { %12854 = vmatprep.subr.msk.bf16.mxu0 %vm2608_vm0, %v20036_v2 }
 0x7d1   : > { %9709 = vmatmul.mubr.bf16.vlgmr.msra.gmra.mrb[100].mxu1 %v18215_v20  ;;  %v15093_v20 = vld [vmem:[%s15630_s16 + $0xfa4] ss:$16 sps:$4 sm:$0xff]  }
 0x7d2   : > { %9772 = vmatpush1.bf16.msra.mxu1 %v15091_v30  ;;  %12835 = vmatprep.mubr.msk.bf16.mxu1 %vm2604_vm1, %v18229_v36  ;;  %v15094_v30 = vld [vmem:[%s15630_s16 + $0x668] ss:$16 sps:$4 sm:$0xff]  }
 0x7d3   : > { %10230 = vmatpush1.bf16.msra.mxu0 %v20037_v41  ;;  %9773 = vmatprep.subr.bf16.mxu1 %v15092_v53  ;;  %v15095_v53 = vld [vmem:[%s15630_s16 + $0xfa0] ss:$16 sps:$4 sm:$0xff]  }
 0x7d4   : > { %v9479_v45 = vpop.f32.mrb[84].mxu1  ;;  %10300 = vmatprep.subr.bf16.mxu0 %v15093_v20  ;;  %v15097_v20 = vld [vmem:[%s15630_s16 + $0xfc4] ss:$16 sps:$4 sm:$0xff]  }
 0x7d5   : > { %v10858_v23 = vsel %vm8058_vm2, %v9479_v45, 0.0  ;;  %v9481_v36 = vpop.f32.mrb[85].mxu1  ;;  %v15096_v45 = vld [vmem:[%s15630_s16 + $0x68c] ss:$16 sps:$4 sm:$0xff]  }
 0x7d6   : > { %v18720_v2 = vadd.f32 %v10858_v23, %v10857_v10  ;;  %v10889_v59 = vsel %vm8058_vm2, %v9481_v36, 0.0  ;;  %10238 = vmatmul.mubr.bf16.vlgmr.msra.gmra.mrb[84].mxu0 %v18708_v46  ;;  %v9483_v22 = vpop.f32.mrb[86].mxu1  ;;  %9774 = vmatpush1.bf16.msra.mxu1 %v15094_v30  ;;  %v15098_v36 = vld [vmem:[%s15630_s16 + $0x688] ss:$16 sps:$4 sm:$0xff]  }
 0x7d7   : > { %v18725_v41 = vadd.f32 %v10889_v59, %v10888_v27  ;;  %10301 = vmatpush1.bf16.msra.mxu0 %v15095_v53  ;;  %12860 = vmatprep.mubr.msk.bf16.mxu0 %vm2604_vm1, %v18716_v13  ;;  %v9484_v15 = vpop.f32.mrb[87].mxu1  ;;  %v15099_v59 = vld [vmem:[%s15630_s16 + $0xfc0] ss:$16 sps:$4 sm:$0xff]   ;;  %v15100_v22 = vld [vmem:[%s15630_s16 + $0x6ac] ss:$16 sps:$4 sm:$0xff]  }
 0x7d8   : > { %9775 = vmatprep.subr.bf16.mxu1 %v15096_v45  ;;  %10302 = vmatprep.subr.bf16.mxu0 %v15097_v20  ;;  %v15101_v53 = vld [vmem:[%s15630_s16 + $0xfe4] ss:$16 sps:$4 sm:$0xff]   ;;  %v15102_v15 = vld [vmem:[%s15630_s16 + $0x6a8] ss:$16 sps:$4 sm:$0xff]   ;;  %v15103_v45 = vld [vmem:[%s15630_s16 + $0xfe0] ss:$16 sps:$4 sm:$0xff]  }
 0x7d9   : > { %v18732_v10 = vpop.f32.mrb[68].mxu0  ;;  %v15104_v20 = vld [vmem:[%s15630_s16 + $0x6cc] ss:$16 sps:$4 sm:$0xff]  }
 0x7da   : > { %v18734_v23 = vpop.f32.mrb[69].mxu0  ;;  %9776 = vmatpush1.bf16.msra.mxu1 %v15098_v36  ;;  %v15105_v36 = vld [vmem:[%s15630_s16 + $0x1004] ss:$16 sps:$4 sm:$0xff]  }
 0x7db   : > { %v9863_v27 = vpop.f32.mrb[70].mxu0  ;;  %10303 = vmatpush1.bf16.msra.mxu0 %v15099_v59  ;;  %9777 = vmatprep.subr.bf16.mxu1 %v15100_v22  ;;  %v15107_v59 = vld [vmem:[%s15630_s16 + $0x1000] ss:$16 sps:$4 sm:$0xff]   ;;  %v15108_v22 = vld [vmem:[%s15630_s16 + $0x6ec] ss:$16 sps:$4 sm:$0xff]  }
 0x7dc   : > { %v9864_v30 = vpop.f32.mrb[71].mxu0  ;;  %10304 = vmatprep.subr.bf16.mxu0 %v15101_v53  ;;  %v15106_v27 = vld [vmem:[%s15630_s16 + $0x6c8] ss:$16 sps:$4 sm:$0xff]  }
 0x7dd   : > { %v15109_v30 = vld [vmem:[%s15630_s16 + $0x1024] ss:$16 sps:$4 sm:$0xff]   ;;  %v15110_v53 = vld [vmem:[%s15630_s16 + $0x6e8] ss:$16 sps:$4 sm:$0xff]  }
 0x7de   : > { %9778 = vmatpush1.bf16.msra.mxu1 %v15102_v15  ;;  %v15111_v15 = vld [vmem:[%s15630_s16 + $0x1020] ss:$16 sps:$4 sm:$0xff]  }
 0x7df   : > { %10305 = vmatpush1.bf16.msra.mxu0 %v15103_v45  ;;  %9779 = vmatprep.subr.bf16.mxu1 %v15104_v20  ;;  %v15112_v45 = vld [vmem:[%s15630_s16 + $0x70c] ss:$16 sps:$4 sm:$0xff]   ;;  %v15113_v20 = vld [vmem:[%s15630_s16 + $0x1044] ss:$16 sps:$4 sm:$0xff]  }
 0x7e0   : > { %10306 = vmatprep.subr.bf16.mxu0 %v15105_v36  ;;  %v15114_v36 = vld [vmem:[%s15630_s16 + $0x708] ss:$16 sps:$4 sm:$0xff]  }
 0x7e2   : > { %9780 = vmatpush1.bf16.msra.mxu1 %v15106_v27  ;;  %v15115_v27 = vld [vmem:[%s15630_s16 + $0x1040] ss:$16 sps:$4 sm:$0xff]  }
 0x7e3   : > { %10307 = vmatpush1.bf16.msra.mxu0 %v15107_v59  ;;  %9781 = vmatprep.subr.bf16.mxu1 %v15108_v22  ;;  %v15116_v59 = vld [vmem:[%s15630_s16 + $0x72c] ss:$16 sps:$4 sm:$0xff]   ;;  %v15117_v22 = vld [vmem:[%s15630_s16 + $0x1064] ss:$16 sps:$4 sm:$0xff]  }
 0x7e4   : > { %10308 = vmatprep.subr.bf16.mxu0 %v15109_v30  ;;  %v15118_v30 = vld [vmem:[%s15630_s16 + $0x728] ss:$16 sps:$4 sm:$0xff]  }
 0x7e6   : > { %9782 = vmatpush1.bf16.msra.mxu1 %v15110_v53  ;;  %v15119_v53 = vld [vmem:[%s15630_s16 + $0x1060] ss:$16 sps:$4 sm:$0xff]  }
 0x7e7   : > { %10309 = vmatpush1.bf16.msra.mxu0 %v15111_v15  ;;  %9783 = vmatprep.subr.bf16.mxu1 %v15112_v45  ;;  %v15120_v15 = vld [vmem:[%s15630_s16 + $0x74c] ss:$16 sps:$4 sm:$0xff]   ;;  %v15121_v45 = vld [vmem:[%s15630_s16 + $0x1084] ss:$16 sps:$4 sm:$0xff]  }
 0x7e8   : > { %10310 = vmatprep.subr.bf16.mxu0 %v15113_v20  ;;  %v15122_v20 = vld [vmem:[%s15630_s16 + $0x748] ss:$16 sps:$4 sm:$0xff]  }
 0x7ea   : > { %9784 = vmatpush1.bf16.msra.mxu1 %v15114_v36  ;;  %v15123_v36 = vld [vmem:[%s15630_s16 + $0x1080] ss:$16 sps:$4 sm:$0xff]  }
 0x7eb   : > { %10311 = vmatpush1.bf16.msra.mxu0 %v15115_v27  ;;  %9785 = vmatprep.subr.bf16.mxu1 %v15116_v59  ;;  %v15124_v27 = vld [vmem:[%s15630_s16 + $0x76c] ss:$16 sps:$4 sm:$0xff]   ;;  %v15125_v59 = vld [vmem:[%s15630_s16 + $0x10a4] ss:$16 sps:$4 sm:$0xff]  }
 0x7ec   : > { %10312 = vmatprep.subr.bf16.mxu0 %v15117_v22  ;;  %v15126_v22 = vld [vmem:[%s15630_s16 + $0x768] ss:$16 sps:$4 sm:$0xff]  }
 0x7ee   : > { %9786 = vmatpush1.bf16.msra.mxu1 %v15118_v30  ;;  %v15127_v30 = vld [vmem:[%s15630_s16 + $0x10a0] ss:$16 sps:$4 sm:$0xff]  }
 0x7ef   : > { %10313 = vmatpush1.bf16.msra.mxu0 %v15119_v53  ;;  %9787 = vmatprep.subr.bf16.mxu1 %v15120_v15  ;;  %v15128_v53 = vld [vmem:[%s15630_s16 + $0x78c] ss:$16 sps:$4 sm:$0xff]   ;;  %v15129_v15 = vld [vmem:[%s15630_s16 + $0x10c4] ss:$16 sps:$4 sm:$0xff]  }
 0x7f0   : > { %10314 = vmatprep.subr.bf16.mxu0 %v15121_v45  ;;  %v15130_v45 = vld [vmem:[%s15630_s16 + $0x788] ss:$16 sps:$4 sm:$0xff]  }
 0x7f2   : > { %9788 = vmatpush1.bf16.msra.mxu1 %v15122_v20  ;;  %v15131_v20 = vld [vmem:[%s15630_s16 + $0x10c0] ss:$16 sps:$4 sm:$0xff]  }
 0x7f3   : > { %10315 = vmatpush1.bf16.msra.mxu0 %v15123_v36  ;;  %9789 = vmatprep.subr.bf16.mxu1 %v15124_v27  ;;  %v15132_v36 = vld [vmem:[%s15630_s16 + $0x7ac] ss:$16 sps:$4 sm:$0xff]   ;;  %v15133_v27 = vld [vmem:[%s15630_s16 + $0x10e4] ss:$16 sps:$4 sm:$0xff]  }
 0x7f4   : > { %10316 = vmatprep.subr.bf16.mxu0 %v15125_v59  ;;  %v15134_v59 = vld [vmem:[%s15630_s16 + $0x7a8] ss:$16 sps:$4 sm:$0xff]  }
 0x7f6   : > { %9790 = vmatpush1.bf16.msra.mxu1 %v15126_v22  ;;  %v15135_v22 = vld [vmem:[%s15630_s16 + $0x10e0] ss:$16 sps:$4 sm:$0xff]  }
 0x7f7   : > { %10317 = vmatpush1.bf16.msra.mxu0 %v15127_v30  ;;  %9791 = vmatprep.subr.bf16.mxu1 %v15128_v53  ;;  %v20038_v30 = vld [vmem:[#allocation18_spill] sm:$0xff]  ;;  %v15136_v53 = vld [vmem:[%s15630_s16 + $0x1104] ss:$16 sps:$4 sm:$0xff]  }
 0x7f8   : > { %10318 = vmatprep.subr.bf16.mxu0 %v15129_v15  ;;  %v9332_v15 = vunpack.i.h.s16 %v18689_v60 }
 0x7fa   : > { %9792 = vmatpush1.bf16.msra.mxu1 %v15130_v45  ;;  %v20039_v45 = vld [vmem:[#allocation19_spill] sm:$0xff] }
 0x7fb   : > { %10319 = vmatpush1.bf16.msra.mxu0 %v15131_v20  ;;  %9793 = vmatprep.subr.bf16.mxu1 %v15132_v36  ;;  %v15137_v20 = vld [vmem:[%s15630_s16 + $0x1100] ss:$16 sps:$4 sm:$0xff]   ;;  %v15138_v36 = vld [vmem:[%s15630_s16 + $0x7dc] ss:$16 sps:$4 sm:$0xff]  }
 0x7fc   : > { %10320 = vmatprep.subr.bf16.mxu0 %v15133_v27  ;;  %v20040_v27 = vld [vmem:[#allocation20_spill] sm:$0xff] }
 0x7fe   : > { %9794 = vmatpush1.bf16.msra.mxu1 %v15134_v59  ;;  %v18784_v59 = vpack.i.b16 %v9332_v15, %v9332_v15 }
 0x7ff   : > { %10321 = vmatpush1.bf16.msra.mxu0 %v15135_v22  ;;  %12834 = vmatprep.subr.msk.bf16.mxu1 %vm2608_vm0, %v20038_v30  ;;  %v15139_v22 = vld [vmem:[%s15630_s16 + $0x7d8] ss:$16 sps:$4 sm:$0xff]  }
 0x800   : > { %10322 = vmatprep.subr.bf16.mxu0 %v15136_v53  ;;  %v20041_v30 = vld [vmem:[#allocation21_spill] sm:$0xff]  ;;  %v15140_v53 = vld [vmem:[%s15630_s16 + $0x7fc] ss:$16 sps:$4 sm:$0xff]  }
 0x802   : > { %9796 = vmatpush1.bf16.msra.mxu1 %v20039_v45 }
 0x803   : > { %10323 = vmatpush1.bf16.msra.mxu0 %v15137_v20  ;;  %9866 = vmatprep.subr.bf16.mxu1 %v15138_v36  ;;  %v18793_v20 = vrot.slane %v18699_v58, %v16166_v50  ;;  %v15141_v36 = vld [vmem:[%s15630_s16 + $0x1134] ss:$16 sps:$4 sm:$0xff]  }
 0x804   : > { %12859 = vmatprep.subr.msk.bf16.mxu0 %vm2608_vm0, %v20040_v27  ;;  %v18801_v27 = vrot.slane %v18784_v59, %v16169_v51 }
 0x805   : > { %9804 = vmatmul.mubr.bf16.vlgmr.msra.gmra.mrb[104].mxu1 %v18301_v8  ;;  %v10919_v8 = vsel %vm8058_vm2, %v18621_v21, 0.0 }
 0x806   : > { %9867 = vmatpush1.bf16.msra.mxu1 %v15139_v22  ;;  %12839 = vmatprep.mubr.msk.bf16.mxu1 %vm2604_vm1, %v18306_v52  ;;  %v10950_v22 = vsel %vm8058_vm2, %v18628_v24, 0.0 }
 0x807   : > { %10325 = vmatpush1.bf16.msra.mxu0 %v20041_v30  ;;  %9868 = vmatprep.subr.bf16.mxu1 %v15140_v53  ;;  %v15142_v53 = vld [vmem:[%s15630_s16 + $0x7f8] ss:$16 sps:$4 sm:$0xff]  }
 0x808   : > { %v9520_v45 = vpop.f32.mrb[88].mxu1  ;;  %10395 = vmatprep.subr.bf16.mxu0 %v15141_v36  ;;  %v15143_v36 = vld [vmem:[%s15630_s16 + $0x1130] ss:$16 sps:$4 sm:$0xff]  }
 0x809   : > { %v10920_v15 = vsel %vm8058_vm2, %v9520_v45, 0.0  ;;  %v9522_v52 = vpop.f32.mrb[89].mxu1 }
 0x80a   : > { %v18805_v30 = vadd.f32 %v10920_v15, %v10919_v8  ;;  %v10951_v58 = vsel %vm8058_vm2, %v9522_v52, 0.0  ;;  %10333 = vmatmul.mubr.bf16.vlgmr.msra.gmra.mrb[88].mxu0 %v18793_v20  ;;  %v9524_v21 = vpop.f32.mrb[90].mxu1  ;;  %9869 = vmatpush1.bf16.msra.mxu1 %v15142_v53  ;;  %v15144_v8 = vld [vmem:[%s15630_s16 + $0x81c] ss:$16 sps:$4 sm:$0xff]   ;;  %v15145_v15 = vld [vmem:[%s15630_s16 + $0x1154] ss:$16 sps:$4 sm:$0xff]  }
 0x80b   : > { %v18810_v45 = vadd.f32 %v10951_v58, %v10950_v22  ;;  %10396 = vmatpush1.bf16.msra.mxu0 %v15143_v36  ;;  %12864 = vmatprep.mubr.msk.bf16.mxu0 %vm2604_vm1, %v18801_v27  ;;  %v9525_v24 = vpop.f32.mrb[91].mxu1  ;;  %v15146_v22 = vld [vmem:[%s15630_s16 + $0x818] ss:$16 sps:$4 sm:$0xff]   ;;  %v15147_v53 = vld [vmem:[%s15630_s16 + $0x1150] ss:$16 sps:$4 sm:$0xff]  }
 0x80c   : > { %9870 = vmatprep.subr.bf16.mxu1 %v15144_v8  ;;  %10397 = vmatprep.subr.bf16.mxu0 %v15145_v15  ;;  %v15148_v36 = vld [vmem:[%s15630_s16 + $0x83c] ss:$16 sps:$4 sm:$0xff]   ;;  %v15149_v8 = vld [vmem:[%s15630_s16 + $0x1174] ss:$16 sps:$4 sm:$0xff]   ;;  %v15150_v15 = vld [vmem:[%s15630_s16 + $0x838] ss:$16 sps:$4 sm:$0xff]  }
 0x80d   : > { %v18817_v52 = vpop.f32.mrb[72].mxu0 }
 0x80e   : > { %v18819_v21 = vpop.f32.mrb[73].mxu0  ;;  %9871 = vmatpush1.bf16.msra.mxu1 %v15146_v22  ;;  %v15153_v22 = vld [vmem:[%s15630_s16 + $0x1194] ss:$16 sps:$4 sm:$0xff]  }
 0x80f   : > { %v9958_v58 = vpop.f32.mrb[74].mxu0  ;;  %10398 = vmatpush1.bf16.msra.mxu0 %v15147_v53  ;;  %9872 = vmatprep.subr.bf16.mxu1 %v15148_v36  ;;  %v15155_v53 = vld [vmem:[%s15630_s16 + $0x1190] ss:$16 sps:$4 sm:$0xff]   ;;  %v15156_v36 = vld [vmem:[%s15630_s16 + $0x87c] ss:$16 sps:$4 sm:$0xff]  }
 0x810   : > { %v9959_v24 = vpop.f32.mrb[75].mxu0  ;;  %10399 = vmatprep.subr.bf16.mxu0 %v15149_v8  ;;  %v15154_v58 = vld [vmem:[%s15630_s16 + $0x858] ss:$16 sps:$4 sm:$0xff]  }
 0x811   : > { %v15157_v24 = vld [vmem:[%s15630_s16 + $0x11b4] ss:$16 sps:$4 sm:$0xff]   ;;  %v15158_v8 = vld [vmem:[%s15630_s16 + $0x878] ss:$16 sps:$4 sm:$0xff]  }
 0x812   : > { %9873 = vmatpush1.bf16.msra.mxu1 %v15150_v15  ;;  %v15161_v15 = vld [vmem:[%s15630_s16 + $0x11d4] ss:$16 sps:$4 sm:$0xff]  }
 0x813   : > { %10400 = vmatpush1.bf16.msra.mxu0 %v15151_v4  ;;  %9874 = vmatprep.subr.bf16.mxu1 %v15152_v63  ;;  %v15159_v4 = vld [vmem:[%s15630_s16 + $0x11b0] ss:$16 sps:$4 sm:$0xff]   ;;  %v15160_v63 = vld [vmem:[%s15630_s16 + $0x89c] ss:$16 sps:$4 sm:$0xff]  }
 0x814   : > { %10401 = vmatprep.subr.bf16.mxu0 %v15153_v22  ;;  %v15162_v22 = vld [vmem:[%s15630_s16 + $0x898] ss:$16 sps:$4 sm:$0xff]  }
 0x816   : > { %9875 = vmatpush1.bf16.msra.mxu1 %v15154_v58  ;;  %v15163_v58 = vld [vmem:[%s15630_s16 + $0x11d0] ss:$16 sps:$4 sm:$0xff]  }
 0x817   : > { %10402 = vmatpush1.bf16.msra.mxu0 %v15155_v53  ;;  %9876 = vmatprep.subr.bf16.mxu1 %v15156_v36  ;;  %v15164_v53 = vld [vmem:[%s15630_s16 + $0x8bc] ss:$16 sps:$4 sm:$0xff]   ;;  %v15165_v36 = vld [vmem:[%s15630_s16 + $0x11f4] ss:$16 sps:$4 sm:$0xff]  }
 0x818   : > { %10403 = vmatprep.subr.bf16.mxu0 %v15157_v24  ;;  %v15166_v24 = vld [vmem:[%s15630_s16 + $0x8b8] ss:$16 sps:$4 sm:$0xff]  }
 0x81a   : > { %9877 = vmatpush1.bf16.msra.mxu1 %v15158_v8  ;;  %v15167_v8 = vld [vmem:[%s15630_s16 + $0x11f0] ss:$16 sps:$4 sm:$0xff]  }
 0x81b   : > { %10404 = vmatpush1.bf16.msra.mxu0 %v15159_v4  ;;  %9878 = vmatprep.subr.bf16.mxu1 %v15160_v63  ;;  %v15168_v4 = vld [vmem:[%s15630_s16 + $0x8dc] ss:$16 sps:$4 sm:$0xff]   ;;  %v15169_v63 = vld [vmem:[%s15630_s16 + $0x1214] ss:$16 sps:$4 sm:$0xff]  }
 0x81c   : > { %10405 = vmatprep.subr.bf16.mxu0 %v15161_v15  ;;  %v15170_v15 = vld [vmem:[%s15630_s16 + $0x8d8] ss:$16 sps:$4 sm:$0xff]  }
 0x81e   : > { %9879 = vmatpush1.bf16.msra.mxu1 %v15162_v22  ;;  %v15171_v22 = vld [vmem:[%s15630_s16 + $0x1210] ss:$16 sps:$4 sm:$0xff]  }
 0x81f   : > { %10406 = vmatpush1.bf16.msra.mxu0 %v15163_v58  ;;  %9880 = vmatprep.subr.bf16.mxu1 %v15164_v53  ;;  %v15172_v58 = vld [vmem:[%s15630_s16 + $0x8fc] ss:$16 sps:$4 sm:$0xff]   ;;  %v15173_v53 = vld [vmem:[%s15630_s16 + $0x1234] ss:$16 sps:$4 sm:$0xff]  }
 0x820   : > { %10407 = vmatprep.subr.bf16.mxu0 %v15165_v36  ;;  %v15174_v36 = vld [vmem:[%s15630_s16 + $0x8f8] ss:$16 sps:$4 sm:$0xff]  }
 0x822   : > { %9881 = vmatpush1.bf16.msra.mxu1 %v15166_v24  ;;  %v15175_v24 = vld [vmem:[%s15630_s16 + $0x1230] ss:$16 sps:$4 sm:$0xff]  }
 0x823   : > { %10408 = vmatpush1.bf16.msra.mxu0 %v15167_v8  ;;  %9882 = vmatprep.subr.bf16.mxu1 %v15168_v4  ;;  %v15176_v8 = vld [vmem:[%s15630_s16 + $0x91c] ss:$16 sps:$4 sm:$0xff]   ;;  %v15177_v4 = vld [vmem:[%s15630_s16 + $0x1254] ss:$16 sps:$4 sm:$0xff]  }
 0x824   : > { %10409 = vmatprep.subr.bf16.mxu0 %v15169_v63  ;;  %v15178_v63 = vld [vmem:[%s15630_s16 + $0x918] ss:$16 sps:$4 sm:$0xff]  }
 0x826   : > { %9883 = vmatpush1.bf16.msra.mxu1 %v15170_v15  ;;  %v15179_v15 = vld [vmem:[%s15630_s16 + $0x1250] ss:$16 sps:$4 sm:$0xff]  }
 0x827   : > { %10410 = vmatpush1.bf16.msra.mxu0 %v15171_v22  ;;  %9884 = vmatprep.subr.bf16.mxu1 %v15172_v58  ;;  %v15180_v22 = vld [vmem:[%s15630_s16 + $0x93c] ss:$16 sps:$4 sm:$0xff]   ;;  %v15181_v58 = vld [vmem:[%s15630_s16 + $0x1274] ss:$16 sps:$4 sm:$0xff]  }
 0x828   : > { %10411 = vmatprep.subr.bf16.mxu0 %v15173_v53  ;;  %v15182_v53 = vld [vmem:[%s15630_s16 + $0x938] ss:$16 sps:$4 sm:$0xff]  }
 0x82a   : > { %9885 = vmatpush1.bf16.msra.mxu1 %v15174_v36  ;;  %v15183_v36 = vld [vmem:[%s15630_s16 + $0x1270] ss:$16 sps:$4 sm:$0xff]  }
 0x82b   : > { %10412 = vmatpush1.bf16.msra.mxu0 %v15175_v24  ;;  %9886 = vmatprep.subr.bf16.mxu1 %v15176_v8  ;;  %v20042_v24 = vld [vmem:[#allocation22_spill] sm:$0xff]  ;;  %v15184_v8 = vld [vmem:[%s15630_s16 + $0x1294] ss:$16 sps:$4 sm:$0xff]  }
 0x82c   : > { %10413 = vmatprep.subr.bf16.mxu0 %v15177_v4  ;;  %v18864_v4 = vcombine.high %v18521_v16, %v18521_v16  ;;  %v20045_v16 = vld [vmem:[#allocation25_spill] sm:$0xff] }
 0x82e   : > { %9887 = vmatpush1.bf16.msra.mxu1 %v15178_v63  ;;  %v20043_v63 = vld [vmem:[#allocation23_spill] sm:$0xff] }
 0x82f   : > { %10414 = vmatpush1.bf16.msra.mxu0 %v15179_v15  ;;  %9888 = vmatprep.subr.bf16.mxu1 %v15180_v22  ;;  %v15185_v15 = vld [vmem:[%s15630_s16 + $0x1290] ss:$16 sps:$4 sm:$0xff]   ;;  %v15186_v22 = vld [vmem:[%s15630_s16 + $0x96c] ss:$16 sps:$4 sm:$0xff]  }
 0x830   : > { %10415 = vmatprep.subr.bf16.mxu0 %v15181_v58  ;;  %v20044_v58 = vld [vmem:[#allocation24_spill] sm:$0xff] }
 0x832   : > { %9889 = vmatpush1.bf16.msra.mxu1 %v15182_v53  ;;  %v18874_v53 = vpack.i.b16 %v18864_v4, %v18864_v4 }
 0x833   : > { %10416 = vmatpush1.bf16.msra.mxu0 %v15183_v36  ;;  %12838 = vmatprep.subr.msk.bf16.mxu1 %vm2608_vm0, %v20042_v24  ;;  %v15187_v36 = vld [vmem:[%s15630_s16 + $0x968] ss:$16 sps:$4 sm:$0xff]   ;;  %v15188_v24 = vld [vmem:[%s15630_s16 + $0x98c] ss:$16 sps:$4 sm:$0xff]  }
 0x834   : > { %10417 = vmatprep.subr.bf16.mxu0 %v15184_v8 }
 0x836   : > { %9891 = vmatpush1.bf16.msra.mxu1 %v20043_v63  ;;  %v18883_v63 = vrot.slane %v18784_v59, %v16166_v50  ;;  %v15190_v59 = vld [vmem:[%s15630_s16 + $0x988] ss:$16 sps:$4 sm:$0xff]  }
 0x837   : > { %10418 = vmatpush1.bf16.msra.mxu0 %v15185_v15  ;;  %9961 = vmatprep.subr.bf16.mxu1 %v15186_v22 }
 0x838   : > { %12863 = vmatprep.subr.msk.bf16.mxu0 %vm2608_vm0, %v20044_v58  ;;  %v18889_v58 = vrot.slane %v18874_v53, %v16169_v51 }
 0x839   : > { %9899 = vmatmul.mubr.bf16.vlgmr.msra.gmra.mrb[108].mxu1 %v18381_v35  ;;  %v15189_v35 = vld [vmem:[%s15630_s16 + $0x12c4] ss:$16 sps:$4 sm:$0xff]  }
 0x83a   : > { %9962 = vmatpush1.bf16.msra.mxu1 %v15187_v36  ;;  %12844 = vmatprep.mubr.msk.bf16.mxu1 %vm2604_vm1, %v18386_v48 }
 0x83b   : > { %10420 = vmatpush1.bf16.msra.mxu0 %v20045_v16  ;;  %9963 = vmatprep.subr.bf16.mxu1 %v15188_v24  ;;  %v10862_v24 = vsel %vm8058_vm2, %v18561_v42, 0.0  ;;  %v10864_v42 = vsel %vm8058_vm2, %v18641_v6, 0.0  ;;  %v15196_v6 = vld [vmem:[%s15630_s16 + $0x9cc] ss:$16 sps:$4 sm:$0xff]  }
 0x83c   : > { %v9574_v8 = vpop.f32.mrb[92].mxu1  ;;  %10490 = vmatprep.subr.bf16.mxu0 %v15189_v35  ;;  %v15191_v35 = vld [vmem:[%s15630_s16 + $0x12c0] ss:$16 sps:$4 sm:$0xff]  }
 0x83d   : > { %v10860_v15 = vsel %vm8058_vm2, %v9574_v8, 0.0  ;;  %v9576_v22 = vpop.f32.mrb[93].mxu1 }
 0x83e   : > { %v10861_v48 = vadd.f32 %v10860_v15, %v18720_v2  ;;  %v10891_v36 = vsel %vm8058_vm2, %v9576_v22, 0.0  ;;  %10428 = vmatmul.mubr.bf16.vlgmr.msra.gmra.mrb[92].mxu0 %v18883_v63  ;;  %v9578_v16 = vpop.f32.mrb[94].mxu1  ;;  %9964 = vmatpush1.bf16.msra.mxu1 %v15190_v59  ;;  %v10893_v15 = vsel %vm8058_vm2, %v18564_v5, 0.0  ;;  %v15193_v59 = vld [vmem:[%s15630_s16 + $0x12e4] ss:$16 sps:$4 sm:$0xff]   ;;  %v10866_v5 = vsel %vm8058_vm2, %v18732_v10, 0.0 }
 0x83f   : > { %v10892_v8 = vadd.f32 %v10891_v36, %v18725_v41  ;;  %10491 = vmatpush1.bf16.msra.mxu0 %v15191_v35  ;;  %12869 = vmatprep.mubr.msk.bf16.mxu0 %vm2604_vm1, %v18889_v58  ;;  %v9579_v2 = vpop.f32.mrb[95].mxu1  ;;  %v15192_v16 = vld [vmem:[%s15630_s16 + $0x9ac] ss:$16 sps:$4 sm:$0xff]   ;;  %v10895_v35 = vsel %vm8058_vm2, %v18643_v32, 0.0 }
 0x840   : > { %v10863_v22 = vadd.f32 %v10862_v24, %v10861_v48  ;;  %9965 = vmatprep.subr.bf16.mxu1 %v15192_v16  ;;  %10492 = vmatprep.subr.bf16.mxu0 %v15193_v59  ;;  %v15195_v16 = vld [vmem:[%s15630_s16 + $0x12e0] ss:$16 sps:$4 sm:$0xff]   ;;  %v10899_v59 = vsel %vm8058_vm2, %v18819_v21, 0.0  ;;  %v15201_v21 = vld [vmem:[%s15630_s16 + $0x1324] ss:$16 sps:$4 sm:$0xff]  }
 0x841   : > { %v10894_v41 = vadd.f32 %v10893_v15, %v10892_v8  ;;  %v10049_v36 = vpop.f32.mrb[76].mxu0  ;;  %v10897_v8 = vsel %vm8058_vm2, %v18734_v23, 0.0 }
 0x842   : > { %v10865_v2 = vadd.f32 %v10864_v42, %v10863_v22  ;;  %v10051_v26 = vpop.f32.mrb[77].mxu0  ;;  %9966 = vmatpush1.bf16.msra.mxu1 %v15194_v28  ;;  %v15197_v22 = vld [vmem:[%s15630_s16 + $0x1304] ss:$16 sps:$4 sm:$0xff]   ;;  %v10868_v28 = vsel %vm8058_vm2, %v18817_v52, 0.0  ;;  %v10870_v23 = vsel %vm8058_vm2, %v10049_v36, 0.0 }
 0x843   : > { %v10896_v48 = vadd.f32 %v10895_v35, %v10894_v41  ;;  %v10053_v24 = vpop.f32.mrb[78].mxu0  ;;  %10493 = vmatpush1.bf16.msra.mxu0 %v15195_v16  ;;  %9967 = vmatprep.subr.bf16.mxu1 %v15196_v6  ;;  %v15198_v41 = vld [vmem:[%s15630_s16 + $0x9c8] ss:$16 sps:$4 sm:$0xff]   ;;  %v15203_v36 = vld [vmem:[%s15630_s16 + $0x1320] ss:$16 sps:$4 sm:$0xff]  }
 0x844   : > { %v10867_v32 = vadd.f32 %v10866_v5, %v10865_v2  ;;  %v10054_v15 = vpop.f32.mrb[79].mxu0  ;;  %10494 = vmatprep.subr.bf16.mxu0 %v15197_v22  ;;  %v15199_v2 = vld [vmem:[%s15630_s16 + $0x1300] ss:$16 sps:$4 sm:$0xff]   ;;  %v15200_v5 = vld [vmem:[%s15630_s16 + $0x9ec] ss:$16 sps:$4 sm:$0xff]  }
 0x845   : > { %v10898_v10 = vadd.f32 %v10897_v8, %v10896_v48  ;;  %v10901_v48 = vsel %vm8058_vm2, %v10051_v26, 0.0  ;;  %v15202_v16 = vld [vmem:[%s15630_s16 + $0x9e8] ss:$16 sps:$4 sm:$0xff]   ;;  %v15204_v6 = vld [vmem:[%s15630_s16 + $0xa0c] ss:$16 sps:$4 sm:$0xff]  }
 0x846   : > { %v10869_v42 = vadd.f32 %v10868_v28, %v10867_v32  ;;  %9968 = vmatpush1.bf16.msra.mxu1 %v15198_v41  ;;  %v15205_v8 = vld [vmem:[%s15630_s16 + $0x1344] ss:$16 sps:$4 sm:$0xff]   ;;  %v15206_v32 = vld [vmem:[%s15630_s16 + $0xa08] ss:$16 sps:$4 sm:$0xff]   ;;  %v15207_v26 = vld [vmem:[%s15630_s16 + $0x1340] ss:$16 sps:$4 sm:$0xff]  }
 0x847   : > { %v10900_v35 = vadd.f32 %v10899_v59, %v10898_v10  ;;  %10495 = vmatpush1.bf16.msra.mxu0 %v15199_v2  ;;  %9969 = vmatprep.subr.bf16.mxu1 %v15200_v5  ;;  %v15208_v15 = vld [vmem:[%s15630_s16 + $0xa2c] ss:$16 sps:$4 sm:$0xff]   ;;  %v15209_v22 = vld [vmem:[%s15630_s16 + $0x1364] ss:$16 sps:$4 sm:$0xff]   ;;  %v15210_v28 = vld [vmem:[%s15630_s16 + $0xa28] ss:$16 sps:$4 sm:$0xff]  }
 0x848   : > { %v18925_v52 = vadd.f32 %v10870_v23, %v10869_v42  ;;  %10496 = vmatprep.subr.bf16.mxu0 %v15201_v21  ;;  %v15211_v10 = vld [vmem:[%s15630_s16 + $0x1360] ss:$16 sps:$4 sm:$0xff]   ;;  %v15212_v59 = vld [vmem:[%s15630_s16 + $0xa4c] ss:$16 sps:$4 sm:$0xff]   ;;  %v15213_v42 = vld [vmem:[%s15630_s16 + $0x1384] ss:$16 sps:$4 sm:$0xff]  }
 0x849   : > { %v18929_v24 = vadd.f32 %v10901_v48, %v10900_v35  ;;  %v15214_v41 = vld [vmem:[%s15630_s16 + $0xa48] ss:$16 sps:$4 sm:$0xff]   ;;  %v15215_v23 = vld [vmem:[%s15630_s16 + $0x1380] ss:$16 sps:$4 sm:$0xff]   ;;  %v15216_v35 = vld [vmem:[%s15630_s16 + $0xa6c] ss:$16 sps:$4 sm:$0xff]  }
 0x84a   : > { %9970 = vmatpush1.bf16.msra.mxu1 %v15202_v16  ;;  %v15217_v2 = vld [vmem:[%s15630_s16 + $0x13a4] ss:$16 sps:$4 sm:$0xff]   ;;  %v15218_v5 = vld [vmem:[%s15630_s16 + $0xa68] ss:$16 sps:$4 sm:$0xff]   ;;  %v15219_v48 = vld [vmem:[%s15630_s16 + $0x13a0] ss:$16 sps:$4 sm:$0xff]  }
 0x84b   : > { %10497 = vmatpush1.bf16.msra.mxu0 %v15203_v36  ;;  %9971 = vmatprep.subr.bf16.mxu1 %v15204_v6  ;;  %v15220_v21 = vld [vmem:[%s15630_s16 + $0xa8c] ss:$16 sps:$4 sm:$0xff]   ;;  %v15221_v16 = vld [vmem:[%s15630_s16 + $0x13c4] ss:$16 sps:$4 sm:$0xff]   ;;  %v15222_v36 = vld [vmem:[%s15630_s16 + $0xa88] ss:$16 sps:$4 sm:$0xff]  }
 0x84c   : > { %10498 = vmatprep.subr.bf16.mxu0 %v15205_v8  ;;  %v15223_v6 = vld [vmem:[%s15630_s16 + $0x13c0] ss:$16 sps:$4 sm:$0xff]   ;;  %v15224_v8 = vld [vmem:[%s15630_s16 + $0xaac] ss:$16 sps:$4 sm:$0xff]  }
 0x84e   : > { %9972 = vmatpush1.bf16.msra.mxu1 %v15206_v32  ;;  %v15225_v32 = vld [vmem:[%s15630_s16 + $0x13e4] ss:$16 sps:$4 sm:$0xff]  }
 0x84f   : > { %10499 = vmatpush1.bf16.msra.mxu0 %v15207_v26  ;;  %9973 = vmatprep.subr.bf16.mxu1 %v15208_v15  ;;  %v15226_v26 = vld [vmem:[%s15630_s16 + $0xaa8] ss:$16 sps:$4 sm:$0xff]   ;;  %v15227_v15 = vld [vmem:[%s15630_s16 + $0x13e0] ss:$16 sps:$4 sm:$0xff]  }
 0x850   : > { %10500 = vmatprep.subr.bf16.mxu0 %v15209_v22  ;;  %v15228_v22 = vld [vmem:[%s15630_s16 + $0xacc] ss:$16 sps:$4 sm:$0xff]  }
 0x852   : > { %9974 = vmatpush1.bf16.msra.mxu1 %v15210_v28  ;;  %v15229_v28 = vld [vmem:[%s15630_s16 + $0x1404] ss:$16 sps:$4 sm:$0xff]  }
 0x853   : > { %10501 = vmatpush1.bf16.msra.mxu0 %v15211_v10  ;;  %9975 = vmatprep.subr.bf16.mxu1 %v15212_v59  ;;  %v15230_v10 = vld [vmem:[%s15630_s16 + $0xac8] ss:$16 sps:$4 sm:$0xff]   ;;  %v15231_v59 = vld [vmem:[%s15630_s16 + $0x1400] ss:$16 sps:$4 sm:$0xff]  }
 0x854   : > { %10502 = vmatprep.subr.bf16.mxu0 %v15213_v42  ;;  %v15232_v42 = vld [vmem:[%s15630_s16 + $0x1424] ss:$16 sps:$4 sm:$0xff]  }
 0x856   : > { %9976 = vmatpush1.bf16.msra.mxu1 %v15214_v41  ;;  %v9334_v41 = vunpack.i.h.s16 %v18864_v4 }
 0x857   : > { %10503 = vmatpush1.bf16.msra.mxu0 %v15215_v23  ;;  %9977 = vmatprep.subr.bf16.mxu1 %v15216_v35  ;;  %v15233_v23 = vld [vmem:[%s15630_s16 + $0x1420] ss:$16 sps:$4 sm:$0xff]   ;;  %v15234_v35 = vld [vmem:[%s15630_s16 + $0xafc] ss:$16 sps:$4 sm:$0xff]  }
 0x858   : > { %10504 = vmatprep.subr.bf16.mxu0 %v15217_v2  ;;  %v18971_v2 = vpack.i.b16 %v9334_v41, %v9334_v41  ;;  %v15244_v41 = vld [vmem:[%s15630_s16 + $0xb5c] ss:$16 sps:$4 sm:$0xff]  }
 0x85a   : > { %9978 = vmatpush1.bf16.msra.mxu1 %v15218_v5  ;;  %v18980_v5 = vrot.slane %v18874_v53, %v16166_v50 }
 0x85b   : > { %10505 = vmatpush1.bf16.msra.mxu0 %v15219_v48  ;;  %9979 = vmatprep.subr.bf16.mxu1 %v15220_v21 }
 0x85c   : > { %10506 = vmatprep.subr.bf16.mxu0 %v15221_v16  ;;  %v15238_v16 = vld [vmem:[%s15630_s16 + $0xb18] ss:$16 sps:$4 sm:$0xff]  }
 0x85e   : > { %9980 = vmatpush1.bf16.msra.mxu1 %v15222_v36 }
 0x85f   : > { %10507 = vmatpush1.bf16.msra.mxu0 %v15223_v6  ;;  %9981 = vmatprep.subr.bf16.mxu1 %v15224_v8  ;;  %v15239_v6 = vld [vmem:[%s15630_s16 + $0x1450] ss:$16 sps:$4 sm:$0xff]   ;;  %v15240_v8 = vld [vmem:[%s15630_s16 + $0xb3c] ss:$16 sps:$4 sm:$0xff]  }
 0x860   : > { %10508 = vmatprep.subr.bf16.mxu0 %v15225_v32  ;;  %v15241_v32 = vld [vmem:[%s15630_s16 + $0x1474] ss:$16 sps:$4 sm:$0xff]  }
 0x862   : > { %9982 = vmatpush1.bf16.msra.mxu1 %v15226_v26 }
 0x863   : > { %10509 = vmatpush1.bf16.msra.mxu0 %v15227_v15  ;;  %9983 = vmatprep.subr.bf16.mxu1 %v15228_v22 }
 0x864   : > { %10510 = vmatprep.subr.bf16.mxu0 %v15229_v28 }
 0x866   : > { %9984 = vmatpush1.bf16.msra.mxu1 %v15230_v10 }
 0x867   : > { %10511 = vmatpush1.bf16.msra.mxu0 %v15231_v59  ;;  %12843 = vmatprep.subr.msk.bf16.mxu1 %vm2608_vm0, %v17034_v1  ;;  %v15235_v1 = vld [vmem:[%s15630_s16 + $0xaf8] ss:$16 sps:$4 sm:$0xff]  }
 0x868   : > { %10512 = vmatprep.subr.bf16.mxu0 %v15232_v42  ;;  %v15243_v42 = vld [vmem:[%s15630_s16 + $0x1470] ss:$16 sps:$4 sm:$0xff]  }
 0x86a   : > { %9986 = vmatpush1.bf16.msra.mxu1 %v17042_v61  ;;  %v15236_v61 = vld [vmem:[%s15630_s16 + $0xb1c] ss:$16 sps:$4 sm:$0xff]  }
 0x86b   : > { %10513 = vmatpush1.bf16.msra.mxu0 %v15233_v23  ;;  %10056 = vmatprep.subr.bf16.mxu1 %v15234_v35 }
 0x86c   : > { %12868 = vmatprep.subr.msk.bf16.mxu0 %vm2608_vm0, %v17045_v39  ;;  %v15237_v39 = vld [vmem:[%s15630_s16 + $0x1454] ss:$16 sps:$4 sm:$0xff]  }
 0x86d   : > { %9994 = vmatmul.mubr.bf16.vlgmr.msra.gmra.mrb[112].mxu1 %v18460_v11 }
 0x86e   : > { %10057 = vmatpush1.bf16.msra.mxu1 %v15235_v1  ;;  %12848 = vmatprep.mubr.msk.bf16.mxu1 %vm2604_vm1, %v18465_v37  ;;  %v18986_v37 = vrot.slane %v18971_v2, %v16169_v51  ;;  %v15245_v1 = vld [vmem:[%s15630_s16 + $0x1494] ss:$16 sps:$4 sm:$0xff]  }
 0x86f   : > { %10515 = vmatpush1.bf16.msra.mxu0 %v17054_v3  ;;  %10058 = vmatprep.subr.bf16.mxu1 %v15236_v61  ;;  %v15247_v61 = vld [vmem:[%s15630_s16 + $0x1490] ss:$16 sps:$4 sm:$0xff]  }
 0x870   : > { %v9615_v4 = vpop.f32.mrb[96].mxu1  ;;  %10585 = vmatprep.subr.bf16.mxu0 %v15237_v39  ;;  %v15249_v39 = vld [vmem:[%s15630_s16 + $0x14b4] ss:$16 sps:$4 sm:$0xff]  }
 0x871   : > { %v10922_v11 = vsel %vm8058_vm2, %v9615_v4, 0.0  ;;  %v9617_v48 = vpop.f32.mrb[97].mxu1  ;;  %v15248_v4 = vld [vmem:[%s15630_s16 + $0xb7c] ss:$16 sps:$4 sm:$0xff]  }
 0x872   : > { %v18989_v3 = vadd.f32 %v10922_v11, %v18805_v30  ;;  %v10953_v21 = vsel %vm8058_vm2, %v9617_v48, 0.0  ;;  %10523 = vmatmul.mubr.bf16.vlgmr.msra.gmra.mrb[96].mxu0 %v18980_v5  ;;  %v9619_v53 = vpop.f32.mrb[98].mxu1  ;;  %10059 = vmatpush1.bf16.msra.mxu1 %v15238_v16  ;;  %v15250_v11 = vld [vmem:[%s15630_s16 + $0xb78] ss:$16 sps:$4 sm:$0xff]   ;;  %v15252_v48 = vld [vmem:[%s15630_s16 + $0xb9c] ss:$16 sps:$4 sm:$0xff]  }
 0x873   : > { %v18995_v36 = vadd.f32 %v10953_v21, %v18810_v45  ;;  %10586 = vmatpush1.bf16.msra.mxu0 %v15239_v6  ;;  %12873 = vmatprep.mubr.msk.bf16.mxu0 %vm2604_vm1, %v18986_v37  ;;  %v9620_v30 = vpop.f32.mrb[99].mxu1  ;;  %v15242_v45 = vld [vmem:[%s15630_s16 + $0xb38] ss:$16 sps:$4 sm:$0xff]   ;;  %v15253_v21 = vld [vmem:[%s15630_s16 + $0x14d4] ss:$16 sps:$4 sm:$0xff]  }
 0x874   : > { %10060 = vmatprep.subr.bf16.mxu1 %v15240_v8  ;;  %10587 = vmatprep.subr.bf16.mxu0 %v15241_v32  ;;  %v15254_v53 = vld [vmem:[%s15630_s16 + $0xb98] ss:$16 sps:$4 sm:$0xff]   ;;  %v15255_v16 = vld [vmem:[%s15630_s16 + $0x14d0] ss:$16 sps:$4 sm:$0xff]   ;;  %v15256_v6 = vld [vmem:[%s15630_s16 + $0xbbc] ss:$16 sps:$4 sm:$0xff]  }
 0x875   : > { %v10144_v26 = vpop.f32.mrb[80].mxu0  ;;  %v15257_v30 = vld [vmem:[%s15630_s16 + $0x14f4] ss:$16 sps:$4 sm:$0xff]   ;;  %v15258_v8 = vld [vmem:[%s15630_s16 + $0xbb8] ss:$16 sps:$4 sm:$0xff]  }
 0x876   : > { %v10872_v15 = vsel %vm8058_vm2, %v10144_v26, 0.0  ;;  %v10146_v22 = vpop.f32.mrb[81].mxu0  ;;  %10061 = vmatpush1.bf16.msra.mxu1 %v15242_v45  ;;  %v15259_v32 = vld [vmem:[%s15630_s16 + $0x14f0] ss:$16 sps:$4 sm:$0xff]   ;;  %v15260_v26 = vld [vmem:[%s15630_s16 + $0xbdc] ss:$16 sps:$4 sm:$0xff]  }
 0x877   : > { %v19005_v28 = vadd.f32 %v10872_v15, %v18925_v52  ;;  %v10903_v10 = vsel %vm8058_vm2, %v10146_v22, 0.0  ;;  %v10148_v59 = vpop.f32.mrb[82].mxu0  ;;  %10588 = vmatpush1.bf16.msra.mxu0 %v15243_v42  ;;  %10062 = vmatprep.subr.bf16.mxu1 %v15244_v41  ;;  %v15246_v52 = vld [vmem:[%s15630_s16 + $0xb58] ss:$16 sps:$4 sm:$0xff]   ;;  %v15261_v15 = vld [vmem:[%s15630_s16 + $0x1514] ss:$16 sps:$4 sm:$0xff]  }
 0x878   : > { %v19011_v23 = vadd.f32 %v10903_v10, %v18929_v24  ;;  %v10149_v35 = vpop.f32.mrb[83].mxu0  ;;  %10589 = vmatprep.subr.bf16.mxu0 %v15245_v1  ;;  %v15251_v24 = vld [vmem:[%s15630_s16 + $0x14b0] ss:$16 sps:$4 sm:$0xff]   ;;  %v15262_v22 = vld [vmem:[%s15630_s16 + $0xbd8] ss:$16 sps:$4 sm:$0xff]  }
 0x879   : > { %v15263_v45 = vld [vmem:[%s15630_s16 + $0x1510] ss:$16 sps:$4 sm:$0xff]   ;;  %v15264_v10 = vld [vmem:[%s15630_s16 + $0xbfc] ss:$16 sps:$4 sm:$0xff]   ;;  %v15265_v59 = vld [vmem:[%s15630_s16 + $0x1534] ss:$16 sps:$4 sm:$0xff]  }
 0x87a   : > { %10063 = vmatpush1.bf16.msra.mxu1 %v15246_v52  ;;  %v15266_v42 = vld [vmem:[%s15630_s16 + $0xbf8] ss:$16 sps:$4 sm:$0xff]   ;;  %v15267_v41 = vld [vmem:[%s15630_s16 + $0x1530] ss:$16 sps:$4 sm:$0xff]   ;;  %v15268_v35 = vld [vmem:[%s15630_s16 + $0xc1c] ss:$16 sps:$4 sm:$0xff]  }
 0x87b   : > { %10590 = vmatpush1.bf16.msra.mxu0 %v15247_v61  ;;  %10064 = vmatprep.subr.bf16.mxu1 %v15248_v4  ;;  %v15269_v1 = vld [vmem:[%s15630_s16 + $0x1554] ss:$16 sps:$4 sm:$0xff]   ;;  %v15270_v52 = vld [vmem:[%s15630_s16 + $0xc18] ss:$16 sps:$4 sm:$0xff]   ;;  %v15271_v61 = vld [vmem:[%s15630_s16 + $0x1550] ss:$16 sps:$4 sm:$0xff]  }
 0x87c   : > { %10591 = vmatprep.subr.bf16.mxu0 %v15249_v39  ;;  %v15272_v4 = vld [vmem:[%s15630_s16 + $0xc3c] ss:$16 sps:$4 sm:$0xff]   ;;  %v15273_v39 = vld [vmem:[%s15630_s16 + $0x1574] ss:$16 sps:$4 sm:$0xff]  }
 0x87e   : > { %10065 = vmatpush1.bf16.msra.mxu1 %v15250_v11  ;;  %v15274_v11 = vld [vmem:[%s15630_s16 + $0xc38] ss:$16 sps:$4 sm:$0xff]  }
 0x87f   : > { %10592 = vmatpush1.bf16.msra.mxu0 %v15251_v24  ;;  %10066 = vmatprep.subr.bf16.mxu1 %v15252_v48  ;;  %v15275_v24 = vld [vmem:[%s15630_s16 + $0x1570] ss:$16 sps:$4 sm:$0xff]   ;;  %v15276_v48 = vld [vmem:[%s15630_s16 + $0xc5c] ss:$16 sps:$4 sm:$0xff]  }
 0x880   : > { %10593 = vmatprep.subr.bf16.mxu0 %v15253_v21  ;;  %v15277_v21 = vld [vmem:[%s15630_s16 + $0x1594] ss:$16 sps:$4 sm:$0xff]  }
 0x882   : > { %10067 = vmatpush1.bf16.msra.mxu1 %v15254_v53  ;;  %v15278_v53 = vld [vmem:[%s15630_s16 + $0xc58] ss:$16 sps:$4 sm:$0xff]  }
 0x883   : > { %10594 = vmatpush1.bf16.msra.mxu0 %v15255_v16  ;;  %10068 = vmatprep.subr.bf16.mxu1 %v15256_v6  ;;  %v15279_v16 = vld [vmem:[%s15630_s16 + $0x1590] ss:$16 sps:$4 sm:$0xff]   ;;  %v15280_v6 = vld [vmem:[%s15630_s16 + $0x15b4] ss:$16 sps:$4 sm:$0xff]  }
 0x884   : > { %10595 = vmatprep.subr.bf16.mxu0 %v15257_v30  ;;  %v19053_v30 = vcombine.high %v18689_v60, %v18689_v60 }
 0x886   : > { %10069 = vmatpush1.bf16.msra.mxu1 %v15258_v8  ;;  %v15281_v8 = vld [vmem:[%s15630_s16 + $0x15b0] ss:$16 sps:$4 sm:$0xff]  }
 0x887   : > { %10596 = vmatpush1.bf16.msra.mxu0 %v15259_v32  ;;  %10070 = vmatprep.subr.bf16.mxu1 %v15260_v26  ;;  %v15282_v32 = vld [vmem:[%s15630_s16 + $0xc8c] ss:$16 sps:$4 sm:$0xff]   ;;  %v15283_v26 = vld [vmem:[%s15630_s16 + $0xc88] ss:$16 sps:$4 sm:$0xff]  }
 0x888   : > { %10597 = vmatprep.subr.bf16.mxu0 %v15261_v15 }
 0x88a   : > { %10071 = vmatpush1.bf16.msra.mxu1 %v15262_v22 }
 0x88b   : > { %10598 = vmatpush1.bf16.msra.mxu0 %v15263_v45  ;;  %10072 = vmatprep.subr.bf16.mxu1 %v15264_v10  ;;  %v15286_v10 = vld [vmem:[%s15630_s16 + $0xca8] ss:$16 sps:$4 sm:$0xff]  }
 0x88c   : > { %10599 = vmatprep.subr.bf16.mxu0 %v15265_v59 }
 0x88e   : > { %10073 = vmatpush1.bf16.msra.mxu1 %v15266_v42  ;;  %v15287_v42 = vld [vmem:[%s15630_s16 + $0x15e0] ss:$16 sps:$4 sm:$0xff]  }
 0x88f   : > { %10600 = vmatpush1.bf16.msra.mxu0 %v15267_v41  ;;  %10074 = vmatprep.subr.bf16.mxu1 %v15268_v35  ;;  %v15288_v41 = vld [vmem:[%s15630_s16 + $0xccc] ss:$16 sps:$4 sm:$0xff]   ;;  %v15289_v35 = vld [vmem:[%s15630_s16 + $0x1604] ss:$16 sps:$4 sm:$0xff]  }
 0x890   : > { %10601 = vmatprep.subr.bf16.mxu0 %v15269_v1 }
 0x892   : > { %10075 = vmatpush1.bf16.msra.mxu1 %v15270_v52 }
 0x893   : > { %10602 = vmatpush1.bf16.msra.mxu0 %v15271_v61  ;;  %10076 = vmatprep.subr.bf16.mxu1 %v15272_v4 }
 0x894   : > { %10603 = vmatprep.subr.bf16.mxu0 %v15273_v39 }
 0x896   : > { %10077 = vmatpush1.bf16.msra.mxu1 %v15274_v11 }
 0x897   : > { %10604 = vmatpush1.bf16.msra.mxu0 %v15275_v24  ;;  %10078 = vmatprep.subr.bf16.mxu1 %v15276_v48  ;;  %v15291_v24 = vld [vmem:[%s15630_s16 + $0x1600] ss:$16 sps:$4 sm:$0xff]   ;;  %v15292_v48 = vld [vmem:[%s15630_s16 + $0xcec] ss:$16 sps:$4 sm:$0xff]  }
 0x898   : > { %10605 = vmatprep.subr.bf16.mxu0 %v15277_v21 }
 0x89a   : > { %10079 = vmatpush1.bf16.msra.mxu1 %v15278_v53 }
 0x89b   : > { %10606 = vmatpush1.bf16.msra.mxu0 %v15279_v16  ;;  %12847 = vmatprep.subr.msk.bf16.mxu1 %vm2608_vm0, %v17133_v62  ;;  %v19063_v62 = vpack.i.b16 %v19053_v30, %v19053_v30  ;;  %v15293_v16 = vld [vmem:[%s15630_s16 + $0x1624] ss:$16 sps:$4 sm:$0xff]  }
 0x89c   : > { %10607 = vmatprep.subr.bf16.mxu0 %v15280_v6  ;;  %v15295_v6 = vld [vmem:[%s15630_s16 + $0x1620] ss:$16 sps:$4 sm:$0xff]  }
 0x89e   : > { %10081 = vmatpush1.bf16.msra.mxu1 %v17141_v14  ;;  %v15284_v14 = vld [vmem:[%s15630_s16 + $0xcac] ss:$16 sps:$4 sm:$0xff]  }
 0x89f   : > { %10608 = vmatpush1.bf16.msra.mxu0 %v15281_v8  ;;  %10151 = vmatprep.subr.bf16.mxu1 %v15282_v32  ;;  %v15296_v8 = vld [vmem:[%s15630_s16 + $0xd0c] ss:$16 sps:$4 sm:$0xff]   ;;  %v15297_v32 = vld [vmem:[%s15630_s16 + $0x1644] ss:$16 sps:$4 sm:$0xff]  }
 0x8a0   : > { %12872 = vmatprep.subr.msk.bf16.mxu0 %vm2608_vm0, %v17144_v7  ;;  %v19072_v7 = vrot.slane %v18971_v2, %v16166_v50 }
 0x8a1   : > { %10089 = vmatmul.mubr.bf16.vlgmr.msra.gmra.mrb[116].mxu1 %v18546_v33  ;;  %v15285_v33 = vld [vmem:[%s15630_s16 + $0x15e4] ss:$16 sps:$4 sm:$0xff]  }
 0x8a2   : > { %10152 = vmatpush1.bf16.msra.mxu1 %v15283_v26  ;;  %12853 = vmatprep.mubr.msk.bf16.mxu1 %vm2604_vm1, %v18553_v0  ;;  %v19078_v0 = vrot.slane %v19063_v62, %v16169_v51  ;;  %v15298_v26 = vld [vmem:[%s15630_s16 + $0xd08] ss:$16 sps:$4 sm:$0xff]  }
 0x8a3   : > { %10610 = vmatpush1.bf16.msra.mxu0 %v17156_v47  ;;  %10153 = vmatprep.subr.bf16.mxu1 %v15284_v14  ;;  %v15300_v14 = vld [vmem:[%s15630_s16 + $0xd2c] ss:$16 sps:$4 sm:$0xff]  }
 0x8a4   : > { %v9710_v60 = vpop.f32.mrb[100].mxu1  ;;  %10680 = vmatprep.subr.bf16.mxu0 %v15285_v33  ;;  %v15302_v33 = vld [vmem:[%s15630_s16 + $0xd28] ss:$16 sps:$4 sm:$0xff]  }
 0x8a5   : > { %v10924_v15 = vsel %vm8058_vm2, %v9710_v60, 0.0  ;;  %v9712_v22 = vpop.f32.mrb[101].mxu1  ;;  %v15301_v60 = vld [vmem:[%s15630_s16 + $0x1664] ss:$16 sps:$4 sm:$0xff]  }
 0x8a6   : > { %v19081_v47 = vadd.f32 %v10924_v15, %v18989_v3  ;;  %v10955_v45 = vsel %vm8058_vm2, %v9712_v22, 0.0  ;;  %10618 = vmatmul.mubr.bf16.vlgmr.msra.gmra.mrb[100].mxu0 %v19072_v7  ;;  %v9714_v2 = vpop.f32.mrb[102].mxu1  ;;  %10154 = vmatpush1.bf16.msra.mxu1 %v15286_v10  ;;  %v15303_v15 = vld [vmem:[%s15630_s16 + $0x1660] ss:$16 sps:$4 sm:$0xff]   ;;  %v15304_v22 = vld [vmem:[%s15630_s16 + $0xd4c] ss:$16 sps:$4 sm:$0xff]  }
 0x8a7   : > { %v19087_v59 = vadd.f32 %v10955_v45, %v18995_v36  ;;  %10681 = vmatpush1.bf16.msra.mxu0 %v15287_v42  ;;  %12878 = vmatprep.mubr.msk.bf16.mxu0 %vm2604_vm1, %v19078_v0  ;;  %v9715_v3 = vpop.f32.mrb[103].mxu1  ;;  %v15290_v36 = vld [vmem:[%s15630_s16 + $0xcc8] ss:$16 sps:$4 sm:$0xff]   ;;  %v15305_v45 = vld [vmem:[%s15630_s16 + $0x1684] ss:$16 sps:$4 sm:$0xff]  }
 0x8a8   : > { %10155 = vmatprep.subr.bf16.mxu1 %v15288_v41  ;;  %10682 = vmatprep.subr.bf16.mxu0 %v15289_v35  ;;  %v15306_v2 = vld [vmem:[%s15630_s16 + $0xd48] ss:$16 sps:$4 sm:$0xff]   ;;  %v15307_v10 = vld [vmem:[%s15630_s16 + $0x1680] ss:$16 sps:$4 sm:$0xff]   ;;  %v15308_v42 = vld [vmem:[%s15630_s16 + $0xd6c] ss:$16 sps:$4 sm:$0xff]  }
 0x8a9   : > { %v10239_v1 = vpop.f32.mrb[84].mxu0  ;;  %v15309_v3 = vld [vmem:[%s15630_s16 + $0x16a4] ss:$16 sps:$4 sm:$0xff]   ;;  %v15310_v41 = vld [vmem:[%s15630_s16 + $0xd68] ss:$16 sps:$4 sm:$0xff]  }
 0x8aa   : > { %v10874_v52 = vsel %vm8058_vm2, %v10239_v1, 0.0  ;;  %v10241_v61 = vpop.f32.mrb[85].mxu0  ;;  %10156 = vmatpush1.bf16.msra.mxu1 %v15290_v36  ;;  %v15311_v35 = vld [vmem:[%s15630_s16 + $0x16a0] ss:$16 sps:$4 sm:$0xff]   ;;  %v15312_v1 = vld [vmem:[%s15630_s16 + $0xd8c] ss:$16 sps:$4 sm:$0xff]  }
 0x8ab   : > { %v19097_v4 = vadd.f32 %v10874_v52, %v19005_v28  ;;  %v10905_v39 = vsel %vm8058_vm2, %v10241_v61, 0.0  ;;  %v10243_v11 = vpop.f32.mrb[86].mxu0  ;;  %10683 = vmatpush1.bf16.msra.mxu0 %v15291_v24  ;;  %10157 = vmatprep.subr.bf16.mxu1 %v15292_v48  ;;  %v15294_v28 = vld [vmem:[%s15630_s16 + $0xce8] ss:$16 sps:$4 sm:$0xff]   ;;  %v15313_v52 = vld [vmem:[%s15630_s16 + $0x16c4] ss:$16 sps:$4 sm:$0xff]  }
 0x8ac   : > { %v19103_v21 = vadd.f32 %v10905_v39, %v19011_v23  ;;  %v10244_v53 = vpop.f32.mrb[87].mxu0  ;;  %10684 = vmatprep.subr.bf16.mxu0 %v15293_v16  ;;  %v15299_v23 = vld [vmem:[%s15630_s16 + $0x1640] ss:$16 sps:$4 sm:$0xff]   ;;  %v15314_v61 = vld [vmem:[%s15630_s16 + $0xd88] ss:$16 sps:$4 sm:$0xff]  }
 0x8ad   : > { %v15315_v36 = vld [vmem:[%s15630_s16 + $0x16c0] ss:$16 sps:$4 sm:$0xff]   ;;  %v15316_v39 = vld [vmem:[%s15630_s16 + $0xdac] ss:$16 sps:$4 sm:$0xff]   ;;  %v15317_v11 = vld [vmem:[%s15630_s16 + $0x16e4] ss:$16 sps:$4 sm:$0xff]  }
 0x8ae   : > { %10158 = vmatpush1.bf16.msra.mxu1 %v15294_v28  ;;  %v15318_v24 = vld [vmem:[%s15630_s16 + $0xda8] ss:$16 sps:$4 sm:$0xff]   ;;  %v15319_v48 = vld [vmem:[%s15630_s16 + $0x16e0] ss:$16 sps:$4 sm:$0xff]   ;;  %v15320_v53 = vld [vmem:[%s15630_s16 + $0xdcc] ss:$16 sps:$4 sm:$0xff]  }
 0x8af   : > { %10685 = vmatpush1.bf16.msra.mxu0 %v15295_v6  ;;  %10159 = vmatprep.subr.bf16.mxu1 %v15296_v8  ;;  %v15321_v16 = vld [vmem:[%s15630_s16 + $0x1704] ss:$16 sps:$4 sm:$0xff]   ;;  %v15322_v28 = vld [vmem:[%s15630_s16 + $0xdc8] ss:$16 sps:$4 sm:$0xff]   ;;  %v15323_v6 = vld [vmem:[%s15630_s16 + $0x1700] ss:$16 sps:$4 sm:$0xff]  }
 0x8b0   : > { %10686 = vmatprep.subr.bf16.mxu0 %v15297_v32  ;;  %v15324_v8 = vld [vmem:[%s15630_s16 + $0xdec] ss:$16 sps:$4 sm:$0xff]   ;;  %v15325_v32 = vld [vmem:[%s15630_s16 + $0x1724] ss:$16 sps:$4 sm:$0xff]  }
 0x8b2   : > { %10160 = vmatpush1.bf16.msra.mxu1 %v15298_v26  ;;  %v15326_v26 = vld [vmem:[%s15630_s16 + $0xde8] ss:$16 sps:$4 sm:$0xff]  }
 0x8b3   : > { %10687 = vmatpush1.bf16.msra.mxu0 %v15299_v23  ;;  %10161 = vmatprep.subr.bf16.mxu1 %v15300_v14  ;;  %v15327_v23 = vld [vmem:[%s15630_s16 + $0x1720] ss:$16 sps:$4 sm:$0xff]   ;;  %v15328_v14 = vld [vmem:[%s15630_s16 + $0x1744] ss:$16 sps:$4 sm:$0xff]  }
 0x8b4   : > { %10688 = vmatprep.subr.bf16.mxu0 %v15301_v60  ;;  %v9336_v60 = vunpack.i.h.s16 %v19053_v30  ;;  %v20046_v30 = vld [vmem:[#allocation26_spill] sm:$0xff] }
 0x8b6   : > { %10162 = vmatpush1.bf16.msra.mxu1 %v15302_v33  ;;  %v15329_v33 = vld [vmem:[%s15630_s16 + $0x1740] ss:$16 sps:$4 sm:$0xff]  }
 0x8b7   : > { %10689 = vmatpush1.bf16.msra.mxu0 %v15303_v15  ;;  %10163 = vmatprep.subr.bf16.mxu1 %v15304_v22  ;;  %v15330_v15 = vld [vmem:[%s15630_s16 + $0xe1c] ss:$16 sps:$4 sm:$0xff]   ;;  %v19150_v22 = vpack.i.b16 %v9336_v60, %v9336_v60  ;;  %v15346_v60 = vld [vmem:[%s15630_s16 + $0xe98] ss:$16 sps:$4 sm:$0xff]  }
 0x8b8   : > { %10690 = vmatprep.subr.bf16.mxu0 %v15305_v45 }
 0x8ba   : > { %10164 = vmatpush1.bf16.msra.mxu1 %v15306_v2  ;;  %v19159_v2 = vrot.slane %v19063_v62, %v16166_v50 }
 0x8bb   : > { %10691 = vmatpush1.bf16.msra.mxu0 %v15307_v10  ;;  %10165 = vmatprep.subr.bf16.mxu1 %v15308_v42 }
 0x8bc   : > { %10692 = vmatprep.subr.bf16.mxu0 %v15309_v3 }
 0x8be   : > { %10166 = vmatpush1.bf16.msra.mxu1 %v15310_v41  ;;  %v15334_v41 = vld [vmem:[%s15630_s16 + $0xe38] ss:$16 sps:$4 sm:$0xff]  }
 0x8bf   : > { %10693 = vmatpush1.bf16.msra.mxu0 %v15311_v35  ;;  %10167 = vmatprep.subr.bf16.mxu1 %v15312_v1  ;;  %v15335_v1 = vld [vmem:[%s15630_s16 + $0x1770] ss:$16 sps:$4 sm:$0xff]  }
 0x8c0   : > { %10694 = vmatprep.subr.bf16.mxu0 %v15313_v52  ;;  %v15336_v52 = vld [vmem:[%s15630_s16 + $0xe5c] ss:$16 sps:$4 sm:$0xff]  }
 0x8c2   : > { %10168 = vmatpush1.bf16.msra.mxu1 %v15314_v61  ;;  %v15337_v61 = vld [vmem:[%s15630_s16 + $0x1794] ss:$16 sps:$4 sm:$0xff]  }
 0x8c3   : > { %10695 = vmatpush1.bf16.msra.mxu0 %v15315_v36  ;;  %10169 = vmatprep.subr.bf16.mxu1 %v15316_v39 }
 0x8c4   : > { %10696 = vmatprep.subr.bf16.mxu0 %v15317_v11 }
 0x8c6   : > { %10170 = vmatpush1.bf16.msra.mxu1 %v15318_v24 }
 0x8c7   : > { %10697 = vmatpush1.bf16.msra.mxu0 %v15319_v48  ;;  %10171 = vmatprep.subr.bf16.mxu1 %v15320_v53 }
 0x8c8   : > { %10698 = vmatprep.subr.bf16.mxu0 %v15321_v16  ;;  %v15339_v16 = vld [vmem:[%s15630_s16 + $0x1790] ss:$16 sps:$4 sm:$0xff]  }
 0x8ca   : > { %10172 = vmatpush1.bf16.msra.mxu1 %v15322_v28  ;;  %v15340_v28 = vld [vmem:[%s15630_s16 + $0xe7c] ss:$16 sps:$4 sm:$0xff]  }
 0x8cb   : > { %10699 = vmatpush1.bf16.msra.mxu0 %v15323_v6  ;;  %10173 = vmatprep.subr.bf16.mxu1 %v15324_v8 }
 0x8cc   : > { %10700 = vmatprep.subr.bf16.mxu0 %v15325_v32  ;;  %v15341_v32 = vld [vmem:[%s15630_s16 + $0x17b4] ss:$16 sps:$4 sm:$0xff]  }
 0x8ce   : > { %10174 = vmatpush1.bf16.msra.mxu1 %v15326_v26  ;;  %v15343_v26 = vld [vmem:[%s15630_s16 + $0x17b0] ss:$16 sps:$4 sm:$0xff]  }
 0x8cf   : > { %10701 = vmatpush1.bf16.msra.mxu0 %v15327_v23  ;;  %12852 = vmatprep.subr.msk.bf16.mxu1 %vm2608_vm0, %v17237_v18  ;;  %v15331_v18 = vld [vmem:[%s15630_s16 + $0xe18] ss:$16 sps:$4 sm:$0xff]   ;;  %v15344_v23 = vld [vmem:[%s15630_s16 + $0xe9c] ss:$16 sps:$4 sm:$0xff]  }
 0x8d0   : > { %10702 = vmatprep.subr.bf16.mxu0 %v15328_v14  ;;  %v15345_v14 = vld [vmem:[%s15630_s16 + $0x17d4] ss:$16 sps:$4 sm:$0xff]  }
 0x8d2   : > { %10176 = vmatpush1.bf16.msra.mxu1 %v17245_v31  ;;  %v15332_v31 = vld [vmem:[%s15630_s16 + $0xe3c] ss:$16 sps:$4 sm:$0xff]  }
 0x8d3   : > { %10703 = vmatpush1.bf16.msra.mxu0 %v15329_v33  ;;  %10246 = vmatprep.subr.bf16.mxu1 %v15330_v15  ;;  %v15348_v33 = vld [vmem:[%s15630_s16 + $0xebc] ss:$16 sps:$4 sm:$0xff]   ;;  %v15349_v15 = vld [vmem:[%s15630_s16 + $0x17f4] ss:$16 sps:$4 sm:$0xff]  }
 0x8d4   : > { %12877 = vmatprep.subr.msk.bf16.mxu0 %vm2608_vm0, %v17248_v40  ;;  %v15333_v40 = vld [vmem:[%s15630_s16 + $0x1774] ss:$16 sps:$4 sm:$0xff]  }
 0x8d5   : > { %10184 = vmatmul.mubr.bf16.vlgmr.msra.gmra.mrb[120].mxu1 %v18625_v29 }
 0x8d6   : > { %10247 = vmatpush1.bf16.msra.mxu1 %v15331_v18  ;;  %12857 = vmatprep.mubr.msk.bf16.mxu1 %vm2604_vm1, %v18632_v17  ;;  %v19165_v17 = vrot.slane %v19150_v22, %v16169_v51  ;;  %v15350_v18 = vld [vmem:[%s15630_s16 + $0xeb8] ss:$16 sps:$4 sm:$0xff]  }
 0x8d7   : > { %10705 = vmatpush1.bf16.msra.mxu0 %v20046_v30  ;;  %10248 = vmatprep.subr.bf16.mxu1 %v15332_v31  ;;  %v15351_v30 = vld [vmem:[%s15630_s16 + $0x17f0] ss:$16 sps:$4 sm:$0xff]   ;;  %v15352_v31 = vld [vmem:[%s15630_s16 + $0xedc] ss:$16 sps:$4 sm:$0xff]  }
 0x8d8   : > { %v9805_v45 = vpop.f32.mrb[104].mxu1  ;;  %10775 = vmatprep.subr.bf16.mxu0 %v15333_v40  ;;  %v15354_v40 = vld [vmem:[%s15630_s16 + $0xed8] ss:$16 sps:$4 sm:$0xff]  }
 0x8d9   : > { %v10926_v29 = vsel %vm8058_vm2, %v9805_v45, 0.0  ;;  %v9807_v10 = vpop.f32.mrb[105].mxu1  ;;  %v15353_v45 = vld [vmem:[%s15630_s16 + $0x1814] ss:$16 sps:$4 sm:$0xff]  }
 0x8da   : > { %v19168_v42 = vadd.f32 %v10926_v29, %v19081_v47  ;;  %v10957_v3 = vsel %vm8058_vm2, %v9807_v10, 0.0  ;;  %10713 = vmatmul.mubr.bf16.vlgmr.msra.gmra.mrb[104].mxu0 %v19159_v2  ;;  %v9809_v62 = vpop.f32.mrb[106].mxu1  ;;  %10249 = vmatpush1.bf16.msra.mxu1 %v15334_v41  ;;  %v15355_v29 = vld [vmem:[%s15630_s16 + $0x1810] ss:$16 sps:$4 sm:$0xff]   ;;  %v15356_v10 = vld [vmem:[%s15630_s16 + $0xefc] ss:$16 sps:$4 sm:$0xff]  }
 0x8db   : > { %v19174_v35 = vadd.f32 %v10957_v3, %v19087_v59  ;;  %10776 = vmatpush1.bf16.msra.mxu0 %v15335_v1  ;;  %12882 = vmatprep.mubr.msk.bf16.mxu0 %vm2604_vm1, %v19165_v17  ;;  %v9810_v47 = vpop.f32.mrb[107].mxu1  ;;  %v15338_v59 = vld [vmem:[%s15630_s16 + $0xe58] ss:$16 sps:$4 sm:$0xff]   ;;  %v15357_v3 = vld [vmem:[%s15630_s16 + $0x1834] ss:$16 sps:$4 sm:$0xff]  }
 0x8dc   : > { %10250 = vmatprep.subr.bf16.mxu1 %v15336_v52  ;;  %10777 = vmatprep.subr.bf16.mxu0 %v15337_v61  ;;  %v15358_v62 = vld [vmem:[%s15630_s16 + $0xef8] ss:$16 sps:$4 sm:$0xff]   ;;  %v15359_v41 = vld [vmem:[%s15630_s16 + $0x1830] ss:$16 sps:$4 sm:$0xff]   ;;  %v15360_v1 = vld [vmem:[%s15630_s16 + $0xf1c] ss:$16 sps:$4 sm:$0xff]  }
 0x8dd   : > { %v10334_v36 = vpop.f32.mrb[88].mxu0  ;;  %v15361_v47 = vld [vmem:[%s15630_s16 + $0x1854] ss:$16 sps:$4 sm:$0xff]   ;;  %v15362_v52 = vld [vmem:[%s15630_s16 + $0xf18] ss:$16 sps:$4 sm:$0xff]  }
 0x8de   : > { %v10876_v39 = vsel %vm8058_vm2, %v10334_v36, 0.0  ;;  %v10336_v11 = vpop.f32.mrb[89].mxu0  ;;  %10251 = vmatpush1.bf16.msra.mxu1 %v15338_v59  ;;  %v15363_v61 = vld [vmem:[%s15630_s16 + $0x1850] ss:$16 sps:$4 sm:$0xff]   ;;  %v15364_v36 = vld [vmem:[%s15630_s16 + $0xf3c] ss:$16 sps:$4 sm:$0xff]  }
 0x8df   : > { %v19184_v24 = vadd.f32 %v10876_v39, %v19097_v4  ;;  %v10907_v48 = vsel %vm8058_vm2, %v10336_v11, 0.0  ;;  %v10338_v53 = vpop.f32.mrb[90].mxu0  ;;  %10778 = vmatpush1.bf16.msra.mxu0 %v15339_v16  ;;  %10252 = vmatprep.subr.bf16.mxu1 %v15340_v28  ;;  %v15342_v4 = vld [vmem:[%s15630_s16 + $0xe78] ss:$16 sps:$4 sm:$0xff]   ;;  %v15365_v39 = vld [vmem:[%s15630_s16 + $0x1874] ss:$16 sps:$4 sm:$0xff]  }
 0x8e0   : > { %v19190_v6 = vadd.f32 %v10907_v48, %v19103_v21  ;;  %v10339_v8 = vpop.f32.mrb[91].mxu0  ;;  %10779 = vmatprep.subr.bf16.mxu0 %v15341_v32  ;;  %v15347_v21 = vld [vmem:[%s15630_s16 + $0x17d0] ss:$16 sps:$4 sm:$0xff]   ;;  %v15366_v11 = vld [vmem:[%s15630_s16 + $0xf38] ss:$16 sps:$4 sm:$0xff]  }
 0x8e1   : > { %v15367_v59 = vld [vmem:[%s15630_s16 + $0x1870] ss:$16 sps:$4 sm:$0xff]   ;;  %v15368_v48 = vld [vmem:[%s15630_s16 + $0xf5c] ss:$16 sps:$4 sm:$0xff]   ;;  %v15369_v53 = vld [vmem:[%s15630_s16 + $0x1894] ss:$16 sps:$4 sm:$0xff]  }
 0x8e2   : > { %10253 = vmatpush1.bf16.msra.mxu1 %v15342_v4  ;;  %v15370_v16 = vld [vmem:[%s15630_s16 + $0xf58] ss:$16 sps:$4 sm:$0xff]   ;;  %v15371_v28 = vld [vmem:[%s15630_s16 + $0x1890] ss:$16 sps:$4 sm:$0xff]   ;;  %v15372_v8 = vld [vmem:[%s15630_s16 + $0xf7c] ss:$16 sps:$4 sm:$0xff]  }
 0x8e3   : > { %10780 = vmatpush1.bf16.msra.mxu0 %v15343_v26  ;;  %10254 = vmatprep.subr.bf16.mxu1 %v15344_v23  ;;  %v15373_v32 = vld [vmem:[%s15630_s16 + $0x18b4] ss:$16 sps:$4 sm:$0xff]   ;;  %v15374_v4 = vld [vmem:[%s15630_s16 + $0xf78] ss:$16 sps:$4 sm:$0xff]   ;;  %v15375_v26 = vld [vmem:[%s15630_s16 + $0x18b0] ss:$16 sps:$4 sm:$0xff]  }
 0x8e4   : > { %10781 = vmatprep.subr.bf16.mxu0 %v15345_v14  ;;  %v15376_v23 = vld [vmem:[%s15630_s16 + $0x18d4] ss:$16 sps:$4 sm:$0xff]   ;;  %v15377_v14 = vld [vmem:[%s15630_s16 + $0x18d0] ss:$16 sps:$4 sm:$0xff]  }
 0x8e6   : > { %10255 = vmatpush1.bf16.msra.mxu1 %v15346_v60  ;;  %v15378_v60 = vld [vmem:[%s15630_s16 + $0xfac] ss:$16 sps:$4 sm:$0xff]  }
 0x8e7   : > { %10782 = vmatpush1.bf16.msra.mxu0 %v15347_v21  ;;  %10256 = vmatprep.subr.bf16.mxu1 %v15348_v33  ;;  %v15379_v21 = vld [vmem:[%s15630_s16 + $0xfa8] ss:$16 sps:$4 sm:$0xff]   ;;  %v15380_v33 = vld [vmem:[%s15630_s16 + $0xfcc] ss:$16 sps:$4 sm:$0xff]  }
 0x8e8   : > { %10783 = vmatprep.subr.bf16.mxu0 %v15349_v15  ;;  %v19243_v15 = vrot.slane %v19150_v22, %v16166_v50 }
 0x8ea   : > { %10257 = vmatpush1.bf16.msra.mxu1 %v15350_v18 }
 0x8eb   : > { %10784 = vmatpush1.bf16.msra.mxu0 %v15351_v30  ;;  %10258 = vmatprep.subr.bf16.mxu1 %v15352_v31  ;;  %v15381_v31 = vld [vmem:[%s15630_s16 + $0xfc8] ss:$16 sps:$4 sm:$0xff]  }
 0x8ec   : > { %10785 = vmatprep.subr.bf16.mxu0 %v15353_v45 }
 0x8ee   : > { %10259 = vmatpush1.bf16.msra.mxu1 %v15354_v40  ;;  %v15382_v40 = vld [vmem:[%s15630_s16 + $0xfec] ss:$16 sps:$4 sm:$0xff]  }
 0x8ef   : > { %10786 = vmatpush1.bf16.msra.mxu0 %v15355_v29  ;;  %10260 = vmatprep.subr.bf16.mxu1 %v15356_v10 }
 0x8f0   : > { %10787 = vmatprep.subr.bf16.mxu0 %v15357_v3  ;;  %v15383_v3 = vld [vmem:[%s15630_s16 + $0xfe8] ss:$16 sps:$4 sm:$0xff]  }
 0x8f2   : > { %10261 = vmatpush1.bf16.msra.mxu1 %v15358_v62 }
 0x8f3   : > { %10788 = vmatpush1.bf16.msra.mxu0 %v15359_v41  ;;  %10262 = vmatprep.subr.bf16.mxu1 %v15360_v1  ;;  %v15384_v1 = vld [vmem:[%s15630_s16 + $0x100c] ss:$16 sps:$4 sm:$0xff]  }
 0x8f4   : > { %10789 = vmatprep.subr.bf16.mxu0 %v15361_v47 }
 0x8f6   : > { %10263 = vmatpush1.bf16.msra.mxu1 %v15362_v52 }
 0x8f7   : > { %10790 = vmatpush1.bf16.msra.mxu0 %v15363_v61  ;;  %10264 = vmatprep.subr.bf16.mxu1 %v15364_v36  ;;  %v15385_v61 = vld [vmem:[%s15630_s16 + $0x1008] ss:$16 sps:$4 sm:$0xff]   ;;  %v15386_v36 = vld [vmem:[%s15630_s16 + $0x102c] ss:$16 sps:$4 sm:$0xff]  }
 0x8f8   : > { %10791 = vmatprep.subr.bf16.mxu0 %v15365_v39  ;;  %v15388_v39 = vld [vmem:[%s15630_s16 + $0x104c] ss:$16 sps:$4 sm:$0xff]  }
 0x8fa   : > { %10265 = vmatpush1.bf16.msra.mxu1 %v15366_v11  ;;  %v15389_v11 = vld [vmem:[%s15630_s16 + $0x1048] ss:$16 sps:$4 sm:$0xff]  }
 0x8fb   : > { %10792 = vmatpush1.bf16.msra.mxu0 %v15367_v59  ;;  %10266 = vmatprep.subr.bf16.mxu1 %v15368_v48  ;;  %v15390_v59 = vld [vmem:[%s15630_s16 + $0x106c] ss:$16 sps:$4 sm:$0xff]  }
 0x8fc   : > { %10793 = vmatprep.subr.bf16.mxu0 %v15369_v53  ;;  %v15392_v48 = vld [vmem:[%s15630_s16 + $0x108c] ss:$16 sps:$4 sm:$0xff]   ;;  %v15393_v53 = vld [vmem:[%s15630_s16 + $0x1088] ss:$16 sps:$4 sm:$0xff]  }
 0x8fe   : > { %10267 = vmatpush1.bf16.msra.mxu1 %v15370_v16  ;;  %v15394_v16 = vld [vmem:[%s15630_s16 + $0x10ac] ss:$16 sps:$4 sm:$0xff]  }
 0x8ff   : > { %10794 = vmatpush1.bf16.msra.mxu0 %v15371_v28  ;;  %10268 = vmatprep.subr.bf16.mxu1 %v15372_v8  ;;  %v15395_v28 = vld [vmem:[%s15630_s16 + $0x10a8] ss:$16 sps:$4 sm:$0xff]   ;;  %v15396_v8 = vld [vmem:[%s15630_s16 + $0x10cc] ss:$16 sps:$4 sm:$0xff]  }
 0x900   : > { %10795 = vmatprep.subr.bf16.mxu0 %v15373_v32  ;;  %v15397_v32 = vld [vmem:[%s15630_s16 + $0x10c8] ss:$16 sps:$4 sm:$0xff]  }
 0x902   : > { %10269 = vmatpush1.bf16.msra.mxu1 %v15374_v4  ;;  %v15398_v4 = vld [vmem:[%s15630_s16 + $0x10ec] ss:$16 sps:$4 sm:$0xff]  }
 0x903   : > { %10796 = vmatpush1.bf16.msra.mxu0 %v15375_v26  ;;  %12856 = vmatprep.subr.msk.bf16.mxu1 %vm2608_vm0, %v17336_v12  ;;  %v20047_v12 = vld [vmem:[#allocation27_spill] sm:$0xff] }
 0x904   : > { %10797 = vmatprep.subr.bf16.mxu0 %v15376_v23  ;;  %v15399_v26 = vld [vmem:[%s15630_s16 + $0x10e8] ss:$16 sps:$4 sm:$0xff]   ;;  %v15400_v23 = vld [vmem:[%s15630_s16 + $0x110c] ss:$16 sps:$4 sm:$0xff]  }
 0x906   : > { %10271 = vmatpush1.bf16.msra.mxu1 %v17344_v57 }
 0x907   : > { %10798 = vmatpush1.bf16.msra.mxu0 %v15377_v14  ;;  %10341 = vmatprep.subr.bf16.mxu1 %v15378_v60  ;;  %v15401_v14 = vld [vmem:[%s15630_s16 + $0x1108] ss:$16 sps:$4 sm:$0xff]   ;;  %v20048_v60 = vld [vmem:[#allocation28_spill] sm:$0xff] }
 0x908   : > { %12881 = vmatprep.subr.msk.bf16.mxu0 %vm2608_vm0, %v17347_v44 }
 0x909   : > { %10279 = vmatmul.mubr.bf16.vlgmr.msra.gmra.mrb[124].mxu1 %v18708_v46 }
 0x90a   : > { %10342 = vmatpush1.bf16.msra.mxu1 %v15379_v21  ;;  %12862 = vmatprep.mubr.msk.bf16.mxu1 %vm2604_vm1, %v18716_v13  ;;  %v15402_v21 = vld [vmem:[%s15630_s16 + $0x113c] ss:$16 sps:$4 sm:$0xff]  }
 0x90b   : > { %10800 = vmatpush1.bf16.msra.mxu0 %v20047_v12  ;;  %10343 = vmatprep.subr.bf16.mxu1 %v15380_v33  ;;  %v15403_v12 = vld [vmem:[%s15630_s16 + $0x1138] ss:$16 sps:$4 sm:$0xff]   ;;  %v15404_v33 = vld [vmem:[%s15630_s16 + $0x115c] ss:$16 sps:$4 sm:$0xff]  }
 0x90c   : > { %v9900_v57 = vpop.f32.mrb[108].mxu1 }
 0x90d   : > { %v10928_v44 = vsel %vm8058_vm2, %v9900_v57, 0.0  ;;  %v9902_v18 = vpop.f32.mrb[109].mxu1 }
 0x90e   : > { %v19247_v46 = vadd.f32 %v10928_v44, %v19168_v42  ;;  %v10959_v30 = vsel %vm8058_vm2, %v9902_v18, 0.0  ;;  %10808 = vmatmul.mubr.bf16.vlgmr.msra.gmra.mrb[108].mxu0 %v19243_v15  ;;  %v9904_v13 = vpop.f32.mrb[110].mxu1  ;;  %10344 = vmatpush1.bf16.msra.mxu1 %v15381_v31 }
 0x90f   : > { %v19253_v45 = vadd.f32 %v10959_v30, %v19174_v35  ;;  %v9905_v22 = vpop.f32.mrb[111].mxu1  ;;  %10345 = vmatprep.subr.bf16.mxu1 %v15382_v40  ;;  %v15405_v13 = vld [vmem:[%s15630_s16 + $0x1158] ss:$16 sps:$4 sm:$0xff]  }
 0x910   : > { %v15406_v22 = vld [vmem:[%s15630_s16 + $0x117c] ss:$16 sps:$4 sm:$0xff]  }
 0x911   : > { %v10429_v29 = vpop.f32.mrb[92].mxu0 }
 0x912   : > { %v10878_v42 = vsel %vm8058_vm2, %v10429_v29, 0.0  ;;  %v10431_v10 = vpop.f32.mrb[93].mxu0  ;;  %10346 = vmatpush1.bf16.msra.mxu1 %v15383_v3 }
 0x913   : > { %v19259_v62 = vadd.f32 %v10878_v42, %v19184_v24  ;;  %v10909_v35 = vsel %vm8058_vm2, %v10431_v10, 0.0  ;;  %v10433_v41 = vpop.f32.mrb[94].mxu0  ;;  %10347 = vmatprep.subr.bf16.mxu1 %v15384_v1  ;;  %v15387_v24 = vld [vmem:[%s15630_s16 + $0x1028] ss:$16 sps:$4 sm:$0xff]  }
 0x914   : > { %v19264_v47 = vadd.f32 %v10909_v35, %v19190_v6  ;;  %v10434_v52 = vpop.f32.mrb[95].mxu0  ;;  %v15391_v6 = vld [vmem:[%s15630_s16 + $0x1068] ss:$16 sps:$4 sm:$0xff]   ;;  %v15408_v35 = vld [vmem:[%s15630_s16 + $0x119c] ss:$16 sps:$4 sm:$0xff]  }
 0x915   : > { %v15407_v42 = vld [vmem:[%s15630_s16 + $0x1178] ss:$16 sps:$4 sm:$0xff]  }
 0x916   : > { %10348 = vmatpush1.bf16.msra.mxu1 %v15385_v61  ;;  %v15409_v52 = vld [vmem:[%s15630_s16 + $0x1198] ss:$16 sps:$4 sm:$0xff]   ;;  %v15410_v61 = vld [vmem:[%s15630_s16 + $0x11bc] ss:$16 sps:$4 sm:$0xff]  }
 0x917   : > { %10349 = vmatprep.subr.bf16.mxu1 %v15386_v36  ;;  %v15412_v36 = vld [vmem:[%s15630_s16 + $0x11dc] ss:$16 sps:$4 sm:$0xff]  }
 0x91a   : > { %10350 = vmatpush1.bf16.msra.mxu1 %v15387_v24  ;;  %v15413_v24 = vld [vmem:[%s15630_s16 + $0x11d8] ss:$16 sps:$4 sm:$0xff]  }
 0x91b   : > { %10351 = vmatprep.subr.bf16.mxu1 %v15388_v39  ;;  %v15414_v39 = vld [vmem:[%s15630_s16 + $0x11fc] ss:$16 sps:$4 sm:$0xff]  }
 0x91e   : > { %10352 = vmatpush1.bf16.msra.mxu1 %v15389_v11  ;;  %v15416_v11 = vld [vmem:[%s15630_s16 + $0x121c] ss:$16 sps:$4 sm:$0xff]  }
 0x91f   : > { %10353 = vmatprep.subr.bf16.mxu1 %v15390_v59  ;;  %v15417_v59 = vld [vmem:[%s15630_s16 + $0x1218] ss:$16 sps:$4 sm:$0xff]  }
 0x922   : > { %10354 = vmatpush1.bf16.msra.mxu1 %v15391_v6  ;;  %v15418_v6 = vld [vmem:[%s15630_s16 + $0x123c] ss:$16 sps:$4 sm:$0xff]  }
 0x923   : > { %10355 = vmatprep.subr.bf16.mxu1 %v15392_v48  ;;  %v15419_v48 = vld [vmem:[%s15630_s16 + $0x1238] ss:$16 sps:$4 sm:$0xff]  }
 0x926   : > { %10356 = vmatpush1.bf16.msra.mxu1 %v15393_v53  ;;  %v15420_v53 = vld [vmem:[%s15630_s16 + $0x125c] ss:$16 sps:$4 sm:$0xff]  }
 0x927   : > { %10357 = vmatprep.subr.bf16.mxu1 %v15394_v16  ;;  %v15421_v16 = vld [vmem:[%s15630_s16 + $0x1258] ss:$16 sps:$4 sm:$0xff]  }
 0x92a   : > { %10358 = vmatpush1.bf16.msra.mxu1 %v15395_v28  ;;  %v15422_v28 = vld [vmem:[%s15630_s16 + $0x127c] ss:$16 sps:$4 sm:$0xff]  }
 0x92b   : > { %10359 = vmatprep.subr.bf16.mxu1 %v15396_v8  ;;  %v15423_v8 = vld [vmem:[%s15630_s16 + $0x1278] ss:$16 sps:$4 sm:$0xff]  }
 0x92e   : > { %10360 = vmatpush1.bf16.msra.mxu1 %v15397_v32  ;;  %v15424_v32 = vld [vmem:[%s15630_s16 + $0x129c] ss:$16 sps:$4 sm:$0xff]  }
 0x92f   : > { %10361 = vmatprep.subr.bf16.mxu1 %v15398_v4  ;;  %v15425_v4 = vld [vmem:[%s15630_s16 + $0x1298] ss:$16 sps:$4 sm:$0xff]  }
 0x932   : > { %10362 = vmatpush1.bf16.msra.mxu1 %v15399_v26  ;;  %v15426_v26 = vld [vmem:[%s15630_s16 + $0x12cc] ss:$16 sps:$4 sm:$0xff]  }
 0x933   : > { %10363 = vmatprep.subr.bf16.mxu1 %v15400_v23  ;;  %v15427_v23 = vld [vmem:[%s15630_s16 + $0x12c8] ss:$16 sps:$4 sm:$0xff]  }
 0x936   : > { %10364 = vmatpush1.bf16.msra.mxu1 %v15401_v14  ;;  %v15428_v14 = vld [vmem:[%s15630_s16 + $0x12ec] ss:$16 sps:$4 sm:$0xff]  }
 0x937   : > { %12861 = vmatprep.subr.msk.bf16.mxu1 %vm2608_vm0, %v17471_v25 }
 0x93a   : > { %10366 = vmatpush1.bf16.msra.mxu1 %v20048_v60 }
 0x93b   : > { %10436 = vmatprep.subr.bf16.mxu1 %v15402_v21 }
 0x93d   : > { %10374 = vmatmul.mubr.bf16.vlgmr.msra.gmra.mrb[128].mxu1 %v18793_v20 }
 0x93e   : > { %10437 = vmatpush1.bf16.msra.mxu1 %v15403_v12  ;;  %12866 = vmatprep.mubr.msk.bf16.mxu1 %vm2604_vm1, %v18801_v27 }
 0x93f   : > { %10438 = vmatprep.subr.bf16.mxu1 %v15404_v33  ;;  %v15429_v33 = vld [vmem:[%s15630_s16 + $0x12e8] ss:$16 sps:$4 sm:$0xff]  }
 0x940   : > { %v9995_v57 = vpop.f32.mrb[112].mxu1 }
 0x941   : > { %v10930_v44 = vsel %vm8058_vm2, %v9995_v57, 0.0  ;;  %v9997_v25 = vpop.f32.mrb[113].mxu1 }
 0x942   : > { %v19294_v18 = vadd.f32 %v10930_v44, %v19247_v46  ;;  %v10961_v30 = vsel %vm8058_vm2, %v9997_v25, 0.0  ;;  %v9999_v20 = vpop.f32.mrb[114].mxu1  ;;  %10439 = vmatpush1.bf16.msra.mxu1 %v15405_v13  ;;  %v15430_v44 = vld [vmem:[%s15630_s16 + $0x130c] ss:$16 sps:$4 sm:$0xff]  }
 0x943   : > { %v19299_v31 = vadd.f32 %v10961_v30, %v19253_v45  ;;  %v10000_v27 = vpop.f32.mrb[115].mxu1  ;;  %10440 = vmatprep.subr.bf16.mxu1 %v15406_v22  ;;  %v15431_v20 = vld [vmem:[%s15630_s16 + $0x1308] ss:$16 sps:$4 sm:$0xff]   ;;  %v15432_v22 = vld [vmem:[%s15630_s16 + $0x132c] ss:$16 sps:$4 sm:$0xff]  }
 0x945   : > { %v10524_v40 = vpop.f32.mrb[96].mxu0 }
 0x946   : > { %v10880_v29 = vsel %vm8058_vm2, %v10524_v40, 0.0  ;;  %v10526_v46 = vpop.f32.mrb[97].mxu0  ;;  %10441 = vmatpush1.bf16.msra.mxu1 %v15407_v42  ;;  %v15434_v42 = vld [vmem:[%s15630_s16 + $0x134c] ss:$16 sps:$4 sm:$0xff]  }
 0x947   : > { %v19305_v10 = vadd.f32 %v10880_v29, %v19259_v62  ;;  %v10911_v45 = vsel %vm8058_vm2, %v10526_v46, 0.0  ;;  %v10528_v3 = vpop.f32.mrb[98].mxu0  ;;  %10442 = vmatprep.subr.bf16.mxu1 %v15408_v35  ;;  %v15411_v62 = vld [vmem:[%s15630_s16 + $0x11b8] ss:$16 sps:$4 sm:$0xff]   ;;  %v15438_v35 = vld [vmem:[%s15630_s16 + $0x138c] ss:$16 sps:$4 sm:$0xff]  }
 0x948   : > { %v19310_v41 = vadd.f32 %v10911_v45, %v19264_v47  ;;  %v10529_v1 = vpop.f32.mrb[99].mxu0  ;;  %v15415_v47 = vld [vmem:[%s15630_s16 + $0x11f8] ss:$16 sps:$4 sm:$0xff]   ;;  %v15436_v45 = vld [vmem:[%s15630_s16 + $0x136c] ss:$16 sps:$4 sm:$0xff]  }
 0x949   : > { %v15433_v46 = vld [vmem:[%s15630_s16 + $0x1328] ss:$16 sps:$4 sm:$0xff]   ;;  %v15440_v1 = vld [vmem:[%s15630_s16 + $0x13ac] ss:$16 sps:$4 sm:$0xff]  }
 0x94a   : > { %10443 = vmatpush1.bf16.msra.mxu1 %v15409_v52  ;;  %v15437_v3 = vld [vmem:[%s15630_s16 + $0x1368] ss:$16 sps:$4 sm:$0xff]  }
 0x94b   : > { %10444 = vmatprep.subr.bf16.mxu1 %v15410_v61  ;;  %v15441_v52 = vld [vmem:[%s15630_s16 + $0x13a8] ss:$16 sps:$4 sm:$0xff]   ;;  %v15442_v61 = vld [vmem:[%s15630_s16 + $0x13cc] ss:$16 sps:$4 sm:$0xff]  }
 0x94e   : > { %10445 = vmatpush1.bf16.msra.mxu1 %v15411_v62  ;;  %v15443_v62 = vld [vmem:[%s15630_s16 + $0x13c8] ss:$16 sps:$4 sm:$0xff]  }
 0x94f   : > { %10446 = vmatprep.subr.bf16.mxu1 %v15412_v36  ;;  %v15444_v36 = vld [vmem:[%s15630_s16 + $0x13ec] ss:$16 sps:$4 sm:$0xff]  }
 0x952   : > { %10447 = vmatpush1.bf16.msra.mxu1 %v15413_v24  ;;  %v15445_v24 = vld [vmem:[%s15630_s16 + $0x13e8] ss:$16 sps:$4 sm:$0xff]  }
 0x953   : > { %10448 = vmatprep.subr.bf16.mxu1 %v15414_v39  ;;  %v15446_v39 = vld [vmem:[%s15630_s16 + $0x140c] ss:$16 sps:$4 sm:$0xff]  }
 0x956   : > { %10449 = vmatpush1.bf16.msra.mxu1 %v15415_v47  ;;  %v15447_v47 = vld [vmem:[%s15630_s16 + $0x1408] ss:$16 sps:$4 sm:$0xff]  }
 0x957   : > { %10450 = vmatprep.subr.bf16.mxu1 %v15416_v11  ;;  %v15448_v11 = vld [vmem:[%s15630_s16 + $0x142c] ss:$16 sps:$4 sm:$0xff]  }
 0x95a   : > { %10451 = vmatpush1.bf16.msra.mxu1 %v15417_v59  ;;  %v15449_v59 = vld [vmem:[%s15630_s16 + $0x1428] ss:$16 sps:$4 sm:$0xff]  }
 0x95b   : > { %10452 = vmatprep.subr.bf16.mxu1 %v15418_v6  ;;  %v15450_v6 = vld [vmem:[%s15630_s16 + $0x145c] ss:$16 sps:$4 sm:$0xff]  }
 0x95e   : > { %10453 = vmatpush1.bf16.msra.mxu1 %v15419_v48  ;;  %v15451_v48 = vld [vmem:[%s15630_s16 + $0x1458] ss:$16 sps:$4 sm:$0xff]  }
 0x95f   : > { %10454 = vmatprep.subr.bf16.mxu1 %v15420_v53  ;;  %v15452_v53 = vld [vmem:[%s15630_s16 + $0x147c] ss:$16 sps:$4 sm:$0xff]  }
 0x962   : > { %10455 = vmatpush1.bf16.msra.mxu1 %v15421_v16 }
 0x963   : > { %10456 = vmatprep.subr.bf16.mxu1 %v15422_v28 }
 0x966   : > { %10457 = vmatpush1.bf16.msra.mxu1 %v15423_v8 }
 0x967   : > { %10458 = vmatprep.subr.bf16.mxu1 %v15424_v32  ;;  %v15453_v32 = vld [vmem:[%s15630_s16 + $0x1478] ss:$16 sps:$4 sm:$0xff]  }
 0x96a   : > { %10459 = vmatpush1.bf16.msra.mxu1 %v15425_v4 }
 0x96b   : > { %12865 = vmatprep.subr.msk.bf16.mxu1 %vm2608_vm0, %v17603_v38 }
 0x96e   : > { %10461 = vmatpush1.bf16.msra.mxu1 %v17614_v54 }
 0x96f   : > { %10531 = vmatprep.subr.bf16.mxu1 %v15426_v26  ;;  %v15454_v26 = vld [vmem:[%s15630_s16 + $0x149c] ss:$16 sps:$4 sm:$0xff]  }
 0x971   : > { %10469 = vmatmul.mubr.bf16.vlgmr.msra.gmra.mrb[132].mxu1 %v18883_v63 }
 0x972   : > { %10532 = vmatpush1.bf16.msra.mxu1 %v15427_v23  ;;  %12871 = vmatprep.mubr.msk.bf16.mxu1 %vm2604_vm1, %v18889_v58 }
 0x973   : > { %10533 = vmatprep.subr.bf16.mxu1 %v15428_v14 }
 0x974   : > { %v10090_v60 = vpop.f32.mrb[116].mxu1 }
 0x975   : > { %v10932_v21 = vsel %vm8058_vm2, %v10090_v60, 0.0  ;;  %v10092_v38 = vpop.f32.mrb[117].mxu1 }
 0x976   : > { %v19340_v12 = vadd.f32 %v10932_v21, %v19294_v18  ;;  %v10963_v54 = vsel %vm8058_vm2, %v10092_v38, 0.0  ;;  %v10094_v63 = vpop.f32.mrb[118].mxu1  ;;  %10534 = vmatpush1.bf16.msra.mxu1 %v15429_v33  ;;  %v15455_v21 = vld [vmem:[%s15630_s16 + $0x1498] ss:$16 sps:$4 sm:$0xff]  }
 0x977   : > { %v19345_v57 = vadd.f32 %v10963_v54, %v19299_v31  ;;  %v10095_v58 = vpop.f32.mrb[119].mxu1  ;;  %10535 = vmatprep.subr.bf16.mxu1 %v15430_v44  ;;  %v15456_v63 = vld [vmem:[%s15630_s16 + $0x14bc] ss:$16 sps:$4 sm:$0xff]  }
 0x978   : > { %v15457_v58 = vld [vmem:[%s15630_s16 + $0x14b8] ss:$16 sps:$4 sm:$0xff]   ;;  %v15458_v44 = vld [vmem:[%s15630_s16 + $0x14dc] ss:$16 sps:$4 sm:$0xff]  }
 0x979   : > { %v10619_v25 = vpop.f32.mrb[100].mxu0 }
 0x97a   : > { %v10882_v30 = vsel %vm8058_vm2, %v10619_v25, 0.0  ;;  %v10621_v18 = vpop.f32.mrb[101].mxu0  ;;  %10536 = vmatpush1.bf16.msra.mxu1 %v15431_v20  ;;  %v15459_v25 = vld [vmem:[%s15630_s16 + $0x14d8] ss:$16 sps:$4 sm:$0xff]   ;;  %v15462_v20 = vld [vmem:[%s15630_s16 + $0x151c] ss:$16 sps:$4 sm:$0xff]  }
 0x97b   : > { %v19351_v13 = vadd.f32 %v10882_v30, %v19305_v10  ;;  %v10913_v31 = vsel %vm8058_vm2, %v10621_v18, 0.0  ;;  %v10623_v27 = vpop.f32.mrb[102].mxu0  ;;  %10537 = vmatprep.subr.bf16.mxu1 %v15432_v22  ;;  %v15435_v10 = vld [vmem:[%s15630_s16 + $0x1348] ss:$16 sps:$4 sm:$0xff]   ;;  %v15460_v30 = vld [vmem:[%s15630_s16 + $0x14fc] ss:$16 sps:$4 sm:$0xff]  }
 0x97c   : > { %v19356_v40 = vadd.f32 %v10913_v31, %v19310_v41  ;;  %v10624_v29 = vpop.f32.mrb[103].mxu0  ;;  %v15439_v41 = vld [vmem:[%s15630_s16 + $0x1388] ss:$16 sps:$4 sm:$0xff]   ;;  %v15464_v31 = vld [vmem:[%s15630_s16 + $0x153c] ss:$16 sps:$4 sm:$0xff]  }
 0x97d   : > { %v15461_v18 = vld [vmem:[%s15630_s16 + $0x14f8] ss:$16 sps:$4 sm:$0xff]   ;;  %v15466_v22 = vld [vmem:[%s15630_s16 + $0x155c] ss:$16 sps:$4 sm:$0xff]  }
 0x97e   : > { %10538 = vmatpush1.bf16.msra.mxu1 %v15433_v46  ;;  %v15465_v27 = vld [vmem:[%s15630_s16 + $0x1538] ss:$16 sps:$4 sm:$0xff]   ;;  %v15468_v29 = vld [vmem:[%s15630_s16 + $0x157c] ss:$16 sps:$4 sm:$0xff]  }
 0x97f   : > { %10539 = vmatprep.subr.bf16.mxu1 %v15434_v42  ;;  %v15469_v46 = vld [vmem:[%s15630_s16 + $0x1578] ss:$16 sps:$4 sm:$0xff]   ;;  %v15470_v42 = vld [vmem:[%s15630_s16 + $0x159c] ss:$16 sps:$4 sm:$0xff]  }
 0x982   : > { %10540 = vmatpush1.bf16.msra.mxu1 %v15435_v10  ;;  %v15471_v10 = vld [vmem:[%s15630_s16 + $0x1598] ss:$16 sps:$4 sm:$0xff]  }
 0x983   : > { %10541 = vmatprep.subr.bf16.mxu1 %v15436_v45  ;;  %v15472_v45 = vld [vmem:[%s15630_s16 + $0x15bc] ss:$16 sps:$4 sm:$0xff]  }
 0x986   : > { %10542 = vmatpush1.bf16.msra.mxu1 %v15437_v3  ;;  %v15473_v3 = vld [vmem:[%s15630_s16 + $0x15b8] ss:$16 sps:$4 sm:$0xff]  }
 0x987   : > { %10543 = vmatprep.subr.bf16.mxu1 %v15438_v35  ;;  %v15474_v35 = vld [vmem:[%s15630_s16 + $0x15ec] ss:$16 sps:$4 sm:$0xff]  }
 0x98a   : > { %10544 = vmatpush1.bf16.msra.mxu1 %v15439_v41  ;;  %v15475_v41 = vld [vmem:[%s15630_s16 + $0x15e8] ss:$16 sps:$4 sm:$0xff]  }
 0x98b   : > { %10545 = vmatprep.subr.bf16.mxu1 %v15440_v1  ;;  %v15476_v1 = vld [vmem:[%s15630_s16 + $0x160c] ss:$16 sps:$4 sm:$0xff]  }
 0x98e   : > { %10546 = vmatpush1.bf16.msra.mxu1 %v15441_v52 }
 0x98f   : > { %10547 = vmatprep.subr.bf16.mxu1 %v15442_v61 }
 0x992   : > { %10548 = vmatpush1.bf16.msra.mxu1 %v15443_v62 }
 0x993   : > { %10549 = vmatprep.subr.bf16.mxu1 %v15444_v36  ;;  %v15477_v36 = vld [vmem:[%s15630_s16 + $0x1608] ss:$16 sps:$4 sm:$0xff]  }
 0x996   : > { %10550 = vmatpush1.bf16.msra.mxu1 %v15445_v24 }
 0x997   : > { %10551 = vmatprep.subr.bf16.mxu1 %v15446_v39  ;;  %v15478_v39 = vld [vmem:[%s15630_s16 + $0x162c] ss:$16 sps:$4 sm:$0xff]  }
 0x99a   : > { %10552 = vmatpush1.bf16.msra.mxu1 %v15447_v47 }
 0x99b   : > { %10553 = vmatprep.subr.bf16.mxu1 %v15448_v11 }
 0x99e   : > { %10554 = vmatpush1.bf16.msra.mxu1 %v15449_v59 }
 0x99f   : > { %12870 = vmatprep.subr.msk.bf16.mxu1 %vm2608_vm0, %v17735_v34 }
 0x9a2   : > { %10556 = vmatpush1.bf16.msra.mxu1 %v17746_v43 }
 0x9a3   : > { %10626 = vmatprep.subr.bf16.mxu1 %v15450_v6  ;;  %v15479_v6 = vld [vmem:[%s15630_s16 + $0x1628] ss:$16 sps:$4 sm:$0xff]  }
 0x9a5   : > { %10564 = vmatmul.mubr.bf16.vlgmr.msra.gmra.mrb[136].mxu1 %v18980_v5 }
 0x9a6   : > { %10627 = vmatpush1.bf16.msra.mxu1 %v15451_v48  ;;  %12875 = vmatprep.mubr.msk.bf16.mxu1 %vm2604_vm1, %v18986_v37 }
 0x9a7   : > { %10628 = vmatprep.subr.bf16.mxu1 %v15452_v53 }
 0x9a8   : > { %v10185_v16 = vpop.f32.mrb[120].mxu1 }
 0x9a9   : > { %v10934_v28 = vsel %vm8058_vm2, %v10185_v16, 0.0  ;;  %v10187_v34 = vpop.f32.mrb[121].mxu1 }
 0x9aa   : > { %v19386_v8 = vadd.f32 %v10934_v28, %v19340_v12  ;;  %v10965_v43 = vsel %vm8058_vm2, %v10187_v34, 0.0  ;;  %v10189_v5 = vpop.f32.mrb[122].mxu1  ;;  %10629 = vmatpush1.bf16.msra.mxu1 %v15453_v32  ;;  %v15480_v28 = vld [vmem:[%s15630_s16 + $0x164c] ss:$16 sps:$4 sm:$0xff]   ;;  %v15481_v32 = vld [vmem:[%s15630_s16 + $0x1648] ss:$16 sps:$4 sm:$0xff]  }
 0x9ab   : > { %v19391_v4 = vadd.f32 %v10965_v43, %v19345_v57  ;;  %v10190_v37 = vpop.f32.mrb[123].mxu1  ;;  %10630 = vmatprep.subr.bf16.mxu1 %v15454_v26 }
 0x9ac   : > { %v15482_v37 = vld [vmem:[%s15630_s16 + $0x166c] ss:$16 sps:$4 sm:$0xff]  }
 0x9ad   : > { %v10714_v23 = vpop.f32.mrb[104].mxu0 }
 0x9ae   : > { %v10884_v14 = vsel %vm8058_vm2, %v10714_v23, 0.0  ;;  %v10716_v60 = vpop.f32.mrb[105].mxu0  ;;  %10631 = vmatpush1.bf16.msra.mxu1 %v15455_v21  ;;  %v15485_v21 = vld [vmem:[%s15630_s16 + $0x1688] ss:$16 sps:$4 sm:$0xff]  }
 0x9af   : > { %v19397_v38 = vadd.f32 %v10884_v14, %v19351_v13  ;;  %v10915_v12 = vsel %vm8058_vm2, %v10716_v60, 0.0  ;;  %v10718_v54 = vpop.f32.mrb[106].mxu0  ;;  %10632 = vmatprep.subr.bf16.mxu1 %v15456_v63  ;;  %v15463_v13 = vld [vmem:[%s15630_s16 + $0x1518] ss:$16 sps:$4 sm:$0xff]   ;;  %v15484_v60 = vld [vmem:[%s15630_s16 + $0x168c] ss:$16 sps:$4 sm:$0xff]  }
 0x9b0   : > { %v19402_v33 = vadd.f32 %v10915_v12, %v19356_v40  ;;  %v10719_v57 = vpop.f32.mrb[107].mxu0  ;;  %v15467_v40 = vld [vmem:[%s15630_s16 + $0x1558] ss:$16 sps:$4 sm:$0xff]   ;;  %v15490_v54 = vld [vmem:[%s15630_s16 + $0x16ec] ss:$16 sps:$4 sm:$0xff]  }
 0x9b1   : > { %v15483_v14 = vld [vmem:[%s15630_s16 + $0x1668] ss:$16 sps:$4 sm:$0xff]  }
 0x9b2   : > { %10633 = vmatpush1.bf16.msra.mxu1 %v15457_v58  ;;  %v15489_v12 = vld [vmem:[%s15630_s16 + $0x16c8] ss:$16 sps:$4 sm:$0xff]   ;;  %v15494_v58 = vld [vmem:[%s15630_s16 + $0x172c] ss:$16 sps:$4 sm:$0xff]  }
 0x9b3   : > { %10634 = vmatprep.subr.bf16.mxu1 %v15458_v44  ;;  %v15491_v63 = vld [vmem:[%s15630_s16 + $0x16e8] ss:$16 sps:$4 sm:$0xff]  }
 0x9b4   : > { %v15493_v57 = vld [vmem:[%s15630_s16 + $0x1708] ss:$16 sps:$4 sm:$0xff]  }
 0x9b5   : > { %v15495_v44 = vld [vmem:[%s15630_s16 + $0x1728] ss:$16 sps:$4 sm:$0xff]  }
 0x9b6   : > { %10635 = vmatpush1.bf16.msra.mxu1 %v15459_v25  ;;  %v15496_v25 = vld [vmem:[%s15630_s16 + $0x174c] ss:$16 sps:$4 sm:$0xff]  }
 0x9b7   : > { %10636 = vmatprep.subr.bf16.mxu1 %v15460_v30  ;;  %v15497_v30 = vld [vmem:[%s15630_s16 + $0x1748] ss:$16 sps:$4 sm:$0xff]  }
 0x9ba   : > { %10637 = vmatpush1.bf16.msra.mxu1 %v15461_v18  ;;  %v20049_v18 = vld [vmem:[#allocation29_spill] sm:$0xff] }
 0x9bb   : > { %10638 = vmatprep.subr.bf16.mxu1 %v15462_v20  ;;  %v15498_v20 = vld [vmem:[%s15630_s16 + $0x177c] ss:$16 sps:$4 sm:$0xff]  }
 0x9be   : > { %10639 = vmatpush1.bf16.msra.mxu1 %v15463_v13  ;;  %v15499_v13 = vld [vmem:[%s15630_s16 + $0x1778] ss:$16 sps:$4 sm:$0xff]  }
 0x9bf   : > { %10640 = vmatprep.subr.bf16.mxu1 %v15464_v31  ;;  %v15500_v31 = vld [vmem:[%s15630_s16 + $0x179c] ss:$16 sps:$4 sm:$0xff]  }
 0x9c2   : > { %10641 = vmatpush1.bf16.msra.mxu1 %v15465_v27 }
 0x9c3   : > { %10642 = vmatprep.subr.bf16.mxu1 %v15466_v22 }
 0x9c6   : > { %10643 = vmatpush1.bf16.msra.mxu1 %v15467_v40 }
 0x9c7   : > { %10644 = vmatprep.subr.bf16.mxu1 %v15468_v29 }
 0x9ca   : > { %10645 = vmatpush1.bf16.msra.mxu1 %v15469_v46  ;;  %v15501_v46 = vld [vmem:[%s15630_s16 + $0x1798] ss:$16 sps:$4 sm:$0xff]  }
 0x9cb   : > { %10646 = vmatprep.subr.bf16.mxu1 %v15470_v42 }
 0x9ce   : > { %10647 = vmatpush1.bf16.msra.mxu1 %v15471_v10  ;;  %v15502_v10 = vld [vmem:[%s15630_s16 + $0x17bc] ss:$16 sps:$4 sm:$0xff]  }
 0x9cf   : > { %10648 = vmatprep.subr.bf16.mxu1 %v15472_v45  ;;  %v15503_v45 = vld [vmem:[%s15630_s16 + $0x17b8] ss:$16 sps:$4 sm:$0xff]  }
 0x9d2   : > { %10649 = vmatpush1.bf16.msra.mxu1 %v15473_v3  ;;  %v15504_v3 = vld [vmem:[%s15630_s16 + $0x17dc] ss:$16 sps:$4 sm:$0xff]  }
 0x9d3   : > { %12874 = vmatprep.subr.msk.bf16.mxu1 %vm2608_vm0, %v17866_v55 }
 0x9d6   : > { %10651 = vmatpush1.bf16.msra.mxu1 %v17878_v9 }
 0x9d7   : > { %10721 = vmatprep.subr.bf16.mxu1 %v15474_v35  ;;  %v15505_v35 = vld [vmem:[%s15630_s16 + $0x17d8] ss:$16 sps:$4 sm:$0xff]  }
 0x9d9   : > { %10659 = vmatmul.mubr.bf16.vlgmr.msra.gmra.mrb[140].mxu1 %v19072_v7 }
 0x9da   : > { %10722 = vmatpush1.bf16.msra.mxu1 %v15475_v41  ;;  %12880 = vmatprep.mubr.msk.bf16.mxu1 %vm2604_vm1, %v19078_v0  ;;  %v15506_v41 = vld [vmem:[%s15630_s16 + $0x17fc] ss:$16 sps:$4 sm:$0xff]  }
 0x9db   : > { %10723 = vmatprep.subr.bf16.mxu1 %v15476_v1  ;;  %v15507_v1 = vld [vmem:[%s15630_s16 + $0x17f8] ss:$16 sps:$4 sm:$0xff]  }
 0x9dc   : > { %v10280_v52 = vpop.f32.mrb[124].mxu1 }
 0x9dd   : > { %v10936_v61 = vsel %vm8058_vm2, %v10280_v52, 0.0  ;;  %v10282_v55 = vpop.f32.mrb[125].mxu1  ;;  %v15508_v52 = vld [vmem:[%s15630_s16 + $0x181c] ss:$16 sps:$4 sm:$0xff]  }
 0x9de   : > { %v19432_v62 = vadd.f32 %v10936_v61, %v19386_v8  ;;  %v10967_v9 = vsel %vm8058_vm2, %v10282_v55, 0.0  ;;  %v10284_v7 = vpop.f32.mrb[126].mxu1  ;;  %10724 = vmatpush1.bf16.msra.mxu1 %v15477_v36  ;;  %v15509_v61 = vld [vmem:[%s15630_s16 + $0x1818] ss:$16 sps:$4 sm:$0xff]   ;;  %v15510_v55 = vld [vmem:[%s15630_s16 + $0x183c] ss:$16 sps:$4 sm:$0xff]  }
 0x9df   : > { %v19437_v24 = vadd.f32 %v10967_v9, %v19391_v4  ;;  %v10285_v0 = vpop.f32.mrb[127].mxu1  ;;  %10725 = vmatprep.subr.bf16.mxu1 %v15478_v39  ;;  %v15512_v9 = vld [vmem:[%s15630_s16 + $0x185c] ss:$16 sps:$4 sm:$0xff]   ;;  %v15513_v7 = vld [vmem:[%s15630_s16 + $0x1858] ss:$16 sps:$4 sm:$0xff]  }
 0x9e0   : > { %v15514_v36 = vld [vmem:[%s15630_s16 + $0x187c] ss:$16 sps:$4 sm:$0xff]   ;;  %v15517_v39 = vld [vmem:[%s15630_s16 + $0x1898] ss:$16 sps:$4 sm:$0xff]  }
 0x9e1   : > { %v10809_v47 = vpop.f32.mrb[108].mxu0  ;;  %v15516_v0 = vld [vmem:[%s15630_s16 + $0x189c] ss:$16 sps:$4 sm:$0xff]  }
 0x9e2   : > { %v10886_v11 = vsel %vm8058_vm2, %v10809_v47, 0.0  ;;  %v10811_v59 = vpop.f32.mrb[109].mxu0  ;;  %10726 = vmatpush1.bf16.msra.mxu1 %v15479_v6  ;;  %v15518_v47 = vld [vmem:[%s15630_s16 + $0x18bc] ss:$16 sps:$4 sm:$0xff]   ;;  %v15521_v6 = vld [vmem:[%s15630_s16 + $0x18d8] ss:$16 sps:$4 sm:$0xff]  }
 0x9e3   : > { %v10887_v48 = vadd.f32 %v10886_v11, %v19397_v38  ;;  %v10917_v53 = vsel %vm8058_vm2, %v10811_v59, 0.0  ;;  %v10813_v16 = vpop.f32.mrb[110].mxu0  ;;  %10727 = vmatprep.subr.bf16.mxu1 %v15480_v28  ;;  %v15487_v38 = vld [vmem:[%s15630_s16 + $0x16a8] ss:$16 sps:$4 sm:$0xff]   ;;  %v15520_v59 = vld [vmem:[%s15630_s16 + $0x18dc] ss:$16 sps:$4 sm:$0xff]  }
 0x9e4   : > { %v10918_v34 = vadd.f32 %v10917_v53, %v19402_v33  ;;  %v10814_v8 = vpop.f32.mrb[111].mxu0  ;;  %v15492_v33 = vld [vmem:[%s15630_s16 + $0x170c] ss:$16 sps:$4 sm:$0xff]   ;;  %v15519_v11 = vld [vmem:[%s15630_s16 + $0x18b8] ss:$16 sps:$4 sm:$0xff]  }
 0x9e5   : > { %v10986_v43 = vrot.slane %v10887_v48, 7  ;;  %v20050_v48 = vld [vmem:[#allocation30_spill] sm:$0xff]  ;;  %v20051_v53 = vld [vmem:[#allocation31_spill] sm:$0xff] }
 0x9e6   : > { %v10987_v5 = vrot.slane %v10918_v34, 7  ;;  %10728 = vmatpush1.bf16.msra.mxu1 %v15481_v32 }
 0x9e7   : > { %v19449_v4 = vsel %vm8058_vm2, %v17923_v49, %v10986_v43  ;;  %10729 = vmatprep.subr.bf16.mxu1 %v15482_v37  ;;  %v15486_v49 = vld [vmem:[%s15630_s16 + $0x16ac] ss:$16 sps:$4 sm:$0xff]  }
 0x9e8   : > { %v19454_v26 = vsel %vm8058_vm2, %v17931_v19, %v10987_v5  ;;  %v15488_v19 = vld [vmem:[%s15630_s16 + $0x16cc] ss:$16 sps:$4 sm:$0xff]  }
 0x9e9   : > { %v11002_v23 = vcombine.low %v19449_v4, %v19454_v26  ;;  %v11065_v4 = vld [vmem:[%s19967_s5] sm:$0xff] (!%p12885_p6) }
 0x9ea   : > { %10730 = vmatpush1.bf16.msra.mxu1 %v15483_v14 }
 0x9eb   : > { %10731 = vmatprep.subr.bf16.mxu1 %v15484_v60 }
 0x9ee   : > { %10732 = vmatpush1.bf16.msra.mxu1 %v15485_v21 }
 0x9ef   : > { %10733 = vmatprep.subr.bf16.mxu1 %v15486_v49 }
 0x9f2   : > { %10734 = vmatpush1.bf16.msra.mxu1 %v15487_v38 }
 0x9f3   : > { %10735 = vmatprep.subr.bf16.mxu1 %v15488_v19 }
 0x9f6   : > { %10736 = vmatpush1.bf16.msra.mxu1 %v15489_v12 }
 0x9f7   : > { %10737 = vmatprep.subr.bf16.mxu1 %v15490_v54 }
 0x9fa   : > { %10738 = vmatpush1.bf16.msra.mxu1 %v15491_v63 }
 0x9fb   : > { %10739 = vmatprep.subr.bf16.mxu1 %v15492_v33 }
 0x9fe   : > { %10740 = vmatpush1.bf16.msra.mxu1 %v15493_v57 }
 0x9ff   : > { %10741 = vmatprep.subr.bf16.mxu1 %v15494_v58 }
 0xa02   : > { %10742 = vmatpush1.bf16.msra.mxu1 %v15495_v44 }
 0xa03   : > { %10743 = vmatprep.subr.bf16.mxu1 %v15496_v25 }
 0xa06   : > { %10744 = vmatpush1.bf16.msra.mxu1 %v15497_v30 }
 0xa07   : > { %12879 = vmatprep.subr.msk.bf16.mxu1 %vm2608_vm0, %v17997_v56 }
 0xa0a   : > { %10746 = vmatpush1.bf16.msra.mxu1 %v20049_v18 }
 0xa0b   : > { %10816 = vmatprep.subr.bf16.mxu1 %v15498_v20 }
 0xa0d   : > { %10754 = vmatmul.mubr.bf16.vlgmr.msra.gmra.mrb[144].mxu1 %v19159_v2 }
 0xa0e   : > { %10817 = vmatpush1.bf16.msra.mxu1 %v15499_v13  ;;  %12884 = vmatprep.mubr.msk.bf16.mxu1 %vm2604_vm1, %v19165_v17 }
 0xa0f   : > { %10818 = vmatprep.subr.bf16.mxu1 %v15500_v31 }
 0xa10   : > { %v10375_v27 = vpop.f32.mrb[128].mxu1 }
 0xa11   : > { %v10938_v56 = vsel %vm8058_vm2, %v10375_v27, 0.0  ;;  %v10377_v22 = vpop.f32.mrb[129].mxu1 }
 0xa12   : > { %v10939_v40 = vadd.f32 %v10938_v56, %v19432_v62  ;;  %v10969_v2 = vsel %vm8058_vm2, %v10377_v22, 0.0  ;;  %v10379_v29 = vpop.f32.mrb[130].mxu1  ;;  %10819 = vmatpush1.bf16.msra.mxu1 %v15501_v46  ;;  %v15511_v62 = vld [vmem:[%s15630_s16 + $0x1838] ss:$16 sps:$4 sm:$0xff]  }
 0xa13   : > { %v10970_v17 = vadd.f32 %v10969_v2, %v19437_v24  ;;  %v10380_v42 = vpop.f32.mrb[131].mxu1  ;;  %10820 = vmatprep.subr.bf16.mxu1 %v15502_v10  ;;  %v15515_v24 = vld [vmem:[%s15630_s16 + $0x1878] ss:$16 sps:$4 sm:$0xff]   ;;  %v15563_v2 = vmov 1983009808  }
 0xa14   : > { %v11005_v29 = vunpack.c.l.s4 %v15563_v2  ;;  %v11077_v2 = vld [vmem:[%s19967_s5 + $0x60] sm:$0xff] (!%p12885_p6) }
 0xa16   : > { %10821 = vmatpush1.bf16.msra.mxu1 %v15503_v45  ;;  %v11006_v10 = vunpack.c.0.s8 %v11005_v29 }
 0xa17   : > { %10822 = vmatprep.subr.bf16.mxu1 %v15504_v3 }
 0xa1a   : > { %10823 = vmatpush1.bf16.msra.mxu1 %v15505_v35 }
 0xa1b   : > { %10824 = vmatprep.subr.bf16.mxu1 %v15506_v41 }
 0xa1e   : > { %10825 = vmatpush1.bf16.msra.mxu1 %v15507_v1 }
 0xa1f   : > { %10826 = vmatprep.subr.bf16.mxu1 %v15508_v52 }
 0xa22   : > { %10827 = vmatpush1.bf16.msra.mxu1 %v15509_v61 }
 0xa23   : > { %10828 = vmatprep.subr.bf16.mxu1 %v15510_v55  ;;  %v20052_v55 = vld [vmem:[#allocation6_spill] sm:$0xff] }
 0xa26   : > { %10829 = vmatpush1.bf16.msra.mxu1 %v15511_v62  ;;  %v19522_v62 = vsub.s32 %v11006_v10, %v20052_v55  ;;  %v11144_v10 = vld [vmem:[%s19967_s5 + $0x278] sm:$0xff] (!%p12885_p6) }
 0xa27   : > { %10830 = vmatprep.subr.bf16.mxu1 %v15512_v9  ;;  %v20053_v9 = vld [vmem:[#allocation32_spill] sm:$0xff] }
 0xa28   : > { %v11148_v55 = vld [vmem:[%s19967_s5 + $0x298] sm:$0xff] (!%p12885_p6) }
 0xa2a   : > { %10831 = vmatpush1.bf16.msra.mxu1 %v15513_v7 }
 0xa2b   : > { %10832 = vmatprep.subr.bf16.mxu1 %v15514_v36  ;;  %v20054_v36 = vld [vmem:[#allocation33_spill] sm:$0xff] }
 0xa2e   : > { %10833 = vmatpush1.bf16.msra.mxu1 %v15515_v24 }
 0xa2f   : > { %10834 = vmatprep.subr.bf16.mxu1 %v15516_v0 }
 0xa32   : > { %10835 = vmatpush1.bf16.msra.mxu1 %v15517_v39  ;;  %v11010_v39 = vrot.slane %v11002_v23, %v19522_v62  ;;  %v11067_v23 = vld [vmem:[%s19967_s5 + $0x10] sm:$0xff] (!%p12885_p6) }
 0xa33   : > { %10836 = vmatprep.subr.bf16.mxu1 %v15518_v47 }
 0xa36   : > { %10837 = vmatpush1.bf16.msra.mxu1 %v15519_v11  ;;  %v10981_v11 = vld [vmem:[#allocation2] sm:$0xff] }
 0xa37   : > { %10838 = vmatprep.subr.bf16.mxu1 %v15520_v59 }
 0xa3a   : > { %10839 = vmatpush1.bf16.msra.mxu1 %v15521_v6 }
 0xa3b   : > { %12883 = vmatprep.subr.msk.bf16.mxu1 %vm2608_vm0, %v20050_v48  ;;  %v11066_v48 = vld [vmem:[%s19967_s5 + $0x8] sm:$0xff] (!%p12885_p6) }
 0xa3e   : > { %10841 = vmatpush1.bf16.msra.mxu1 %v20051_v53  ;;  %v11068_v53 = vld [vmem:[%s19967_s5 + $0x18] sm:$0xff] (!%p12885_p6) }
 0xa3f   : > { %v12890_v26 = vpack.c.bf16 (!%p12885_p6), %v11068_v53, %v11066_v48  ;;  %v11152_v48 = vld [vmem:[%s19967_s5 + $0x2b8] sm:$0xff] (!%p12885_p6) }
 0xa41   : > { %10849 = vmatmul.mubr.bf16.vlgmr.msra.gmra.mrb[148].mxu1 %v19243_v15  ;;  %12891 = vmatprep.subr.bf16.mxu1 (!%p12885_p6), %v12890_v26 }
 0xa44   : > { %v10470_v16 = vpop.f32.mrb[132].mxu1 }
 0xa45   : > { %v10940_v28 = vsel %vm8058_vm2, %v10470_v16, 0.0  ;;  %v10472_v34 = vpop.f32.mrb[133].mxu1  ;;  %v11130_v16 = vld [vmem:[%s19967_s5 + $0x208] sm:$0xff] (!%p12885_p6) }
 0xa46   : > { %v10941_v8 = vadd.f32 %v10940_v28, %v10939_v40  ;;  %v10971_v43 = vsel %vm8058_vm2, %v10472_v34, 0.0  ;;  %v10474_v5 = vpop.f32.mrb[134].mxu1  ;;  %v11132_v28 = vld [vmem:[%s19967_s5 + $0x218] sm:$0xff] (!%p12885_p6)  ;;  %v12892_v34 = vpack.c.bf16 (!%p12885_p6), %v11067_v23, %v11065_v4  ;;  %v11085_v23 = vld [vmem:[%s19967_s5 + $0xa0] sm:$0xff] (!%p12885_p6) }
 0xa47   : > { %v10972_v32 = vadd.f32 %v10971_v43, %v10970_v17  ;;  %v10475_v37 = vpop.f32.mrb[135].mxu1  ;;  %v11129_v43 = vld [vmem:[%s19967_s5 + $0x200] sm:$0xff] (!%p12885_p6)  ;;  %v11131_v5 = vld [vmem:[%s19967_s5 + $0x210] sm:$0xff] (!%p12885_p6) }
 0xa48   : > { %v12956_v37 = vpack.c.bf16 (!%p12885_p6), %v11131_v5, %v11129_v43  ;;  %12893 = vmatpush1.bf16.msra.mxu1 (!%p12885_p6), %v12892_v34  ;;  %v11090_v43 = vld [vmem:[%s19967_s5 + $0xc8] sm:$0xff] (!%p12885_p6)  ;;  %v11092_v5 = vld [vmem:[%s19967_s5 + $0xd8] sm:$0xff] (!%p12885_p6) }
 0xa78   : > { %v10565_v14 = vpop.f32.mrb[136].mxu1 }
 0xa79   : > { %v10942_v60 = vsel %vm8058_vm2, %v10565_v14, 0.0  ;;  %v10567_v21 = vpop.f32.mrb[137].mxu1  ;;  %v11072_v14 = vld [vmem:[%s19967_s5 + $0x38] sm:$0xff] (!%p12885_p6) }
 0xa7a   : > { %v10943_v49 = vadd.f32 %v10942_v60, %v10941_v8  ;;  %v10973_v38 = vsel %vm8058_vm2, %v10567_v21, 0.0  ;;  %v10569_v19 = vpop.f32.mrb[138].mxu1  ;;  %v12954_v8 = vpack.c.bf16 (!%p12885_p6), %v11132_v28, %v11130_v16  ;;  %v11069_v60 = vld [vmem:[%s19967_s5 + $0x20] sm:$0xff] (!%p12885_p6)  ;;  %v11071_v21 = vld [vmem:[%s19967_s5 + $0x30] sm:$0xff] (!%p12885_p6) }
 0xa7b   : > { %v10974_v12 = vadd.f32 %v10973_v38, %v10972_v32  ;;  %v10570_v15 = vpop.f32.mrb[139].mxu1  ;;  %v11070_v32 = vld [vmem:[%s19967_s5 + $0x28] sm:$0xff] (!%p12885_p6)  ;;  %v12896_v38 = vpack.c.bf16 (!%p12885_p6), %v11071_v21, %v11069_v60  ;;  %v11087_v16 = vld [vmem:[%s19967_s5 + $0xb0] sm:$0xff] (!%p12885_p6)  ;;  %v11149_v28 = vld [vmem:[%s19967_s5 + $0x2a0] sm:$0xff] (!%p12885_p6)  ;;  %v12914_v21 = vpack.c.bf16 (!%p12885_p6), %v11092_v5, %v11090_v43 }
 0xa7c   : > { %12955 = vmatprep.subr.bf16.mxu0 (!%p12885_p6), %v12954_v8  ;;  %v11134_v19 = vld [vmem:[%s19967_s5 + $0x228] sm:$0xff] (!%p12885_p6)  ;;  %v11133_v15 = vld [vmem:[%s19967_s5 + $0x220] sm:$0xff] (!%p12885_p6)  ;;  %v11151_v8 = vld [vmem:[%s19967_s5 + $0x2b0] sm:$0xff] (!%p12885_p6) }
 0xa7d   : > { %12957 = vmatpush1.bf16.msra.mxu0 (!%p12885_p6), %v12956_v37  ;;  %v11156_v37 = vld [vmem:[%s19967_s5 + $0x2d8] sm:$0xff] (!%p12885_p6)  ;;  %v12976_v60 = vpack.c.bf16 (!%p12885_p6), %v11151_v8, %v11149_v28  ;;  %v11110_v8 = vld [vmem:[%s19967_s5 + $0x168] sm:$0xff] (!%p12885_p6) }
 0xa7e   : > { %v11112_v43 = vld [vmem:[%s19967_s5 + $0x178] sm:$0xff] (!%p12885_p6)  ;;  %v11174_v5 = vld [vmem:[%s19967_s5 + $0x368] sm:$0xff] (!%p12885_p6) }
 0xaac   : > { %v10660_v54 = vpop.f32.mrb[140].mxu1 }
 0xaad   : > { %v10944_v63 = vsel %vm8058_vm2, %v10660_v54, 0.0  ;;  %v10662_v33 = vpop.f32.mrb[141].mxu1 }
 0xaae   : > { %v10945_v57 = vadd.f32 %v10944_v63, %v10943_v49  ;;  %v10975_v58 = vsel %vm8058_vm2, %v10662_v33, 0.0  ;;  %v10664_v44 = vpop.f32.mrb[142].mxu1  ;;  %v12894_v49 = vpack.c.bf16 (!%p12885_p6), %v11072_v14, %v11070_v32  ;;  %v11135_v63 = vld [vmem:[%s19967_s5 + $0x230] sm:$0xff] (!%p12885_p6)  ;;  %v11074_v33 = vld [vmem:[%s19967_s5 + $0x48] sm:$0xff] (!%p12885_p6)  ;;  %v12912_v14 = vpack.c.bf16 (!%p12885_p6), %v11087_v16, %v11085_v23  ;;  %v11169_v16 = vld [vmem:[%s19967_s5 + $0x340] sm:$0xff] (!%p12885_p6) }
 0xaaf   : > { %v10976_v25 = vadd.f32 %v10975_v58, %v10974_v12  ;;  %v10665_v30 = vpop.f32.mrb[143].mxu1  ;;  %v11136_v12 = vld [vmem:[%s19967_s5 + $0x238] sm:$0xff] (!%p12885_p6)  ;;  %v12960_v58 = vpack.c.bf16 (!%p12885_p6), %v11135_v63, %v11133_v15  ;;  %v11154_v32 = vld [vmem:[%s19967_s5 + $0x2c8] sm:$0xff] (!%p12885_p6)  ;;  %v11155_v15 = vld [vmem:[%s19967_s5 + $0x2d0] sm:$0xff] (!%p12885_p6) }
 0xab0   : > { %v12958_v54 = vpack.c.bf16 (!%p12885_p6), %v11136_v12, %v11134_v19  ;;  %12895 = vmatprep.subr.bf16.mxu1 (!%p12885_p6), %v12894_v49  ;;  %v11075_v30 = vld [vmem:[%s19967_s5 + $0x50] sm:$0xff] (!%p12885_p6)  ;;  %v11089_v49 = vld [vmem:[%s19967_s5 + $0xc0] sm:$0xff] (!%p12885_p6)  ;;  %v12978_v12 = vpack.c.bf16 (!%p12885_p6), %v11156_v37, %v11154_v32  ;;  %v11096_v63 = vld [vmem:[%s19967_s5 + $0xf8] sm:$0xff] (!%p12885_p6) }
 0xab1   : > { %12897 = vmatpush1.bf16.msra.mxu1 (!%p12885_p6), %v12896_v38  ;;  %v11091_v38 = vld [vmem:[%s19967_s5 + $0xd0] sm:$0xff] (!%p12885_p6)  ;;  %v11153_v19 = vld [vmem:[%s19967_s5 + $0x2c0] sm:$0xff] (!%p12885_p6)  ;;  %v11176_v32 = vld [vmem:[%s19967_s5 + $0x378] sm:$0xff] (!%p12885_p6) }
 0xab2   : > { %12959 = vmatprep.subr.bf16.mxu0 (!%p12885_p6), %v12958_v54  ;;  %v11094_v54 = vld [vmem:[%s19967_s5 + $0xe8] sm:$0xff] (!%p12885_p6)  ;;  %v11107_v23 = vld [vmem:[%s19967_s5 + $0x150] sm:$0xff] (!%p12885_p6) }
 0xab3   : > { %12961 = vmatpush1.bf16.msra.mxu0 (!%p12885_p6), %v12960_v58  ;;  %v12916_v58 = vpack.c.bf16 (!%p12885_p6), %v11091_v38, %v11089_v49 }
 0xae0   : > { %v10755_v18 = vpop.f32.mrb[144].mxu1 }
 0xae1   : > { %v10946_v20 = vsel %vm8058_vm2, %v10755_v18, 0.0  ;;  %v10757_v13 = vpop.f32.mrb[145].mxu1  ;;  %v11138_v18 = vld [vmem:[%s19967_s5 + $0x248] sm:$0xff] (!%p12885_p6) }
 0xae2   : > { %v10947_v31 = vadd.f32 %v10946_v20, %v10945_v57  ;;  %v10977_v27 = vsel %vm8058_vm2, %v10757_v13, 0.0  ;;  %v10759_v56 = vpop.f32.mrb[146].mxu1  ;;  %v11076_v57 = vld [vmem:[%s19967_s5 + $0x58] sm:$0xff] (!%p12885_p6)  ;;  %v11137_v13 = vld [vmem:[%s19967_s5 + $0x240] sm:$0xff] (!%p12885_p6) }
 0xae3   : > { %v10978_v22 = vadd.f32 %v10977_v27, %v10976_v25  ;;  %v10760_v40 = vpop.f32.mrb[147].mxu1  ;;  %v12898_v44 = vpack.c.bf16 (!%p12885_p6), %v11076_v57, %v11074_v33  ;;  %v11073_v25 = vld [vmem:[%s19967_s5 + $0x40] sm:$0xff] (!%p12885_p6)  ;;  %v11140_v20 = vld [vmem:[%s19967_s5 + $0x258] sm:$0xff] (!%p12885_p6)  ;;  %v11158_v33 = vld [vmem:[%s19967_s5 + $0x2e8] sm:$0xff] (!%p12885_p6) }
 0xae4   : > { %v12900_v27 = vpack.c.bf16 (!%p12885_p6), %v11075_v30, %v11073_v25  ;;  %v12962_v56 = vpack.c.bf16 (!%p12885_p6), %v11140_v20, %v11138_v18  ;;  %v11080_v40 = vld [vmem:[%s19967_s5 + $0x78] sm:$0xff] (!%p12885_p6)  ;;  %v12918_v25 = vpack.c.bf16 (!%p12885_p6), %v11096_v63, %v11094_v54  ;;  %v11093_v30 = vld [vmem:[%s19967_s5 + $0xe0] sm:$0xff] (!%p12885_p6)  ;;  %v11095_v18 = vld [vmem:[%s19967_s5 + $0xf0] sm:$0xff] (!%p12885_p6)  ;;  %v12998_v54 = vpack.c.bf16 (!%p12885_p6), %v11176_v32, %v11174_v5 }
 0xae5   : > { %12899 = vmatprep.subr.bf16.mxu1 (!%p12885_p6), %v12898_v44  ;;  %v11160_v57 = vld [vmem:[%s19967_s5 + $0x2f8] sm:$0xff] (!%p12885_p6)  ;;  %v12980_v44 = vpack.c.bf16 (!%p12885_p6), %v11155_v15, %v11153_v19  ;;  %v11157_v20 = vld [vmem:[%s19967_s5 + $0x2e0] sm:$0xff] (!%p12885_p6)  ;;  %v11175_v63 = vld [vmem:[%s19967_s5 + $0x370] sm:$0xff] (!%p12885_p6) }
 0xae6   : > { %12963 = vmatprep.subr.bf16.mxu0 (!%p12885_p6), %v12962_v56  ;;  %12901 = vmatpush1.bf16.msra.mxu1 (!%p12885_p6), %v12900_v27  ;;  %v11098_v27 = vld [vmem:[%s19967_s5 + $0x108] sm:$0xff] (!%p12885_p6)  ;;  %v11100_v56 = vld [vmem:[%s19967_s5 + $0x118] sm:$0xff] (!%p12885_p6)  ;;  %v11173_v15 = vld [vmem:[%s19967_s5 + $0x360] sm:$0xff] (!%p12885_p6) }
 0xae7   : > { %v11126_v5 = vld [vmem:[%s19967_s5 + $0x1e8] sm:$0xff] (!%p12885_p6)  ;;  %v11128_v32 = vld [vmem:[%s19967_s5 + $0x1f8] sm:$0xff] (!%p12885_p6) }
 0xb14   : > { %v10850_v46 = vpop.f32.mrb[148].mxu1 }
 0xb15   : > { %v10948_v17 = vsel %vm8058_vm2, %v10850_v46, 0.0  ;;  %v10852_v42 = vpop.f32.mrb[149].mxu1 }
 0xb16   : > { %v10949_v45 = vadd.f32 %v10948_v17, %v10947_v31  ;;  %v10979_v3 = vsel %vm8058_vm2, %v10852_v42, 0.0  ;;  %v10854_v35 = vpop.f32.mrb[150].mxu1  ;;  %v11139_v31 = vld [vmem:[%s19967_s5 + $0x250] sm:$0xff] (!%p12885_p6)  ;;  %v11142_v42 = vld [vmem:[%s19967_s5 + $0x268] sm:$0xff] (!%p12885_p6) }
 0xb17   : > { %v10980_v41 = vadd.f32 %v10979_v3, %v10978_v22  ;;  %v10855_v1 = vpop.f32.mrb[151].mxu1  ;;  %v11078_v22 = vld [vmem:[%s19967_s5 + $0x68] sm:$0xff] (!%p12885_p6)  ;;  %v12964_v29 = vpack.c.bf16 (!%p12885_p6), %v11139_v31, %v11137_v13  ;;  %v11079_v17 = vld [vmem:[%s19967_s5 + $0x70] sm:$0xff] (!%p12885_p6)  ;;  %v11141_v3 = vld [vmem:[%s19967_s5 + $0x260] sm:$0xff] (!%p12885_p6)  ;;  %v12982_v13 = vpack.c.bf16 (!%p12885_p6), %v11160_v57, %v11158_v33 }
 0xb18   : > { %v10988_v52 = vrot.slane %v10949_v45, 7  ;;  %v12902_v46 = vpack.c.bf16 (!%p12885_p6), %v11080_v40, %v11078_v22  ;;  %v12966_v45 = vpack.c.bf16 (!%p12885_p6), %v11144_v10, %v11142_v42  ;;  %v11143_v35 = vld [vmem:[%s19967_s5 + $0x270] sm:$0xff] (!%p12885_p6)  ;;  %v11084_v1 = vld [vmem:[%s19967_s5 + $0x98] sm:$0xff] (!%p12885_p6)  ;;  %v11162_v22 = vld [vmem:[%s19967_s5 + $0x308] sm:$0xff] (!%p12885_p6) }
 0xb19   : > { %v10989_v61 = vrot.slane %v10980_v41, 7  ;;  %v11082_v41 = vld [vmem:[%s19967_s5 + $0x88] sm:$0xff] (!%p12885_p6)  ;;  %12965 = vmatpush1.bf16.msra.mxu0 (!%p12885_p6), %v12964_v29  ;;  %v11159_v31 = vld [vmem:[%s19967_s5 + $0x2f0] sm:$0xff] (!%p12885_p6)  ;;  %v11164_v40 = vld [vmem:[%s19967_s5 + $0x318] sm:$0xff] (!%p12885_p6) }
 0xb1a   : > { %v10996_v7 = vsel %vm8058_vm2, %v20053_v9, %v10988_v52  ;;  %v12904_v52 = vpack.c.bf16 (!%p12885_p6), %v11079_v17, %v11077_v2  ;;  %12903 = vmatprep.subr.bf16.mxu1 (!%p12885_p6), %v12902_v46  ;;  %v12968_v9 = vpack.c.bf16 (!%p12885_p6), %v11143_v35, %v11141_v3  ;;  %12967 = vmatprep.subr.bf16.mxu0 (!%p12885_p6), %v12966_v45  ;;  %v11097_v17 = vld [vmem:[%s19967_s5 + $0x100] sm:$0xff] (!%p12885_p6)  ;;  %v11099_v42 = vld [vmem:[%s19967_s5 + $0x110] sm:$0xff] (!%p12885_p6)  ;;  %v11102_v35 = vld [vmem:[%s19967_s5 + $0x128] sm:$0xff] (!%p12885_p6) }
 0xb1b   : > { %v10997_v24 = vsel %vm8058_vm2, %v20054_v36, %v10989_v61  ;;  %v11146_v61 = vld [vmem:[%s19967_s5 + $0x288] sm:$0xff] (!%p12885_p6)  ;;  %v11081_v36 = vld [vmem:[%s19967_s5 + $0x80] sm:$0xff] (!%p12885_p6)  ;;  %v12920_v2 = vpack.c.bf16 (!%p12885_p6), %v11095_v18, %v11093_v30  ;;  %v12984_v29 = vpack.c.bf16 (!%p12885_p6), %v11159_v31, %v11157_v20  ;;  %v12922_v46 = vpack.c.bf16 (!%p12885_p6), %v11100_v56, %v11098_v27  ;;  %v11163_v3 = vld [vmem:[%s19967_s5 + $0x310] sm:$0xff] (!%p12885_p6) }
 0xb1c   : > { %v11003_v0 = vcombine.low %v10996_v7, %v10997_v24  ;;  %v12906_v7 = vpack.c.bf16 (!%p12885_p6), %v11084_v1, %v11082_v41  ;;  %v11083_v24 = vld [vmem:[%s19967_s5 + $0x90] sm:$0xff] (!%p12885_p6)  ;;  %12905 = vmatpush1.bf16.msra.mxu1 (!%p12885_p6), %v12904_v52  ;;  %v11161_v10 = vld [vmem:[%s19967_s5 + $0x300] sm:$0xff] (!%p12885_p6)  ;;  %v12986_v45 = vpack.c.bf16 (!%p12885_p6), %v11164_v40, %v11162_v22  ;;  %v11104_v41 = vld [vmem:[%s19967_s5 + $0x138] sm:$0xff] (!%p12885_p6)  ;;  %v13000_v27 = vpack.c.bf16 (!%p12885_p6), %v11175_v63, %v11173_v15 }
 0xb1d   : > { %v12908_v53 = vpack.c.bf16 (!%p12885_p6), %v11083_v24, %v11081_v36  ;;  %12969 = vmatpush1.bf16.msra.mxu0 (!%p12885_p6), %v12968_v9  ;;  %v11166_v1 = vld [vmem:[%s19967_s5 + $0x328] sm:$0xff] (!%p12885_p6)  ;;  %v11168_v52 = vld [vmem:[%s19967_s5 + $0x338] sm:$0xff] (!%p12885_p6)  ;;  %v12926_v9 = vpack.c.bf16 (!%p12885_p6), %v11104_v41, %v11102_v35  ;;  %v11103_v36 = vld [vmem:[%s19967_s5 + $0x130] sm:$0xff] (!%p12885_p6) }
 0xb1e   : > { %v11017_v47 = vrot.slane %v11003_v0, %v19522_v62  ;;  %11025 = sbr.rel (%p12885_p6) target bundleno = 3119 (0xc2f), region = 56  ;;  %v11145_v0 = vld [vmem:[%s19967_s5 + $0x280] sm:$0xff] (!%p12885_p6)  ;;  %12907 = vmatprep.subr.bf16.mxu1 (!%p12885_p6), %v12906_v7  ;;  %v11114_v33 = vld [vmem:[%s19967_s5 + $0x188] sm:$0xff] (!%p12885_p6)  ;;  %v11116_v57 = vld [vmem:[%s19967_s5 + $0x198] sm:$0xff] (!%p12885_p6) }
 0xb1f   : > { %v11101_v7 = vld [vmem:[%s19967_s5 + $0x120] sm:$0xff] (!%p12885_p6)  ;;  %v12938_v56 = vpack.c.bf16 (!%p12885_p6), %v11116_v57, %v11114_v33  ;;  %v11115_v40 = vld [vmem:[%s19967_s5 + $0x190] sm:$0xff] (!%p12885_p6)  ;;  %v11184_v35 = vld [vmem:[%s19967_s5 + $0x3b8] sm:$0xff] (!%p12885_p6) }
 0xb20   : > { %v11018_v59 = vcombine.low %v11010_v39, %v11017_v47  ;;  %v12970_v39 = vpack.c.bf16 (!%p12885_p6), %v11148_v55, %v11146_v61  ;;  %v11147_v47 = vld [vmem:[%s19967_s5 + $0x290] sm:$0xff] (!%p12885_p6)  ;;  %12909 = vmatpush1.bf16.msra.mxu1 (!%p12885_p6), %v12908_v53  ;;  %v12924_v61 = vpack.c.bf16 (!%p12885_p6), %v11099_v42, %v11097_v17  ;;  %v12988_v55 = vpack.c.bf16 (!%p12885_p6), %v11163_v3, %v11161_v10  ;;  %v11165_v24 = vld [vmem:[%s19967_s5 + $0x320] sm:$0xff] (!%p12885_p6)  ;;  %v11118_v17 = vld [vmem:[%s19967_s5 + $0x1a8] sm:$0xff] (!%p12885_p6) }
 0xb21   : > { %v12972_v4 = vpack.c.bf16 (!%p12885_p6), %v11147_v47, %v11145_v0  ;;  %v12990_v0 = vpack.c.bf16 (!%p12885_p6), %v11168_v52, %v11166_v1  ;;  %v11106_v47 = vld [vmem:[%s19967_s5 + $0x148] sm:$0xff] (!%p12885_p6)  ;;  %v11027_v30 = vld [vmem:[%s19966_s4] sm:$0xf] (!%p12885_p6)  ;;  %v11120_v42 = vld [vmem:[%s19967_s5 + $0x1b8] sm:$0xff] (!%p12885_p6) }
 0xb22   : > { %v11020_v6 = vadd.f32 %v11018_v59, %v10981_v11  ;;  %v11086_v11 = vld [vmem:[%s19967_s5 + $0xa8] sm:$0xff] (!%p12885_p6)  ;;  %v11088_v59 = vld [vmem:[%s19967_s5 + $0xb8] sm:$0xff] (!%p12885_p6)  ;;  %12971 = vmatprep.subr.bf16.mxu0 (!%p12885_p6), %v12970_v39  ;;  %v11167_v39 = vld [vmem:[%s19967_s5 + $0x330] sm:$0xff] (!%p12885_p6)  ;;  %v11032_v18 = vrot.slane (!%p12885_p6), %v11027_v30, %v16166_v50  ;;  %v11036_v20 = vrot.slane (!%p12885_p6), %v11027_v30, %v16169_v51 }
 0xb23   : > { %v12910_v26 = vpack.c.bf16 (!%p12885_p6), %v11088_v59, %v11086_v11  ;;  %12973 = vmatpush1.bf16.msra.mxu0 (!%p12885_p6), %v12972_v4  ;;  %v11108_v11 = vld [vmem:[%s19967_s5 + $0x158] sm:$0xff] (!%p12885_p6)  ;;  %v11170_v59 = vld [vmem:[%s19967_s5 + $0x348] sm:$0xff] (!%p12885_p6)  ;;  %v12992_v53 = vpack.c.bf16 (!%p12885_p6), %v11167_v39, %v11165_v24  ;;  %v11113_v22 = vld [vmem:[%s19967_s5 + $0x180] sm:$0xff] (!%p12885_p6) }
 0xb24   : > { %11021 = vst [vmem:[#allocation2] sm:$0xff] %v11020_v6  ;;  %v11150_v6 = vld [vmem:[%s19967_s5 + $0x2a8] sm:$0xff] (!%p12885_p6)  ;;  %v12930_v4 = vpack.c.bf16 (!%p12885_p6), %v11108_v11, %v11106_v47  ;;  %v11045_v10 = vcombine.low (!%p12885_p6), %v11032_v18, %v11036_v20  ;;  %v12940_v41 = vpack.c.bf16 (!%p12885_p6), %v11115_v40, %v11113_v22  ;;  %v11117_v1 = vld [vmem:[%s19967_s5 + $0x1a0] sm:$0xff] (!%p12885_p6)  ;;  %v11183_v39 = vld [vmem:[%s19967_s5 + $0x3b0] sm:$0xff] (!%p12885_p6) }
 0xb25   : > { %v12974_v34 = vpack.c.bf16 %v11152_v48, %v11150_v6  ;;  %12911 = vmatprep.subr.bf16.mxu1 %v12910_v26  ;;  %v11172_v6 = vld [vmem:[%s19967_s5 + $0x358] sm:$0xff]  ;;  %v12928_v48 = vpack.c.bf16 %v11103_v36, %v11101_v7  ;;  %v11105_v26 = vld [vmem:[%s19967_s5 + $0x140] sm:$0xff]  ;;  %v11182_v3 = vld [vmem:[%s19967_s5 + $0x3a8] sm:$0xff] }
 0xb26   : > { %12913 = vmatpush1.bf16.msra.mxu1 %v12912_v14  ;;  %v12994_v28 = vpack.c.bf16 %v11172_v6, %v11170_v59  ;;  %v12932_v37 = vpack.c.bf16 %v11107_v23, %v11105_v26  ;;  %v11109_v14 = vld [vmem:[%s19967_s5 + $0x160] sm:$0xff]  ;;  %v11053_v52 = vrot.slane %v11045_v10, %v19522_v62  ;;  %v11119_v7 = vld [vmem:[%s19967_s5 + $0x1b0] sm:$0xff]  ;;  %v11122_v47 = vld [vmem:[%s19967_s5 + $0x1c8] sm:$0xff] }
 0xb27   : > { %12975 = vmatprep.subr.bf16.mxu0 %v12974_v34  ;;  %12915 = vmatprep.subr.bf16.mxu1 %v12914_v21  ;;  %v11171_v34 = vld [vmem:[%s19967_s5 + $0x350] sm:$0xff]  ;;  %v11181_v36 = vld [vmem:[%s19967_s5 + $0x3a0] sm:$0xff]  ;;  %v11124_v11 = vld [vmem:[%s19967_s5 + $0x1d8] sm:$0xff] }
 0xb28   : > { %12977 = vmatpush1.bf16.msra.mxu0 %v12976_v60  ;;  %v11111_v60 = vld [vmem:[%s19967_s5 + $0x170] sm:$0xff]  ;;  %v12996_v19 = vpack.c.bf16 %v11171_v34, %v11169_v16  ;;  %v11186_v6 = vld [vmem:[%s19967_s5 + $0x3c8] sm:$0xff]  ;;  %v13008_v26 = vpack.c.bf16 %v11183_v39, %v11181_v36  ;;  %v12946_v23 = vpack.c.bf16 %v11124_v11, %v11122_v47  ;;  %v11121_v16 = vld [vmem:[%s19967_s5 + $0x1c0] sm:$0xff] }
 0xb29   : > { %12979 = vmatprep.subr.bf16.mxu0 %v12978_v12  ;;  %v20055_v21 = vld [vmem:[#allocation6_spill] sm:$0xff]  ;;  %v12934_v12 = vpack.c.bf16 %v11112_v43, %v11110_v8  ;;  %v11185_v34 = vld [vmem:[%s19967_s5 + $0x3c0] sm:$0xff] }
 0xb2a   : > { %12917 = vmatpush1.bf16.msra.mxu1 %v12916_v58  ;;  %v11039_v49 = vsub.s32 2, %v20055_v21  ;;  %v11043_v38 = vsub.s32 3, %v20055_v21  ;;  %v12936_v58 = vpack.c.bf16 %v11111_v60, %v11109_v14  ;;  %v11187_v43 = vld [vmem:[%s19967_s5 + $0x3d0] sm:$0xff]  ;;  %v11190_v14 = vld [vmem:[%s19967_s5 + $0x3e8] sm:$0xff]  ;;  %v11192_v60 = vld [vmem:[%s19967_s5 + $0x3f8] sm:$0xff] }
 0xb2b   : > { %12919 = vmatprep.subr.bf16.mxu1 %v12918_v25  ;;  %v11180_v25 = vld [vmem:[%s19967_s5 + $0x398] sm:$0xff]  ;;  %v11026_v24 = vld [vmem:[#allocation2] sm:$0xff]  ;;  %v13014_v63 = vpack.c.bf16 %v11192_v60, %v11190_v14  ;;  %v11191_v57 = vld [vmem:[%s19967_s5 + $0x3f0] sm:$0xff] }
 0xb2c   : > { %12981 = vmatpush1.bf16.msra.mxu0 %v12980_v44  ;;  %v11178_v44 = vld [vmem:[%s19967_s5 + $0x388] sm:$0xff]  ;;  %v11044_v31 = vrot.slane %v11027_v30, %v11043_v38  ;;  %v11125_v15 = vld [vmem:[%s19967_s5 + $0x1e0] sm:$0xff] }
 0xb2d   : > { %12983 = vmatprep.subr.bf16.mxu0 %v12982_v13  ;;  %v11040_v13 = vrot.slane %v11027_v30, %v11039_v49  ;;  %v11189_v33 = vld [vmem:[%s19967_s5 + $0x3e0] sm:$0xff] }
 0xb2e   : > { %12921 = vmatpush1.bf16.msra.mxu1 %v12920_v2  ;;  %v11177_v2 = vld [vmem:[%s19967_s5 + $0x380] sm:$0xff]  ;;  %v13016_v18 = vpack.c.bf16 %v11191_v57, %v11189_v33 }
 0xb2f   : > { %12923 = vmatprep.subr.bf16.mxu1 %v12922_v46  ;;  %v11179_v46 = vld [vmem:[%s19967_s5 + $0x390] sm:$0xff]  ;;  %v11193_v20 = vld [vmem:[%s19968_s6] sm:$0x3] }
 0xb30   : > { %12985 = vmatpush1.bf16.msra.mxu0 %v12984_v29  ;;  %v13002_v29 = vpack.c.bf16 %v11180_v25, %v11178_v44 }
 0xb31   : > { %12987 = vmatprep.subr.bf16.mxu0 %v12986_v45  ;;  %v11046_v45 = vcombine.low %v11040_v13, %v11044_v31  ;;  %v11198_v13 = vrot.slane %v11193_v20, %v16166_v50  ;;  %v11202_v31 = vrot.slane %v11193_v20, %v16169_v51 }
 0xb32   : > { %12925 = vmatpush1.bf16.msra.mxu1 %v12924_v61 }
 0xb33   : > { %12927 = vmatprep.subr.bf16.mxu1 %v12926_v9  ;;  %v11060_v61 = vrot.slane %v11046_v45, %v19522_v62  ;;  %v12942_v9 = vpack.c.bf16 %v11120_v42, %v11118_v17 }
 0xb34   : > { %12989 = vmatpush1.bf16.msra.mxu0 %v12988_v55  ;;  %v13004_v55 = vpack.c.bf16 %v11179_v46, %v11177_v2 }
 0xb35   : > { %12991 = vmatprep.subr.bf16.mxu0 %v12990_v0  ;;  %v13006_v0 = vpack.c.bf16 %v11184_v35, %v11182_v3  ;;  %v11061_v59 = vcombine.low %v11053_v52, %v11060_v61 }
 0xb36   : > { %12929 = vmatpush1.bf16.msra.mxu1 %v12928_v48  ;;  %v11188_v48 = vld [vmem:[%s19967_s5 + $0x3d8] sm:$0xff] }
 0xb37   : > { %12931 = vmatprep.subr.bf16.mxu1 %v12930_v4  ;;  %v11063_v4 = vadd.f32 %v11061_v59, %v11026_v24  ;;  %v13010_v8 = vpack.c.bf16 %v11188_v48, %v11186_v6 }
 0xb38   : > { %12993 = vmatpush1.bf16.msra.mxu0 %v12992_v53  ;;  %v12944_v53 = vpack.c.bf16 %v11119_v7, %v11117_v1 }
 0xb39   : > { %12995 = vmatprep.subr.bf16.mxu0 %v12994_v28  ;;  %v11123_v28 = vld [vmem:[%s19967_s5 + $0x1d0] sm:$0xff] }
 0xb3a   : > { %12933 = vmatpush1.bf16.msra.mxu1 %v12932_v37  ;;  %v11064_v37 = vmax.f32 %v11063_v4, 0.0  ;;  %v12948_v21 = vpack.c.bf16 %v11123_v28, %v11121_v16 }
 0xb3b   : > { %12935 = vmatprep.subr.bf16.mxu1 %v12934_v12  ;;  %v12950_v12 = vpack.c.bf16 %v11128_v32, %v11126_v5 }
 0xb3c   : > { %12997 = vmatpush1.bf16.msra.mxu0 %v12996_v19  ;;  %v11213_v49 = vrot.slane %v11064_v37, %v19522_v62  ;;  %v11206_v38 = vcombine.high %v11064_v37, %v11064_v37  ;;  %v13012_v19 = vpack.c.bf16 %v11187_v43, %v11185_v34 }
 0xb3d   : > { %12999 = vmatprep.subr.bf16.mxu0 %v12998_v54  ;;  %v11127_v54 = vld [vmem:[%s19967_s5 + $0x1f0] sm:$0xff] }
 0xb3e   : > { %12937 = vmatpush1.bf16.msra.mxu1 %v12936_v58  ;;  %v11221_v58 = vcombine.high %v11213_v49, %v11213_v49  ;;  %v11220_v44 = vrot.slane %v11206_v38, %v19522_v62  ;;  %v12952_v25 = vpack.c.bf16 %v11127_v54, %v11125_v15 }
 0xb3f   : > { %12939 = vmatprep.subr.bf16.mxu1 %v12938_v56 }
 0xb40   : > { %13001 = vmatpush1.bf16.msra.mxu0 %v13000_v27  ;;  %11291 = vmatprep.mubr.f32.mxu1 %v11221_v58  ;;  %v11222_v30 = vcombine.high %v11220_v44, %v11220_v44 }
 0xb41   : > { %13003 = vmatprep.subr.bf16.mxu0 %v13002_v29 }
 0xb42   : > { %12941 = vmatpush1.bf16.msra.mxu1 %v12940_v41  ;;  %11362 = vmatprep.mubr.f32.mxu0 %v11222_v30 }
 0xb43   : > { %12943 = vmatprep.subr.bf16.mxu1 %v12942_v9 }
 0xb44   : > { %13005 = vmatpush1.bf16.msra.mxu0 %v13004_v55 }
 0xb45   : > { %13007 = vmatprep.subr.bf16.mxu0 %v13006_v0 }
 0xb46   : > { %12945 = vmatpush1.bf16.msra.mxu1 %v12944_v53 }
 0xb47   : > { %12947 = vmatprep.subr.bf16.mxu1 %v12946_v23 }
 0xb48   : > { %13009 = vmatpush1.bf16.msra.mxu0 %v13008_v26 }
 0xb49   : > { %13011 = vmatprep.subr.bf16.mxu0 %v13010_v8 }
 0xb4a   : > { %12949 = vmatpush1.bf16.msra.mxu1 %v12948_v21 }
 0xb4b   : > { %12951 = vmatprep.subr.bf16.mxu1 %v12950_v12 }
 0xb4c   : > { %13013 = vmatpush1.bf16.msra.mxu0 %v13012_v19 }
 0xb4d   : > { %13015 = vmatprep.subr.bf16.mxu0 %v13014_v63 }
 0xb4e   : > { %12953 = vmatpush1.bf16.msra.mxu1 %v12952_v25 }
 0xb50   : > { %13017 = vmatpush1.bf16.msra.mxu0 %v13016_v18 }
 0xb51   : > { %11292 = vmatmul.mubr.f32.vlgmr.msra.gmra.mrb[0].mxu1 %v11213_v49 }
 0xb53   : > { %11363 = vmatmul.mubr.f32.vlgmr.msra.gmra.mrb[0].mxu0 %v11220_v44 }
 0xc24   : > { %v11293_v27 = vpop.f32.mrb[0].mxu1 }
 0xc25   : > { %v11294_v56 = vadd.f32 %v11293_v27, %v11198_v13  ;;  %v11295_v22 = vpop.f32.mrb[1].mxu1 }
 0xc26   : > { %v11364_v40 = vpop.f32.mrb[0].mxu0  ;;  %v11296_v2 = vadd.f32 %v11295_v22, %v11202_v31 }
 0xc27   : > { %v11366_v29 = vpop.f32.mrb[1].mxu0  ;;  %v11365_v46 = vadd.f32 %v11364_v40, %v11294_v56 }
 0xc28   : > { %v11367_v17 = vadd.f32 %v11366_v29, %v11296_v2 }
 0xc2a   : > { %v11371_v42 = vcombine.low %v11365_v46, %v11367_v17 }
 0xc2c   : > { %v11378_v10 = vrot.slane %v11371_v42, %v19522_v62 }
 0xc2e   : > { %11382 = vst.msk [vmem:[#allocation3] sm:$0xf] %vm11381_vm4, %v11378_v10 }
 0xc2f PF: > { %p13068_p7 = scmp.eq.s32.totalorder %s15611_s25, 1  ;;  %s15564_s19 = smov [#allocation3]  }
 0xc30   : > { %s11390_s20 = sshll.u32 %s15564_s19, 4  ;;  %s11391_s20 = int_to_ptr.vmem [resolvable:$true] %s11390_s20 }
 0xc31   : > { %s15522_s21 = scalar_lea.vmem %s11391_s20, 64  ;;  %p15529_p11 = scmp.lt.s32.totalorder %s11391_s20, %s11391_s20 }
 0xc32   : > { %p15523_p8 = scmp.ne.s32.totalorder %s11391_s20, %s15522_s21  ;;  %p15530_p12 = scmp.lt.s32.totalorder %s15522_s21, %s15522_s21 }
 0xc34   : > { %p15524_p9 = pnand %p15523_p8, %p13068_p7  ;;  %p15531_p13 = por %p15530_p12, %p15529_p11 }
 0xc36   : > { %p15525_p10 = pneg %p15524_p9 }
 0xc38   : > { %p15532_p0 = pnand %p15531_p13, %p15525_p10 }
 0xc3a   : > { %15535 = shalt.err (!%p15532_p0)
}
 0xc3b   : > { %s15536_s26 = scalar_lea.hbm %s19969_s7, 64 }
 0xc3c   : > { %p15537_p1 = scmp.ne.s32.totalorder %s19969_s7, %s15536_s26  ;;  %p15542_p4 = scmp.lt.u32.totalorder %s15536_s26, %s19969_s7 }
 0xc3e   : > { %p15538_p2 = pnand %p15537_p1, %p13068_p7 }
 0xc40   : > { %p15539_p3 = pneg %p15538_p2 }
 0xc42   : > { %p15544_p5 = pnand %p15542_p4, %p15539_p3 }
 0xc44   : > { %15547 = shalt.err (!%p15544_p5)
}
 0xc45   : > { %13065 = dma.vmem_to_hbm [thread:$0]  (%p13068_p7), %s11391_s20, 64, %s19969_s7, [#allocation4]  }
 0xc46   : > { %15553 = dma.done.wait (%p13068_p7), [#allocation4], 64  }
 0xc47   : > { %15555 = vsyncadd (%p13068_p7), [#allocation4], 4294967232 }
 0xc48 PF: > { %s18_s24 = sadd.s32 1, %s15558_s24  }
 0xc49   : > { %p15_p6 = scmp.ge.s32.totalorder %s18_s24, 4  }
 0xc4b   :  { %17 = sbr.rel (!%p15_p6) target bundleno = 1 (0x1), region = 90 }
 0xc52   :  { %11403 = vsyncpa [#allocation4], 1 }
 0xc53   :  { %11405 = vsyncpa [#allocation4 + $0x1], 1 }

</bundles_post_ra>
